<compile_context>
chip_gen: v6e
topology: v6e:2x2x1
jax: 0.10.0
libtpu: 0.0.40
codegen_flags: <defaults>
</compile_context>

<pallas_src>
import functools

import jax
import jax.numpy as jnp
from jax.experimental import pallas as pl
from jax.experimental.pallas import tpu as pltpu

_MATMUL_TILE_CAP = 1024     # row tile for matmul+BN+act kernels
_CONV12_TILE_CAP = 2048     # row tile for the fused conv1/conv2 front-end
_PROJ_TILE_CAP = 1024       # row tile for the MBConv projection


def _round_up(x, m):
    return ((x + m - 1) // m) * m


def _choose_tile(m, align, cap):
    """Row tile TM (multiple of `align`, <= cap) and padded extent Mp (multiple of TM)."""
    mp = _round_up(m, align)
    if mp <= cap:
        return mp, mp
    return _round_up(m, cap), cap


@functools.lru_cache(maxsize=None)
def _vmem_limit_bytes():
    """Generation-aware VMEM request: ~75% of physical, capped at 96 MiB."""
    try:
        cap = getattr(pltpu.get_tpu_info(), "vmem_capacity_bytes", None)
    except Exception:
        cap = None
    if not cap:
        cap = 128 * 1024 * 1024
    return int(min(cap * 3 // 4, 96 * 1024 * 1024))


@functools.lru_cache(maxsize=None)
def _bf16_vpu_ok():
    """True on v6e / v7x (bf16-native VPU); False on v5e and older."""
    try:
        kind = jax.devices()[0].device_kind.lower()
    except Exception:
        return False
    return ("v6" in kind) or ("v7" in kind) or ("7x" in kind)


def _sigmoid(y):
    # exp -> EUP, approximate reciprocal -> EUP slot: keeps the divide off the VALU.
    return pl.reciprocal(1.0 + jnp.exp(-y), approx=True)


def _act(y, act):
    if act == "relu":
        return jnp.maximum(y, 0.0)
    if act == "swish":
        return y * _sigmoid(y)
    if act == "sigmoid":
        return _sigmoid(y)
    return y


# --------------------------------------------------------------------------
# Kernel: generic fused  act((x @ w) * scale + bias)   (bf16 MXU, f32 epilogue)
# --------------------------------------------------------------------------
def _matmul_bn_act_kernel(x_ref, w_ref, s_ref, b_ref, o_ref, *, act):
    y = jnp.dot(x_ref[...], w_ref[...], preferred_element_type=jnp.float32)
    y = y * s_ref[...] + b_ref[...]
    o_ref[...] = _act(y, act).astype(o_ref.dtype)


def matmul_bn_act(x, w, scale, bias, act="none", out_dtype=jnp.float32):
    M, K = x.shape
    N = w.shape[1]
    align = 16 if x.dtype == jnp.bfloat16 else 8
    Mp, TM = _choose_tile(M, align, _MATMUL_TILE_CAP)
    if Mp != M:
        x = jnp.pad(x, ((0, Mp - M), (0, 0)))
    out = pl.pallas_call(
        functools.partial(_matmul_bn_act_kernel, act=act),
        out_shape=jax.ShapeDtypeStruct((Mp, N), out_dtype),
        grid=(Mp // TM,),
        in_specs=[
            pl.BlockSpec((TM, K), lambda i: (i, 0)),
            pl.BlockSpec((K, N), lambda i: (0, 0)),
            pl.BlockSpec((1, N), lambda i: (0, 0)),
            pl.BlockSpec((1, N), lambda i: (0, 0)),
        ],
        out_specs=pl.BlockSpec((TM, N), lambda i: (i, 0)),
        compiler_params=pltpu.CompilerParams(
            dimension_semantics=("parallel",),
            vmem_limit_bytes=_vmem_limit_bytes()),
    )(x, w, scale.reshape(1, N).astype(jnp.float32),
      bias.reshape(1, N).astype(jnp.float32))
    return out[:M]


# --------------------------------------------------------------------------
# Kernel: fused  conv1(3x3 dil 8, one-hot input)+BN+ReLU  ->  conv2(1x1)+BN+ReLU
#                -> qtable scaling -> AddCoords,  one (TM, 36) bf16 output.
#
# Inputs per row (pixel):
#   pos    (TM,16) bf16 : tap codes  class + 22*tap  for the 9 dilated taps
#                         (cols 9..15 are zero padding); values < 198 (exact
#                         in bf16).
#   coords (TM, 4) bf16 : [xx, yy, rr, 0]  AddCoords channels (batch-invariant)
#   qidx   (TM, 1) f32  : (h%8)*8 + (w%8)  cell index into the qtable block
#   qt     (1,64,16)bf16: per-batch qtembed[qtable]  (8x8 cells x 16 channels)
# The one-hot over K=256 (9 taps x 22 classes, padded) is built with one tiny
# "spread" MXU matmul + a single f32 equality against a lane iota.
# --------------------------------------------------------------------------
def _conv12_kernel(pos_ref, coords_ref, qidx_ref, qt_ref, spread_ref, table_ref,
                   b1_ref, w2_ref, s2_ref, b2_ref, o_ref):
    # broadcast each tap code across its 22-lane slot (exact small integers)
    gathered = jnp.dot(pos_ref[0], spread_ref[...],
                       preferred_element_type=jnp.float32)            # (TM,256)
    lanes = jax.lax.broadcasted_iota(jnp.int32, gathered.shape, 1).astype(jnp.float32)
    onehot = (gathered == lanes).astype(jnp.bfloat16)                 # (TM,256)

    # conv1 (gather-sum over 9 taps) with BN scale folded into the table
    h1 = jnp.dot(onehot, table_ref[...], preferred_element_type=jnp.float32)
    h1 = jnp.maximum(h1 + b1_ref[...], 0.0)                           # (TM,64)

    # conv2 1x1 + BN + ReLU
    h2 = jnp.dot(h1.astype(jnp.bfloat16), w2_ref[...],
                 preferred_element_type=jnp.float32)
    h2 = jnp.maximum(h2 * s2_ref[...] + b2_ref[...], 0.0)             # (TM,16)

    # qtable scale: one-hot over the 64-entry per-batch table
    q_lanes = jax.lax.broadcasted_iota(
        jnp.int32, (gathered.shape[0], 64), 1).astype(jnp.float32)
    q_onehot = (qidx_ref[...] == q_lanes).astype(jnp.bfloat16)        # (TM,64)
    qt = jnp.dot(q_onehot, qt_ref[0], preferred_element_type=jnp.float32)
    scaled = h2 * qt                                                  # (TM,16)

    o_ref[0] = jnp.concatenate(
        [scaled.astype(jnp.bfloat16), h2.astype(jnp.bfloat16), coords_ref[...]],
        axis=-1)                                                      # (TM,36)


def conv12_fused(pos, coords, qidx, qt_tab, prep):
    B, HW, _ = pos.shape
    HWp, TM = _choose_tile(HW, 16, _CONV12_TILE_CAP)
    if HWp != HW:
        pos = jnp.pad(pos, ((0, 0), (0, HWp - HW), (0, 0)))
        coords = jnp.pad(coords, ((0, HWp - HW), (0, 0)))
        qidx = jnp.pad(qidx, ((0, HWp - HW), (0, 0)))
    out = pl.pallas_call(
        _conv12_kernel,
        out_shape=jax.ShapeDtypeStruct((B, HWp, 36), jnp.bfloat16),
        grid=(B, HWp // TM),
        in_specs=[
            pl.BlockSpec((1, TM, 16), lambda b, i: (b, i, 0)),
            pl.BlockSpec((TM, 4), lambda b, i: (i, 0)),
            pl.BlockSpec((TM, 1), lambda b, i: (i, 0)),
            pl.BlockSpec((1, 64, 16), lambda b, i: (b, 0, 0)),
            pl.BlockSpec((16, 256), lambda b, i: (0, 0)),
            pl.BlockSpec((256, 64), lambda b, i: (0, 0)),
            pl.BlockSpec((1, 64), lambda b, i: (0, 0)),
            pl.BlockSpec((64, 16), lambda b, i: (0, 0)),
            pl.BlockSpec((1, 16), lambda b, i: (0, 0)),
            pl.BlockSpec((1, 16), lambda b, i: (0, 0)),
        ],
        out_specs=pl.BlockSpec((1, TM, 36), lambda b, i: (b, i, 0)),
        compiler_params=pltpu.CompilerParams(
            dimension_semantics=("parallel", "parallel"),
            vmem_limit_bytes=_vmem_limit_bytes()),
    )(pos, coords, qidx, qt_tab,
      prep["conv1_spread"], prep["conv1_table"],
      prep["conv1_bias"].reshape(1, 64).astype(jnp.float32),
      prep["conv2_w"],
      prep["conv2_scale"].reshape(1, 16).astype(jnp.float32),
      prep["conv2_bias"].reshape(1, 16).astype(jnp.float32))
    return out[:, :HW]


# --------------------------------------------------------------------------
# Kernel: depthwise 3x3 (stride 1, SAME) + BN + swish, halo-tiled, with the
#         SE global-average-pool fused in.  Only 2 misaligned sublane (W)
#         slices per block (the three W-shifted slabs are built once, the
#         ky shifts slice only the major H axis).  Taps run in bf16 on
#         v6e/v7x, f32 on v5e.
# --------------------------------------------------------------------------
def _dw_bn_swish_pool_kernel(x_ref, w_ref, s_ref, b_ref, o_ref, p_ref,
                             *, hb, wb, acc_dtype):
    wts = w_ref[...].astype(acc_dtype)                       # (9, TC)
    xb = x_ref[0]                                            # (hb+2, wb+2, TC)
    if xb.dtype != acc_dtype:
        xb = xb.astype(acc_dtype)
    # pre-shift along W once per kx (2 misaligned slices instead of 9)
    cols = [xb[:, kx:kx + wb, :] for kx in range(3)]         # each (hb+2, wb, TC)
    acc = jnp.zeros((hb, wb, xb.shape[-1]), acc_dtype)
    for ky in range(3):
        for kx in range(3):
            acc = acc + cols[kx][ky:ky + hb] * wts[ky * 3 + kx]
    y = acc.astype(jnp.float32) * s_ref[...] + b_ref[...]
    y = y * _sigmoid(y)                                      # swish (EUP path)
    o_ref[0] = y.astype(o_ref.dtype)
    p_ref[...] = (jnp.sum(y, axis=(0, 1)) * (1.0 / float(hb * wb))).reshape(p_ref.shape)


def _dw_channel_tile(hp, wp, h, w, c):
    budget = _vmem_limit_bytes() // 3                        # leave pipeline headroom
    for tc in (512, 256, 128):
        if c % tc:
            continue
        need = (hp * wp + h * w) * tc * 2 * 2                # bf16 in+out, double-buffered
        if need <= budget:
            return tc
    return 128


def depthwise3x3_bn_swish_pool(x_nhwc, w9c, scale, bias):
    B, H, W, C = x_nhwc.shape
    TC = _dw_channel_tile(H + 2, W + 2, H, W, C)
    acc_dtype = (jnp.bfloat16
                 if (_bf16_vpu_ok() and x_nhwc.dtype == jnp.bfloat16)
                 else jnp.float32)
    xp = jnp.pad(x_nhwc, ((0, 0), (1, 1), (1, 1), (0, 0)))
    h, pooled = pl.pallas_call(
        functools.partial(_dw_bn_swish_pool_kernel, hb=H, wb=W, acc_dtype=acc_dtype),
        out_shape=(jax.ShapeDtypeStruct((B, H, W, C), x_nhwc.dtype),
                   jax.ShapeDtypeStruct((B, 1, C), jnp.float32)),
        grid=(B, C // TC),
        in_specs=[
            pl.BlockSpec((1, H + 2, W + 2, TC), lambda b, c: (b, 0, 0, c)),
            pl.BlockSpec((9, TC), lambda b, c: (0, c)),
            pl.BlockSpec((1, TC), lambda b, c: (0, c)),
            pl.BlockSpec((1, TC), lambda b, c: (0, c)),
        ],
        out_specs=(pl.BlockSpec((1, H, W, TC), lambda b, c: (b, 0, 0, c)),
                   pl.BlockSpec((1, 1, TC), lambda b, c: (b, 0, c))),
        compiler_params=pltpu.CompilerParams(
            dimension_semantics=("parallel", "parallel"),
            vmem_limit_bytes=_vmem_limit_bytes()),
    )(xp, w9c, scale.reshape(1, C).astype(jnp.float32),
      bias.reshape(1, C).astype(jnp.float32))
    return h, pooled.reshape(B, C)


# --------------------------------------------------------------------------
# Kernel: fused SE MLP  sigmoid( swish(pool @ Wr + br) @ We + be )   (bf16 MXU)
# --------------------------------------------------------------------------
def _se_gate_kernel(p_ref, wr_ref, br_ref, we_ref, be_ref, g_ref):
    pb = p_ref[...].astype(jnp.bfloat16)
    r = jnp.dot(pb, wr_ref[...], preferred_element_type=jnp.float32) + br_ref[...]
    r = r * _sigmoid(r)                                       # swish
    e = jnp.dot(r.astype(jnp.bfloat16), we_ref[...],
                preferred_element_type=jnp.float32) + be_ref[...]
    g_ref[...] = _sigmoid(e)


def se_gate(pooled, wr, br, we, be):
    B, C = pooled.shape
    return pl.pallas_call(
        _se_gate_kernel,
        out_shape=jax.ShapeDtypeStruct((B, C), jnp.float32),
        compiler_params=pltpu.CompilerParams(vmem_limit_bytes=_vmem_limit_bytes()),
    )(pooled, wr, br.reshape(1, -1), we, be.reshape(1, -1))


# --------------------------------------------------------------------------
# Kernel: project 1x1 conv + BN (no act).  The SE gate is pre-folded into the
# per-batch weight slab (tiny) so no activation rescaling happens here.
# --------------------------------------------------------------------------
def _proj_bn_kernel(h_ref, w_ref, s_ref, b_ref, o_ref):
    y = jnp.dot(h_ref[0], w_ref[0], preferred_element_type=jnp.float32)
    o_ref[0] = (y * s_ref[...] + b_ref[...]).astype(o_ref.dtype)


def project_bn(h_nhwc, w_gated, scale, bias, out_dtype=jnp.bfloat16):
    B, H, W, C = h_nhwc.shape
    N = w_gated.shape[-1]
    HW = H * W
    h3 = h_nhwc.reshape(B, HW, C)
    HWp, TR = _choose_tile(HW, 16, _PROJ_TILE_CAP)
    if HWp != HW:
        h3 = jnp.pad(h3, ((0, 0), (0, HWp - HW), (0, 0)))
    out = pl.pallas_call(
        _proj_bn_kernel,
        out_shape=jax.ShapeDtypeStruct((B, HWp, N), out_dtype),
        grid=(B, HWp // TR),
        in_specs=[
            pl.BlockSpec((1, TR, C), lambda b, r: (b, r, 0)),
            pl.BlockSpec((1, C, N), lambda b, r: (b, 0, 0)),
            pl.BlockSpec((1, N), lambda b, r: (0, 0)),
            pl.BlockSpec((1, N), lambda b, r: (0, 0)),
        ],
        out_specs=pl.BlockSpec((1, TR, N), lambda b, r: (b, r, 0)),
        compiler_params=pltpu.CompilerParams(
            dimension_semantics=("parallel", "parallel"),
            vmem_limit_bytes=_vmem_limit_bytes()),
    )(h3, w_gated, scale.reshape(1, N).astype(jnp.float32),
      bias.reshape(1, N).astype(jnp.float32))
    return out[:, :HW].reshape(B, H, W, N)


# --------------------------------------------------------------------------
# Parameters (deterministic, synthetic) + one-time preparation
# --------------------------------------------------------------------------
def bn_fold(bn, conv_bias=None):
    scale = bn["gamma"] / jnp.sqrt(bn["var"] + bn["eps"])
    bias = bn["beta"] - bn["mean"] * scale
    if conv_bias is not None:
        bias = bias + conv_bias * scale
    return scale, bias


def init_params(key):
    ks = iter(jax.random.split(key, 96))

    def w(shape, fan_in):
        return jax.random.normal(next(ks), shape, jnp.float32) / jnp.sqrt(float(fan_in))

    def bn(n, eps):
        return dict(
            gamma=1.0 + 0.1 * jax.random.normal(next(ks), (n,), jnp.float32),
            beta=0.1 * jax.random.normal(next(ks), (n,), jnp.float32),
            mean=0.01 * jax.random.normal(next(ks), (n,), jnp.float32),
            var=1.0 + 0.1 * jnp.abs(jax.random.normal(next(ks), (n,), jnp.float32)),
            eps=jnp.float32(eps),
        )

    p = {}
    # obembed is fixed identity (one-hot); qtembed is Embedding(64, 16)
    p["qtembed"] = jax.random.normal(next(ks), (64, 16), jnp.float32)
    # conv1: 3x3, dilation 8, 21->64, bias=True (HWIO flattened: (tap, class))
    p["conv1_w"] = w((9 * 21, 64), 9 * 21)
    p["conv1_b"] = 0.1 * jax.random.normal(next(ks), (64,), jnp.float32)
    p["bn_c1"] = bn(64, 1e-5)
    # conv2: 1x1, 64->16, no bias
    p["conv2_w"] = w((64, 16), 64)
    p["bn_c2"] = bn(16, 1e-5)
    # conv0[0]: 8x8 stride 8, 35->256, no bias (HWIO flattened)
    p["conv0_w"] = w((8 * 8 * 35, 256), 8 * 8 * 35)
    p["bn_c0"] = bn(256, 1e-5)
    # 3 MBConv blocks: 256 -> (x6) 1536 -> 256, SE squeeze = int(256*0.25) = 64
    blocks = []
    for _ in range(3):
        cin, cexp, csq, cout = 256, 1536, 64, 256
        blocks.append(dict(
            expand_w=w((cin, cexp), cin), bn0=bn(cexp, 1e-3),
            dw_w=w((9, cexp), 9), bn1=bn(cexp, 1e-3),
            se_r_w=w((cexp, csq), cexp),
            se_r_b=0.1 * jax.random.normal(next(ks), (csq,), jnp.float32),
            se_e_w=w((csq, cexp), csq),
            se_e_b=0.1 * jax.random.normal(next(ks), (cexp,), jnp.float32),
            proj_w=w((cexp, cout), cexp), bn2=bn(cout, 1e-3),
        ))
    p["blocks"] = blocks
    return p


def prepare_params(p):
    """Fold eval-mode BN into scale/bias, pre-cast MXU weights to bf16 once,
    build the K=256 conv1 gather table (class 21 = zero padding row, rows
    198..255 = zero) and the tap 'spread' matrix used for the in-kernel
    one-hot construction, and pre-pad conv0's contraction dim 2240 -> 2304."""
    q = {}
    s1, b1 = bn_fold(p["bn_c1"], conv_bias=p["conv1_b"])
    tab = p["conv1_w"].reshape(9, 21, 64) * s1[None, None, :]
    tab = jnp.pad(tab, ((0, 0), (0, 1), (0, 0))).reshape(9 * 22, 64)
    q["conv1_table"] = jnp.pad(tab, ((0, 256 - 9 * 22), (0, 0))).astype(jnp.bfloat16)
    q["conv1_bias"] = b1
    k = jnp.arange(256)
    spread = ((k[None, :] // 22) == jnp.arange(16)[:, None]) & (k[None, :] < 9 * 22)
    q["conv1_spread"] = spread.astype(jnp.bfloat16)
    q["conv2_w"] = p["conv2_w"].astype(jnp.bfloat16)
    q["conv2_scale"], q["conv2_bias"] = bn_fold(p["bn_c2"])
    q["qtembed"] = p["qtembed"]
    w0 = p["conv0_w"].reshape(8, 8, 35, 256)
    w0 = jnp.pad(w0, ((0, 0), (0, 0), (0, 1), (0, 0))).reshape(8 * 8 * 36, 256)
    q["conv0_w"] = w0.astype(jnp.bfloat16)
    q["conv0_scale"], q["conv0_bias"] = bn_fold(p["bn_c0"])
    blocks = []
    for blk in p["blocks"]:
        nb = dict(
            expand_w=blk["expand_w"].astype(jnp.bfloat16),
            dw_w=blk["dw_w"].astype(jnp.float32),
            se_r_w=blk["se_r_w"].astype(jnp.bfloat16),
            se_r_b=blk["se_r_b"],
            se_e_w=blk["se_e_w"].astype(jnp.bfloat16),
            se_e_b=blk["se_e_b"],
            proj_w=blk["proj_w"].astype(jnp.float32),   # SE gate folded per batch at run time
        )
        nb["bn0_scale"], nb["bn0_bias"] = bn_fold(blk["bn0"])
        nb["bn1_scale"], nb["bn1_bias"] = bn_fold(blk["bn1"])
        nb["bn2_scale"], nb["bn2_bias"] = bn_fold(blk["bn2"])
        blocks.append(nb)
    q["blocks"] = blocks
    return q


# --------------------------------------------------------------------------
# Forward pass
# --------------------------------------------------------------------------
def mbconv_block(blk, x_nhwc):
    B, H, W, C = x_nhwc.shape
    M = B * H * W
    # expand 1x1 + BN + swish (bf16 MXU, f32 epilogue, EUP swish)
    h = matmul_bn_act(x_nhwc.reshape(M, C), blk["expand_w"],
                      blk["bn0_scale"], blk["bn0_bias"],
                      act="swish", out_dtype=jnp.bfloat16)
    Ce = h.shape[-1]
    h = h.reshape(B, H, W, Ce)
    # depthwise 3x3 + BN + swish, SE global-avg-pool fused in
    h, pooled = depthwise3x3_bn_swish_pool(h, blk["dw_w"],
                                           blk["bn1_scale"], blk["bn1_bias"])
    # SE gate (tiny fused kernel), folded into the per-batch projection weights
    gate = se_gate(pooled, blk["se_r_w"], blk["se_r_b"],
                   blk["se_e_w"], blk["se_e_b"])                     # (B, Ce) f32
    w_gated = (blk["proj_w"][None] * gate[:, :, None]).astype(jnp.bfloat16)  # (B,Ce,256)
    out = project_bn(h, w_gated, blk["bn2_scale"], blk["bn2_bias"],
                     out_dtype=jnp.bfloat16)
    # block_args.stride == [1] -> reference's `stride == 1` check is False:
    # no residual skip (matches the PyTorch code literally).
    return out


def fph_forward(prep, x_idx, qtable):
    """x_idx: int (B, H, W), qtable: int (B, 1, 8, 8). Returns NCHW (B, 256, H/8, W/8)."""
    B, H, W = x_idx.shape
    Hb, Wb = H // 8, W // 8
    HW = H * W

    # conv1 (3x3, dilation 8) on a one-hot input == 9 table lookups; pack the
    # 9 tap codes (class + 22*tap, < 198, exact in bf16) per pixel.
    idx_pad = jnp.pad(x_idx, ((0, 0), (8, 8), (8, 8)), constant_values=21)
    taps = []
    for ky in range(3):
        for kx in range(3):
            t = ky * 3 + kx
            taps.append(idx_pad[:, ky * 8:ky * 8 + H, kx * 8:kx * 8 + W] + t * 22)
    pos = jnp.stack(taps, axis=-1).astype(jnp.bfloat16)              # (B,H,W,9)
    pos = jnp.pad(pos, ((0, 0), (0, 0), (0, 0), (0, 7)))             # (B,H,W,16)
    pos = pos.reshape(B, HW, 16)

    # per-spatial-row aux: AddCoords channels (with_r=True) + zero pad channel,
    # and the 8x8 qtable cell index (batch-invariant, tiny)
    hh = (jnp.arange(H, dtype=jnp.float32) / (H - 1)) * 2.0 - 1.0
    ww = (jnp.arange(W, dtype=jnp.float32) / (W - 1)) * 2.0 - 1.0
    xx = jnp.broadcast_to(hh[:, None], (H, W))
    yy = jnp.broadcast_to(ww[None, :], (H, W))
    rr = jnp.sqrt((xx - 0.5) ** 2 + (yy - 0.5) ** 2)
    coords = jnp.stack([xx, yy, rr, jnp.zeros((H, W), jnp.float32)], axis=-1)
    coords = coords.reshape(HW, 4).astype(jnp.bfloat16)
    hi = jnp.arange(H, dtype=jnp.int32)[:, None]
    wi = jnp.arange(W, dtype=jnp.int32)[None, :]
    qidx = ((hi % 8) * 8 + (wi % 8)).astype(jnp.float32).reshape(HW, 1)

    # per-batch qtable embedding block (8x8 cells x 16 channels)
    qt_tab = prep["qtembed"][qtable[:, 0]].reshape(B, 64, 16).astype(jnp.bfloat16)

    # fused conv1+BN+ReLU -> conv2(1x1)+BN+ReLU -> qt scale -> AddCoords
    x36 = conv12_fused(pos, coords, qidx, qt_tab, prep)              # (B, HW, 36)
    x36 = x36.reshape(B, H, W, 36)

    # conv0[0]: 8x8 / stride-8 conv -> patch extraction (XLA glue) + bf16 matmul
    # TODO(synk): emit conv12 output directly in 8x8-patch layout to drop this transpose.
    p8 = x36.reshape(B, Hb, 8, Wb, 8, 36).transpose(0, 1, 3, 2, 4, 5)
    p8 = p8.reshape(B * Hb * Wb, 8 * 8 * 36)
    y = matmul_bn_act(p8, prep["conv0_w"], prep["conv0_scale"], prep["conv0_bias"],
                      act="relu", out_dtype=jnp.bfloat16)
    y = y.reshape(B, Hb, Wb, 256)

    # conv0[3..5]: three MBConv blocks
    for blk in prep["blocks"]:
        y = mbconv_block(blk, y)

    # back to PyTorch's NCHW layout, f32
    return jnp.transpose(y.astype(jnp.float32), (0, 3, 1, 2))


# --------------------------------------------------------------------------
if __name__ == "__main__":
    key = jax.random.PRNGKey(0)
    kx, kq = jax.random.split(key)
    B, H, W = 2, 16, 16
    x = jax.random.randint(kx, (B, H, W), 0, 21, dtype=jnp.int32)
    qtable = jax.random.randint(kq, (B, 1, 8, 8), 0, 64, dtype=jnp.int32)

    params = init_params(jax.random.PRNGKey(42))
    prep = prepare_params(params)

    fwd = jax.jit(fph_forward)
    out = fwd(prep, x, qtable)
    out = jax.block_until_ready(out)

    assert out.shape == (B, 256, H // 8, W // 8), out.shape
    assert bool(jnp.all(jnp.isfinite(out)))
    print("KERNEL_OK")
</pallas_src>

<mosaic_0001>
module attributes {stable_mosaic.version = 11 : i64} {
  func.func @_conv12_kernel(%arg0: i32, %arg1: i32, %arg2: memref<1x256x16xbf16, #tpu.memory_space<vmem>>, %arg3: memref<256x4xbf16, #tpu.memory_space<vmem>>, %arg4: memref<256x1xf32, #tpu.memory_space<vmem>>, %arg5: memref<1x64x16xbf16, #tpu.memory_space<vmem>>, %arg6: memref<16x256xbf16, #tpu.memory_space<vmem>>, %arg7: memref<256x64xbf16, #tpu.memory_space<vmem>>, %arg8: memref<1x64xf32, #tpu.memory_space<vmem>>, %arg9: memref<64x16xbf16, #tpu.memory_space<vmem>>, %arg10: memref<1x16xf32, #tpu.memory_space<vmem>>, %arg11: memref<1x16xf32, #tpu.memory_space<vmem>>, %arg12: memref<1x256x36xbf16, #tpu.memory_space<vmem>>) attributes {dimension_semantics = [#tpu.dimension_semantics<parallel>, #tpu.dimension_semantics<parallel>], iteration_bounds = array<i64: 2, 1>, scalar_prefetch = 0 : i64, scratch_operands = 0 : i64, tpu.core_type = #tpu.core_type<tc>, window_params = [{transform_indices = @transform_0, window_bounds = array<i64: 1, 256, 16>}, {transform_indices = @transform_1, window_bounds = array<i64: 256, 4>}, {transform_indices = @transform_2, window_bounds = array<i64: 256, 1>}, {transform_indices = @transform_3, window_bounds = array<i64: 1, 64, 16>}, {pipeline_mode = #tpu.pipeline_mode<synchronous>, transform_indices = @transform_4, window_bounds = array<i64: 16, 256>}, {pipeline_mode = #tpu.pipeline_mode<synchronous>, transform_indices = @transform_5, window_bounds = array<i64: 256, 64>}, {pipeline_mode = #tpu.pipeline_mode<synchronous>, transform_indices = @transform_6, window_bounds = array<i64: 1, 64>}, {pipeline_mode = #tpu.pipeline_mode<synchronous>, transform_indices = @transform_7, window_bounds = array<i64: 64, 16>}, {pipeline_mode = #tpu.pipeline_mode<synchronous>, transform_indices = @transform_8, window_bounds = array<i64: 1, 16>}, {pipeline_mode = #tpu.pipeline_mode<synchronous>, transform_indices = @transform_9, window_bounds = array<i64: 1, 16>}, {transform_indices = @transform_10, window_bounds = array<i64: 1, 256, 36>}]} {
    %c0 = arith.constant 0 : index
    %c0_0 = arith.constant 0 : index
    %c0_1 = arith.constant 0 : index
    %0 = vector.load %arg2[%c0, %c0_0, %c0_1] : memref<1x256x16xbf16, #tpu.memory_space<vmem>>, vector<1x256x16xbf16>
    %1 = vector.shape_cast %0 : vector<1x256x16xbf16> to vector<256x16xbf16>
    %c0_2 = arith.constant 0 : index
    %c0_3 = arith.constant 0 : index
    %2 = vector.load %arg6[%c0_2, %c0_3] : memref<16x256xbf16, #tpu.memory_space<vmem>>, vector<16x256xbf16>
    %cst = arith.constant dense<0.000000e+00> : vector<256x256xf32>
    %3 = tpu.matmul %1, %2, %cst {dimension_numbers = #tpu.dot_dimension_numbers<[1], [0], [0], [1], [0, 0, 1, 1], [], []>} : vector<256x16xbf16>, vector<16x256xbf16>, vector<256x256xf32> -> vector<256x256xf32>
    %4 = tpu.iota {dimensions = array<i32: 1>} : vector<256x256xi32>
    %5 = arith.sitofp %4 : vector<256x256xi32> to vector<256x256xf32>
    %6 = arith.cmpf oeq, %3, %5 : vector<256x256xf32>
    %7 = arith.extui %6 : vector<256x256xi1> to vector<256x256xi32>
    %8 = arith.sitofp %7 : vector<256x256xi32> to vector<256x256xf32>
    %9 = arith.truncf %8 : vector<256x256xf32> to vector<256x256xbf16>
    %c0_4 = arith.constant 0 : index
    %c0_5 = arith.constant 0 : index
    %10 = vector.load %arg7[%c0_4, %c0_5] : memref<256x64xbf16, #tpu.memory_space<vmem>>, vector<256x64xbf16>
    %cst_6 = arith.constant dense<0.000000e+00> : vector<256x64xf32>
    %11 = tpu.matmul %9, %10, %cst_6 {dimension_numbers = #tpu.dot_dimension_numbers<[1], [0], [0], [1], [0, 0, 1, 1], [], []>} : vector<256x256xbf16>, vector<256x64xbf16>, vector<256x64xf32> -> vector<256x64xf32>
    %c0_7 = arith.constant 0 : index
    %c0_8 = arith.constant 0 : index
    %12 = vector.load %arg8[%c0_7, %c0_8] : memref<1x64xf32, #tpu.memory_space<vmem>>, vector<1x64xf32>
    %13 = vector.broadcast %12 : vector<1x64xf32> to vector<256x64xf32>
    %14 = arith.addf %11, %13 : vector<256x64xf32>
    %cst_9 = arith.constant 0.000000e+00 : f32
    %15 = vector.broadcast %cst_9 : f32 to vector<256x64xf32>
    %16 = arith.maximumf %14, %15 : vector<256x64xf32>
    %17 = arith.truncf %16 : vector<256x64xf32> to vector<256x64xbf16>
    %c0_10 = arith.constant 0 : index
    %c0_11 = arith.constant 0 : index
    %18 = vector.load %arg9[%c0_10, %c0_11] : memref<64x16xbf16, #tpu.memory_space<vmem>>, vector<64x16xbf16>
    %cst_12 = arith.constant dense<0.000000e+00> : vector<256x16xf32>
    %19 = tpu.matmul %17, %18, %cst_12 {dimension_numbers = #tpu.dot_dimension_numbers<[1], [0], [0], [1], [0, 0, 1, 1], [], []>} : vector<256x64xbf16>, vector<64x16xbf16>, vector<256x16xf32> -> vector<256x16xf32>
    %c0_13 = arith.constant 0 : index
    %c0_14 = arith.constant 0 : index
    %20 = vector.load %arg10[%c0_13, %c0_14] : memref<1x16xf32, #tpu.memory_space<vmem>>, vector<1x16xf32>
    %21 = vector.broadcast %20 : vector<1x16xf32> to vector<256x16xf32>
    %22 = arith.mulf %19, %21 : vector<256x16xf32>
    %c0_15 = arith.constant 0 : index
    %c0_16 = arith.constant 0 : index
    %23 = vector.load %arg11[%c0_15, %c0_16] : memref<1x16xf32, #tpu.memory_space<vmem>>, vector<1x16xf32>
    %24 = vector.broadcast %23 : vector<1x16xf32> to vector<256x16xf32>
    %25 = arith.addf %22, %24 : vector<256x16xf32>
    %cst_17 = arith.constant 0.000000e+00 : f32
    %26 = vector.broadcast %cst_17 : f32 to vector<256x16xf32>
    %27 = arith.maximumf %25, %26 : vector<256x16xf32>
    %28 = tpu.iota {dimensions = array<i32: 1>} : vector<256x64xi32>
    %29 = arith.sitofp %28 : vector<256x64xi32> to vector<256x64xf32>
    %c0_18 = arith.constant 0 : index
    %c0_19 = arith.constant 0 : index
    %30 = vector.load %arg4[%c0_18, %c0_19] : memref<256x1xf32, #tpu.memory_space<vmem>>, vector<256x1xf32>
    %31 = vector.broadcast %30 : vector<256x1xf32> to vector<256x64xf32>
    %32 = arith.cmpf oeq, %31, %29 : vector<256x64xf32>
    %33 = arith.extui %32 : vector<256x64xi1> to vector<256x64xi32>
    %34 = arith.sitofp %33 : vector<256x64xi32> to vector<256x64xf32>
    %35 = arith.truncf %34 : vector<256x64xf32> to vector<256x64xbf16>
    %c0_20 = arith.constant 0 : index
    %c0_21 = arith.constant 0 : index
    %c0_22 = arith.constant 0 : index
    %36 = vector.load %arg5[%c0_20, %c0_21, %c0_22] : memref<1x64x16xbf16, #tpu.memory_space<vmem>>, vector<1x64x16xbf16>
    %37 = vector.shape_cast %36 : vector<1x64x16xbf16> to vector<64x16xbf16>
    %cst_23 = arith.constant dense<0.000000e+00> : vector<256x16xf32>
    %38 = tpu.matmul %35, %37, %cst_23 {dimension_numbers = #tpu.dot_dimension_numbers<[1], [0], [0], [1], [0, 0, 1, 1], [], []>} : vector<256x64xbf16>, vector<64x16xbf16>, vector<256x16xf32> -> vector<256x16xf32>
    %39 = arith.mulf %27, %38 : vector<256x16xf32>
    %40 = arith.truncf %39 : vector<256x16xf32> to vector<256x16xbf16>
    %41 = arith.truncf %27 : vector<256x16xf32> to vector<256x16xbf16>
    %c0_24 = arith.constant 0 : index
    %c0_25 = arith.constant 0 : index
    %42 = vector.load %arg3[%c0_24, %c0_25] : memref<256x4xbf16, #tpu.memory_space<vmem>>, vector<256x4xbf16>
    %43 = tpu.concatenate %40, %41, %42 in 1 : vector<256x16xbf16>, vector<256x16xbf16>, vector<256x4xbf16> -> vector<256x36xbf16>
    %c0_26 = arith.constant 0 : index
    %c0_27 = arith.constant 0 : index
    %c0_28 = arith.constant 0 : index
    %44 = vector.load %arg12[%c0_26, %c0_27, %c0_28] : memref<1x256x36xbf16, #tpu.memory_space<vmem>>, vector<1x256x36xbf16>
    %45 = vector.shape_cast %44 : vector<1x256x36xbf16> to vector<256x36xbf16>
    %46 = vector.shape_cast %43 : vector<256x36xbf16> to vector<1x256x36xbf16>
    tpu.vector_store %arg12[%c0_26, %c0_27, %c0_28], %46 {strides = array<i32>} : memref<1x256x36xbf16, #tpu.memory_space<vmem>>, vector<1x256x36xbf16>,
    return
  }
  func.func @transform_0(%arg0: i32, %arg1: i32) -> (i32, i32, i32) {
    %c0_i32 = arith.constant 0 : i32
    %c0_i32_0 = arith.constant 0 : i32
    return %arg0, %arg1, %c0_i32 : i32, i32, i32
  }
  func.func @transform_1(%arg0: i32, %arg1: i32) -> (i32, i32) {
    %c0_i32 = arith.constant 0 : i32
    %c0_i32_0 = arith.constant 0 : i32
    return %arg1, %c0_i32 : i32, i32
  }
  func.func @transform_2(%arg0: i32, %arg1: i32) -> (i32, i32) {
    %c0_i32 = arith.constant 0 : i32
    %c0_i32_0 = arith.constant 0 : i32
    return %arg1, %c0_i32 : i32, i32
  }
  func.func @transform_3(%arg0: i32, %arg1: i32) -> (i32, i32, i32) {
    %c0_i32 = arith.constant 0 : i32
    %c0_i32_0 = arith.constant 0 : i32
    %c0_i32_1 = arith.constant 0 : i32
    return %arg0, %c0_i32, %c0_i32_0 : i32, i32, i32
  }
  func.func @transform_4(%arg0: i32, %arg1: i32) -> (i32, i32) {
    %c0_i32 = arith.constant 0 : i32
    %c0_i32_0 = arith.constant 0 : i32
    %c0_i32_1 = arith.constant 0 : i32
    return %c0_i32, %c0_i32_0 : i32, i32
  }
  func.func @transform_5(%arg0: i32, %arg1: i32) -> (i32, i32) {
    %c0_i32 = arith.constant 0 : i32
    %c0_i32_0 = arith.constant 0 : i32
    %c0_i32_1 = arith.constant 0 : i32
    return %c0_i32, %c0_i32_0 : i32, i32
  }
  func.func @transform_6(%arg0: i32, %arg1: i32) -> (i32, i32) {
    %c0_i32 = arith.constant 0 : i32
    %c0_i32_0 = arith.constant 0 : i32
    %c0_i32_1 = arith.constant 0 : i32
    return %c0_i32, %c0_i32_0 : i32, i32
  }
  func.func @transform_7(%arg0: i32, %arg1: i32) -> (i32, i32) {
    %c0_i32 = arith.constant 0 : i32
    %c0_i32_0 = arith.constant 0 : i32
    %c0_i32_1 = arith.constant 0 : i32
    return %c0_i32, %c0_i32_0 : i32, i32
  }
  func.func @transform_8(%arg0: i32, %arg1: i32) -> (i32, i32) {
    %c0_i32 = arith.constant 0 : i32
    %c0_i32_0 = arith.constant 0 : i32
    %c0_i32_1 = arith.constant 0 : i32
    return %c0_i32, %c0_i32_0 : i32, i32
  }
  func.func @transform_9(%arg0: i32, %arg1: i32) -> (i32, i32) {
    %c0_i32 = arith.constant 0 : i32
    %c0_i32_0 = arith.constant 0 : i32
    %c0_i32_1 = arith.constant 0 : i32
    return %c0_i32, %c0_i32_0 : i32, i32
  }
  func.func @transform_10(%arg0: i32, %arg1: i32) -> (i32, i32, i32) {
    %c0_i32 = arith.constant 0 : i32
    %c0_i32_0 = arith.constant 0 : i32
    return %arg0, %arg1, %c0_i32 : i32, i32, i32
  }
}

module attributes {stable_mosaic.version = 11 : i64} {
  func.func @_matmul_bn_act_kernel(%arg0: i32, %arg1: memref<16x2304xbf16, #tpu.memory_space<vmem>>, %arg2: memref<2304x256xbf16, #tpu.memory_space<vmem>>, %arg3: memref<1x256xf32, #tpu.memory_space<vmem>>, %arg4: memref<1x256xf32, #tpu.memory_space<vmem>>, %arg5: memref<16x256xbf16, #tpu.memory_space<vmem>>) attributes {dimension_semantics = [#tpu.dimension_semantics<parallel>], iteration_bounds = array<i64: 1>, scalar_prefetch = 0 : i64, scratch_operands = 0 : i64, tpu.core_type = #tpu.core_type<tc>, window_params = [{transform_indices = @transform_0, window_bounds = array<i64: 16, 2304>}, {pipeline_mode = #tpu.pipeline_mode<synchronous>, transform_indices = @transform_1, window_bounds = array<i64: 2304, 256>}, {pipeline_mode = #tpu.pipeline_mode<synchronous>, transform_indices = @transform_2, window_bounds = array<i64: 1, 256>}, {pipeline_mode = #tpu.pipeline_mode<synchronous>, transform_indices = @transform_3, window_bounds = array<i64: 1, 256>}, {transform_indices = @transform_4, window_bounds = array<i64: 16, 256>}]} {
    %c0 = arith.constant 0 : index
    %c0_0 = arith.constant 0 : index
    %0 = vector.load %arg1[%c0, %c0_0] : memref<16x2304xbf16, #tpu.memory_space<vmem>>, vector<16x2304xbf16>
    %c0_1 = arith.constant 0 : index
    %c0_2 = arith.constant 0 : index
    %1 = vector.load %arg2[%c0_1, %c0_2] : memref<2304x256xbf16, #tpu.memory_space<vmem>>, vector<2304x256xbf16>
    %cst = arith.constant dense<0.000000e+00> : vector<16x256xf32>
    %2 = tpu.matmul %0, %1, %cst {dimension_numbers = #tpu.dot_dimension_numbers<[1], [0], [0], [1], [0, 0, 1, 1], [], []>} : vector<16x2304xbf16>, vector<2304x256xbf16>, vector<16x256xf32> -> vector<16x256xf32>
    %c0_3 = arith.constant 0 : index
    %c0_4 = arith.constant 0 : index
    %3 = vector.load %arg3[%c0_3, %c0_4] : memref<1x256xf32, #tpu.memory_space<vmem>>, vector<1x256xf32>
    %4 = vector.broadcast %3 : vector<1x256xf32> to vector<16x256xf32>
    %5 = arith.mulf %2, %4 : vector<16x256xf32>
    %c0_5 = arith.constant 0 : index
    %c0_6 = arith.constant 0 : index
    %6 = vector.load %arg4[%c0_5, %c0_6] : memref<1x256xf32, #tpu.memory_space<vmem>>, vector<1x256xf32>
    %7 = vector.broadcast %6 : vector<1x256xf32> to vector<16x256xf32>
    %8 = arith.addf %5, %7 : vector<16x256xf32>
    %cst_7 = arith.constant 0.000000e+00 : f32
    %9 = vector.broadcast %cst_7 : f32 to vector<16x256xf32>
    %10 = arith.maximumf %8, %9 : vector<16x256xf32>
    %11 = arith.truncf %10 : vector<16x256xf32> to vector<16x256xbf16>
    %c0_8 = arith.constant 0 : index
    %c0_9 = arith.constant 0 : index
    %12 = vector.load %arg5[%c0_8, %c0_9] : memref<16x256xbf16, #tpu.memory_space<vmem>>, vector<16x256xbf16>
    tpu.vector_store %arg5[%c0_8, %c0_9], %11 {strides = array<i32>} : memref<16x256xbf16, #tpu.memory_space<vmem>>, vector<16x256xbf16>,
    return
  }
  func.func @transform_0(%arg0: i32) -> (i32, i32) {
    %c0_i32 = arith.constant 0 : i32
    %c0_i32_0 = arith.constant 0 : i32
    return %arg0, %c0_i32 : i32, i32
  }
  func.func @transform_1(%arg0: i32) -> (i32, i32) {
    %c0_i32 = arith.constant 0 : i32
    %c0_i32_0 = arith.constant 0 : i32
    %c0_i32_1 = arith.constant 0 : i32
    return %c0_i32, %c0_i32_0 : i32, i32
  }
  func.func @transform_2(%arg0: i32) -> (i32, i32) {
    %c0_i32 = arith.constant 0 : i32
    %c0_i32_0 = arith.constant 0 : i32
    %c0_i32_1 = arith.constant 0 : i32
    return %c0_i32, %c0_i32_0 : i32, i32
  }
  func.func @transform_3(%arg0: i32) -> (i32, i32) {
    %c0_i32 = arith.constant 0 : i32
    %c0_i32_0 = arith.constant 0 : i32
    %c0_i32_1 = arith.constant 0 : i32
    return %c0_i32, %c0_i32_0 : i32, i32
  }
  func.func @transform_4(%arg0: i32) -> (i32, i32) {
    %c0_i32 = arith.constant 0 : i32
    %c0_i32_0 = arith.constant 0 : i32
    return %arg0, %c0_i32 : i32, i32
  }
}

module attributes {stable_mosaic.version = 11 : i64} {
  func.func @_matmul_bn_act_kernel(%arg0: i32, %arg1: memref<16x256xbf16, #tpu.memory_space<vmem>>, %arg2: memref<256x1536xbf16, #tpu.memory_space<vmem>>, %arg3: memref<1x1536xf32, #tpu.memory_space<vmem>>, %arg4: memref<1x1536xf32, #tpu.memory_space<vmem>>, %arg5: memref<16x1536xbf16, #tpu.memory_space<vmem>>) attributes {dimension_semantics = [#tpu.dimension_semantics<parallel>], iteration_bounds = array<i64: 1>, scalar_prefetch = 0 : i64, scratch_operands = 0 : i64, tpu.core_type = #tpu.core_type<tc>, window_params = [{transform_indices = @transform_0, window_bounds = array<i64: 16, 256>}, {pipeline_mode = #tpu.pipeline_mode<synchronous>, transform_indices = @transform_1, window_bounds = array<i64: 256, 1536>}, {pipeline_mode = #tpu.pipeline_mode<synchronous>, transform_indices = @transform_2, window_bounds = array<i64: 1, 1536>}, {pipeline_mode = #tpu.pipeline_mode<synchronous>, transform_indices = @transform_3, window_bounds = array<i64: 1, 1536>}, {transform_indices = @transform_4, window_bounds = array<i64: 16, 1536>}]} {
    %c0 = arith.constant 0 : index
    %c0_0 = arith.constant 0 : index
    %0 = vector.load %arg1[%c0, %c0_0] : memref<16x256xbf16, #tpu.memory_space<vmem>>, vector<16x256xbf16>
    %c0_1 = arith.constant 0 : index
    %c0_2 = arith.constant 0 : index
    %1 = vector.load %arg2[%c0_1, %c0_2] : memref<256x1536xbf16, #tpu.memory_space<vmem>>, vector<256x1536xbf16>
    %cst = arith.constant dense<0.000000e+00> : vector<16x1536xf32>
    %2 = tpu.matmul %0, %1, %cst {dimension_numbers = #tpu.dot_dimension_numbers<[1], [0], [0], [1], [0, 0, 1, 1], [], []>} : vector<16x256xbf16>, vector<256x1536xbf16>, vector<16x1536xf32> -> vector<16x1536xf32>
    %c0_3 = arith.constant 0 : index
    %c0_4 = arith.constant 0 : index
    %3 = vector.load %arg3[%c0_3, %c0_4] : memref<1x1536xf32, #tpu.memory_space<vmem>>, vector<1x1536xf32>
    %4 = vector.broadcast %3 : vector<1x1536xf32> to vector<16x1536xf32>
    %5 = arith.mulf %2, %4 : vector<16x1536xf32>
    %c0_5 = arith.constant 0 : index
    %c0_6 = arith.constant 0 : index
    %6 = vector.load %arg4[%c0_5, %c0_6] : memref<1x1536xf32, #tpu.memory_space<vmem>>, vector<1x1536xf32>
    %7 = vector.broadcast %6 : vector<1x1536xf32> to vector<16x1536xf32>
    %8 = arith.addf %5, %7 : vector<16x1536xf32>
    %cst_7 = arith.constant 0.000000e+00 : f32
    %9 = vector.broadcast %cst_7 : f32 to vector<16x1536xf32>
    %10 = arith.subf %9, %8 : vector<16x1536xf32>
    %11 = math.exp %10 : vector<16x1536xf32>
    %cst_8 = arith.constant 1.000000e+00 : f32
    %12 = vector.broadcast %cst_8 : f32 to vector<16x1536xf32>
    %13 = arith.addf %12, %11 : vector<16x1536xf32>
    %14 = tpu.reciprocal %13 {approx = true} : vector<16x1536xf32> -> vector<16x1536xf32>
    %15 = arith.mulf %8, %14 : vector<16x1536xf32>
    %16 = arith.truncf %15 : vector<16x1536xf32> to vector<16x1536xbf16>
    %c0_9 = arith.constant 0 : index
    %c0_10 = arith.constant 0 : index
    %17 = vector.load %arg5[%c0_9, %c0_10] : memref<16x1536xbf16, #tpu.memory_space<vmem>>, vector<16x1536xbf16>
    tpu.vector_store %arg5[%c0_9, %c0_10], %16 {strides = array<i32>} : memref<16x1536xbf16, #tpu.memory_space<vmem>>, vector<16x1536xbf16>,
    return
  }
  func.func @transform_0(%arg0: i32) -> (i32, i32) {
    %c0_i32 = arith.constant 0 : i32
    %c0_i32_0 = arith.constant 0 : i32
    return %arg0, %c0_i32 : i32, i32
  }
  func.func @transform_1(%arg0: i32) -> (i32, i32) {
    %c0_i32 = arith.constant 0 : i32
    %c0_i32_0 = arith.constant 0 : i32
    %c0_i32_1 = arith.constant 0 : i32
    return %c0_i32, %c0_i32_0 : i32, i32
  }
  func.func @transform_2(%arg0: i32) -> (i32, i32) {
    %c0_i32 = arith.constant 0 : i32
    %c0_i32_0 = arith.constant 0 : i32
    %c0_i32_1 = arith.constant 0 : i32
    return %c0_i32, %c0_i32_0 : i32, i32
  }
  func.func @transform_3(%arg0: i32) -> (i32, i32) {
    %c0_i32 = arith.constant 0 : i32
    %c0_i32_0 = arith.constant 0 : i32
    %c0_i32_1 = arith.constant 0 : i32
    return %c0_i32, %c0_i32_0 : i32, i32
  }
  func.func @transform_4(%arg0: i32) -> (i32, i32) {
    %c0_i32 = arith.constant 0 : i32
    %c0_i32_0 = arith.constant 0 : i32
    return %arg0, %c0_i32 : i32, i32
  }
}

module attributes {stable_mosaic.version = 11 : i64} {
  func.func @_dw_bn_swish_pool_kernel(%arg0: i32, %arg1: i32, %arg2: memref<1x4x4x512xbf16, #tpu.memory_space<vmem>>, %arg3: memref<9x512xf32, #tpu.memory_space<vmem>>, %arg4: memref<1x512xf32, #tpu.memory_space<vmem>>, %arg5: memref<1x512xf32, #tpu.memory_space<vmem>>, %arg6: memref<1x2x2x512xbf16, #tpu.memory_space<vmem>>, %arg7: memref<1x1x512xf32, #tpu.memory_space<vmem>>) attributes {dimension_semantics = [#tpu.dimension_semantics<parallel>, #tpu.dimension_semantics<parallel>], iteration_bounds = array<i64: 2, 3>, scalar_prefetch = 0 : i64, scratch_operands = 0 : i64, tpu.core_type = #tpu.core_type<tc>, window_params = [{transform_indices = @transform_0, window_bounds = array<i64: 1, 4, 4, 512>}, {transform_indices = @transform_1, window_bounds = array<i64: 9, 512>}, {transform_indices = @transform_2, window_bounds = array<i64: 1, 512>}, {transform_indices = @transform_3, window_bounds = array<i64: 1, 512>}, {transform_indices = @transform_4, window_bounds = array<i64: 1, 2, 2, 512>}, {transform_indices = @transform_5, window_bounds = array<i64: 1, 1, 512>}]} {
    %c0 = arith.constant 0 : index
    %c0_0 = arith.constant 0 : index
    %0 = vector.load %arg3[%c0, %c0_0] : memref<9x512xf32, #tpu.memory_space<vmem>>, vector<9x512xf32>
    %c0_1 = arith.constant 0 : index
    %c0_2 = arith.constant 0 : index
    %c0_3 = arith.constant 0 : index
    %c0_4 = arith.constant 0 : index
    %1 = vector.load %arg2[%c0_1, %c0_2, %c0_3, %c0_4] : memref<1x4x4x512xbf16, #tpu.memory_space<vmem>>, vector<1x4x4x512xbf16>
    %2 = vector.shape_cast %1 : vector<1x4x4x512xbf16> to vector<4x4x512xbf16>
    %3 = arith.extf %2 : vector<4x4x512xbf16> to vector<4x4x512xf32>
    %4 = vector.extract_strided_slice %3 {offsets = [0, 0, 0], sizes = [4, 2, 512], strides = [1, 1, 1]} : vector<4x4x512xf32> to vector<4x2x512xf32>
    %5 = vector.extract_strided_slice %3 {offsets = [0, 1, 0], sizes = [4, 2, 512], strides = [1, 1, 1]} : vector<4x4x512xf32> to vector<4x2x512xf32>
    %6 = vector.extract_strided_slice %3 {offsets = [0, 2, 0], sizes = [4, 2, 512], strides = [1, 1, 1]} : vector<4x4x512xf32> to vector<4x2x512xf32>
    %cst = arith.constant 0.000000e+00 : f32
    %7 = vector.broadcast %cst : f32 to vector<2x2x512xf32>
    %8 = vector.extract_strided_slice %4 {offsets = [0, 0, 0], sizes = [2, 2, 512], strides = [1, 1, 1]} : vector<4x2x512xf32> to vector<2x2x512xf32>
    %9 = vector.extract_strided_slice %0 {offsets = [0, 0], sizes = [1, 512], strides = [1, 1]} : vector<9x512xf32> to vector<1x512xf32>
    %10 = vector.shape_cast %9 : vector<1x512xf32> to vector<512xf32>
    %11 = vector.shape_cast %10 : vector<512xf32> to vector<1x1x512xf32>
    %12 = vector.broadcast %11 : vector<1x1x512xf32> to vector<2x2x512xf32>
    %13 = arith.mulf %8, %12 : vector<2x2x512xf32>
    %14 = arith.addf %7, %13 : vector<2x2x512xf32>
    %15 = vector.extract_strided_slice %5 {offsets = [0, 0, 0], sizes = [2, 2, 512], strides = [1, 1, 1]} : vector<4x2x512xf32> to vector<2x2x512xf32>
    %16 = vector.extract_strided_slice %0 {offsets = [1, 0], sizes = [1, 512], strides = [1, 1]} : vector<9x512xf32> to vector<1x512xf32>
    %17 = vector.shape_cast %16 : vector<1x512xf32> to vector<512xf32>
    %18 = vector.shape_cast %17 : vector<512xf32> to vector<1x1x512xf32>
    %19 = vector.broadcast %18 : vector<1x1x512xf32> to vector<2x2x512xf32>
    %20 = arith.mulf %15, %19 : vector<2x2x512xf32>
    %21 = arith.addf %14, %20 : vector<2x2x512xf32>
    %22 = vector.extract_strided_slice %6 {offsets = [0, 0, 0], sizes = [2, 2, 512], strides = [1, 1, 1]} : vector<4x2x512xf32> to vector<2x2x512xf32>
    %23 = vector.extract_strided_slice %0 {offsets = [2, 0], sizes = [1, 512], strides = [1, 1]} : vector<9x512xf32> to vector<1x512xf32>
    %24 = vector.shape_cast %23 : vector<1x512xf32> to vector<512xf32>
    %25 = vector.shape_cast %24 : vector<512xf32> to vector<1x1x512xf32>
    %26 = vector.broadcast %25 : vector<1x1x512xf32> to vector<2x2x512xf32>
    %27 = arith.mulf %22, %26 : vector<2x2x512xf32>
    %28 = arith.addf %21, %27 : vector<2x2x512xf32>
    %29 = vector.extract_strided_slice %4 {offsets = [1, 0, 0], sizes = [2, 2, 512], strides = [1, 1, 1]} : vector<4x2x512xf32> to vector<2x2x512xf32>
    %30 = vector.extract_strided_slice %0 {offsets = [3, 0], sizes = [1, 512], strides = [1, 1]} : vector<9x512xf32> to vector<1x512xf32>
    %31 = vector.shape_cast %30 : vector<1x512xf32> to vector<512xf32>
    %32 = vector.shape_cast %31 : vector<512xf32> to vector<1x1x512xf32>
    %33 = vector.broadcast %32 : vector<1x1x512xf32> to vector<2x2x512xf32>
    %34 = arith.mulf %29, %33 : vector<2x2x512xf32>
    %35 = arith.addf %28, %34 : vector<2x2x512xf32>
    %36 = vector.extract_strided_slice %5 {offsets = [1, 0, 0], sizes = [2, 2, 512], strides = [1, 1, 1]} : vector<4x2x512xf32> to vector<2x2x512xf32>
    %37 = vector.extract_strided_slice %0 {offsets = [4, 0], sizes = [1, 512], strides = [1, 1]} : vector<9x512xf32> to vector<1x512xf32>
    %38 = vector.shape_cast %37 : vector<1x512xf32> to vector<512xf32>
    %39 = vector.shape_cast %38 : vector<512xf32> to vector<1x1x512xf32>
    %40 = vector.broadcast %39 : vector<1x1x512xf32> to vector<2x2x512xf32>
    %41 = arith.mulf %36, %40 : vector<2x2x512xf32>
    %42 = arith.addf %35, %41 : vector<2x2x512xf32>
    %43 = vector.extract_strided_slice %6 {offsets = [1, 0, 0], sizes = [2, 2, 512], strides = [1, 1, 1]} : vector<4x2x512xf32> to vector<2x2x512xf32>
    %44 = vector.extract_strided_slice %0 {offsets = [5, 0], sizes = [1, 512], strides = [1, 1]} : vector<9x512xf32> to vector<1x512xf32>
    %45 = vector.shape_cast %44 : vector<1x512xf32> to vector<512xf32>
    %46 = vector.shape_cast %45 : vector<512xf32> to vector<1x1x512xf32>
    %47 = vector.broadcast %46 : vector<1x1x512xf32> to vector<2x2x512xf32>
    %48 = arith.mulf %43, %47 : vector<2x2x512xf32>
    %49 = arith.addf %42, %48 : vector<2x2x512xf32>
    %50 = vector.extract_strided_slice %4 {offsets = [2, 0, 0], sizes = [2, 2, 512], strides = [1, 1, 1]} : vector<4x2x512xf32> to vector<2x2x512xf32>
    %51 = vector.extract_strided_slice %0 {offsets = [6, 0], sizes = [1, 512], strides = [1, 1]} : vector<9x512xf32> to vector<1x512xf32>
    %52 = vector.shape_cast %51 : vector<1x512xf32> to vector<512xf32>
    %53 = vector.shape_cast %52 : vector<512xf32> to vector<1x1x512xf32>
    %54 = vector.broadcast %53 : vector<1x1x512xf32> to vector<2x2x512xf32>
    %55 = arith.mulf %50, %54 : vector<2x2x512xf32>
    %56 = arith.addf %49, %55 : vector<2x2x512xf32>
    %57 = vector.extract_strided_slice %5 {offsets = [2, 0, 0], sizes = [2, 2, 512], strides = [1, 1, 1]} : vector<4x2x512xf32> to vector<2x2x512xf32>
    %58 = vector.extract_strided_slice %0 {offsets = [7, 0], sizes = [1, 512], strides = [1, 1]} : vector<9x512xf32> to vector<1x512xf32>
    %59 = vector.shape_cast %58 : vector<1x512xf32> to vector<512xf32>
    %60 = vector.shape_cast %59 : vector<512xf32> to vector<1x1x512xf32>
    %61 = vector.broadcast %60 : vector<1x1x512xf32> to vector<2x2x512xf32>
    %62 = arith.mulf %57, %61 : vector<2x2x512xf32>
    %63 = arith.addf %56, %62 : vector<2x2x512xf32>
    %64 = vector.extract_strided_slice %6 {offsets = [2, 0, 0], sizes = [2, 2, 512], strides = [1, 1, 1]} : vector<4x2x512xf32> to vector<2x2x512xf32>
    %65 = vector.extract_strided_slice %0 {offsets = [8, 0], sizes = [1, 512], strides = [1, 1]} : vector<9x512xf32> to vector<1x512xf32>
    %66 = vector.shape_cast %65 : vector<1x512xf32> to vector<512xf32>
    %67 = vector.shape_cast %66 : vector<512xf32> to vector<1x1x512xf32>
    %68 = vector.broadcast %67 : vector<1x1x512xf32> to vector<2x2x512xf32>
    %69 = arith.mulf %64, %68 : vector<2x2x512xf32>
    %70 = arith.addf %63, %69 : vector<2x2x512xf32>
    %c0_5 = arith.constant 0 : index
    %c0_6 = arith.constant 0 : index
    %71 = vector.load %arg4[%c0_5, %c0_6] : memref<1x512xf32, #tpu.memory_space<vmem>>, vector<1x512xf32>
    %72 = vector.shape_cast %71 : vector<1x512xf32> to vector<1x1x512xf32>
    %73 = vector.broadcast %72 : vector<1x1x512xf32> to vector<2x2x512xf32>
    %74 = arith.mulf %70, %73 : vector<2x2x512xf32>
    %c0_7 = arith.constant 0 : index
    %c0_8 = arith.constant 0 : index
    %75 = vector.load %arg5[%c0_7, %c0_8] : memref<1x512xf32, #tpu.memory_space<vmem>>, vector<1x512xf32>
    %76 = vector.shape_cast %75 : vector<1x512xf32> to vector<1x1x512xf32>
    %77 = vector.broadcast %76 : vector<1x1x512xf32> to vector<2x2x512xf32>
    %78 = arith.addf %74, %77 : vector<2x2x512xf32>
    %cst_9 = arith.constant 0.000000e+00 : f32
    %79 = vector.broadcast %cst_9 : f32 to vector<2x2x512xf32>
    %80 = arith.subf %79, %78 : vector<2x2x512xf32>
    %81 = math.exp %80 : vector<2x2x512xf32>
    %cst_10 = arith.constant 1.000000e+00 : f32
    %82 = vector.broadcast %cst_10 : f32 to vector<2x2x512xf32>
    %83 = arith.addf %82, %81 : vector<2x2x512xf32>
    %84 = tpu.reciprocal %83 {approx = true} : vector<2x2x512xf32> -> vector<2x2x512xf32>
    %85 = arith.mulf %78, %84 : vector<2x2x512xf32>
    %86 = arith.truncf %85 : vector<2x2x512xf32> to vector<2x2x512xbf16>
    %c0_11 = arith.constant 0 : index
    %c0_12 = arith.constant 0 : index
    %c0_13 = arith.constant 0 : index
    %c0_14 = arith.constant 0 : index
    %87 = vector.load %arg6[%c0_11, %c0_12, %c0_13, %c0_14] : memref<1x2x2x512xbf16, #tpu.memory_space<vmem>>, vector<1x2x2x512xbf16>
    %88 = vector.shape_cast %87 : vector<1x2x2x512xbf16> to vector<2x2x512xbf16>
    %89 = vector.shape_cast %86 : vector<2x2x512xbf16> to vector<1x2x2x512xbf16>
    tpu.vector_store %arg6[%c0_11, %c0_12, %c0_13, %c0_14], %89 {strides = array<i32>} : memref<1x2x2x512xbf16, #tpu.memory_space<vmem>>, vector<1x2x2x512xbf16>,
    %cst_15 = arith.constant dense<0.000000e+00> : vector<512xf32>
    %90 = vector.multi_reduction <add>, %85, %cst_15 [0, 1] : vector<2x2x512xf32> to vector<512xf32>
    %cst_16 = arith.constant 2.500000e-01 : f32
    %91 = vector.broadcast %cst_16 : f32 to vector<512xf32>
    %92 = arith.mulf %90, %91 : vector<512xf32>
    %93 = vector.shape_cast %92 : vector<512xf32> to vector<1x1x512xf32>
    %c0_17 = arith.constant 0 : index
    %c0_18 = arith.constant 0 : index
    %c0_19 = arith.constant 0 : index
    %94 = vector.load %arg7[%c0_17, %c0_18, %c0_19] : memref<1x1x512xf32, #tpu.memory_space<vmem>>, vector<1x1x512xf32>
    tpu.vector_store %arg7[%c0_17, %c0_18, %c0_19], %93 {strides = array<i32>} : memref<1x1x512xf32, #tpu.memory_space<vmem>>, vector<1x1x512xf32>,
    return
  }
  func.func @transform_0(%arg0: i32, %arg1: i32) -> (i32, i32, i32, i32) {
    %c0_i32 = arith.constant 0 : i32
    %c0_i32_0 = arith.constant 0 : i32
    %c0_i32_1 = arith.constant 0 : i32
    return %arg0, %c0_i32, %c0_i32_0, %arg1 : i32, i32, i32, i32
  }
  func.func @transform_1(%arg0: i32, %arg1: i32) -> (i32, i32) {
    %c0_i32 = arith.constant 0 : i32
    %c0_i32_0 = arith.constant 0 : i32
    return %c0_i32, %arg1 : i32, i32
  }
  func.func @transform_2(%arg0: i32, %arg1: i32) -> (i32, i32) {
    %c0_i32 = arith.constant 0 : i32
    %c0_i32_0 = arith.constant 0 : i32
    return %c0_i32, %arg1 : i32, i32
  }
  func.func @transform_3(%arg0: i32, %arg1: i32) -> (i32, i32) {
    %c0_i32 = arith.constant 0 : i32
    %c0_i32_0 = arith.constant 0 : i32
    return %c0_i32, %arg1 : i32, i32
  }
  func.func @transform_4(%arg0: i32, %arg1: i32) -> (i32, i32, i32, i32) {
    %c0_i32 = arith.constant 0 : i32
    %c0_i32_0 = arith.constant 0 : i32
    %c0_i32_1 = arith.constant 0 : i32
    return %arg0, %c0_i32, %c0_i32_0, %arg1 : i32, i32, i32, i32
  }
  func.func @transform_5(%arg0: i32, %arg1: i32) -> (i32, i32, i32) {
    %c0_i32 = arith.constant 0 : i32
    %c0_i32_0 = arith.constant 0 : i32
    return %arg0, %c0_i32, %arg1 : i32, i32, i32
  }
}

module attributes {stable_mosaic.version = 11 : i64} {
  func.func @_se_gate_kernel(%arg0: memref<2x1536xf32, #tpu.memory_space<vmem>>, %arg1: memref<1536x64xbf16, #tpu.memory_space<vmem>>, %arg2: memref<1x64xf32, #tpu.memory_space<vmem>>, %arg3: memref<64x1536xbf16, #tpu.memory_space<vmem>>, %arg4: memref<1x1536xf32, #tpu.memory_space<vmem>>, %arg5: memref<2x1536xf32, #tpu.memory_space<vmem>>) attributes {dimension_semantics = [], scalar_prefetch = 0 : i64, scratch_operands = 0 : i64, tpu.core_type = #tpu.core_type<tc>} {
    %c0 = arith.constant 0 : index
    %c0_0 = arith.constant 0 : index
    %0 = vector.load %arg0[%c0, %c0_0] : memref<2x1536xf32, #tpu.memory_space<vmem>>, vector<2x1536xf32>
    %1 = arith.truncf %0 : vector<2x1536xf32> to vector<2x1536xbf16>
    %c0_1 = arith.constant 0 : index
    %c0_2 = arith.constant 0 : index
    %2 = vector.load %arg1[%c0_1, %c0_2] : memref<1536x64xbf16, #tpu.memory_space<vmem>>, vector<1536x64xbf16>
    %cst = arith.constant dense<0.000000e+00> : vector<2x64xf32>
    %3 = tpu.matmul %1, %2, %cst {dimension_numbers = #tpu.dot_dimension_numbers<[1], [0], [0], [1], [0, 0, 1, 1], [], []>} : vector<2x1536xbf16>, vector<1536x64xbf16>, vector<2x64xf32> -> vector<2x64xf32>
    %c0_3 = arith.constant 0 : index
    %c0_4 = arith.constant 0 : index
    %4 = vector.load %arg2[%c0_3, %c0_4] : memref<1x64xf32, #tpu.memory_space<vmem>>, vector<1x64xf32>
    %5 = vector.broadcast %4 : vector<1x64xf32> to vector<2x64xf32>
    %6 = arith.addf %3, %5 : vector<2x64xf32>
    %cst_5 = arith.constant 0.000000e+00 : f32
    %7 = vector.broadcast %cst_5 : f32 to vector<2x64xf32>
    %8 = arith.subf %7, %6 : vector<2x64xf32>
    %9 = math.exp %8 : vector<2x64xf32>
    %cst_6 = arith.constant 1.000000e+00 : f32
    %10 = vector.broadcast %cst_6 : f32 to vector<2x64xf32>
    %11 = arith.addf %10, %9 : vector<2x64xf32>
    %12 = tpu.reciprocal %11 {approx = true} : vector<2x64xf32> -> vector<2x64xf32>
    %13 = arith.mulf %6, %12 : vector<2x64xf32>
    %14 = arith.truncf %13 : vector<2x64xf32> to vector<2x64xbf16>
    %c0_7 = arith.constant 0 : index
    %c0_8 = arith.constant 0 : index
    %15 = vector.load %arg3[%c0_7, %c0_8] : memref<64x1536xbf16, #tpu.memory_space<vmem>>, vector<64x1536xbf16>
    %cst_9 = arith.constant dense<0.000000e+00> : vector<2x1536xf32>
    %16 = tpu.matmul %14, %15, %cst_9 {dimension_numbers = #tpu.dot_dimension_numbers<[1], [0], [0], [1], [0, 0, 1, 1], [], []>} : vector<2x64xbf16>, vector<64x1536xbf16>, vector<2x1536xf32> -> vector<2x1536xf32>
    %c0_10 = arith.constant 0 : index
    %c0_11 = arith.constant 0 : index
    %17 = vector.load %arg4[%c0_10, %c0_11] : memref<1x1536xf32, #tpu.memory_space<vmem>>, vector<1x1536xf32>
    %18 = vector.broadcast %17 : vector<1x1536xf32> to vector<2x1536xf32>
    %19 = arith.addf %16, %18 : vector<2x1536xf32>
    %cst_12 = arith.constant 0.000000e+00 : f32
    %20 = vector.broadcast %cst_12 : f32 to vector<2x1536xf32>
    %21 = arith.subf %20, %19 : vector<2x1536xf32>
    %22 = math.exp %21 : vector<2x1536xf32>
    %cst_13 = arith.constant 1.000000e+00 : f32
    %23 = vector.broadcast %cst_13 : f32 to vector<2x1536xf32>
    %24 = arith.addf %23, %22 : vector<2x1536xf32>
    %25 = tpu.reciprocal %24 {approx = true} : vector<2x1536xf32> -> vector<2x1536xf32>
    %c0_14 = arith.constant 0 : index
    %c0_15 = arith.constant 0 : index
    %26 = vector.load %arg5[%c0_14, %c0_15] : memref<2x1536xf32, #tpu.memory_space<vmem>>, vector<2x1536xf32>
    tpu.vector_store %arg5[%c0_14, %c0_15], %25 {strides = array<i32>} : memref<2x1536xf32, #tpu.memory_space<vmem>>, vector<2x1536xf32>,
    return
  }
}

module attributes {stable_mosaic.version = 11 : i64} {
  func.func @_proj_bn_kernel(%arg0: i32, %arg1: i32, %arg2: memref<1x16x1536xbf16, #tpu.memory_space<vmem>>, %arg3: memref<1x1536x256xbf16, #tpu.memory_space<vmem>>, %arg4: memref<1x256xf32, #tpu.memory_space<vmem>>, %arg5: memref<1x256xf32, #tpu.memory_space<vmem>>, %arg6: memref<1x16x256xbf16, #tpu.memory_space<vmem>>) attributes {dimension_semantics = [#tpu.dimension_semantics<parallel>, #tpu.dimension_semantics<parallel>], iteration_bounds = array<i64: 2, 1>, scalar_prefetch = 0 : i64, scratch_operands = 0 : i64, tpu.core_type = #tpu.core_type<tc>, window_params = [{transform_indices = @transform_0, window_bounds = array<i64: 1, 16, 1536>}, {transform_indices = @transform_1, window_bounds = array<i64: 1, 1536, 256>}, {pipeline_mode = #tpu.pipeline_mode<synchronous>, transform_indices = @transform_2, window_bounds = array<i64: 1, 256>}, {pipeline_mode = #tpu.pipeline_mode<synchronous>, transform_indices = @transform_3, window_bounds = array<i64: 1, 256>}, {transform_indices = @transform_4, window_bounds = array<i64: 1, 16, 256>}]} {
    %c0 = arith.constant 0 : index
    %c0_0 = arith.constant 0 : index
    %c0_1 = arith.constant 0 : index
    %0 = vector.load %arg2[%c0, %c0_0, %c0_1] : memref<1x16x1536xbf16, #tpu.memory_space<vmem>>, vector<1x16x1536xbf16>
    %1 = vector.shape_cast %0 : vector<1x16x1536xbf16> to vector<16x1536xbf16>
    %c0_2 = arith.constant 0 : index
    %c0_3 = arith.constant 0 : index
    %c0_4 = arith.constant 0 : index
    %2 = vector.load %arg3[%c0_2, %c0_3, %c0_4] : memref<1x1536x256xbf16, #tpu.memory_space<vmem>>, vector<1x1536x256xbf16>
    %3 = vector.shape_cast %2 : vector<1x1536x256xbf16> to vector<1536x256xbf16>
    %cst = arith.constant dense<0.000000e+00> : vector<16x256xf32>
    %4 = tpu.matmul %1, %3, %cst {dimension_numbers = #tpu.dot_dimension_numbers<[1], [0], [0], [1], [0, 0, 1, 1], [], []>} : vector<16x1536xbf16>, vector<1536x256xbf16>, vector<16x256xf32> -> vector<16x256xf32>
    %c0_5 = arith.constant 0 : index
    %c0_6 = arith.constant 0 : index
    %5 = vector.load %arg4[%c0_5, %c0_6] : memref<1x256xf32, #tpu.memory_space<vmem>>, vector<1x256xf32>
    %6 = vector.broadcast %5 : vector<1x256xf32> to vector<16x256xf32>
    %7 = arith.mulf %4, %6 : vector<16x256xf32>
    %c0_7 = arith.constant 0 : index
    %c0_8 = arith.constant 0 : index
    %8 = vector.load %arg5[%c0_7, %c0_8] : memref<1x256xf32, #tpu.memory_space<vmem>>, vector<1x256xf32>
    %9 = vector.broadcast %8 : vector<1x256xf32> to vector<16x256xf32>
    %10 = arith.addf %7, %9 : vector<16x256xf32>
    %11 = arith.truncf %10 : vector<16x256xf32> to vector<16x256xbf16>
    %c0_9 = arith.constant 0 : index
    %c0_10 = arith.constant 0 : index
    %c0_11 = arith.constant 0 : index
    %12 = vector.load %arg6[%c0_9, %c0_10, %c0_11] : memref<1x16x256xbf16, #tpu.memory_space<vmem>>, vector<1x16x256xbf16>
    %13 = vector.shape_cast %12 : vector<1x16x256xbf16> to vector<16x256xbf16>
    %14 = vector.shape_cast %11 : vector<16x256xbf16> to vector<1x16x256xbf16>
    tpu.vector_store %arg6[%c0_9, %c0_10, %c0_11], %14 {strides = array<i32>} : memref<1x16x256xbf16, #tpu.memory_space<vmem>>, vector<1x16x256xbf16>,
    return
  }
  func.func @transform_0(%arg0: i32, %arg1: i32) -> (i32, i32, i32) {
    %c0_i32 = arith.constant 0 : i32
    %c0_i32_0 = arith.constant 0 : i32
    return %arg0, %arg1, %c0_i32 : i32, i32, i32
  }
  func.func @transform_1(%arg0: i32, %arg1: i32) -> (i32, i32, i32) {
    %c0_i32 = arith.constant 0 : i32
    %c0_i32_0 = arith.constant 0 : i32
    %c0_i32_1 = arith.constant 0 : i32
    return %arg0, %c0_i32, %c0_i32_0 : i32, i32, i32
  }
  func.func @transform_2(%arg0: i32, %arg1: i32) -> (i32, i32) {
    %c0_i32 = arith.constant 0 : i32
    %c0_i32_0 = arith.constant 0 : i32
    %c0_i32_1 = arith.constant 0 : i32
    return %c0_i32, %c0_i32_0 : i32, i32
  }
  func.func @transform_3(%arg0: i32, %arg1: i32) -> (i32, i32) {
    %c0_i32 = arith.constant 0 : i32
    %c0_i32_0 = arith.constant 0 : i32
    %c0_i32_1 = arith.constant 0 : i32
    return %c0_i32, %c0_i32_0 : i32, i32
  }
  func.func @transform_4(%arg0: i32, %arg1: i32) -> (i32, i32, i32) {
    %c0_i32 = arith.constant 0 : i32
    %c0_i32_0 = arith.constant 0 : i32
    return %arg0, %arg1, %c0_i32 : i32, i32, i32
  }
}

</mosaic_0001>

<bundles_post_ra>
// kernel: fph_forward.16
= control target key start
LH: loop header
LB: loop body
LE: loop exit
PB: predicated region body
PF: predicated region fallthrough
CT: control target
= control target key end

     0   :  { %s3249_s1 = inlined_call_operand.vmem [shape: bf16[256,1536], index: 1, kind: input, shape index: {}]   ;;  %s3250_s0 = inlined_call_operand.vmem [shape: bf16[16,256], index: 0, kind: input, shape index: {}]   ;;  %s3251_s2 = inlined_call_operand.vmem [shape: f32[1,1536], index: 2, kind: input, shape index: {}]   ;;  %s3252_s3 = inlined_call_operand.vmem [shape: f32[1,1536], index: 3, kind: input, shape index: {}]   ;;  %s3253_s4 = inlined_call_operand.vmem [shape: bf16[16,1536], index: 4, kind: output, shape index: {}]  }
   0x1   :  { %v2065_v0 = vld [vmem:[%s3249_s1 + $0x2a4] ss:$48 sps:$4 sm:$0xff]   ;;  %v2067_v1 = vld [vmem:[%s3249_s1 + $0x2ac] ss:$48 sps:$4 sm:$0xff]   ;;  %v2069_v2 = vld [vmem:[%s3249_s1 + $0x2a0] ss:$48 sps:$4 sm:$0xff]  }
   0x2   :  { %1181 = vmatprep.subr.bf16.mxu0 %v2065_v0  ;;  %v2070_v3 = vld [vmem:[%s3249_s1 + $0x2a8] ss:$48 sps:$4 sm:$0xff]   ;;  %1224 = vmatprep.subr.bf16.mxu1 %v2067_v1  ;;  %v2071_v4 = vld [vmem:[%s3249_s1 + $0x244] ss:$48 sps:$4 sm:$0xff]   ;;  %v2073_v5 = vld [vmem:[%s3249_s1 + $0x24c] ss:$48 sps:$4 sm:$0xff]  }
   0x3   :  { %1182 = vmatpush1.bf16.msra.mxu0 %v2069_v2  ;;  %1225 = vmatpush1.bf16.msra.mxu1 %v2070_v3  ;;  %v2075_v6 = vld [vmem:[%s3249_s1 + $0x240] ss:$48 sps:$4 sm:$0xff]   ;;  %v2076_v7 = vld [vmem:[%s3249_s1 + $0x248] ss:$48 sps:$4 sm:$0xff]   ;;  %v2077_v8 = vld [vmem:[%s3249_s1 + $0x1e4] ss:$48 sps:$4 sm:$0xff]  }
   0x4   :  { %1183 = vmatprep.subr.bf16.mxu0 %v2071_v4  ;;  %1226 = vmatprep.subr.bf16.mxu1 %v2073_v5  ;;  %v2079_v9 = vld [vmem:[%s3249_s1 + $0x1ec] ss:$48 sps:$4 sm:$0xff]   ;;  %v2081_v10 = vld [vmem:[%s3249_s1 + $0x1e0] ss:$48 sps:$4 sm:$0xff]   ;;  %v2082_v11 = vld [vmem:[%s3249_s1 + $0x1e8] ss:$48 sps:$4 sm:$0xff]  }
   0x5   :  { %v2083_v12 = vld [vmem:[%s3249_s1 + $0x184] ss:$48 sps:$4 sm:$0xff]   ;;  %v2085_v13 = vld [vmem:[%s3249_s1 + $0x18c] ss:$48 sps:$4 sm:$0xff]   ;;  %v2087_v14 = vld [vmem:[%s3249_s1 + $0x180] ss:$48 sps:$4 sm:$0xff]  }
   0x6   :  { %v2088_v15 = vld [vmem:[%s3249_s1 + $0x188] ss:$48 sps:$4 sm:$0xff]   ;;  %v2089_v16 = vld [vmem:[%s3249_s1 + $0x124] ss:$48 sps:$4 sm:$0xff]   ;;  %v2091_v17 = vld [vmem:[%s3249_s1 + $0x12c] ss:$48 sps:$4 sm:$0xff]  }
   0x7   :  { %1184 = vmatpush1.bf16.msra.mxu0 %v2075_v6  ;;  %1227 = vmatpush1.bf16.msra.mxu1 %v2076_v7  ;;  %v2093_v18 = vld [vmem:[%s3249_s1 + $0x120] ss:$48 sps:$4 sm:$0xff]   ;;  %v2094_v19 = vld [vmem:[%s3249_s1 + $0x128] ss:$48 sps:$4 sm:$0xff]   ;;  %v2095_v20 = vld [vmem:[%s3249_s1 + $0xc4] ss:$48 sps:$4 sm:$0xff]  }
   0x8   :  { %1185 = vmatprep.subr.bf16.mxu0 %v2077_v8  ;;  %1228 = vmatprep.subr.bf16.mxu1 %v2079_v9  ;;  %v2097_v21 = vld [vmem:[%s3249_s1 + $0xcc] ss:$48 sps:$4 sm:$0xff]   ;;  %v2099_v22 = vld [vmem:[%s3249_s1 + $0xc0] ss:$48 sps:$4 sm:$0xff]   ;;  %v2100_v23 = vld [vmem:[%s3249_s1 + $0xc8] ss:$48 sps:$4 sm:$0xff]  }
   0x9   :  { %v2101_v24 = vld [vmem:[%s3249_s1 + $0x64] ss:$48 sps:$4 sm:$0xff]   ;;  %v2103_v25 = vld [vmem:[%s3249_s1 + $0x6c] ss:$48 sps:$4 sm:$0xff]   ;;  %v2105_v26 = vld [vmem:[%s3249_s1 + $0x60] ss:$48 sps:$4 sm:$0xff]  }
   0xa   :  { %v2106_v27 = vld [vmem:[%s3249_s1 + $0x68] ss:$48 sps:$4 sm:$0xff]   ;;  %v2107_v28 = vld [vmem:[%s3249_s1 + $0x4] ss:$48 sps:$4 sm:$0xff]   ;;  %v2109_v29 = vld [vmem:[%s3249_s1 + $0xc] ss:$48 sps:$4 sm:$0xff]  }
   0xb   :  { %1186 = vmatpush1.bf16.msra.mxu0 %v2081_v10  ;;  %1229 = vmatpush1.bf16.msra.mxu1 %v2082_v11  ;;  %v2111_v30 = vld [vmem:[%s3249_s1] ss:$48 sps:$4 sm:$0xff]   ;;  %v2112_v31 = vld [vmem:[%s3249_s1 + $0x8] ss:$48 sps:$4 sm:$0xff]   ;;  %v2113_v32 = vld [vmem:[%s3249_s1 + $0x5a4] ss:$48 sps:$4 sm:$0xff]  }
   0xc   :  { %1187 = vmatprep.subr.bf16.mxu0 %v2083_v12  ;;  %1230 = vmatprep.subr.bf16.mxu1 %v2085_v13  ;;  %v2115_v33 = vld [vmem:[%s3249_s1 + $0x5ac] ss:$48 sps:$4 sm:$0xff]   ;;  %v2117_v34 = vld [vmem:[%s3249_s1 + $0x5a0] ss:$48 sps:$4 sm:$0xff]   ;;  %v2118_v35 = vld [vmem:[%s3249_s1 + $0x5a8] ss:$48 sps:$4 sm:$0xff]  }
   0xd   :  { %v2119_v36 = vld [vmem:[%s3249_s1 + $0x544] ss:$48 sps:$4 sm:$0xff]   ;;  %v2121_v37 = vld [vmem:[%s3249_s1 + $0x54c] ss:$48 sps:$4 sm:$0xff]   ;;  %v2123_v38 = vld [vmem:[%s3249_s1 + $0x540] ss:$48 sps:$4 sm:$0xff]  }
   0xe   :  { %v2124_v39 = vld [vmem:[%s3249_s1 + $0x548] ss:$48 sps:$4 sm:$0xff]   ;;  %v2125_v40 = vld [vmem:[%s3249_s1 + $0x4e4] ss:$48 sps:$4 sm:$0xff]   ;;  %v2127_v41 = vld [vmem:[%s3249_s1 + $0x4ec] ss:$48 sps:$4 sm:$0xff]  }
   0xf   :  { %1188 = vmatpush1.bf16.msra.mxu0 %v2087_v14  ;;  %1231 = vmatpush1.bf16.msra.mxu1 %v2088_v15  ;;  %v2129_v42 = vld [vmem:[%s3249_s1 + $0x4e0] ss:$48 sps:$4 sm:$0xff]   ;;  %v2130_v43 = vld [vmem:[%s3249_s1 + $0x4e8] ss:$48 sps:$4 sm:$0xff]   ;;  %v2131_v44 = vld [vmem:[%s3249_s1 + $0x484] ss:$48 sps:$4 sm:$0xff]  }
  0x10   :  { %1189 = vmatprep.subr.bf16.mxu0 %v2089_v16  ;;  %1232 = vmatprep.subr.bf16.mxu1 %v2091_v17  ;;  %v2133_v45 = vld [vmem:[%s3249_s1 + $0x48c] ss:$48 sps:$4 sm:$0xff]   ;;  %v2135_v46 = vld [vmem:[%s3249_s1 + $0x480] ss:$48 sps:$4 sm:$0xff]   ;;  %v2136_v47 = vld [vmem:[%s3249_s1 + $0x488] ss:$48 sps:$4 sm:$0xff]  }
  0x11   :  { %v2624_v48 = vld [vmem:[%s3250_s0 + $0x4] ss:$8 sps:$4 sm:$0xff]   ;;  %v2141_v51 = vld [vmem:[%s3249_s1 + $0x420] ss:$48 sps:$4 sm:$0xff]   ;;  %v2142_v52 = vld [vmem:[%s3249_s1 + $0x428] ss:$48 sps:$4 sm:$0xff]  }
  0x12   :  { %v2137_v49 = vld [vmem:[%s3249_s1 + $0x424] ss:$48 sps:$4 sm:$0xff]   ;;  %v2139_v50 = vld [vmem:[%s3249_s1 + $0x42c] ss:$48 sps:$4 sm:$0xff]   ;;  %1213 = vmatprep.mubr.bf16.mxu0 %v2624_v48  ;;  %1256 = vmatprep.mubr.bf16.mxu1 %v2624_v48  ;;  %v2147_v55 = vld [vmem:[%s3249_s1 + $0x3c0] ss:$48 sps:$4 sm:$0xff]  }
  0x13   :  { %1190 = vmatpush1.bf16.msra.mxu0 %v2093_v18  ;;  %1233 = vmatpush1.bf16.msra.mxu1 %v2094_v19  ;;  %v2143_v53 = vld [vmem:[%s3249_s1 + $0x3c4] ss:$48 sps:$4 sm:$0xff]   ;;  %v2145_v54 = vld [vmem:[%s3249_s1 + $0x3cc] ss:$48 sps:$4 sm:$0xff]   ;;  %v2148_v56 = vld [vmem:[%s3249_s1 + $0x3c8] ss:$48 sps:$4 sm:$0xff]  }
  0x14   :  { %1191 = vmatprep.subr.bf16.mxu0 %v2095_v20  ;;  %1234 = vmatprep.subr.bf16.mxu1 %v2097_v21  ;;  %v2149_v57 = vld [vmem:[%s3249_s1 + $0x364] ss:$48 sps:$4 sm:$0xff]   ;;  %v2151_v58 = vld [vmem:[%s3249_s1 + $0x36c] ss:$48 sps:$4 sm:$0xff]   ;;  %v2153_v59 = vld [vmem:[%s3249_s1 + $0x360] ss:$48 sps:$4 sm:$0xff]  }
  0x15   :  { %v2154_v60 = vld [vmem:[%s3249_s1 + $0x368] ss:$48 sps:$4 sm:$0xff]   ;;  %v2155_v61 = vld [vmem:[%s3249_s1 + $0x304] ss:$48 sps:$4 sm:$0xff]   ;;  %v2157_v62 = vld [vmem:[%s3249_s1 + $0x30c] ss:$48 sps:$4 sm:$0xff]  }
  0x16   :  { %v2159_v63 = vld [vmem:[%s3249_s1 + $0x300] ss:$48 sps:$4 sm:$0xff]   ;;  %v2160_v0 = vld [vmem:[%s3249_s1 + $0x308] ss:$48 sps:$4 sm:$0xff]   ;;  %v2166_v1 = vld [vmem:[%s3249_s1 + $0x2b4] ss:$48 sps:$4 sm:$0xff]  }
  0x17   :  { %1192 = vmatpush1.bf16.msra.mxu0 %v2099_v22  ;;  %1235 = vmatpush1.bf16.msra.mxu1 %v2100_v23  ;;  %v2169_v2 = vld [vmem:[%s3249_s1 + $0x2bc] ss:$48 sps:$4 sm:$0xff]   ;;  %v2685_v3 = vld [vmem:[%s3250_s0] ss:$8 sps:$4 sm:$0xff]   ;;  %v2172_v6 = vld [vmem:[%s3249_s1 + $0x254] ss:$48 sps:$4 sm:$0xff]  }
  0x18   :  { %1193 = vmatprep.subr.bf16.mxu0 %v2101_v24  ;;  %1236 = vmatprep.subr.bf16.mxu1 %v2103_v25  ;;  %v2164_v4 = vld [vmem:[%s3249_s1 + $0x2b0] ss:$48 sps:$4 sm:$0xff]   ;;  %v2167_v5 = vld [vmem:[%s3249_s1 + $0x2b8] ss:$48 sps:$4 sm:$0xff]   ;;  %v2175_v7 = vld [vmem:[%s3249_s1 + $0x25c] ss:$48 sps:$4 sm:$0xff]  }
  0x19   :  { %v2170_v8 = vld [vmem:[%s3249_s1 + $0x250] ss:$48 sps:$4 sm:$0xff]   ;;  %v2173_v9 = vld [vmem:[%s3249_s1 + $0x258] ss:$48 sps:$4 sm:$0xff]   ;;  %v2178_v10 = vld [vmem:[%s3249_s1 + $0x1f4] ss:$48 sps:$4 sm:$0xff]  }
  0x1a   :  { %v2181_v11 = vld [vmem:[%s3249_s1 + $0x1fc] ss:$48 sps:$4 sm:$0xff]   ;;  %v2176_v12 = vld [vmem:[%s3249_s1 + $0x1f0] ss:$48 sps:$4 sm:$0xff]   ;;  %v2179_v13 = vld [vmem:[%s3249_s1 + $0x1f8] ss:$48 sps:$4 sm:$0xff]  }
  0x1b   :  { %1194 = vmatpush1.bf16.msra.mxu0 %v2105_v26  ;;  %1237 = vmatpush1.bf16.msra.mxu1 %v2106_v27  ;;  %v2184_v14 = vld [vmem:[%s3249_s1 + $0x194] ss:$48 sps:$4 sm:$0xff]   ;;  %v2187_v15 = vld [vmem:[%s3249_s1 + $0x19c] ss:$48 sps:$4 sm:$0xff]   ;;  %v2182_v16 = vld [vmem:[%s3249_s1 + $0x190] ss:$48 sps:$4 sm:$0xff]  }
  0x1c   :  { %1195 = vmatprep.subr.bf16.mxu0 %v2107_v28  ;;  %1238 = vmatprep.subr.bf16.mxu1 %v2109_v29  ;;  %v2185_v17 = vld [vmem:[%s3249_s1 + $0x198] ss:$48 sps:$4 sm:$0xff]   ;;  %v2190_v18 = vld [vmem:[%s3249_s1 + $0x134] ss:$48 sps:$4 sm:$0xff]   ;;  %v2193_v19 = vld [vmem:[%s3249_s1 + $0x13c] ss:$48 sps:$4 sm:$0xff]  }
  0x1d   :  { %v2188_v20 = vld [vmem:[%s3249_s1 + $0x130] ss:$48 sps:$4 sm:$0xff]   ;;  %v2191_v21 = vld [vmem:[%s3249_s1 + $0x138] ss:$48 sps:$4 sm:$0xff]   ;;  %v2196_v22 = vld [vmem:[%s3249_s1 + $0xd4] ss:$48 sps:$4 sm:$0xff]  }
  0x1e   :  { %v2199_v23 = vld [vmem:[%s3249_s1 + $0xdc] ss:$48 sps:$4 sm:$0xff]   ;;  %v2194_v24 = vld [vmem:[%s3249_s1 + $0xd0] ss:$48 sps:$4 sm:$0xff]   ;;  %v2197_v25 = vld [vmem:[%s3249_s1 + $0xd8] ss:$48 sps:$4 sm:$0xff]  }
  0x1f   :  { %1196 = vmatpush1.bf16.msra.mxu0 %v2111_v30  ;;  %1239 = vmatpush1.bf16.msra.mxu1 %v2112_v31  ;;  %v2202_v26 = vld [vmem:[%s3249_s1 + $0x74] ss:$48 sps:$4 sm:$0xff]   ;;  %v2205_v27 = vld [vmem:[%s3249_s1 + $0x7c] ss:$48 sps:$4 sm:$0xff]   ;;  %v2200_v28 = vld [vmem:[%s3249_s1 + $0x70] ss:$48 sps:$4 sm:$0xff]  }
  0x20   :  { %1197 = vmatprep.subr.bf16.mxu0 %v2113_v32  ;;  %1240 = vmatprep.subr.bf16.mxu1 %v2115_v33  ;;  %v2203_v29 = vld [vmem:[%s3249_s1 + $0x78] ss:$48 sps:$4 sm:$0xff]   ;;  %v2208_v30 = vld [vmem:[%s3249_s1 + $0x14] ss:$48 sps:$4 sm:$0xff]   ;;  %v2211_v31 = vld [vmem:[%s3249_s1 + $0x1c] ss:$48 sps:$4 sm:$0xff]  }
  0x21   :  { %v2206_v32 = vld [vmem:[%s3249_s1 + $0x10] ss:$48 sps:$4 sm:$0xff]   ;;  %v2209_v33 = vld [vmem:[%s3249_s1 + $0x18] ss:$48 sps:$4 sm:$0xff]  }
  0x23   :  { %1198 = vmatpush2.bf16.msra.mxu0 %v2117_v34  ;;  %1241 = vmatpush2.bf16.msra.mxu1 %v2118_v35  ;;  %v2214_v34 = vld [vmem:[%s3249_s1 + $0x5b4] ss:$48 sps:$4 sm:$0xff]   ;;  %v2217_v35 = vld [vmem:[%s3249_s1 + $0x5bc] ss:$48 sps:$4 sm:$0xff]  }
  0x24   :  { %1199 = vmatprep.subr.bf16.mxu0 %v2119_v36  ;;  %1242 = vmatprep.subr.bf16.mxu1 %v2121_v37  ;;  %v2212_v36 = vld [vmem:[%s3249_s1 + $0x5b0] ss:$48 sps:$4 sm:$0xff]   ;;  %v2215_v37 = vld [vmem:[%s3249_s1 + $0x5b8] ss:$48 sps:$4 sm:$0xff]  }
  0x27   :  { %1200 = vmatpush2.bf16.msra.mxu0 %v2123_v38  ;;  %1243 = vmatpush2.bf16.msra.mxu1 %v2124_v39  ;;  %v2220_v38 = vld [vmem:[%s3249_s1 + $0x554] ss:$48 sps:$4 sm:$0xff]   ;;  %v2223_v39 = vld [vmem:[%s3249_s1 + $0x55c] ss:$48 sps:$4 sm:$0xff]  }
  0x28   :  { %1201 = vmatprep.subr.bf16.mxu0 %v2125_v40  ;;  %1244 = vmatprep.subr.bf16.mxu1 %v2127_v41  ;;  %v2218_v40 = vld [vmem:[%s3249_s1 + $0x550] ss:$48 sps:$4 sm:$0xff]   ;;  %v2221_v41 = vld [vmem:[%s3249_s1 + $0x558] ss:$48 sps:$4 sm:$0xff]  }
  0x2b   :  { %1202 = vmatpush2.bf16.msra.mxu0 %v2129_v42  ;;  %1245 = vmatpush2.bf16.msra.mxu1 %v2130_v43  ;;  %v2226_v42 = vld [vmem:[%s3249_s1 + $0x4f4] ss:$48 sps:$4 sm:$0xff]   ;;  %v2229_v43 = vld [vmem:[%s3249_s1 + $0x4fc] ss:$48 sps:$4 sm:$0xff]  }
  0x2c   :  { %1203 = vmatprep.subr.bf16.mxu0 %v2131_v44  ;;  %1246 = vmatprep.subr.bf16.mxu1 %v2133_v45  ;;  %v2224_v44 = vld [vmem:[%s3249_s1 + $0x4f0] ss:$48 sps:$4 sm:$0xff]   ;;  %v2227_v45 = vld [vmem:[%s3249_s1 + $0x4f8] ss:$48 sps:$4 sm:$0xff]  }
  0x2f   :  { %1204 = vmatpush2.bf16.msra.mxu0 %v2135_v46  ;;  %1247 = vmatpush2.bf16.msra.mxu1 %v2136_v47  ;;  %v2232_v46 = vld [vmem:[%s3249_s1 + $0x494] ss:$48 sps:$4 sm:$0xff]   ;;  %v2235_v47 = vld [vmem:[%s3249_s1 + $0x49c] ss:$48 sps:$4 sm:$0xff]  }
  0x30   :  { %1205 = vmatprep.subr.bf16.mxu0 %v2137_v49  ;;  %1248 = vmatprep.subr.bf16.mxu1 %v2139_v50  ;;  %v2230_v49 = vld [vmem:[%s3249_s1 + $0x490] ss:$48 sps:$4 sm:$0xff]   ;;  %v2233_v50 = vld [vmem:[%s3249_s1 + $0x498] ss:$48 sps:$4 sm:$0xff]  }
  0x33   :  { %1206 = vmatpush2.bf16.msra.mxu0 %v2141_v51  ;;  %1249 = vmatpush2.bf16.msra.mxu1 %v2142_v52  ;;  %v2238_v51 = vld [vmem:[%s3249_s1 + $0x434] ss:$48 sps:$4 sm:$0xff]   ;;  %v2241_v52 = vld [vmem:[%s3249_s1 + $0x43c] ss:$48 sps:$4 sm:$0xff]  }
  0x34   :  { %1207 = vmatprep.subr.bf16.mxu0 %v2143_v53  ;;  %1250 = vmatprep.subr.bf16.mxu1 %v2145_v54  ;;  %v2236_v53 = vld [vmem:[%s3249_s1 + $0x430] ss:$48 sps:$4 sm:$0xff]   ;;  %v2239_v54 = vld [vmem:[%s3249_s1 + $0x438] ss:$48 sps:$4 sm:$0xff]  }
  0x37   :  { %1208 = vmatpush2.bf16.msra.mxu0 %v2147_v55  ;;  %1251 = vmatpush2.bf16.msra.mxu1 %v2148_v56  ;;  %v2244_v55 = vld [vmem:[%s3249_s1 + $0x3d4] ss:$48 sps:$4 sm:$0xff]   ;;  %v2247_v56 = vld [vmem:[%s3249_s1 + $0x3dc] ss:$48 sps:$4 sm:$0xff]  }
  0x38   :  { %1209 = vmatprep.subr.bf16.mxu0 %v2149_v57  ;;  %1252 = vmatprep.subr.bf16.mxu1 %v2151_v58  ;;  %v2242_v57 = vld [vmem:[%s3249_s1 + $0x3d0] ss:$48 sps:$4 sm:$0xff]   ;;  %v2245_v58 = vld [vmem:[%s3249_s1 + $0x3d8] ss:$48 sps:$4 sm:$0xff]  }
  0x3b   :  { %1210 = vmatpush2.bf16.msra.mxu0 %v2153_v59  ;;  %1253 = vmatpush2.bf16.msra.mxu1 %v2154_v60  ;;  %v2250_v59 = vld [vmem:[%s3249_s1 + $0x374] ss:$48 sps:$4 sm:$0xff]   ;;  %v2253_v60 = vld [vmem:[%s3249_s1 + $0x37c] ss:$48 sps:$4 sm:$0xff]  }
  0x3c   :  { %1211 = vmatprep.subr.bf16.mxu0 %v2155_v61  ;;  %1254 = vmatprep.subr.bf16.mxu1 %v2157_v62  ;;  %v2248_v61 = vld [vmem:[%s3249_s1 + $0x370] ss:$48 sps:$4 sm:$0xff]   ;;  %v2251_v62 = vld [vmem:[%s3249_s1 + $0x378] ss:$48 sps:$4 sm:$0xff]  }
  0x3f   :  { %1212 = vmatpush2.bf16.msra.mxu0 %v2159_v63  ;;  %1255 = vmatpush2.bf16.msra.mxu1 %v2160_v0  ;;  %v2256_v63 = vld [vmem:[%s3249_s1 + $0x314] ss:$48 sps:$4 sm:$0xff]   ;;  %v2259_v0 = vld [vmem:[%s3249_s1 + $0x31c] ss:$48 sps:$4 sm:$0xff]  }
  0x40   :  { %1267 = vmatprep.subr.bf16.mxu0 %v2166_v1  ;;  %1310 = vmatprep.subr.bf16.mxu1 %v2169_v2  ;;  %v2254_v1 = vld [vmem:[%s3249_s1 + $0x310] ss:$48 sps:$4 sm:$0xff]   ;;  %v2257_v2 = vld [vmem:[%s3249_s1 + $0x318] ss:$48 sps:$4 sm:$0xff]  }
  0x42   :  { %1214 = vmatmul.mubr.bf16.vlgmr.msra.gmra.mxu0 %v2685_v3  ;;  %1257 = vmatmul.mubr.bf16.vlgmr.msra.gmra.mxu1 %v2685_v3 }
  0x43   :  { %1268 = vmatpush1.bf16.msra.mxu0 %v2164_v4  ;;  %1311 = vmatpush1.bf16.msra.mxu1 %v2167_v5  ;;  %v2262_v4 = vld [vmem:[%s3249_s1 + $0x2c4] ss:$48 sps:$4 sm:$0xff]   ;;  %v2265_v5 = vld [vmem:[%s3249_s1 + $0x2cc] ss:$48 sps:$4 sm:$0xff]  }
  0x44   :  { %1269 = vmatprep.subr.bf16.mxu0 %v2172_v6  ;;  %1312 = vmatprep.subr.bf16.mxu1 %v2175_v7  ;;  %v2260_v6 = vld [vmem:[%s3249_s1 + $0x2c0] ss:$48 sps:$4 sm:$0xff]   ;;  %v2263_v7 = vld [vmem:[%s3249_s1 + $0x2c8] ss:$48 sps:$4 sm:$0xff]  }
  0x45   :  { %1299 = vmatprep.mubr.bf16.mxu0 %v2624_v48  ;;  %1342 = vmatprep.mubr.bf16.mxu1 %v2624_v48 }
  0x47   :  { %1270 = vmatpush1.bf16.msra.mxu0 %v2170_v8  ;;  %1313 = vmatpush1.bf16.msra.mxu1 %v2173_v9  ;;  %v2268_v8 = vld [vmem:[%s3249_s1 + $0x264] ss:$48 sps:$4 sm:$0xff]   ;;  %v2271_v9 = vld [vmem:[%s3249_s1 + $0x26c] ss:$48 sps:$4 sm:$0xff]  }
  0x48   :  { %1271 = vmatprep.subr.bf16.mxu0 %v2178_v10  ;;  %1314 = vmatprep.subr.bf16.mxu1 %v2181_v11  ;;  %v2266_v10 = vld [vmem:[%s3249_s1 + $0x260] ss:$48 sps:$4 sm:$0xff]   ;;  %v2269_v11 = vld [vmem:[%s3249_s1 + $0x268] ss:$48 sps:$4 sm:$0xff]  }
  0x4b   :  { %1272 = vmatpush1.bf16.msra.mxu0 %v2176_v12  ;;  %1315 = vmatpush1.bf16.msra.mxu1 %v2179_v13  ;;  %v2274_v12 = vld [vmem:[%s3249_s1 + $0x204] ss:$48 sps:$4 sm:$0xff]   ;;  %v2277_v13 = vld [vmem:[%s3249_s1 + $0x20c] ss:$48 sps:$4 sm:$0xff]  }
  0x4c   :  { %1273 = vmatprep.subr.bf16.mxu0 %v2184_v14  ;;  %1316 = vmatprep.subr.bf16.mxu1 %v2187_v15  ;;  %v2272_v14 = vld [vmem:[%s3249_s1 + $0x200] ss:$48 sps:$4 sm:$0xff]   ;;  %v2275_v15 = vld [vmem:[%s3249_s1 + $0x208] ss:$48 sps:$4 sm:$0xff]  }
  0x4f   :  { %1274 = vmatpush1.bf16.msra.mxu0 %v2182_v16  ;;  %1317 = vmatpush1.bf16.msra.mxu1 %v2185_v17  ;;  %v2280_v16 = vld [vmem:[%s3249_s1 + $0x1a4] ss:$48 sps:$4 sm:$0xff]   ;;  %v2278_v17 = vld [vmem:[%s3249_s1 + $0x1a0] ss:$48 sps:$4 sm:$0xff]  }
  0x50   :  { %1275 = vmatprep.subr.bf16.mxu0 %v2190_v18  ;;  %1318 = vmatprep.subr.bf16.mxu1 %v2193_v19  ;;  %v2281_v18 = vld [vmem:[%s3249_s1 + $0x1a8] ss:$48 sps:$4 sm:$0xff]   ;;  %v2286_v19 = vld [vmem:[%s3249_s1 + $0x144] ss:$48 sps:$4 sm:$0xff]  }
  0x53   :  { %1276 = vmatpush1.bf16.msra.mxu0 %v2188_v20  ;;  %1319 = vmatpush1.bf16.msra.mxu1 %v2191_v21  ;;  %v2289_v20 = vld [vmem:[%s3249_s1 + $0x14c] ss:$48 sps:$4 sm:$0xff]   ;;  %v2284_v21 = vld [vmem:[%s3249_s1 + $0x140] ss:$48 sps:$4 sm:$0xff]  }
  0x54   :  { %1277 = vmatprep.subr.bf16.mxu0 %v2196_v22  ;;  %1320 = vmatprep.subr.bf16.mxu1 %v2199_v23  ;;  %v2287_v22 = vld [vmem:[%s3249_s1 + $0x148] ss:$48 sps:$4 sm:$0xff]   ;;  %v2292_v23 = vld [vmem:[%s3249_s1 + $0xe4] ss:$48 sps:$4 sm:$0xff]  }
  0x57   :  { %1278 = vmatpush1.bf16.msra.mxu0 %v2194_v24  ;;  %1321 = vmatpush1.bf16.msra.mxu1 %v2197_v25  ;;  %v2295_v24 = vld [vmem:[%s3249_s1 + $0xec] ss:$48 sps:$4 sm:$0xff]   ;;  %v2290_v25 = vld [vmem:[%s3249_s1 + $0xe0] ss:$48 sps:$4 sm:$0xff]  }
  0x58   :  { %1279 = vmatprep.subr.bf16.mxu0 %v2202_v26  ;;  %1322 = vmatprep.subr.bf16.mxu1 %v2205_v27  ;;  %v2293_v26 = vld [vmem:[%s3249_s1 + $0xe8] ss:$48 sps:$4 sm:$0xff]   ;;  %v2298_v27 = vld [vmem:[%s3249_s1 + $0x84] ss:$48 sps:$4 sm:$0xff]  }
  0x5b   :  { %1280 = vmatpush1.bf16.msra.mxu0 %v2200_v28  ;;  %1323 = vmatpush1.bf16.msra.mxu1 %v2203_v29  ;;  %v2301_v28 = vld [vmem:[%s3249_s1 + $0x8c] ss:$48 sps:$4 sm:$0xff]   ;;  %v2296_v29 = vld [vmem:[%s3249_s1 + $0x80] ss:$48 sps:$4 sm:$0xff]  }
  0x5c   :  { %1281 = vmatprep.subr.bf16.mxu0 %v2208_v30  ;;  %1324 = vmatprep.subr.bf16.mxu1 %v2211_v31  ;;  %v2299_v30 = vld [vmem:[%s3249_s1 + $0x88] ss:$48 sps:$4 sm:$0xff]   ;;  %v2304_v31 = vld [vmem:[%s3249_s1 + $0x24] ss:$48 sps:$4 sm:$0xff]  }
  0x5f   :  { %1282 = vmatpush1.bf16.msra.mxu0 %v2206_v32  ;;  %1325 = vmatpush1.bf16.msra.mxu1 %v2209_v33  ;;  %v2307_v32 = vld [vmem:[%s3249_s1 + $0x2c] ss:$48 sps:$4 sm:$0xff]   ;;  %v2302_v33 = vld [vmem:[%s3249_s1 + $0x20] ss:$48 sps:$4 sm:$0xff]  }
  0x60   :  { %1283 = vmatprep.subr.bf16.mxu0 %v2214_v34  ;;  %1326 = vmatprep.subr.bf16.mxu1 %v2217_v35  ;;  %v2305_v34 = vld [vmem:[%s3249_s1 + $0x28] ss:$48 sps:$4 sm:$0xff]   ;;  %v2310_v35 = vld [vmem:[%s3249_s1 + $0x5c4] ss:$48 sps:$4 sm:$0xff]  }
  0x63   :  { %1284 = vmatpush2.bf16.msra.mxu0 %v2212_v36  ;;  %1327 = vmatpush2.bf16.msra.mxu1 %v2215_v37  ;;  %v2313_v36 = vld [vmem:[%s3249_s1 + $0x5cc] ss:$48 sps:$4 sm:$0xff]   ;;  %v2308_v37 = vld [vmem:[%s3249_s1 + $0x5c0] ss:$48 sps:$4 sm:$0xff]  }
  0x64   :  { %1285 = vmatprep.subr.bf16.mxu0 %v2220_v38  ;;  %1328 = vmatprep.subr.bf16.mxu1 %v2223_v39  ;;  %v2311_v38 = vld [vmem:[%s3249_s1 + $0x5c8] ss:$48 sps:$4 sm:$0xff]   ;;  %v2316_v39 = vld [vmem:[%s3249_s1 + $0x564] ss:$48 sps:$4 sm:$0xff]  }
  0x67   :  { %1286 = vmatpush2.bf16.msra.mxu0 %v2218_v40  ;;  %1329 = vmatpush2.bf16.msra.mxu1 %v2221_v41  ;;  %v2319_v40 = vld [vmem:[%s3249_s1 + $0x56c] ss:$48 sps:$4 sm:$0xff]   ;;  %v2314_v41 = vld [vmem:[%s3249_s1 + $0x560] ss:$48 sps:$4 sm:$0xff]  }
  0x68   :  { %1287 = vmatprep.subr.bf16.mxu0 %v2226_v42  ;;  %1330 = vmatprep.subr.bf16.mxu1 %v2229_v43  ;;  %v2317_v42 = vld [vmem:[%s3249_s1 + $0x568] ss:$48 sps:$4 sm:$0xff]   ;;  %v2322_v43 = vld [vmem:[%s3249_s1 + $0x504] ss:$48 sps:$4 sm:$0xff]  }
  0x6b   :  { %1288 = vmatpush2.bf16.msra.mxu0 %v2224_v44  ;;  %1331 = vmatpush2.bf16.msra.mxu1 %v2227_v45  ;;  %v2325_v44 = vld [vmem:[%s3249_s1 + $0x50c] ss:$48 sps:$4 sm:$0xff]   ;;  %v2320_v45 = vld [vmem:[%s3249_s1 + $0x500] ss:$48 sps:$4 sm:$0xff]  }
  0x6c   :  { %1289 = vmatprep.subr.bf16.mxu0 %v2232_v46  ;;  %1332 = vmatprep.subr.bf16.mxu1 %v2235_v47  ;;  %v2323_v46 = vld [vmem:[%s3249_s1 + $0x508] ss:$48 sps:$4 sm:$0xff]   ;;  %v2328_v47 = vld [vmem:[%s3249_s1 + $0x4a4] ss:$48 sps:$4 sm:$0xff]  }
  0x6f   :  { %1290 = vmatpush2.bf16.msra.mxu0 %v2230_v49  ;;  %1333 = vmatpush2.bf16.msra.mxu1 %v2233_v50  ;;  %v2331_v49 = vld [vmem:[%s3249_s1 + $0x4ac] ss:$48 sps:$4 sm:$0xff]   ;;  %v2326_v50 = vld [vmem:[%s3249_s1 + $0x4a0] ss:$48 sps:$4 sm:$0xff]  }
  0x70   :  { %1291 = vmatprep.subr.bf16.mxu0 %v2238_v51  ;;  %1334 = vmatprep.subr.bf16.mxu1 %v2241_v52  ;;  %v2329_v51 = vld [vmem:[%s3249_s1 + $0x4a8] ss:$48 sps:$4 sm:$0xff]   ;;  %v2334_v52 = vld [vmem:[%s3249_s1 + $0x444] ss:$48 sps:$4 sm:$0xff]  }
  0x73   :  { %1292 = vmatpush2.bf16.msra.mxu0 %v2236_v53  ;;  %1335 = vmatpush2.bf16.msra.mxu1 %v2239_v54  ;;  %v2337_v53 = vld [vmem:[%s3249_s1 + $0x44c] ss:$48 sps:$4 sm:$0xff]   ;;  %v2332_v54 = vld [vmem:[%s3249_s1 + $0x440] ss:$48 sps:$4 sm:$0xff]  }
  0x74   :  { %1293 = vmatprep.subr.bf16.mxu0 %v2244_v55  ;;  %1336 = vmatprep.subr.bf16.mxu1 %v2247_v56  ;;  %v2335_v55 = vld [vmem:[%s3249_s1 + $0x448] ss:$48 sps:$4 sm:$0xff]   ;;  %v2340_v56 = vld [vmem:[%s3249_s1 + $0x3e4] ss:$48 sps:$4 sm:$0xff]  }
  0x77   :  { %1294 = vmatpush2.bf16.msra.mxu0 %v2242_v57  ;;  %1337 = vmatpush2.bf16.msra.mxu1 %v2245_v58  ;;  %v2343_v57 = vld [vmem:[%s3249_s1 + $0x3ec] ss:$48 sps:$4 sm:$0xff]   ;;  %v2338_v58 = vld [vmem:[%s3249_s1 + $0x3e0] ss:$48 sps:$4 sm:$0xff]  }
  0x78   :  { %1295 = vmatprep.subr.bf16.mxu0 %v2250_v59  ;;  %1338 = vmatprep.subr.bf16.mxu1 %v2253_v60  ;;  %v2341_v59 = vld [vmem:[%s3249_s1 + $0x3e8] ss:$48 sps:$4 sm:$0xff]   ;;  %v2346_v60 = vld [vmem:[%s3249_s1 + $0x384] ss:$48 sps:$4 sm:$0xff]  }
  0x7b   :  { %1296 = vmatpush2.bf16.msra.mxu0 %v2248_v61  ;;  %1339 = vmatpush2.bf16.msra.mxu1 %v2251_v62  ;;  %v2349_v61 = vld [vmem:[%s3249_s1 + $0x38c] ss:$48 sps:$4 sm:$0xff]   ;;  %v2344_v62 = vld [vmem:[%s3249_s1 + $0x380] ss:$48 sps:$4 sm:$0xff]  }
  0x7c   :  { %1297 = vmatprep.subr.bf16.mxu0 %v2256_v63  ;;  %1340 = vmatprep.subr.bf16.mxu1 %v2259_v0  ;;  %v2347_v63 = vld [vmem:[%s3249_s1 + $0x388] ss:$48 sps:$4 sm:$0xff]   ;;  %v2352_v0 = vld [vmem:[%s3249_s1 + $0x324] ss:$48 sps:$4 sm:$0xff]  }
  0x7f   :  { %1298 = vmatpush2.bf16.msra.mxu0 %v2254_v1  ;;  %1341 = vmatpush2.bf16.msra.mxu1 %v2257_v2  ;;  %v2355_v1 = vld [vmem:[%s3249_s1 + $0x32c] ss:$48 sps:$4 sm:$0xff]   ;;  %v2350_v2 = vld [vmem:[%s3249_s1 + $0x320] ss:$48 sps:$4 sm:$0xff]  }
  0x80   :  { %1353 = vmatprep.subr.bf16.mxu0 %v2262_v4  ;;  %1396 = vmatprep.subr.bf16.mxu1 %v2265_v5  ;;  %v2353_v4 = vld [vmem:[%s3249_s1 + $0x328] ss:$48 sps:$4 sm:$0xff]   ;;  %v1443_v5 = vlaneseq }
  0x82   :  { %1300 = vmatmul.mubr.bf16.vlgmr.msra.gmra.mxu0 %v2685_v3  ;;  %1343 = vmatmul.mubr.bf16.vlgmr.msra.gmra.mxu1 %v2685_v3 }
  0x83   :  { %1354 = vmatpush1.bf16.msra.mxu0 %v2260_v6  ;;  %1397 = vmatpush1.bf16.msra.mxu1 %v2263_v7  ;;  %v3075_v6 = vshrl.u32 %v1443_v5, 7 }
  0x84   :  { %1355 = vmatprep.subr.bf16.mxu0 %v2268_v8  ;;  %1398 = vmatprep.subr.bf16.mxu1 %v2271_v9  ;;  %v3086_v9 = vld [vmem:[%s3251_s2] sm:$0xff] }
  0x85   :  { %1385 = vmatprep.mubr.bf16.mxu0 %v2624_v48  ;;  %1428 = vmatprep.mubr.bf16.mxu1 %v2624_v48  ;;  %v2283_v48 = vld [vmem:[%s3249_s1 + $0x1ac] ss:$48 sps:$4 sm:$0xff]   ;;  %v3078_v7 = vsub.s32 0, %v3075_v6  ;;  %v3081_v8 = vsub.s32 2, %v3075_v6 }
  0x87   :  { %1356 = vmatpush1.bf16.msra.mxu0 %v2266_v10  ;;  %1399 = vmatpush1.bf16.msra.mxu1 %v2269_v11  ;;  %v3089_v10 = vsub.s32 1, %v3075_v6  ;;  %v3092_v11 = vsub.s32 3, %v3075_v6 }
  0x88   :  { %1357 = vmatprep.subr.bf16.mxu0 %v2274_v12  ;;  %1400 = vmatprep.subr.bf16.mxu1 %v2277_v13  ;;  %v1446_v12 = vrot.slane %v3086_v9, %v3078_v7  ;;  %v1454_v13 = vrot.slane %v3086_v9, %v3081_v8 }
  0x8b   :  { %1358 = vmatpush1.bf16.msra.mxu0 %v2272_v14  ;;  %1401 = vmatpush1.bf16.msra.mxu1 %v2275_v15 }
  0x8c   :  { %1359 = vmatprep.subr.bf16.mxu0 %v2280_v16  ;;  %1402 = vmatprep.subr.bf16.mxu1 %v2283_v48  ;;  %v1450_v16 = vrot.slane %v3086_v9, %v3089_v10  ;;  %v1458_v48 = vrot.slane %v3086_v9, %v3092_v11 }
  0x8f   :  { %1360 = vmatpush1.bf16.msra.mxu0 %v2278_v17  ;;  %1403 = vmatpush1.bf16.msra.mxu1 %v2281_v18 }
  0x90   :  { %1361 = vmatprep.subr.bf16.mxu0 %v2286_v19  ;;  %1404 = vmatprep.subr.bf16.mxu1 %v2289_v20 }
  0x93   :  { %1362 = vmatpush1.bf16.msra.mxu0 %v2284_v21  ;;  %1405 = vmatpush1.bf16.msra.mxu1 %v2287_v22 }
  0x94   :  { %1363 = vmatprep.subr.bf16.mxu0 %v2292_v23  ;;  %1406 = vmatprep.subr.bf16.mxu1 %v2295_v24 }
  0x97   :  { %1364 = vmatpush1.bf16.msra.mxu0 %v2290_v25  ;;  %1407 = vmatpush1.bf16.msra.mxu1 %v2293_v26 }
  0x98   :  { %1365 = vmatprep.subr.bf16.mxu0 %v2298_v27  ;;  %1408 = vmatprep.subr.bf16.mxu1 %v2301_v28 }
  0x9b   :  { %1366 = vmatpush1.bf16.msra.mxu0 %v2296_v29  ;;  %1409 = vmatpush1.bf16.msra.mxu1 %v2299_v30 }
  0x9c   :  { %1367 = vmatprep.subr.bf16.mxu0 %v2304_v31  ;;  %1410 = vmatprep.subr.bf16.mxu1 %v2307_v32 }
  0x9f   :  { %1368 = vmatpush1.bf16.msra.mxu0 %v2302_v33  ;;  %1411 = vmatpush1.bf16.msra.mxu1 %v2305_v34 }
  0xa0   :  { %1369 = vmatprep.subr.bf16.mxu0 %v2310_v35  ;;  %1412 = vmatprep.subr.bf16.mxu1 %v2313_v36 }
  0xa3   :  { %1370 = vmatpush2.bf16.msra.mxu0 %v2308_v37  ;;  %1413 = vmatpush2.bf16.msra.mxu1 %v2311_v38 }
  0xa4   :  { %1371 = vmatprep.subr.bf16.mxu0 %v2316_v39  ;;  %1414 = vmatprep.subr.bf16.mxu1 %v2319_v40 }
  0xa7   :  { %1372 = vmatpush2.bf16.msra.mxu0 %v2314_v41  ;;  %1415 = vmatpush2.bf16.msra.mxu1 %v2317_v42 }
  0xa8   :  { %1373 = vmatprep.subr.bf16.mxu0 %v2322_v43  ;;  %1416 = vmatprep.subr.bf16.mxu1 %v2325_v44 }
  0xab   :  { %1374 = vmatpush2.bf16.msra.mxu0 %v2320_v45  ;;  %1417 = vmatpush2.bf16.msra.mxu1 %v2323_v46 }
  0xac   :  { %1375 = vmatprep.subr.bf16.mxu0 %v2328_v47  ;;  %1418 = vmatprep.subr.bf16.mxu1 %v2331_v49 }
  0xaf   :  { %1376 = vmatpush2.bf16.msra.mxu0 %v2326_v50  ;;  %1419 = vmatpush2.bf16.msra.mxu1 %v2329_v51 }
  0xb0   :  { %1377 = vmatprep.subr.bf16.mxu0 %v2334_v52  ;;  %1420 = vmatprep.subr.bf16.mxu1 %v2337_v53 }
  0xb3   :  { %1378 = vmatpush2.bf16.msra.mxu0 %v2332_v54  ;;  %1421 = vmatpush2.bf16.msra.mxu1 %v2335_v55 }
  0xb4   :  { %1379 = vmatprep.subr.bf16.mxu0 %v2340_v56  ;;  %1422 = vmatprep.subr.bf16.mxu1 %v2343_v57 }
  0xb7   :  { %1380 = vmatpush2.bf16.msra.mxu0 %v2338_v58  ;;  %1423 = vmatpush2.bf16.msra.mxu1 %v2341_v59 }
  0xb8   :  { %1381 = vmatprep.subr.bf16.mxu0 %v2346_v60  ;;  %1424 = vmatprep.subr.bf16.mxu1 %v2349_v61 }
  0xbb   :  { %1382 = vmatpush2.bf16.msra.mxu0 %v2344_v62  ;;  %1425 = vmatpush2.bf16.msra.mxu1 %v2347_v63 }
  0xbc   :  { %1383 = vmatprep.subr.bf16.mxu0 %v2352_v0  ;;  %1426 = vmatprep.subr.bf16.mxu1 %v2355_v1 }
  0xbf   :  { %1384 = vmatpush2.bf16.msra.mxu0 %v2350_v2  ;;  %1427 = vmatpush2.bf16.msra.mxu1 %v2353_v4 }
  0xc2   :  { %1386 = vmatmul.mubr.bf16.vlgmr.msra.gmra.mxu0 %v2685_v3  ;;  %1429 = vmatmul.mubr.bf16.vlgmr.msra.gmra.mxu1 %v2685_v3  ;;  %v3097_v3 = vld [vmem:[%s3252_s3] sm:$0xff] }
  0xc3   :  { %v1534_v14 = vrot.slane %v3097_v3, %v3078_v7  ;;  %v1542_v15 = vrot.slane %v3097_v3, %v3081_v8  ;;  %v1538_v21 = vrot.slane %v3097_v3, %v3089_v10  ;;  %v1546_v22 = vrot.slane %v3097_v3, %v3092_v11 }
 0x102   :  { %v1215_v17 = vpop.f32.mrf.mxu0  ;;  %v1258_v18 = vpop.f32.mrf.mxu1 }
 0x103   :  { %v1503_v19 = vmul.f32 %v1446_v12, %v1215_v17  ;;  %v1505_v20 = vmul.f32 %v1454_v13, %v1258_v18 }
 0x104   :  { %v1217_v23 = vpop.f32.mrf.mxu0  ;;  %v1260_v24 = vpop.f32.mrf.mxu1 }
 0x105   :  { %v3115_v25 = vadd.f32 %v1534_v14, %v1503_v19  ;;  %v3117_v26 = vadd.f32 %v1542_v15, %v1505_v20  ;;  %v1504_v27 = vmul.f32 %v1450_v16, %v1217_v23  ;;  %v1506_v28 = vmul.f32 %v1458_v48, %v1260_v24 }
 0x106   :  { %v1219_v29 = vpop.f32.mrf.mxu0  ;;  %v1262_v30 = vpop.f32.mrf.mxu1 }
 0x107   :  { %v1615_v31 = vsub.f32 0.0, %v3115_v25  ;;  %v1617_v32 = vsub.f32 0.0, %v3117_v26  ;;  %v3121_v33 = vadd.f32 %v1538_v21, %v1504_v27  ;;  %v3123_v34 = vadd.f32 %v1546_v22, %v1506_v28 }
 0x108   :  { %v1515_v35 = vmul.f32 %v1446_v12, %v1219_v29  ;;  %v1517_v36 = vmul.f32 %v1454_v13, %v1262_v30  ;;  %v1221_v37 = vpop.f32.mrf.mxu0  ;;  %v1264_v38 = vpop.f32.mrf.mxu1 }
 0x109   :  { %v1639_v39 = vmul.f32 1.442695, %v1615_v31  ;;  %v1643_v40 = vmul.f32 1.442695, %v1617_v32  ;;  %v1616_v41 = vsub.f32 0.0, %v3121_v33  ;;  %v1618_v42 = vsub.f32 0.0, %v3123_v34 }
 0x10a   :  { %v3127_v43 = vadd.f32 %v1534_v14, %v1515_v35  ;;  %v3129_v44 = vadd.f32 %v1542_v15, %v1517_v36  ;;  %v1516_v45 = vmul.f32 %v1450_v16, %v1221_v37  ;;  %v1518_v46 = vmul.f32 %v1458_v48, %v1264_v38 }
 0x10b   :  { %2356 = vpow2.f32 %v1639_v39  ;;  %v1641_v47 = vmul.f32 1.442695, %v1616_v41  ;;  %v1645_v49 = vmul.f32 1.442695, %v1618_v42  ;;  %v1461_v38 = vsub.s32 4, %v3075_v6 }
 0x10c   :  { %2358 = vpow2.f32 %v1643_v40  ;;  %v1627_v50 = vsub.f32 0.0, %v3127_v43  ;;  %v1629_v51 = vsub.f32 0.0, %v3129_v44  ;;  %v1604_v52 = vadd.f32 %v1538_v21, %v1516_v45 }
 0x10d   :  { %2360 = vpow2.f32 %v1641_v47  ;;  %v1606_v53 = vadd.f32 %v1546_v22, %v1518_v46  ;;  %v1469_v39 = vsub.s32 6, %v3075_v6  ;;  %v1465_v40 = vsub.s32 5, %v3075_v6 }
 0x10e   :  { %2362 = vpow2.f32 %v1645_v49  ;;  %v1663_v54 = vmul.f32 1.442695, %v1627_v50  ;;  %v1667_v55 = vmul.f32 1.442695, %v1629_v51  ;;  %v1628_v56 = vsub.f32 0.0, %v1604_v52 }
 0x10f   :  { %v1630_v57 = vsub.f32 0.0, %v1606_v53  ;;  %v1473_v41 = vsub.s32 7, %v3075_v6  ;;  %v1462_v42 = vrot.slane %v3086_v9, %v1461_v38  ;;  %v1558_v45 = vrot.slane %v3097_v3, %v1469_v39 }
 0x110   :  { %2364 = vpow2.f32 %v1663_v54  ;;  %v1665_v58 = vmul.f32 1.442695, %v1628_v56  ;;  %v1466_v46 = vrot.slane %v3086_v9, %v1465_v40 }
 0x111   :  { %2366 = vpow2.f32 %v1667_v55  ;;  %v1669_v59 = vmul.f32 1.442695, %v1630_v57  ;;  %v1474_v47 = vrot.slane %v3086_v9, %v1473_v41  ;;  %v1562_v6 = vrot.slane %v3097_v3, %v1473_v41 }
 0x112   :  { %2368 = vpow2.f32 %v1665_v58 }
 0x113   :  { %2370 = vpow2.f32 %v1669_v59 }
 0x118   :  { %v2357_v60 = vpop.eup %2356 }
 0x119   :  { %v2359_v61 = vpop.eup %2358  ;;  %v1687_v62 = vadd.f32 1.0, %v2357_v60 }
 0x11a   :  { %v2361_v63 = vpop.eup %2360  ;;  %v1689_v0 = vadd.f32 1.0, %v2359_v61 }
 0x11b   :  { %v2363_v1 = vpop.eup %2362  ;;  %2372 = vrcp.f32 %v1687_v62  ;;  %v1688_v2 = vadd.f32 1.0, %v2361_v63 }
 0x11c   :  { %2374 = vrcp.f32 %v1689_v0  ;;  %v1690_v4 = vadd.f32 1.0, %v2363_v1 }
 0x11d   :  { %v2365_v5 = vpop.eup %2364  ;;  %2376 = vrcp.f32 %v1688_v2 }
 0x11e   :  { %v2367_v12 = vpop.eup %2366  ;;  %2378 = vrcp.f32 %v1690_v4  ;;  %v1699_v13 = vadd.f32 1.0, %v2365_v5 }
 0x11f   :  { %v2369_v14 = vpop.eup %2368  ;;  %v1701_v15 = vadd.f32 1.0, %v2367_v12 }
 0x120   :  { %v2371_v16 = vpop.eup %2370  ;;  %2380 = vrcp.f32 %v1699_v13  ;;  %v1700_v48 = vadd.f32 1.0, %v2369_v14 }
 0x121   :  { %2382 = vrcp.f32 %v1701_v15  ;;  %v1702_v17 = vadd.f32 1.0, %v2371_v16 }
 0x122   :  { %2384 = vrcp.f32 %v1700_v48 }
 0x123   :  { %2386 = vrcp.f32 %v1702_v17 }
 0x128   :  { %v2373_v18 = vpop.eup %2372 }
 0x129   :  { %v2375_v19 = vpop.eup %2374  ;;  %v1735_v22 = vmul.f32 %v2373_v18, %v3115_v25 }
 0x12a   :  { %v2377_v20 = vpop.eup %2376  ;;  %v1737_v24 = vmul.f32 %v2375_v19, %v3117_v26 }
 0x12b   :  { %v2379_v21 = vpop.eup %2378  ;;  %v1736_v23 = vmul.f32 %v2377_v20, %v3121_v33 }
 0x12c   :  { %v1738_v27 = vmul.f32 %v2379_v21, %v3123_v34 }
 0x12d   :  { %v2381_v28 = vpop.eup %2380  ;;  %v2053_v29 = vpack.c.bf16 %v1736_v23, %v1735_v22 }
 0x12e   :  { %v2383_v30 = vpop.eup %2382  ;;  %v2054_v31 = vpack.c.bf16 %v1738_v27, %v1737_v24  ;;  %v1747_v25 = vmul.f32 %v2381_v28, %v3127_v43  ;;  %v1470_v43 = vrot.slane %v3086_v9, %v1469_v39 }
 0x12f   :  { %v2385_v32 = vpop.eup %2384  ;;  %1831 = vst [vmem:[%s3253_s4] sm:$0xff] %v2053_v29  ;;  %v1749_v26 = vmul.f32 %v2383_v30, %v3129_v44  ;;  %v1550_v44 = vrot.slane %v3097_v3, %v1461_v38 }
 0x130   :  { %v2387_v35 = vpop.eup %2386  ;;  %1832 = vst [vmem:[%s3253_s4 + $0x8] sm:$0xff] %v2054_v31  ;;  %v1748_v33 = vmul.f32 %v2385_v32, %v1604_v52 }
 0x131   :  { %v1750_v34 = vmul.f32 %v2387_v35, %v1606_v53  ;;  %v1554_v53 = vrot.slane %v3097_v3, %v1465_v40 }
 0x132   :  { %v2059_v36 = vpack.c.bf16 %v1748_v33, %v1747_v25 }
 0x133   :  { %v2060_v37 = vpack.c.bf16 %v1750_v34, %v1749_v26 }
 0x134   :  { %1837 = vst [vmem:[%s3253_s4 + $0x30] sm:$0xff] %v2059_v36 }
 0x135   :  { %1838 = vst [vmem:[%s3253_s4 + $0x38] sm:$0xff] %v2060_v37 }
 0x142   :  { %v1301_v49 = vpop.f32.mrf.mxu0  ;;  %v1344_v50 = vpop.f32.mrf.mxu1 }
 0x143   :  { %v1507_v51 = vmul.f32 %v1462_v42, %v1301_v49  ;;  %v1509_v52 = vmul.f32 %v1470_v43, %v1344_v50 }
 0x144   :  { %v1303_v54 = vpop.f32.mrf.mxu0  ;;  %v1346_v55 = vpop.f32.mrf.mxu1 }
 0x145   :  { %v3163_v56 = vadd.f32 %v1550_v44, %v1507_v51  ;;  %v3165_v57 = vadd.f32 %v1558_v45, %v1509_v52  ;;  %v1508_v58 = vmul.f32 %v1466_v46, %v1303_v54  ;;  %v1510_v59 = vmul.f32 %v1474_v47, %v1346_v55 }
 0x146   :  { %v1305_v60 = vpop.f32.mrf.mxu0  ;;  %v1348_v61 = vpop.f32.mrf.mxu1 }
 0x147   :  { %v1619_v9 = vsub.f32 0.0, %v3163_v56  ;;  %v1621_v62 = vsub.f32 0.0, %v3165_v57  ;;  %v3169_v63 = vadd.f32 %v1554_v53, %v1508_v58  ;;  %v3171_v0 = vadd.f32 %v1562_v6, %v1510_v59 }
 0x148   :  { %v1519_v1 = vmul.f32 %v1462_v42, %v1305_v60  ;;  %v1521_v3 = vmul.f32 %v1470_v43, %v1348_v61  ;;  %v1307_v2 = vpop.f32.mrf.mxu0  ;;  %v1350_v4 = vpop.f32.mrf.mxu1 }
 0x149   :  { %v1647_v5 = vmul.f32 1.442695, %v1619_v9  ;;  %v1651_v12 = vmul.f32 1.442695, %v1621_v62  ;;  %v1620_v13 = vsub.f32 0.0, %v3169_v63  ;;  %v1622_v14 = vsub.f32 0.0, %v3171_v0 }
 0x14a   :  { %v3175_v15 = vadd.f32 %v1550_v44, %v1519_v1  ;;  %v3177_v16 = vadd.f32 %v1558_v45, %v1521_v3  ;;  %v1520_v48 = vmul.f32 %v1466_v46, %v1307_v2  ;;  %v1522_v17 = vmul.f32 %v1474_v47, %v1350_v4  ;;  %v1440_v1 = vld [vmem:[%s3251_s2 + $0x8] sm:$0xf] }
 0x14b   :  { %2388 = vpow2.f32 %v1647_v5  ;;  %v1649_v18 = vmul.f32 1.442695, %v1620_v13  ;;  %v1653_v19 = vmul.f32 1.442695, %v1622_v14  ;;  %v1528_v3 = vld [vmem:[%s3252_s3 + $0x8] sm:$0xf]  ;;  %v1478_v2 = vrot.slane %v1440_v1, %v3078_v7 }
 0x14c   :  { %2390 = vpow2.f32 %v1651_v12  ;;  %v1631_v20 = vsub.f32 0.0, %v3175_v15  ;;  %v1633_v21 = vsub.f32 0.0, %v3177_v16  ;;  %v1608_v22 = vadd.f32 %v1554_v53, %v1520_v48 }
 0x14d   :  { %2392 = vpow2.f32 %v1649_v18  ;;  %v1610_v23 = vadd.f32 %v1562_v6, %v1522_v17  ;;  %v1486_v4 = vrot.slane %v1440_v1, %v3081_v8  ;;  %v1566_v5 = vrot.slane %v1528_v3, %v3078_v7 }
 0x14e   :  { %2394 = vpow2.f32 %v1653_v19  ;;  %v1671_v24 = vmul.f32 1.442695, %v1631_v20  ;;  %v1675_v27 = vmul.f32 1.442695, %v1633_v21  ;;  %v1632_v28 = vsub.f32 0.0, %v1608_v22 }
 0x14f   :  { %v1634_v29 = vsub.f32 0.0, %v1610_v23  ;;  %v1574_v12 = vrot.slane %v1528_v3, %v3081_v8  ;;  %v1482_v13 = vrot.slane %v1440_v1, %v3089_v10  ;;  %v1490_v14 = vrot.slane %v1440_v1, %v3092_v11 }
 0x150   :  { %2396 = vpow2.f32 %v1671_v24  ;;  %v1673_v30 = vmul.f32 1.442695, %v1632_v28  ;;  %v1570_v18 = vrot.slane %v1528_v3, %v3089_v10  ;;  %v1578_v19 = vrot.slane %v1528_v3, %v3092_v11 }
 0x151   :  { %2398 = vpow2.f32 %v1675_v27  ;;  %v1677_v31 = vmul.f32 1.442695, %v1634_v29 }
 0x152   :  { %2400 = vpow2.f32 %v1673_v30 }
 0x153   :  { %2402 = vpow2.f32 %v1677_v31 }
 0x158   :  { %v2389_v32 = vpop.eup %2388 }
 0x159   :  { %v2391_v35 = vpop.eup %2390  ;;  %v1691_v25 = vadd.f32 1.0, %v2389_v32 }
 0x15a   :  { %v2393_v33 = vpop.eup %2392  ;;  %v1693_v26 = vadd.f32 1.0, %v2391_v35 }
 0x15b   :  { %v2395_v34 = vpop.eup %2394  ;;  %2404 = vrcp.f32 %v1691_v25  ;;  %v1692_v36 = vadd.f32 1.0, %v2393_v33 }
 0x15c   :  { %2406 = vrcp.f32 %v1693_v26  ;;  %v1694_v37 = vadd.f32 1.0, %v2395_v34 }
 0x15d   :  { %v2397_v38 = vpop.eup %2396  ;;  %2408 = vrcp.f32 %v1692_v36 }
 0x15e   :  { %v2399_v39 = vpop.eup %2398  ;;  %2410 = vrcp.f32 %v1694_v37  ;;  %v1703_v40 = vadd.f32 1.0, %v2397_v38 }
 0x15f   :  { %v2401_v41 = vpop.eup %2400  ;;  %v1705_v42 = vadd.f32 1.0, %v2399_v39 }
 0x160   :  { %v2403_v43 = vpop.eup %2402  ;;  %2412 = vrcp.f32 %v1703_v40  ;;  %v1704_v44 = vadd.f32 1.0, %v2401_v41 }
 0x161   :  { %2414 = vrcp.f32 %v1705_v42  ;;  %v1706_v45 = vadd.f32 1.0, %v2403_v43 }
 0x162   :  { %2416 = vrcp.f32 %v1704_v44 }
 0x163   :  { %2418 = vrcp.f32 %v1706_v45 }
 0x168   :  { %v2405_v46 = vpop.eup %2404 }
 0x169   :  { %v2407_v47 = vpop.eup %2406  ;;  %v1739_v51 = vmul.f32 %v2405_v46, %v3163_v56 }
 0x16a   :  { %v2409_v49 = vpop.eup %2408  ;;  %v1741_v53 = vmul.f32 %v2407_v47, %v3165_v57 }
 0x16b   :  { %v2411_v50 = vpop.eup %2410  ;;  %v1740_v52 = vmul.f32 %v2409_v49, %v3169_v63 }
 0x16c   :  { %v1742_v6 = vmul.f32 %v2411_v50, %v3171_v0 }
 0x16d   :  { %v2413_v54 = vpop.eup %2412  ;;  %v2055_v55 = vpack.c.bf16 %v1740_v52, %v1739_v51 }
 0x16e   :  { %v2415_v58 = vpop.eup %2414  ;;  %v2056_v59 = vpack.c.bf16 %v1742_v6, %v1741_v53  ;;  %v1751_v56 = vmul.f32 %v2413_v54, %v3175_v15 }
 0x16f   :  { %v2417_v60 = vpop.eup %2416  ;;  %1833 = vst [vmem:[%s3253_s4 + $0x10] sm:$0xff] %v2055_v55  ;;  %v1753_v57 = vmul.f32 %v2415_v58, %v3177_v16 }
 0x170   :  { %v2419_v61 = vpop.eup %2418  ;;  %1834 = vst [vmem:[%s3253_s4 + $0x18] sm:$0xff] %v2056_v59  ;;  %v1752_v9 = vmul.f32 %v2417_v60, %v1608_v22 }
 0x171   :  { %v1754_v62 = vmul.f32 %v2419_v61, %v1610_v23 }
 0x172   :  { %v2061_v63 = vpack.c.bf16 %v1752_v9, %v1751_v56 }
 0x173   :  { %v2062_v0 = vpack.c.bf16 %v1754_v62, %v1753_v57 }
 0x174   :  { %1839 = vst [vmem:[%s3253_s4 + $0x40] sm:$0xff] %v2061_v63 }
 0x175   :  { %1840 = vst [vmem:[%s3253_s4 + $0x48] sm:$0xff] %v2062_v0 }
 0x182   :  { %v1387_v15 = vpop.f32.mrf.mxu0  ;;  %v1430_v16 = vpop.f32.mrf.mxu1 }
 0x183   :  { %v1511_v48 = vmul.f32 %v1478_v2, %v1387_v15  ;;  %v1513_v17 = vmul.f32 %v1486_v4, %v1430_v16 }
 0x184   :  { %v1389_v20 = vpop.f32.mrf.mxu0  ;;  %v1432_v21 = vpop.f32.mrf.mxu1 }
 0x185   :  { %v3213_v22 = vadd.f32 %v1566_v5, %v1511_v48  ;;  %v3215_v23 = vadd.f32 %v1574_v12, %v1513_v17  ;;  %v1512_v7 = vmul.f32 %v1482_v13, %v1389_v20  ;;  %v1514_v8 = vmul.f32 %v1490_v14, %v1432_v21 }
 0x186   :  { %v1391_v24 = vpop.f32.mrf.mxu0  ;;  %v1434_v27 = vpop.f32.mrf.mxu1 }
 0x187   :  { %v1623_v28 = vsub.f32 0.0, %v3213_v22  ;;  %v1625_v29 = vsub.f32 0.0, %v3215_v23  ;;  %v3219_v30 = vadd.f32 %v1570_v18, %v1512_v7  ;;  %v3221_v31 = vadd.f32 %v1578_v19, %v1514_v8 }
 0x188   :  { %v1523_v10 = vmul.f32 %v1478_v2, %v1391_v24  ;;  %v1525_v11 = vmul.f32 %v1486_v4, %v1434_v27  ;;  %v1393_v32 = vpop.f32.mrf.mxu0  ;;  %v1436_v35 = vpop.f32.mrf.mxu1 }
 0x189   :  { %v1655_v25 = vmul.f32 1.442695, %v1623_v28  ;;  %v1659_v33 = vmul.f32 1.442695, %v1625_v29  ;;  %v1624_v26 = vsub.f32 0.0, %v3219_v30  ;;  %v1626_v34 = vsub.f32 0.0, %v3221_v31 }
 0x18a   :  { %v3225_v36 = vadd.f32 %v1566_v5, %v1523_v10  ;;  %v3227_v37 = vadd.f32 %v1574_v12, %v1525_v11  ;;  %v1524_v38 = vmul.f32 %v1482_v13, %v1393_v32  ;;  %v1526_v39 = vmul.f32 %v1490_v14, %v1436_v35 }
 0x18b   :  { %2420 = vpow2.f32 %v1655_v25  ;;  %v1657_v40 = vmul.f32 1.442695, %v1624_v26  ;;  %v1661_v41 = vmul.f32 1.442695, %v1626_v34 }
 0x18c   :  { %2422 = vpow2.f32 %v1659_v33  ;;  %v1635_v42 = vsub.f32 0.0, %v3225_v36  ;;  %v1637_v43 = vsub.f32 0.0, %v3227_v37  ;;  %v1612_v44 = vadd.f32 %v1570_v18, %v1524_v38 }
 0x18d   :  { %2424 = vpow2.f32 %v1657_v40  ;;  %v1614_v45 = vadd.f32 %v1578_v19, %v1526_v39 }
 0x18e   :  { %2426 = vpow2.f32 %v1661_v41  ;;  %v1679_v46 = vmul.f32 1.442695, %v1635_v42  ;;  %v1683_v47 = vmul.f32 1.442695, %v1637_v43  ;;  %v1636_v49 = vsub.f32 0.0, %v1612_v44 }
 0x18f   :  { %v1638_v50 = vsub.f32 0.0, %v1614_v45 }
 0x190   :  { %2428 = vpow2.f32 %v1679_v46  ;;  %v1681_v51 = vmul.f32 1.442695, %v1636_v49 }
 0x191   :  { %2430 = vpow2.f32 %v1683_v47  ;;  %v1685_v52 = vmul.f32 1.442695, %v1638_v50 }
 0x192   :  { %2432 = vpow2.f32 %v1681_v51 }
 0x193   :  { %2434 = vpow2.f32 %v1685_v52 }
 0x198   :  { %v2421_v53 = vpop.eup %2420 }
 0x199   :  { %v2423_v6 = vpop.eup %2422  ;;  %v1695_v54 = vadd.f32 1.0, %v2421_v53 }
 0x19a   :  { %v2425_v55 = vpop.eup %2424  ;;  %v1697_v58 = vadd.f32 1.0, %v2423_v6 }
 0x19b   :  { %v2427_v59 = vpop.eup %2426  ;;  %2436 = vrcp.f32 %v1695_v54  ;;  %v1696_v60 = vadd.f32 1.0, %v2425_v55 }
 0x19c   :  { %2438 = vrcp.f32 %v1697_v58  ;;  %v1698_v61 = vadd.f32 1.0, %v2427_v59 }
 0x19d   :  { %v2429_v56 = vpop.eup %2428  ;;  %2440 = vrcp.f32 %v1696_v60 }
 0x19e   :  { %v2431_v9 = vpop.eup %2430  ;;  %2442 = vrcp.f32 %v1698_v61  ;;  %v1707_v57 = vadd.f32 1.0, %v2429_v56 }
 0x19f   :  { %v2433_v62 = vpop.eup %2432  ;;  %v1709_v63 = vadd.f32 1.0, %v2431_v9 }
 0x1a0   :  { %v2435_v0 = vpop.eup %2434  ;;  %2444 = vrcp.f32 %v1707_v57  ;;  %v1708_v1 = vadd.f32 1.0, %v2433_v62 }
 0x1a1   :  { %2446 = vrcp.f32 %v1709_v63  ;;  %v1710_v3 = vadd.f32 1.0, %v2435_v0 }
 0x1a2   :  { %2448 = vrcp.f32 %v1708_v1 }
 0x1a3   :  { %2450 = vrcp.f32 %v1710_v3 }
 0x1a8   :  { %v2437_v2 = vpop.eup %2436 }
 0x1a9   :  { %v2439_v4 = vpop.eup %2438  ;;  %v1743_v13 = vmul.f32 %v2437_v2, %v3213_v22 }
 0x1aa   :  { %v2441_v5 = vpop.eup %2440  ;;  %v1745_v15 = vmul.f32 %v2439_v4, %v3215_v23 }
 0x1ab   :  { %v2443_v12 = vpop.eup %2442  ;;  %v1744_v14 = vmul.f32 %v2441_v5, %v3219_v30 }
 0x1ac   :  { %v1746_v16 = vmul.f32 %v2443_v12, %v3221_v31 }
 0x1ad   :  { %v2445_v48 = vpop.eup %2444  ;;  %v2057_v17 = vpack.c.bf16 %v1744_v14, %v1743_v13 }
 0x1ae   :  { %v2447_v18 = vpop.eup %2446  ;;  %v2058_v19 = vpack.c.bf16 %v1746_v16, %v1745_v15  ;;  %v1755_v22 = vmul.f32 %v2445_v48, %v3225_v36 }
 0x1af   :  { %v2449_v20 = vpop.eup %2448  ;;  %1835 = vst [vmem:[%s3253_s4 + $0x20] sm:$0xff] %v2057_v17  ;;  %v1757_v23 = vmul.f32 %v2447_v18, %v3227_v37 }
 0x1b0   :  { %v2451_v21 = vpop.eup %2450  ;;  %1836 = vst [vmem:[%s3253_s4 + $0x28] sm:$0xff] %v2058_v19  ;;  %v1756_v7 = vmul.f32 %v2449_v20, %v1612_v44 }
 0x1b1   :  { %v1758_v8 = vmul.f32 %v2451_v21, %v1614_v45 }
 0x1b2   :  { %v2063_v24 = vpack.c.bf16 %v1756_v7, %v1755_v22 }
 0x1b3   :  { %v2064_v27 = vpack.c.bf16 %v1758_v8, %v1757_v23 }
 0x1b4   :  { %1841 = vst [vmem:[%s3253_s4 + $0x50] sm:$0xff] %v2063_v24 }
 0x1b5   :  { %1842 = vst [vmem:[%s3253_s4 + $0x58] sm:$0xff] %v2064_v27 }

// kernel: fph_forward.14
= control target key start
LH: loop header
LB: loop body
LE: loop exit
PB: predicated region body
PF: predicated region fallthrough
CT: control target
= control target key end

     0   :  { %15 = vsyncpa [#allocation3], 0  ;;  %s4958_s0 = inlined_call_operand.vmem [shape: bf16[2,256,16], index: 0, kind: input, shape index: {}]   ;;  %s4959_s1 = inlined_call_operand.vmem [shape: bf16[256,4], index: 1, kind: input, shape index: {}]   ;;  %s4960_s2 = inlined_call_operand.vmem [shape: f32[256,1], index: 2, kind: input, shape index: {}]   ;;  %s4961_s3 = inlined_call_operand.vmem [shape: bf16[2,64,16], index: 3, kind: input, shape index: {}]   ;;  %s4962_s4 = inlined_call_operand.hbm [shape: bf16[16,256], index: 4, kind: input, shape index: {}]   ;;  %s4963_s5 = inlined_call_operand.vmem [shape: bf16[256,64], index: 5, kind: input, shape index: {}]   ;;  %s4964_s6 = inlined_call_operand.hbm [shape: f32[1,64], index: 6, kind: input, shape index: {}]   ;;  %s4965_s7 = inlined_call_operand.vmem [shape: bf16[64,16], index: 7, kind: input, shape index: {}]   ;;  %s4966_s8 = inlined_call_operand.hbm [shape: f32[1,16], index: 8, kind: input, shape index: {}]   ;;  %s4967_s9 = inlined_call_operand.hbm [shape: f32[1,16], index: 9, kind: input, shape index: {}]   ;;  %s4968_s10 = inlined_call_operand.vmem [shape: bf16[2,256,36], index: 10, kind: output, shape index: {}]  }
   0x1   :  { %16 = vsyncpa [#allocation5], 0 }
   0x2   :  { %17 = vsyncpa [#allocation8], 0  ;;  %s3911_s13 = smov 0   ;;  %s3913_s14 = smov 0  }
   0x3   :  { %s3915_s15 = smov 0  }
   0x4 LB: > { %s3845_s16 = smov [#allocation4]   ;;  %s3005_s18 = sadd.s32 4294967295, %s3843_s15   ;;  %s3843_s15 = sphi %s3915_s15, %s23_s15   ;;  %s3839_s14 = sphi %s3913_s14, %s4992_s14   ;;  %s3835_s13 = sphi %s3911_s13, %s4991_s13  }
   0x5   : > { %s347_s17 = sshll.u32 %s3845_s16, 4  ;;  %p3007_p0 = scmp.ge.s32.totalorder %s3843_s15, 1  ;;  %s348_s17 = int_to_ptr.vmem [resolvable:$true] %s347_s17 }
   0x6   : > { %p300_p1 = scmp.lt.s32.totalorder %s3843_s15, 3  ;;  %p3929_p2 = scmp.eq.s32.totalorder %s3005_s18, 0 }
   0x7   : > { %s35_s21 = sadd.s32 1, %s3839_s14  ;;  %s3846_s24 = smov [#allocation2]  }
   0x8   : > { %p3933_p3 = pnand %p3007_p0, %p300_p1  ;;  %p3946_p6 = scmp.ge.s32.totalorder %s35_s21, 2 }
   0x9   : > { %s330_s25 = sshll.u32 %s3846_s24, 4  ;;  %s3716_s26 = scalar_lea.vmem %s348_s17, 16  ;;  %s331_s25 = int_to_ptr.vmem [resolvable:$true] %s330_s25 }
   0xa   : > { %p3588_p4 = pneg %p3933_p3  ;;  %p3717_p8 = scmp.ne.s32.totalorder %s348_s17, %s3716_s26 }
   0xb   : > { %s3723_s27 = scalar_lea.vmem %s348_s17, 32  ;;  %p3724_p11 = scmp.lt.s32.totalorder %s348_s17, %s348_s17 }
   0xc   : > { %p3942_p5 = pnand %p3929_p2, %p3588_p4  ;;  %p3725_p12 = scmp.lt.s32.totalorder %s3723_s27, %s3716_s26 }
   0xe   : > { %p3707_p7 = pneg %p3942_p5  ;;  %p3726_p13 = por %p3725_p12, %p3724_p11 }
  0x10   : > { %p3719_p9 = pnand %p3717_p8, %p3707_p7 }
  0x12   : > { %p3720_p10 = pneg %p3719_p9 }
  0x14   : > { %p3727_p0 = pnand %p3726_p13, %p3720_p10 }
  0x16   : > { %3730 = shalt.err (!%p3727_p0)
}
  0x17   : > { %3594 = dma.hbm_to_vmem [thread:$0]  (!%p3942_p5), %s4964_s6, 16, %s348_s17, [#allocation5]  }
  0x18   : > { %s4994_s21 = smov (%p3946_p6, %s35_s21), 0  ;;  %s3742_s30 = scalar_lea.vmem %s331_s25, 256 }
  0x19   : > { %p3743_p1 = scmp.ne.s32.totalorder %s331_s25, %s3742_s30  ;;  %p3750_p9 = scmp.lt.s32.totalorder %s331_s25, %s331_s25 }
  0x1a   : > { %p3751_p10 = scmp.lt.s32.totalorder %s3742_s30, %s3742_s30 }
  0x1b   : > { %p3745_p4 = pnand %p3743_p1, %p3707_p7 }
  0x1c   : > { %p3752_p11 = por %p3751_p10, %p3750_p9 }
  0x1d   : > { %p3746_p8 = pneg %p3745_p4 }
  0x1f   : > { %p3753_p12 = pnand %p3752_p11, %p3746_p8 }
  0x21   : > { %3756 = shalt.err (!%p3753_p12)
}
  0x22   : > { %s3847_s11 = smov 128   ;;  %s3848_s12 = smov 8  }
  0x23   : > { %3591 = dma.hbm_to_vmem [thread:$0]  (!%p3942_p5), %s4962_s4, 256, %s331_s25, [#allocation3], %s3847_s11, %s3847_s11, %s3848_s12  }
  0x24   : > { %s3849_s18 = smov [#allocation6]   ;;  %s3850_s24 = smov [#allocation7]  }
  0x25   : > { %s361_s23 = sshll.u32 %s3849_s18, 4  ;;  %s372_s26 = sshll.u32 %s3850_s24, 4  ;;  %s362_s23 = int_to_ptr.vmem [resolvable:$true] %s361_s23  ;;  %s373_s26 = int_to_ptr.vmem [resolvable:$true] %s372_s26 }
  0x26   : > { %s3768_s27 = scalar_lea.vmem %s362_s23, 16  ;;  %s3775_s28 = scalar_lea.vmem %s362_s23, 32 }
  0x27   : > { %p3769_p6 = scmp.ne.s32.totalorder %s362_s23, %s3768_s27  ;;  %p3776_p1 = scmp.lt.s32.totalorder %s362_s23, %s362_s23 }
  0x28   : > { %p3777_p4 = scmp.lt.s32.totalorder %s3775_s28, %s3768_s27 }
  0x29   : > { %p3771_p13 = pnand %p3769_p6, %p3707_p7 }
  0x2a   : > { %p3778_p8 = por %p3777_p4, %p3776_p1 }
  0x2b   : > { %p3772_p0 = pneg %p3771_p13 }
  0x2d   : > { %p3779_p9 = pnand %p3778_p8, %p3772_p0 }
  0x2f   : > { %3782 = shalt.err (!%p3779_p9)
}
  0x30   : > { %3597 = dma.hbm_to_vmem [thread:$0]  (!%p3942_p5), %s4966_s8, 16, %s362_s23, [#allocation5]  }
  0x31   : > { %s3794_s30 = scalar_lea.vmem %s373_s26, 16  ;;  %s3801_s11 = scalar_lea.vmem %s373_s26, 32 }
  0x32   : > { %p3795_p10 = scmp.ne.s32.totalorder %s373_s26, %s3794_s30  ;;  %p3802_p6 = scmp.lt.s32.totalorder %s373_s26, %s373_s26 }
  0x33   : > { %p3803_p13 = scmp.lt.s32.totalorder %s3801_s11, %s3794_s30 }
  0x34   : > { %p3797_p11 = pnand %p3795_p10, %p3707_p7 }
  0x35   : > { %p3804_p1 = por %p3803_p13, %p3802_p6 }
  0x36   : > { %p3798_p12 = pneg %p3797_p11 }
  0x38   : > { %p3805_p0 = pnand %p3804_p1, %p3798_p12 }
  0x3a   : > { %3808 = shalt.err (!%p3805_p0)
}
  0x3b   : > { %3600 = dma.hbm_to_vmem [thread:$0]  (!%p3942_p5), %s4967_s9, 16, %s373_s26, [#allocation8]  }
  0x3c   : > { %406 = sbr.rel (%p3933_p3) target bundleno = 935 (0x3a7), region = 60 }
  0x41   : > { %3822 = dma.done.wait (%p3929_p2), [#allocation3], 256  }
  0x42   : > { %3824 = vsyncadd (%p3929_p2), [#allocation3], 4294967040 }
  0x43   : > { %3826 = dma.done.wait (%p3929_p2), [#allocation5], 32  }
  0x44   : > { %3828 = vsyncadd (%p3929_p2), [#allocation5], 4294967264 }
  0x45   : > { %3830 = dma.done.wait (%p3929_p2), [#allocation8], 16  }
  0x46   : > { %3832 = vsyncadd (%p3929_p2), [#allocation8], 4294967280  ;;  %p480_p3 = scmp.lt.s32.totalorder %s3835_s13, 1  ;;  %v3851_v0 = vmov 0   ;;  %v3646_v1 = vld [vmem:[#allocation2 + $0x4] ss:$8 sps:$4 sm:$0xff]   ;;  %v883_v39 = vlaneseq }
  0x47   : > { %722 = vmatprep.mubr.bf16.mxu0 %v3851_v0  ;;  %3644 = vset.pattern.permute.xlu0 %v3851_v0  ;;  %v3648_v2 = vld [vmem:[#allocation2] ss:$8 sps:$4 sm:$0xff]   ;;  %vm641_vm0 = vcmask 130048   ;;  %v3665_v6 = vld [vmem:[%s4963_s5 + $0x78] sm:$0xff]   ;;  %v3667_v8 = vld [vmem:[%s4963_s5 + $0x70] sm:$0xff]   ;;  %s3854_s11 = smov 32  }
  0x48   : > { %s4996_s13 = smov (!%p480_p3, %s3835_s13), 1  ;;  %3645 = vset.pattern.permute.xlu1 %v3851_v0  ;;  %704 = vmatprep.subr.bf16.mxu0 %v3646_v1  ;;  %v3666_v7 = vld [vmem:[%s4963_s5 + $0x38] sm:$0xff]   ;;  %v3668_v9 = vld [vmem:[%s4963_s5 + $0x30] sm:$0xff]   ;;  %v3669_v10 = vld [vmem:[%s4963_s5 + $0x68] sm:$0xff]   ;;  %v884_v40 = vand.u32 127, %v883_v39  ;;  %s3855_s28 = smov 16  }
  0x49   : > { %s3329_s20 = sshll.u32 %s4996_s13, 7  ;;  %705 = vmatpush1.bf16.msra.mxu0 %v3648_v2  ;;  %3332 = vmatprep.subr.bf16.mxu1 %v3665_v6  ;;  %v3670_v12 = vld [vmem:[%s4963_s5 + $0x28] sm:$0xff]   ;;  %v3671_v13 = vld [vmem:[%s4963_s5 + $0x60] sm:$0xff]   ;;  %v3673_v15 = vld [vmem:[%s4963_s5 + $0x58] sm:$0xff]   ;;  %v3852_v57 = vmov 1.0|1.0  }
  0x4a   : > { %s4015_s19 = scalar_lea.vmem %s4958_s0, %s3329_s20  ;;  %3333 = vmatpush3.bf16.msra.mxu1 %v3666_v7  ;;  %v3672_v14 = vld [vmem:[%s4963_s5 + $0x20] sm:$0xff]   ;;  %v3674_v16 = vld [vmem:[%s4963_s5 + $0x18] sm:$0xff]   ;;  %v3675_v18 = vld [vmem:[%s4963_s5 + $0x50] sm:$0xff]   ;;  %v885_v41 = vadd.s32 128, %v884_v40  ;;  %v4132_v47 = vcvt.s32.f32 %v884_v40  ;;  %s3330_s23 = sshll.u32 %s4996_s13, 5 }
  0x4b   : > { %v3649_v3 = vld [vmem:[%s4015_s19] sm:$0xff]   ;;  %v3650_v4 = vld [vmem:[%s4015_s19 + $0x8] sm:$0xff]   ;;  %v3651_v5 = vld [vmem:[%s4015_s19 + $0x10] sm:$0xff]   ;;  %3334 = vmatprep.subr.bf16.mxu1 %v3667_v8  ;;  %s4300_s27 = scalar_lea.vmem %s4961_s3, %s3330_s23  ;;  %s4795_s22 = scalar_lea.vmem %s4968_s10, %s3329_s20 }
  0x4c   : > { %3044 = vmatmul.mubr.msk.bf16.vlgmr.msra.gmra.mxu0 %vm641_vm0, %v3649_v3  ;;  %v3652_v11 = vld [vmem:[%s4015_s19 + $0x18] sm:$0xff]   ;;  %v3653_v17 = vld [vmem:[%s4015_s19 + $0x20] sm:$0xff]   ;;  %v3676_v19 = vld [vmem:[%s4963_s5 + $0x10] sm:$0xff]   ;;  %v4130_v46 = vcvt.s32.f32 %v885_v41 }
  0x4d   : > { %732 = vmatprep.mubr.bf16.mxu0 %v3851_v0  ;;  %v3654_v20 = vld [vmem:[%s4015_s19 + $0x28] sm:$0xff]   ;;  %v3655_v21 = vld [vmem:[%s4015_s19 + $0x30] sm:$0xff]   ;;  %v3656_v22 = vld [vmem:[%s4015_s19 + $0x38] sm:$0xff]  }
  0x4e   : > { %3335 = vmatpush3.bf16.msra.mxu1 %v3668_v9  ;;  %v3657_v23 = vld [vmem:[%s4015_s19 + $0x40] sm:$0xff]   ;;  %v3677_v24 = vld [vmem:[%s4963_s5 + $0x48] sm:$0xff]   ;;  %v3659_v29 = vld [vmem:[%s4015_s19 + $0x50] sm:$0xff]  }
  0x4f   : > { %3336 = vmatprep.subr.bf16.mxu1 %v3669_v10  ;;  %v3678_v25 = vld [vmem:[%s4963_s5 + $0x8] sm:$0xff]   ;;  %v3679_v27 = vld [vmem:[%s4963_s5 + $0x40] sm:$0xff]   ;;  %v3660_v30 = vld [vmem:[%s4015_s19 + $0x58] sm:$0xff]  }
  0x50   : > { %v3658_v26 = vld [vmem:[%s4015_s19 + $0x48] sm:$0xff]   ;;  %v3680_v28 = vld [vmem:[%s4963_s5] sm:$0xff]   ;;  %v3663_v33 = vld [vmem:[%s4015_s19 + $0x70] sm:$0xff]  }
  0x51   : > { %v3661_v31 = vld [vmem:[%s4015_s19 + $0x60] sm:$0xff]   ;;  %v3662_v32 = vld [vmem:[%s4015_s19 + $0x68] sm:$0xff]   ;;  %v3664_v34 = vld [vmem:[%s4015_s19 + $0x78] sm:$0xff]  }
  0x52   : > { %3337 = vmatpush3.bf16.msra.mxu1 %v3670_v12  ;;  %v1812_v35 = vld [vmem:[%s4960_s2 + $0x20] sm:$0xff]  ;;  %v1814_v36 = vld [vmem:[%s4960_s2 + $0x30] sm:$0xff]  ;;  %v1813_v37 = vld [vmem:[%s4960_s2 + $0x28] sm:$0xff] }
  0x53   : > { %3338 = vmatprep.subr.bf16.mxu1 %v3671_v13  ;;  %1862 = vperm.xlu0 %3644, %v1812_v35   ;;  %v1815_v38 = vld [vmem:[%s4960_s2 + $0x38] sm:$0xff]  ;;  %v1817_v44 = vld [vmem:[%s4960_s2 + $0x48] sm:$0xff]  ;;  %v1816_v45 = vld [vmem:[%s4960_s2 + $0x40] sm:$0xff] }
  0x54   : > { %3045 = vmatmul.mubr.msk.bf16.gmra.mxu0 %vm641_vm0, %v3650_v4  ;;  %1872 = vperm.xlu1 %3645, %v1814_v36   ;;  %v1819_v49 = vld [vmem:[%s4960_s2 + $0x58] sm:$0xff]  ;;  %v1818_v50 = vld [vmem:[%s4960_s2 + $0x50] sm:$0xff]  ;;  %v1821_v53 = vld [vmem:[%s4960_s2 + $0x68] sm:$0xff] }
  0x55   : > { %742 = vmatprep.mubr.bf16.mxu0 %v3851_v0  ;;  %v3681_v51 = vld [vmem:[%s4965_s7 + $0x18] sm:$0xff]   ;;  %v1820_v55 = vld [vmem:[%s4960_s2 + $0x60] sm:$0xff]  ;;  %v3682_v56 = vld [vmem:[%s4965_s7 + $0x10] sm:$0xff]  }
  0x56   : > { %3339 = vmatpush3.bf16.msra.mxu1 %v3672_v14  ;;  %3484 = vmatprep.subr.bf16.mxu0 %v3681_v51  ;;  %v1823_v60 = vld [vmem:[%s4960_s2 + $0x78] sm:$0xff]  ;;  %v1822_v61 = vld [vmem:[%s4960_s2 + $0x70] sm:$0xff]  ;;  %v1824_v1 = vld [vmem:[%s4960_s2 + $0x80] sm:$0xff] }
  0x57   : > { %3340 = vmatprep.subr.bf16.mxu1 %v3673_v15  ;;  %1867 = vperm.xlu0 %3644, %v1813_v37   ;;  %v1827_v4 = vld [vmem:[%s4960_s2 + $0x98] sm:$0xff]  ;;  %v1829_v8 = vld [vmem:[%s4960_s2 + $0xa8] sm:$0xff]  ;;  %v1828_v9 = vld [vmem:[%s4960_s2 + $0xa0] sm:$0xff] }
  0x58   : > { %1877 = vperm.xlu1 %3645, %v1815_v38   ;;  %3485 = vmatpush3.bf16.msra.mxu0 %v3681_v51  ;;  %v1831_v12 = vld [vmem:[%s4960_s2 + $0xb8] sm:$0xff]  ;;  %v1830_v13 = vld [vmem:[%s4960_s2 + $0xb0] sm:$0xff]  ;;  %v1809_v41 = vld [vmem:[%s4960_s2 + $0x8] sm:$0xff] }
  0x59   : > { %3486 = vmatprep.subr.bf16.mxu0 %v3682_v56  ;;  %v1811_v51 = vld [vmem:[%s4960_s2 + $0x18] sm:$0xff] }
  0x5a   : > { %3341 = vmatpush3.bf16.msra.mxu1 %v3674_v16  ;;  %v1833_v16 = vld [vmem:[%s4960_s2 + $0xc8] sm:$0xff] }
  0x5b   : > { %3342 = vmatprep.subr.bf16.mxu1 %v3675_v18  ;;  %1882 = vperm.xlu0 %3644, %v1816_v45   ;;  %v1837_v45 = vld [vmem:[%s4960_s2 + $0xe8] sm:$0xff] }
  0x5c   : > { %3046 = vmatmul.mubr.msk.bf16.gmra.mxu0 %vm641_vm0, %v3651_v5  ;;  %1887 = vperm.xlu1 %3645, %v1817_v44   ;;  %v1826_v5 = vld [vmem:[%s4960_s2 + $0x90] sm:$0xff] }
  0x5d   : > { %752 = vmatprep.mubr.bf16.mxu0 %v3851_v0  ;;  %3487 = vmatpush3.bf16.msra.mxu0 %v3682_v56  ;;  %v1838_v56 = vld [vmem:[%s4960_s2 + $0xf0] sm:$0xff] }
  0x5e   : > { %3343 = vmatpush3.bf16.msra.mxu1 %v3676_v19 }
  0x5f   : > { %3344 = vmatprep.subr.bf16.mxu1 %v3677_v24  ;;  %1892 = vperm.xlu0 %3644, %v1818_v50  }
  0x60   : > { %1897 = vperm.xlu1 %3645, %v1819_v49  }
  0x62   : > { %3345 = vmatpush3.bf16.msra.mxu1 %v3678_v25 }
  0x63   : > { %3346 = vmatprep.subr.bf16.mxu1 %v3679_v27  ;;  %1902 = vperm.xlu0 %3644, %v1820_v55   ;;  %v1839_v55 = vld [vmem:[%s4960_s2 + $0xf8] sm:$0xff] }
  0x64   : > { %3047 = vmatmul.mubr.msk.bf16.gmra.mxu0 %vm641_vm0, %v3652_v11  ;;  %1907 = vperm.xlu1 %3645, %v1821_v53  }
  0x65   : > { %762 = vmatprep.mubr.bf16.mxu0 %v3851_v0 }
  0x66   : > { %3347 = vmatpush3.bf16.msra.mxu1 %v3680_v28 }
  0x67   : > { %1912 = vperm.xlu0 %3644, %v1822_v61   ;;  %v3684_v61 = vld [vmem:[%s4965_s7] sm:$0xff]  }
  0x68   : > { %1917 = vperm.xlu1 %3645, %v1823_v60  }
  0x6b   : > { %1922 = vperm.xlu0 %3644, %v1824_v1  }
  0x6c   : > { %3048 = vmatmul.mubr.msk.bf16.gmra.mxu0 %vm641_vm0, %v3653_v17  ;;  %v1832_v17 = vld [vmem:[%s4960_s2 + $0xc0] sm:$0xff] }
  0x6d   : > { %772 = vmatprep.mubr.bf16.mxu0 %v3851_v0 }
  0x6f   : > { %1932 = vperm.xlu0 %3644, %v1826_v5  }
  0x73   : > { %1942 = vperm.xlu0 %3644, %v1828_v9   ;;  %v4320_v9 = vld [vmem:[%s4300_s27 + $0x8] sm:$0xff]  }
  0x74   : > { %3049 = vmatmul.mubr.msk.bf16.gmra.mxu0 %vm641_vm0, %v3654_v20  ;;  %v1835_v20 = vld [vmem:[%s4960_s2 + $0xd8] sm:$0xff] }
  0x75   : > { %782 = vmatprep.mubr.bf16.mxu0 %v3851_v0 }
  0x77   : > { %1952 = vperm.xlu0 %3644, %v1830_v13   ;;  %v4330_v13 = vld [vmem:[%s4300_s27] sm:$0xff]  }
  0x7b   : > { %1962 = vperm.xlu0 %3644, %v1832_v17  }
  0x7c   : > { %3050 = vmatmul.mubr.msk.bf16.gmra.mxu0 %vm641_vm0, %v3655_v21  ;;  %v1834_v21 = vld [vmem:[%s4960_s2 + $0xd0] sm:$0xff] }
  0x7d   : > { %792 = vmatprep.mubr.bf16.mxu0 %v3851_v0 }
  0x7f   : > { %1972 = vperm.xlu0 %3644, %v1834_v21  }
  0x84   : > { %3051 = vmatmul.mubr.msk.bf16.gmra.mxu0 %vm641_vm0, %v3656_v22 }
  0x85   : > { %802 = vmatprep.mubr.bf16.mxu0 %v3851_v0 }
  0x8c   : > { %3052 = vmatmul.mubr.msk.bf16.gmra.mxu0 %vm641_vm0, %v3657_v23 }
  0x8d   : > { %812 = vmatprep.mubr.bf16.mxu0 %v3851_v0 }
  0x94   : > { %3053 = vmatmul.mubr.msk.bf16.gmra.mxu0 %vm641_vm0, %v3658_v26 }
  0x95   : > { %822 = vmatprep.mubr.bf16.mxu0 %v3851_v0 }
  0x9c   : > { %3054 = vmatmul.mubr.msk.bf16.gmra.mxu0 %vm641_vm0, %v3659_v29 }
  0x9d   : > { %832 = vmatprep.mubr.bf16.mxu0 %v3851_v0 }
  0xa4   : > { %3055 = vmatmul.mubr.msk.bf16.gmra.mxu0 %vm641_vm0, %v3660_v30 }
  0xa5   : > { %842 = vmatprep.mubr.bf16.mxu0 %v3851_v0 }
  0xac   : > { %3056 = vmatmul.mubr.msk.bf16.gmra.mxu0 %vm641_vm0, %v3661_v31 }
  0xad   : > { %852 = vmatprep.mubr.bf16.mxu0 %v3851_v0 }
  0xb4   : > { %3057 = vmatmul.mubr.msk.bf16.gmra.mxu0 %vm641_vm0, %v3662_v32 }
  0xb5   : > { %862 = vmatprep.mubr.bf16.mxu0 %v3851_v0 }
  0xbc   : > { %3058 = vmatmul.mubr.msk.bf16.gmra.mxu0 %vm641_vm0, %v3663_v33 }
  0xbd   : > { %872 = vmatprep.mubr.bf16.mxu0 %v3851_v0  ;;  %v1825_v0 = vld [vmem:[%s4960_s2 + $0x88] sm:$0xff] }
  0xbe   : > { %1927 = vperm.xlu1 %3645, %v1825_v0  }
  0xc2   : > { %1937 = vperm.xlu1 %3645, %v1827_v4  }
  0xc4   : > { %3059 = vmatmul.mubr.msk.bf16.gmra.mxu0 %vm641_vm0, %v3664_v34 }
  0xc6   : > { %1947 = vperm.xlu1 %3645, %v1829_v8  }
  0xca   : > { %1957 = vperm.xlu1 %3645, %v1831_v12  }
  0xce   : > { %1967 = vperm.xlu1 %3645, %v1833_v16   ;;  %v1863_v12 = vpop.permute.xlu0 %1862 }
  0xcf   : > { %v1873_v16 = vpop.permute.xlu1 %1872 }
  0xd2   : > { %1977 = vperm.xlu1 %3645, %v1835_v20  }
  0xd3   : > { %v1878_v21 = vpop.permute.xlu1 %1877 }
  0xd6   : > { %1847 = vperm.xlu1 %3645, %v1809_v41  }
  0xda   : > { %1987 = vperm.xlu1 %3645, %v1837_v45  }
  0xde   : > { %1857 = vperm.xlu1 %3645, %v1811_v51  }
  0xe2   : > { %1997 = vperm.xlu1 %3645, %v1839_v55  }
 0x10c   : > { %v724_v42 = vpop.f32.mrf.mxu0 }
 0x10d   : > { %vm888_vm4 = vcmp.eq.f32.partialorder %v724_v42, %v4132_v47  ;;  %v1808_v42 = vld [vmem:[%s4960_s2] sm:$0xff] }
 0x10e   : > { %v726_v43 = vpop.f32.mrf.mxu0  ;;  %1842 = vperm.xlu0 %3644, %v1808_v42  }
 0x10f   : > { %vm889_vm2 = vcmp.eq.f32.partialorder %v726_v43, %v4130_v46 }
 0x110   : > { %v728_v48 = vpop.f32.mrf.mxu0 }
 0x111   : > { %vm890_vm1 = vcmp.eq.f32.partialorder %v728_v48, %v4132_v47  ;;  %v1836_v48 = vld [vmem:[%s4960_s2 + $0xe0] sm:$0xff] }
 0x112   : > { %v730_v52 = vpop.f32.mrf.mxu0  ;;  %vm3143_vm6 = vmpackc.low %vm890_vm1, %vm888_vm4  ;;  %1982 = vperm.xlu0 %3644, %v1836_v48  }
 0x113   : > { %vm891_vm3 = vcmp.eq.f32.partialorder %v730_v52, %v4130_v46  ;;  %v1810_v52 = vld [vmem:[%s4960_s2 + $0x10] sm:$0xff] }
 0x114   : > { %v734_v54 = vpop.f32.mrf.mxu0  ;;  %vm3141_vm5 = vmpackc.low %vm891_vm3, %vm889_vm2 }
 0x115   : > { %3142 = vmatprep.mubr.msk.bf16.mxu1 %vm3141_vm5, %v3852_v57  ;;  %vm892_vm10 = vcmp.eq.f32.partialorder %v734_v54, %v4132_v47 }
 0x116   : > { %v736_v58 = vpop.f32.mrf.mxu0  ;;  %3144 = vmatmul.mubr.msk.bf16.vlgmr.msra.gmra.mxu1 %vm3143_vm6, %v3852_v57  ;;  %1852 = vperm.xlu0 %3644, %v1810_v52  }
 0x117   : > { %vm893_vm8 = vcmp.eq.f32.partialorder %v736_v58, %v4130_v46  ;;  %v3683_v58 = vld [vmem:[%s4965_s7 + $0x8] sm:$0xff]  }
 0x118   : > { %v738_v59 = vpop.f32.mrf.mxu0  ;;  %3488 = vmatprep.subr.bf16.mxu0 %v3683_v58 }
 0x119   : > { %vm894_vm7 = vcmp.eq.f32.partialorder %v738_v59, %v4132_v47  ;;  %3489 = vmatpush3.bf16.msra.mxu0 %v3683_v58 }
 0x11a   : > { %v740_v62 = vpop.f32.mrf.mxu0  ;;  %vm3147_vm12 = vmpackc.low %vm894_vm7, %vm892_vm10  ;;  %1992 = vperm.xlu0 %3644, %v1838_v56   ;;  %3490 = vmatprep.subr.bf16.mxu0 %v3684_v61 }
 0x11b   : > { %vm895_vm9 = vcmp.eq.f32.partialorder %v740_v62, %v4130_v46 }
 0x11c   : > { %vm3145_vm11 = vmpackc.low %vm895_vm9, %vm893_vm8  ;;  %v744_v63 = vpop.f32.mrf.mxu0 }
 0x11d   : > { %3146 = vmatprep.mubr.msk.bf16.mxu1 %vm3145_vm11, %v3852_v57  ;;  %vm896_vm1 = vcmp.eq.f32.partialorder %v744_v63, %v4132_v47  ;;  %3491 = vmatpush3.bf16.msra.mxu0 %v3684_v61 }
 0x11e   : > { %v746_v2 = vpop.f32.mrf.mxu0  ;;  %3148 = vmatmul.mubr.msk.bf16.gmra.mxu1 %vm3147_vm12, %v3852_v57 }
 0x11f   : > { %vm897_vm14 = vcmp.eq.f32.partialorder %v746_v2, %v4130_v46 }
 0x120   : > { %v748_v3 = vpop.f32.mrf.mxu0 }
 0x121   : > { %vm898_vm13 = vcmp.eq.f32.partialorder %v748_v3, %v4132_v47  ;;  %v4303_v3 = vld [vmem:[%s4300_s27 + $0x18] sm:$0xff]  }
 0x122   : > { %v750_v6 = vpop.f32.mrf.mxu0  ;;  %vm3151_vm3 = vmpackc.low %vm898_vm13, %vm896_vm1  ;;  %3564 = vmatprep.subr.bf16.mxu1 %v4303_v3  ;;  %3524 = vmatprep.subr.bf16.mxu0 %v4303_v3 }
 0x123   : > { %vm899_vm15 = vcmp.eq.f32.partialorder %v750_v6, %v4130_v46  ;;  %3568 = vmatpush3.bf16.msra.mxu1 %v4303_v3  ;;  %v4314_v6 = vld [vmem:[%s4300_s27 + $0x10] sm:$0xff]  }
 0x124   : > { %vm3149_vm2 = vmpackc.low %vm899_vm15, %vm897_vm14  ;;  %v754_v7 = vpop.f32.mrf.mxu0  ;;  %3565 = vmatprep.subr.bf16.mxu1 %v4314_v6 }
 0x125   : > { %3150 = vmatprep.mubr.msk.bf16.mxu1 %vm3149_vm2, %v3852_v57  ;;  %vm900_vm7 = vcmp.eq.f32.partialorder %v754_v7, %v4132_v47 }
 0x126   : > { %v756_v10 = vpop.f32.mrf.mxu0  ;;  %3152 = vmatmul.mubr.msk.bf16.gmra.mxu1 %vm3151_vm3, %v3852_v57 }
 0x127   : > { %vm901_vm5 = vcmp.eq.f32.partialorder %v756_v10, %v4130_v46  ;;  %3569 = vmatpush3.bf16.msra.mxu1 %v4314_v6 }
 0x128   : > { %v758_v11 = vpop.f32.mrf.mxu0  ;;  %3566 = vmatprep.subr.bf16.mxu1 %v4320_v9 }
 0x129   : > { %vm902_vm4 = vcmp.eq.f32.partialorder %v758_v11, %v4132_v47 }
 0x12a   : > { %v760_v14 = vpop.f32.mrf.mxu0  ;;  %vm3155_vm9 = vmpackc.low %vm902_vm4, %vm900_vm7 }
 0x12b   : > { %vm903_vm6 = vcmp.eq.f32.partialorder %v760_v14, %v4130_v46  ;;  %3570 = vmatpush3.bf16.msra.mxu1 %v4320_v9 }
 0x12c   : > { %vm3153_vm8 = vmpackc.low %vm903_vm6, %vm901_vm5  ;;  %v764_v15 = vpop.f32.mrf.mxu0  ;;  %3567 = vmatprep.subr.bf16.mxu1 %v4330_v13 }
 0x12d   : > { %3154 = vmatprep.mubr.msk.bf16.mxu1 %vm3153_vm8, %v3852_v57  ;;  %vm904_vm13 = vcmp.eq.f32.partialorder %v764_v15, %v4132_v47 }
 0x12e   : > { %v766_v18 = vpop.f32.mrf.mxu0  ;;  %3156 = vmatmul.mubr.msk.bf16.gmra.mxu1 %vm3155_vm9, %v3852_v57 }
 0x12f   : > { %vm905_vm11 = vcmp.eq.f32.partialorder %v766_v18, %v4130_v46  ;;  %3571 = vmatpush3.bf16.msra.mxu1 %v4330_v13  ;;  %v1868_v18 = vpop.permute.xlu0 %1867 }
 0x130   : > { %v768_v19 = vpop.f32.mrf.mxu0 }
 0x131   : > { %vm906_vm10 = vcmp.eq.f32.partialorder %v768_v19, %v4132_v47 }
 0x132   : > { %v770_v22 = vpop.f32.mrf.mxu0  ;;  %vm3159_vm15 = vmpackc.low %vm906_vm10, %vm904_vm13 }
 0x133   : > { %vm907_vm12 = vcmp.eq.f32.partialorder %v770_v22, %v4130_v46 }
 0x134   : > { %vm3157_vm14 = vmpackc.low %vm907_vm12, %vm905_vm11  ;;  %v774_v23 = vpop.f32.mrf.mxu0 }
 0x135   : > { %3158 = vmatprep.mubr.msk.bf16.mxu1 %vm3157_vm14, %v3852_v57  ;;  %vm908_vm4 = vcmp.eq.f32.partialorder %v774_v23, %v4132_v47  ;;  %v3853_v23 = vmov 0.0  }
 0x136   : > { %v776_v24 = vpop.f32.mrf.mxu0  ;;  %3160 = vmatmul.mubr.msk.bf16.gmra.mxu1 %vm3159_vm15, %v3852_v57 }
 0x137   : > { %vm909_vm2 = vcmp.eq.f32.partialorder %v776_v24, %v4130_v46 }
 0x138   : > { %v778_v25 = vpop.f32.mrf.mxu0 }
 0x139   : > { %vm910_vm1 = vcmp.eq.f32.partialorder %v778_v25, %v4132_v47 }
 0x13a   : > { %v780_v26 = vpop.f32.mrf.mxu0  ;;  %vm3163_vm6 = vmpackc.low %vm910_vm1, %vm908_vm4 }
 0x13b   : > { %vm911_vm3 = vcmp.eq.f32.partialorder %v780_v26, %v4130_v46 }
 0x13c   : > { %vm3161_vm5 = vmpackc.low %vm911_vm3, %vm909_vm2  ;;  %v784_v27 = vpop.f32.mrf.mxu0 }
 0x13d   : > { %3162 = vmatprep.mubr.msk.bf16.mxu1 %vm3161_vm5, %v3852_v57  ;;  %vm912_vm10 = vcmp.eq.f32.partialorder %v784_v27, %v4132_v47 }
 0x13e   : > { %v786_v28 = vpop.f32.mrf.mxu0  ;;  %3164 = vmatmul.mubr.msk.bf16.gmra.mxu1 %vm3163_vm6, %v3852_v57 }
 0x13f   : > { %vm913_vm8 = vcmp.eq.f32.partialorder %v786_v28, %v4130_v46  ;;  %v1888_v28 = vpop.permute.xlu1 %1887 }
 0x140   : > { %v788_v29 = vpop.f32.mrf.mxu0 }
 0x141   : > { %vm914_vm7 = vcmp.eq.f32.partialorder %v788_v29, %v4132_v47  ;;  %v1883_v29 = vpop.permute.xlu0 %1882 }
 0x142   : > { %v790_v30 = vpop.f32.mrf.mxu0  ;;  %vm3167_vm12 = vmpackc.low %vm914_vm7, %vm912_vm10 }
 0x143   : > { %vm915_vm9 = vcmp.eq.f32.partialorder %v790_v30, %v4130_v46 }
 0x144   : > { %vm3165_vm11 = vmpackc.low %vm915_vm9, %vm913_vm8  ;;  %v794_v31 = vpop.f32.mrf.mxu0 }
 0x145   : > { %3166 = vmatprep.mubr.msk.bf16.mxu1 %vm3165_vm11, %v3852_v57  ;;  %vm916_vm1 = vcmp.eq.f32.partialorder %v794_v31, %v4132_v47 }
 0x146   : > { %v796_v32 = vpop.f32.mrf.mxu0  ;;  %3168 = vmatmul.mubr.msk.bf16.gmra.mxu1 %vm3167_vm12, %v3852_v57 }
 0x147   : > { %vm917_vm14 = vcmp.eq.f32.partialorder %v796_v32, %v4130_v46 }
 0x148   : > { %v798_v33 = vpop.f32.mrf.mxu0 }
 0x149   : > { %vm918_vm13 = vcmp.eq.f32.partialorder %v798_v33, %v4132_v47  ;;  %v1898_v33 = vpop.permute.xlu1 %1897 }
 0x14a   : > { %v800_v34 = vpop.f32.mrf.mxu0  ;;  %vm3171_vm3 = vmpackc.low %vm918_vm13, %vm916_vm1 }
 0x14b   : > { %vm919_vm15 = vcmp.eq.f32.partialorder %v800_v34, %v4130_v46  ;;  %v1893_v34 = vpop.permute.xlu0 %1892 }
 0x14c   : > { %vm3169_vm2 = vmpackc.low %vm919_vm15, %vm917_vm14  ;;  %v804_v35 = vpop.f32.mrf.mxu0 }
 0x14d   : > { %3170 = vmatprep.mubr.msk.bf16.mxu1 %vm3169_vm2, %v3852_v57  ;;  %vm920_vm7 = vcmp.eq.f32.partialorder %v804_v35, %v4132_v47 }
 0x14e   : > { %v806_v36 = vpop.f32.mrf.mxu0  ;;  %3172 = vmatmul.mubr.msk.bf16.gmra.mxu1 %vm3171_vm3, %v3852_v57 }
 0x14f   : > { %vm921_vm5 = vcmp.eq.f32.partialorder %v806_v36, %v4130_v46 }
 0x150   : > { %v808_v37 = vpop.f32.mrf.mxu0 }
 0x151   : > { %vm922_vm4 = vcmp.eq.f32.partialorder %v808_v37, %v4132_v47 }
 0x152   : > { %v810_v38 = vpop.f32.mrf.mxu0  ;;  %vm3175_vm9 = vmpackc.low %vm922_vm4, %vm920_vm7 }
 0x153   : > { %vm923_vm6 = vcmp.eq.f32.partialorder %v810_v38, %v4130_v46 }
 0x154   : > { %vm3173_vm8 = vmpackc.low %vm923_vm6, %vm921_vm5  ;;  %v814_v39 = vpop.f32.mrf.mxu0 }
 0x155   : > { %3174 = vmatprep.mubr.msk.bf16.mxu1 %vm3173_vm8, %v3852_v57  ;;  %vm924_vm13 = vcmp.eq.f32.partialorder %v814_v39, %v4132_v47  ;;  %v1908_v39 = vpop.permute.xlu1 %1907 }
 0x156   : > { %v816_v40 = vpop.f32.mrf.mxu0  ;;  %3176 = vmatmul.mubr.msk.bf16.gmra.mxu1 %vm3175_vm9, %v3852_v57 }
 0x157   : > { %vm925_vm11 = vcmp.eq.f32.partialorder %v816_v40, %v4130_v46  ;;  %v1903_v40 = vpop.permute.xlu0 %1902 }
 0x158   : > { %v818_v43 = vpop.f32.mrf.mxu0 }
 0x159   : > { %vm926_vm10 = vcmp.eq.f32.partialorder %v818_v43, %v4132_v47  ;;  %v1918_v43 = vpop.permute.xlu1 %1917 }
 0x15a   : > { %v820_v44 = vpop.f32.mrf.mxu0  ;;  %vm3179_vm15 = vmpackc.low %vm926_vm10, %vm924_vm13 }
 0x15b   : > { %vm927_vm12 = vcmp.eq.f32.partialorder %v820_v44, %v4130_v46  ;;  %v1913_v44 = vpop.permute.xlu0 %1912 }
 0x15c   : > { %vm3177_vm14 = vmpackc.low %vm927_vm12, %vm925_vm11  ;;  %v824_v49 = vpop.f32.mrf.mxu0 }
 0x15d   : > { %3178 = vmatprep.mubr.msk.bf16.mxu1 %vm3177_vm14, %v3852_v57  ;;  %vm928_vm4 = vcmp.eq.f32.partialorder %v824_v49, %v4132_v47  ;;  %v1928_v51 = vpop.permute.xlu1 %1927 }
 0x15e   : > { %v826_v50 = vpop.f32.mrf.mxu0  ;;  %3180 = vmatmul.mubr.msk.bf16.gmra.mxu1 %vm3179_vm15, %v3852_v57 }
 0x15f   : > { %vm929_vm2 = vcmp.eq.f32.partialorder %v826_v50, %v4130_v46  ;;  %v1923_v52 = vpop.permute.xlu0 %1922 }
 0x160   : > { %v828_v53 = vpop.f32.mrf.mxu0 }
 0x161   : > { %vm930_vm1 = vcmp.eq.f32.partialorder %v828_v53, %v4132_v47  ;;  %v1938_v55 = vpop.permute.xlu1 %1937 }
 0x162   : > { %v830_v54 = vpop.f32.mrf.mxu0  ;;  %vm3183_vm6 = vmpackc.low %vm930_vm1, %vm928_vm4 }
 0x163   : > { %vm931_vm3 = vcmp.eq.f32.partialorder %v830_v54, %v4130_v46  ;;  %v1933_v56 = vpop.permute.xlu0 %1932 }
 0x164   : > { %vm3181_vm5 = vmpackc.low %vm931_vm3, %vm929_vm2  ;;  %v834_v59 = vpop.f32.mrf.mxu0 }
 0x165   : > { %3182 = vmatprep.mubr.msk.bf16.mxu1 %vm3181_vm5, %v3852_v57  ;;  %vm932_vm10 = vcmp.eq.f32.partialorder %v834_v59, %v4132_v47 }
 0x166   : > { %v836_v60 = vpop.f32.mrf.mxu0  ;;  %3184 = vmatmul.mubr.msk.bf16.gmra.mxu1 %vm3183_vm6, %v3852_v57 }
 0x167   : > { %vm933_vm8 = vcmp.eq.f32.partialorder %v836_v60, %v4130_v46 }
 0x168   : > { %v838_v62 = vpop.f32.mrf.mxu0 }
 0x169   : > { %vm934_vm7 = vcmp.eq.f32.partialorder %v838_v62, %v4132_v47  ;;  %v1948_v62 = vpop.permute.xlu1 %1947 }
 0x16a   : > { %v840_v63 = vpop.f32.mrf.mxu0  ;;  %vm3187_vm12 = vmpackc.low %vm934_vm7, %vm932_vm10 }
 0x16b   : > { %vm935_vm9 = vcmp.eq.f32.partialorder %v840_v63, %v4130_v46  ;;  %v1943_v63 = vpop.permute.xlu0 %1942 }
 0x16c   : > { %vm3185_vm11 = vmpackc.low %vm935_vm9, %vm933_vm8  ;;  %v844_v0 = vpop.f32.mrf.mxu0 }
 0x16d   : > { %3186 = vmatprep.mubr.msk.bf16.mxu1 %vm3185_vm11, %v3852_v57  ;;  %vm936_vm1 = vcmp.eq.f32.partialorder %v844_v0, %v4132_v47 }
 0x16e   : > { %v846_v1 = vpop.f32.mrf.mxu0  ;;  %3188 = vmatmul.mubr.msk.bf16.gmra.mxu1 %vm3187_vm12, %v3852_v57 }
 0x16f   : > { %vm937_vm14 = vcmp.eq.f32.partialorder %v846_v1, %v4130_v46 }
 0x170   : > { %v848_v2 = vpop.f32.mrf.mxu0 }
 0x171   : > { %vm938_vm13 = vcmp.eq.f32.partialorder %v848_v2, %v4132_v47  ;;  %v1958_v2 = vpop.permute.xlu1 %1957 }
 0x172   : > { %v850_v4 = vpop.f32.mrf.mxu0  ;;  %vm3191_vm3 = vmpackc.low %vm938_vm13, %vm936_vm1  ;;  %vm2004_vm1 = vcmp.eq.f32.partialorder %v1863_v12, %v4132_v47 }
 0x173   : > { %vm939_vm15 = vcmp.eq.f32.partialorder %v850_v4, %v4130_v46  ;;  %v3231_v24 = vsel %vm2004_vm1, 1.0, %v3853_v23  ;;  %vm2013_vm1 = vcmp.eq.f32.partialorder %v1908_v39, %v4132_v47  ;;  %v1953_v4 = vpop.permute.xlu0 %1952 }
 0x174   : > { %vm3189_vm2 = vmpackc.low %vm939_vm15, %vm937_vm14  ;;  %v854_v5 = vpop.f32.mrf.mxu0  ;;  %v3240_v41 = vsel %vm2013_vm1, 1.0, %v3853_v23 }
 0x175   : > { %3190 = vmatprep.mubr.msk.bf16.mxu1 %vm3189_vm2, %v3852_v57  ;;  %vm940_vm7 = vcmp.eq.f32.partialorder %v854_v5, %v4132_v47  ;;  %vm2005_vm2 = vcmp.eq.f32.partialorder %v1868_v18, %v4132_v47 }
 0x176   : > { %v856_v7 = vpop.f32.mrf.mxu0  ;;  %3192 = vmatmul.mubr.msk.bf16.gmra.mxu1 %vm3191_vm3, %v3852_v57  ;;  %v3232_v25 = vsel %vm2005_vm2, 1.0, %v3853_v23  ;;  %vm2012_vm2 = vcmp.eq.f32.partialorder %v1903_v40, %v4132_v47 }
 0x177   : > { %vm941_vm5 = vcmp.eq.f32.partialorder %v856_v7, %v4130_v46  ;;  %v2098_v27 = vpack.c.bf16 %v3232_v25, %v3231_v24  ;;  %v3239_v42 = vsel %vm2012_vm2, 1.0, %v3853_v23  ;;  %v1963_v12 = vpop.permute.xlu0 %1962 }
 0x178   : > { %v858_v8 = vpop.f32.mrf.mxu0  ;;  %v2102_v45 = vpack.c.bf16 %v3240_v41, %v3239_v42 }
 0x179   : > { %vm942_vm4 = vcmp.eq.f32.partialorder %v858_v8, %v4132_v47 }
 0x17a   : > { %v860_v10 = vpop.f32.mrf.mxu0  ;;  %vm3195_vm9 = vmpackc.low %vm942_vm4, %vm940_vm7 }
 0x17b   : > { %vm943_vm6 = vcmp.eq.f32.partialorder %v860_v10, %v4130_v46 }
 0x17c   : > { %vm3193_vm8 = vmpackc.low %vm943_vm6, %vm941_vm5  ;;  %v864_v11 = vpop.f32.mrf.mxu0 }
 0x17d   : > { %3194 = vmatprep.mubr.msk.bf16.mxu1 %vm3193_vm8, %v3852_v57  ;;  %vm944_vm13 = vcmp.eq.f32.partialorder %v864_v11, %v4132_v47  ;;  %vm2006_vm8 = vcmp.eq.f32.partialorder %v1873_v16, %v4132_v47  ;;  %v1968_v11 = vpop.permute.xlu1 %1967 }
 0x17e   : > { %v866_v14 = vpop.f32.mrf.mxu0  ;;  %3196 = vmatmul.mubr.msk.bf16.gmra.mxu1 %vm3195_vm9, %v3852_v57  ;;  %vm2007_vm9 = vcmp.eq.f32.partialorder %v1878_v21, %v4132_v47 }
 0x17f   : > { %vm945_vm11 = vcmp.eq.f32.partialorder %v866_v14, %v4130_v46  ;;  %v3234_v30 = vsel %vm2007_vm9, 1.0, %v3853_v23  ;;  %vm2021_vm9 = vcmp.eq.f32.partialorder %v1948_v62, %v4132_v47 }
 0x180   : > { %v868_v15 = vpop.f32.mrf.mxu0  ;;  %v3248_v0 = vsel %vm2021_vm9, 1.0, %v3853_v23 }
 0x181   : > { %vm946_vm10 = vcmp.eq.f32.partialorder %v868_v15, %v4132_v47  ;;  %v1978_v16 = vpop.permute.xlu1 %1977 }
 0x182   : > { %v870_v17 = vpop.f32.mrf.mxu0  ;;  %vm3199_vm15 = vmpackc.low %vm946_vm10, %vm944_vm13  ;;  %vm1488_vm13 = vcmask 523264   ;;  %vm2027_vm1 = vcmp.eq.f32.partialorder %v1978_v16, %v4132_v47 }
 0x183   : > { %vm947_vm12 = vcmp.eq.f32.partialorder %v870_v17, %v4130_v46  ;;  %v1973_v17 = vpop.permute.xlu0 %1972 }
 0x184   : > { %vm3197_vm14 = vmpackc.low %vm947_vm12, %vm945_vm11  ;;  %v874_v19 = vpop.f32.mrf.mxu0  ;;  %vm2009_vm11 = vcmp.eq.f32.partialorder %v1888_v28, %v4132_v47  ;;  %vm2008_vm12 = vcmp.eq.f32.partialorder %v1883_v29, %v4132_v47  ;;  %vm2026_vm2 = vcmp.eq.f32.partialorder %v1973_v17, %v4132_v47 }
 0x185   : > { %3198 = vmatprep.mubr.msk.bf16.mxu1 %vm3197_vm14, %v3852_v57  ;;  %vm948_vm6 = vcmp.eq.f32.partialorder %v874_v19, %v4132_v47  ;;  %v3236_v31 = vsel %vm2009_vm11, 1.0, %v3853_v23  ;;  %v3235_v32 = vsel %vm2008_vm12, 1.0, %v3853_v23  ;;  %vm2011_vm14 = vcmp.eq.f32.partialorder %v1898_v33, %v4132_v47 }
 0x186   : > { %v876_v20 = vpop.f32.mrf.mxu0  ;;  %3200 = vmatmul.mubr.msk.bf16.gmra.mxu1 %vm3199_vm15, %v3852_v57  ;;  %v2100_v36 = vpack.c.bf16 %v3236_v31, %v3235_v32  ;;  %vm2010_vm15 = vcmp.eq.f32.partialorder %v1893_v34, %v4132_v47  ;;  %vm2023_vm11 = vcmp.eq.f32.partialorder %v1958_v2, %v4132_v47  ;;  %vm2022_vm12 = vcmp.eq.f32.partialorder %v1953_v4, %v4132_v47  ;;  %v4417_v32 = vld [vmem:[#allocation4] ss:$0 sm:$0xff] }
 0x187   : > { %vm949_vm4 = vcmp.eq.f32.partialorder %v876_v20, %v4130_v46  ;;  %v3237_v37 = vsel %vm2010_vm15, 1.0, %v3853_v23  ;;  %v3250_v7 = vsel %vm2023_vm11, 1.0, %v3853_v23  ;;  %v3249_v8 = vsel %vm2022_vm12, 1.0, %v3853_v23  ;;  %v3692_v2 = vld [vmem:[%s4959_s1 + $0x10] sm:$0xff]  }
 0x188   : > { %v878_v22 = vpop.f32.mrf.mxu0  ;;  %v2107_v10 = vpack.c.bf16 %v3250_v7, %v3249_v8  ;;  %vm2024_vm15 = vcmp.eq.f32.partialorder %v1963_v12, %v4132_v47  ;;  %v3254_v19 = vsel %vm2027_vm1, 1.0, %v3853_v23  ;;  %v3253_v20 = vsel %vm2026_vm2, 1.0, %v3853_v23  ;;  %v3693_v12 = vld [vmem:[%s4959_s1 + $0x28] sm:$0xff]  }
 0x189   : > { %vm950_vm3 = vcmp.eq.f32.partialorder %v878_v22, %v4132_v47  ;;  %v3251_v15 = vsel %vm2024_vm15, 1.0, %v3853_v23  ;;  %v2109_v21 = vpack.c.bf16 %v3254_v19, %v3253_v20  ;;  %v1848_v22 = vpop.permute.xlu1 %1847  ;;  %v1843_v24 = vpop.permute.xlu0 %1842  ;;  %v3695_v20 = vld [vmem:[%s4959_s1 + $0x38] sm:$0xff]   ;;  %vm2802_vm11 = vcmask 289792  }
 0x18a   : > { %v880_v26 = vpop.f32.mrf.mxu0  ;;  %vm3203_vm10 = vmpackc.low %vm950_vm3, %vm948_vm6  ;;  %vm2015_vm3 = vcmp.eq.f32.partialorder %v1918_v43, %v4132_v47  ;;  %vm2016_vm6 = vcmp.eq.f32.partialorder %v1923_v52, %v4132_v47 }
 0x18b   : > { %vm951_vm5 = vcmp.eq.f32.partialorder %v880_v26, %v4130_v46  ;;  %v3233_v46 = vsel %vm2006_vm8, 1.0, %v3853_v23  ;;  %v3242_v48 = vsel %vm2015_vm3, 1.0, %v3853_v23  ;;  %v3243_v54 = vsel %vm2016_vm6, 1.0, %v3853_v23 }
 0x18c   : > { %vm3201_vm7 = vmpackc.low %vm951_vm5, %vm949_vm4  ;;  %v2099_v35 = vpack.c.bf16 %v3234_v30, %v3233_v46  ;;  %vm2014_vm4 = vcmp.eq.f32.partialorder %v1913_v44, %v4132_v47  ;;  %vm2017_vm5 = vcmp.eq.f32.partialorder %v1928_v51, %v4132_v47  ;;  %vm2018_vm8 = vcmp.eq.f32.partialorder %v1933_v56, %v4132_v47 }
 0x18d   : > { %3202 = vmatprep.mubr.msk.bf16.mxu1 %vm3201_vm7, %v3852_v57  ;;  %v3241_v49 = vsel %vm2014_vm4, 1.0, %v3853_v23  ;;  %v3244_v53 = vsel %vm2017_vm5, 1.0, %v3853_v23  ;;  %vm2019_vm7 = vcmp.eq.f32.partialorder %v1938_v55, %v4132_v47  ;;  %v3245_v60 = vsel %vm2018_vm8, 1.0, %v3853_v23  ;;  %v1988_v28 = vpop.permute.xlu1 %1987  ;;  %v1983_v46 = vpop.permute.xlu0 %1982 }
 0x18e   : > { %3204 = vmatmul.mubr.msk.bf16.gmra.mxu1 %vm3203_vm10, %v3852_v57  ;;  %v3238_v57 = vsel %vm2011_vm14, 1.0, %v3853_v23  ;;  %v2103_v50 = vpack.c.bf16 %v3242_v48, %v3241_v49  ;;  %v2104_v58 = vpack.c.bf16 %v3244_v53, %v3243_v54  ;;  %v3246_v59 = vsel %vm2019_vm7, 1.0, %v3853_v23 }
 0x18f   : > { %3536 = vmatprep.mubr.msk.bf16.mxu1 %vm1488_vm13, %v2098_v27  ;;  %v2101_v38 = vpack.c.bf16 %v3238_v57, %v3237_v37  ;;  %v2105_v61 = vpack.c.bf16 %v3246_v59, %v3245_v60  ;;  %vm2020_vm10 = vcmp.eq.f32.partialorder %v1943_v63, %v4132_v47  ;;  %vm2025_vm14 = vcmp.eq.f32.partialorder %v1968_v11, %v4132_v47  ;;  %v3690_v63 = vld [vmem:[%s4959_s1] sm:$0xff]  }
 0x190   : > { %v3247_v1 = vsel %vm2020_vm10, 1.0, %v3853_v23  ;;  %v3252_v14 = vsel %vm2025_vm14, 1.0, %v3853_v23  ;;  %vm2001_vm3 = vcmp.eq.f32.partialorder %v1848_v22, %v4132_v47  ;;  %vm2000_vm4 = vcmp.eq.f32.partialorder %v1843_v24, %v4132_v47  ;;  %2577 = vrot.lane.b32.xlu0 %v3690_v63, %s3854_s11  ;;  %v3696_v22 = vld [vmem:[%s4959_s1 + $0x30] sm:$0xff]  }
 0x191   : > { %v2106_v5 = vpack.c.bf16 %v3248_v0, %v3247_v1  ;;  %v2108_v18 = vpack.c.bf16 %v3252_v14, %v3251_v15  ;;  %v4410_v26 = vsel %vm2001_vm3, 1.0, %v3853_v23  ;;  %v4413_v27 = vsel %vm2000_vm4, 1.0, %v3853_v23  ;;  %v1858_v34 = vpop.permute.xlu1 %1857  ;;  %v3691_v1 = vld [vmem:[%s4959_s1 + $0x18] sm:$0xff]   ;;  %v3694_v15 = vld [vmem:[%s4959_s1 + $0x20] sm:$0xff]  }
 0x192   : > { %v2096_v29 = vpack.c.bf16 %v4410_v26, %v4413_v27  ;;  %vm2029_vm5 = vcmp.eq.f32.partialorder %v1988_v28, %v4132_v47  ;;  %vm2028_vm6 = vcmp.eq.f32.partialorder %v1983_v46, %v4132_v47  ;;  %vm2003_vm7 = vcmp.eq.f32.partialorder %v1858_v34, %v4132_v47 }
 0x193   : > { %v3256_v57 = vsel %vm2029_vm5, 1.0, %v3853_v23  ;;  %v3255_v37 = vsel %vm2028_vm6, 1.0, %v3853_v23 }
 0x194   : > { %v2110_v41 = vpack.c.bf16 %v3256_v57, %v3255_v37  ;;  %2581 = vrot.lane.b32.xlu0 %v3692_v2, %s3854_s11 }
 0x196   : > { %3537 = vmatmul.mubr.msk.bf16.vlgmr.msra.gmra.mxu1 %vm1488_vm13, %v2099_v35  ;;  %v1853_v35 = vpop.permute.xlu0 %1852 }
 0x197   : > { %3540 = vmatprep.mubr.msk.bf16.mxu1 %vm1488_vm13, %v2100_v36  ;;  %vm2002_vm8 = vcmp.eq.f32.partialorder %v1853_v35, %v4132_v47 }
 0x198   : > { %v4430_v42 = vsel %vm2002_vm8, 1.0, %v3853_v23  ;;  %2585 = vrot.lane.b32.xlu0 %v3694_v15, %s3854_s11 }
 0x19a   : > { %v1993_v49 = vpop.permute.xlu0 %1992 }
 0x19b   : > { %vm2030_vm10 = vcmp.eq.f32.partialorder %v1993_v49, %v4132_v47 }
 0x19c   : > { %v3257_v55 = vsel %vm2030_vm10, 1.0, %v3853_v23  ;;  %2589 = vrot.lane.b32.xlu0 %v3696_v22, %s3854_s11 }
 0x19e   : > { %3541 = vmatmul.mubr.msk.bf16.gmra.mxu1 %vm1488_vm13, %v2101_v38  ;;  %v4425_v38 = vsel %vm2003_vm7, 1.0, %v3853_v23 }
 0x19f   : > { %3544 = vmatprep.mubr.msk.bf16.mxu1 %vm1488_vm13, %v2102_v45  ;;  %v2097_v44 = vpack.c.bf16 %v4425_v38, %v4430_v42  ;;  %v1998_v45 = vpop.permute.xlu1 %1997 }
 0x1a0   : > { %vm2031_vm9 = vcmp.eq.f32.partialorder %v1998_v45, %v4132_v47  ;;  %v3689_v47 = vld [vmem:[%s4959_s1 + $0x8] sm:$0xff]  }
 0x1a1   : > { %v3258_v51 = vsel %vm2031_vm9, 1.0, %v3853_v23  ;;  %2579 = vrot.lane.b32.xlu1 %v3689_v47, %s3854_s11 }
 0x1a5   : > { %2583 = vrot.lane.b32.xlu1 %v3691_v1, %s3854_s11 }
 0x1a6   : > { %3545 = vmatmul.mubr.msk.bf16.gmra.mxu1 %vm1488_vm13, %v2103_v50 }
 0x1a7   : > { %3548 = vmatprep.mubr.msk.bf16.mxu1 %vm1488_vm13, %v2104_v58  ;;  %v2111_v58 = vpack.c.bf16 %v3258_v51, %v3257_v55 }
 0x1a9   : > { %2587 = vrot.lane.b32.xlu1 %v3693_v12, %s3854_s11 }
 0x1ad   : > { %2591 = vrot.lane.b32.xlu1 %v3695_v20, %s3854_s11 }
 0x1ae   : > { %3549 = vmatmul.mubr.msk.bf16.gmra.mxu1 %vm1488_vm13, %v2105_v61 }
 0x1af   : > { %3552 = vmatprep.mubr.msk.bf16.mxu1 %vm1488_vm13, %v2106_v5 }
 0x1b6   : > { %3553 = vmatmul.mubr.msk.bf16.gmra.mxu1 %vm1488_vm13, %v2107_v10 }
 0x1b7   : > { %3556 = vmatprep.mubr.msk.bf16.mxu1 %vm1488_vm13, %v2108_v18 }
 0x1be   : > { %3557 = vmatmul.mubr.msk.bf16.gmra.mxu1 %vm1488_vm13, %v2109_v21 }
 0x1bf   : > { %3560 = vmatprep.mubr.msk.bf16.mxu1 %vm1488_vm13, %v2110_v41 }
 0x1c6   : > { %3561 = vmatmul.mubr.msk.bf16.gmra.mxu1 %vm1488_vm13, %v2111_v58 }
 0x1d6   : > { %v3348_v25 = vpop.f32.mrf.mxu1 }
 0x1d8   : > { %v3349_v30 = vpop.f32.mrf.mxu1 }
 0x1d9   : > { %v3350_v31 = vadd.f32 %v3349_v30, %v3348_v25 }
 0x1da   : > { %v3351_v33 = vpop.f32.mrf.mxu1 }
 0x1db   : > { %v1282_v39 = vadd.f32 %v3350_v31, %v4417_v32 }
 0x1dc   : > { %v3352_v36 = vpop.f32.mrf.mxu1 }
 0x1dd   : > { %v3353_v40 = vadd.f32 %v3352_v36, %v3351_v33  ;;  %v1408_v52 = vmax.f32 %v1282_v39, 0.0 }
 0x1de   : > { %v3354_v43 = vpop.f32.mrf.mxu1 }
 0x1df   : > { %v1285_v48 = vadd.f32 %v3353_v40, %v4417_v32 }
 0x1e0   : > { %v3355_v50 = vpop.f32.mrf.mxu1 }
 0x1e1   : > { %v1409_v53 = vmax.f32 %v1285_v48, 0.0  ;;  %v3356_v54 = vadd.f32 %v3355_v50, %v3354_v43 }
 0x1e2   : > { %v3357_v56 = vpop.f32.mrf.mxu1 }
 0x1e3   : > { %v1440_v59 = vpack.c.bf16 %v1409_v53, %v1408_v52  ;;  %v1290_v61 = vadd.f32 %v3356_v54, %v4417_v32 }
 0x1e4   : > { %v3358_v60 = vpop.f32.mrf.mxu1 }
 0x1e5   : > { %v3359_v62 = vadd.f32 %v3358_v60, %v3357_v56  ;;  %3492 = vmatprep.mubr.msk.bf16.mxu0 %vm1488_vm13, %v1440_v59  ;;  %v1410_v5 = vmax.f32 %v1290_v61, 0.0 }
 0x1e6   : > { %v3360_v23 = vpop.f32.mrf.mxu1 }
 0x1e7   : > { %v1293_v0 = vadd.f32 %v3359_v62, %v4417_v32 }
 0x1e8   : > { %v3361_v4 = vpop.f32.mrf.mxu1 }
 0x1e9   : > { %v1411_v7 = vmax.f32 %v1293_v0, 0.0  ;;  %v3362_v8 = vadd.f32 %v3361_v4, %v3360_v23 }
 0x1ea   : > { %v3363_v10 = vpop.f32.mrf.mxu1 }
 0x1eb   : > { %v1441_v11 = vpack.c.bf16 %v1411_v7, %v1410_v5  ;;  %v1298_v16 = vadd.f32 %v3362_v8, %v4417_v32 }
 0x1ec   : > { %v3364_v14 = vpop.f32.mrf.mxu1 }
 0x1ed   : > { %v3365_v17 = vadd.f32 %v3364_v14, %v3363_v10  ;;  %3493 = vmatmul.mubr.msk.bf16.vlgmr.msra.gmra.mxu0 %vm1488_vm13, %v1441_v11  ;;  %v1412_v24 = vmax.f32 %v1298_v16, 0.0 }
 0x1ee   : > { %v3366_v18 = vpop.f32.mrf.mxu1  ;;  %3525 = vmatpush3.bf16.msra.mxu0 %v4303_v3 }
 0x1ef   : > { %v1301_v19 = vadd.f32 %v3365_v17, %v4417_v32  ;;  %3526 = vmatprep.subr.bf16.mxu0 %v4314_v6 }
 0x1f0   : > { %v3367_v21 = vpop.f32.mrf.mxu1 }
 0x1f1   : > { %v1413_v25 = vmax.f32 %v1301_v19, 0.0  ;;  %v3368_v3 = vadd.f32 %v3367_v21, %v3366_v18 }
 0x1f2   : > { %v3369_v28 = vpop.f32.mrf.mxu1  ;;  %3527 = vmatpush3.bf16.msra.mxu0 %v4314_v6 }
 0x1f3   : > { %v1442_v46 = vpack.c.bf16 %v1413_v25, %v1412_v24  ;;  %3528 = vmatprep.subr.bf16.mxu0 %v4320_v9  ;;  %v1306_v31 = vadd.f32 %v3368_v3, %v4417_v32 }
 0x1f4   : > { %v3370_v30 = vpop.f32.mrf.mxu1 }
 0x1f5   : > { %v3371_v33 = vadd.f32 %v3370_v30, %v3369_v28  ;;  %3496 = vmatprep.mubr.msk.bf16.mxu0 %vm1488_vm13, %v1442_v46  ;;  %v1414_v36 = vmax.f32 %v1306_v31, 0.0 }
 0x1f6   : > { %v3372_v34 = vpop.f32.mrf.mxu1  ;;  %3529 = vmatpush3.bf16.msra.mxu0 %v4320_v9 }
 0x1f7   : > { %v1309_v35 = vadd.f32 %v3371_v33, %v4417_v32  ;;  %3530 = vmatprep.subr.bf16.mxu0 %v4330_v13 }
 0x1f8   : > { %v3373_v6 = vpop.f32.mrf.mxu1 }
 0x1f9   : > { %v1415_v57 = vmax.f32 %v1309_v35, 0.0  ;;  %v3374_v37 = vadd.f32 %v3373_v6, %v3372_v34 }
 0x1fa   : > { %v3375_v39 = vpop.f32.mrf.mxu1  ;;  %3531 = vmatpush3.bf16.msra.mxu0 %v4330_v13 }
 0x1fb   : > { %v1443_v40 = vpack.c.bf16 %v1415_v57, %v1414_v36  ;;  %v1314_v43 = vadd.f32 %v3374_v37, %v4417_v32 }
 0x1fc   : > { %v3376_v41 = vpop.f32.mrf.mxu1 }
 0x1fd   : > { %v3377_v45 = vadd.f32 %v3376_v41, %v3375_v39  ;;  %3497 = vmatmul.mubr.msk.bf16.gmra.mxu0 %vm1488_vm13, %v1443_v40  ;;  %v1416_v50 = vmax.f32 %v1314_v43, 0.0 }
 0x1fe   : > { %v3378_v48 = vpop.f32.mrf.mxu1 }
 0x1ff   : > { %v1317_v9 = vadd.f32 %v3377_v45, %v4417_v32 }
 0x200   : > { %v3379_v49 = vpop.f32.mrf.mxu1 }
 0x201   : > { %v1417_v51 = vmax.f32 %v1317_v9, 0.0  ;;  %v3380_v52 = vadd.f32 %v3379_v49, %v3378_v48 }
 0x202   : > { %v3381_v53 = vpop.f32.mrf.mxu1 }
 0x203   : > { %v1444_v54 = vpack.c.bf16 %v1417_v51, %v1416_v50  ;;  %v1322_v56 = vadd.f32 %v3380_v52, %v4417_v32 }
 0x204   : > { %v3382_v55 = vpop.f32.mrf.mxu1 }
 0x205   : > { %v3383_v13 = vadd.f32 %v3382_v55, %v3381_v53  ;;  %3500 = vmatprep.mubr.msk.bf16.mxu0 %vm1488_vm13, %v1444_v54  ;;  %v1418_v61 = vmax.f32 %v1322_v56, 0.0  ;;  %v3697_v54 = vld [vmem:[%s4959_s1 + $0x48] sm:$0xff]  }
 0x206   : > { %v3384_v58 = vpop.f32.mrf.mxu1  ;;  %2595 = vrot.lane.b32.xlu1 %v3697_v54, %s3854_s11 }
 0x207   : > { %v1325_v59 = vadd.f32 %v3383_v13, %v4417_v32 }
 0x208   : > { %v3385_v60 = vpop.f32.mrf.mxu1 }
 0x209   : > { %v1419_v62 = vmax.f32 %v1325_v59, 0.0  ;;  %v3386_v47 = vadd.f32 %v3385_v60, %v3384_v58  ;;  %v3698_v58 = vld [vmem:[%s4959_s1 + $0x40] sm:$0xff]  }
 0x20a   : > { %v3387_v63 = vpop.f32.mrf.mxu1  ;;  %2593 = vrot.lane.b32.xlu0 %v3698_v58, %s3854_s11 }
 0x20b   : > { %v1445_v23 = vpack.c.bf16 %v1419_v62, %v1418_v61  ;;  %v1330_v1 = vadd.f32 %v3386_v47, %v4417_v32  ;;  %v3699_v61 = vld [vmem:[%s4959_s1 + $0x58] sm:$0xff]  }
 0x20c   : > { %v3388_v0 = vpop.f32.mrf.mxu1  ;;  %2599 = vrot.lane.b32.xlu1 %v3699_v61, %s3854_s11 }
 0x20d   : > { %v3389_v2 = vadd.f32 %v3388_v0, %v3387_v63  ;;  %3501 = vmatmul.mubr.msk.bf16.gmra.mxu0 %vm1488_vm13, %v1445_v23  ;;  %v1420_v8 = vmax.f32 %v1330_v1, 0.0  ;;  %v3700_v0 = vld [vmem:[%s4959_s1 + $0x50] sm:$0xff]  }
 0x20e   : > { %v3390_v4 = vpop.f32.mrf.mxu1  ;;  %2597 = vrot.lane.b32.xlu0 %v3700_v0, %s3854_s11  ;;  %v4561_v0 = vld [vmem:[#allocation7] ss:$0 sm:$0xff] }
 0x20f   : > { %v1333_v5 = vadd.f32 %v3389_v2, %v4417_v32 }
 0x210   : > { %v3391_v7 = vpop.f32.mrf.mxu1 }
 0x211   : > { %v1421_v10 = vmax.f32 %v1333_v5, 0.0  ;;  %v3392_v11 = vadd.f32 %v3391_v7, %v3390_v4  ;;  %v3701_v4 = vld [vmem:[%s4959_s1 + $0x68] sm:$0xff]  }
 0x212   : > { %v3393_v12 = vpop.f32.mrf.mxu1  ;;  %2603 = vrot.lane.b32.xlu1 %v3701_v4, %s3854_s11 }
 0x213   : > { %v1446_v14 = vpack.c.bf16 %v1421_v10, %v1420_v8  ;;  %v1338_v16 = vadd.f32 %v3392_v11, %v4417_v32  ;;  %v3702_v10 = vld [vmem:[%s4959_s1 + $0x60] sm:$0xff]  }
 0x214   : > { %v3394_v15 = vpop.f32.mrf.mxu1  ;;  %2601 = vrot.lane.b32.xlu0 %v3702_v10, %s3854_s11 }
 0x215   : > { %v3395_v17 = vadd.f32 %v3394_v15, %v3393_v12  ;;  %3504 = vmatprep.mubr.msk.bf16.mxu0 %vm1488_vm13, %v1446_v14  ;;  %v1422_v21 = vmax.f32 %v1338_v16, 0.0 }
 0x216   : > { %v3396_v18 = vpop.f32.mrf.mxu1 }
 0x217   : > { %v1341_v19 = vadd.f32 %v3395_v17, %v4417_v32 }
 0x218   : > { %v3397_v20 = vpop.f32.mrf.mxu1 }
 0x219   : > { %v1423_v22 = vmax.f32 %v1341_v19, 0.0  ;;  %v3398_v24 = vadd.f32 %v3397_v20, %v3396_v18 }
 0x21a   : > { %v3399_v25 = vpop.f32.mrf.mxu1 }
 0x21b   : > { %v1447_v3 = vpack.c.bf16 %v1423_v22, %v1422_v21  ;;  %v1346_v46 = vadd.f32 %v3398_v24, %v4417_v32 }
 0x21c   : > { %v3400_v28 = vpop.f32.mrf.mxu1 }
 0x21d   : > { %v3401_v30 = vadd.f32 %v3400_v28, %v3399_v25  ;;  %3505 = vmatmul.mubr.msk.bf16.gmra.mxu0 %vm1488_vm13, %v1447_v3  ;;  %v1424_v35 = vmax.f32 %v1346_v46, 0.0 }
 0x21e   : > { %v3402_v31 = vpop.f32.mrf.mxu1 }
 0x21f   : > { %v1349_v33 = vadd.f32 %v3401_v30, %v4417_v32 }
 0x220   : > { %v3403_v34 = vpop.f32.mrf.mxu1 }
 0x221   : > { %v1425_v6 = vmax.f32 %v1349_v33, 0.0  ;;  %v3404_v36 = vadd.f32 %v3403_v34, %v3402_v31 }
 0x222   : > { %v3405_v57 = vpop.f32.mrf.mxu1 }
 0x223   : > { %v1448_v37 = vpack.c.bf16 %v1425_v6, %v1424_v35  ;;  %v1354_v40 = vadd.f32 %v3404_v36, %v4417_v32 }
 0x224   : > { %v3406_v39 = vpop.f32.mrf.mxu1 }
 0x225   : > { %v3407_v41 = vadd.f32 %v3406_v39, %v3405_v57  ;;  %3508 = vmatprep.mubr.msk.bf16.mxu0 %vm1488_vm13, %v1448_v37  ;;  %v1426_v9 = vmax.f32 %v1354_v40, 0.0 }
 0x226   : > { %v3408_v43 = vpop.f32.mrf.mxu1 }
 0x227   : > { %v1357_v45 = vadd.f32 %v3407_v41, %v4417_v32 }
 0x228   : > { %v3409_v48 = vpop.f32.mrf.mxu1 }
 0x229   : > { %v1427_v49 = vmax.f32 %v1357_v45, 0.0  ;;  %v3410_v50 = vadd.f32 %v3409_v48, %v3408_v43 }
 0x22a   : > { %v3411_v51 = vpop.f32.mrf.mxu1 }
 0x22b   : > { %v1449_v52 = vpack.c.bf16 %v1427_v49, %v1426_v9  ;;  %v1362_v55 = vadd.f32 %v3410_v50, %v4417_v32 }
 0x22c   : > { %v3412_v53 = vpop.f32.mrf.mxu1 }
 0x22d   : > { %v3413_v56 = vadd.f32 %v3412_v53, %v3411_v51  ;;  %3509 = vmatmul.mubr.msk.bf16.gmra.mxu0 %vm1488_vm13, %v1449_v52  ;;  %v1428_v62 = vmax.f32 %v1362_v55, 0.0 }
 0x22e   : > { %v3414_v13 = vpop.f32.mrf.mxu1 }
 0x22f   : > { %v1365_v59 = vadd.f32 %v3413_v56, %v4417_v32 }
 0x230   : > { %v3415_v60 = vpop.f32.mrf.mxu1 }
 0x231   : > { %v1429_v47 = vmax.f32 %v1365_v59, 0.0  ;;  %v3416_v63 = vadd.f32 %v3415_v60, %v3414_v13 }
 0x232   : > { %v3417_v23 = vpop.f32.mrf.mxu1 }
 0x233   : > { %v1450_v1 = vpack.c.bf16 %v1429_v47, %v1428_v62  ;;  %v1370_v5 = vadd.f32 %v3416_v63, %v4417_v32  ;;  %v4558_v63 = vld [vmem:[#allocation6] ss:$0 sm:$0xff] }
 0x234   : > { %v3418_v2 = vpop.f32.mrf.mxu1 }
 0x235   : > { %v3419_v7 = vadd.f32 %v3418_v2, %v3417_v23  ;;  %3512 = vmatprep.mubr.msk.bf16.mxu0 %vm1488_vm13, %v1450_v1  ;;  %v1430_v14 = vmax.f32 %v1370_v5, 0.0 }
 0x236   : > { %v3420_v8 = vpop.f32.mrf.mxu1 }
 0x237   : > { %v1373_v11 = vadd.f32 %v3419_v7, %v4417_v32 }
 0x238   : > { %v3421_v12 = vpop.f32.mrf.mxu1 }
 0x239   : > { %v1431_v15 = vmax.f32 %v1373_v11, 0.0  ;;  %v3422_v16 = vadd.f32 %v3421_v12, %v3420_v8 }
 0x23a   : > { %v3423_v17 = vpop.f32.mrf.mxu1 }
 0x23b   : > { %v1451_v18 = vpack.c.bf16 %v1431_v15, %v1430_v14  ;;  %v1378_v20 = vadd.f32 %v3422_v16, %v4417_v32 }
 0x23c   : > { %v3424_v19 = vpop.f32.mrf.mxu1 }
 0x23d   : > { %v3425_v21 = vadd.f32 %v3424_v19, %v3423_v17  ;;  %3513 = vmatmul.mubr.msk.bf16.gmra.mxu0 %vm1488_vm13, %v1451_v18  ;;  %v1432_v3 = vmax.f32 %v1378_v20, 0.0 }
 0x23e   : > { %v3426_v22 = vpop.f32.mrf.mxu1 }
 0x23f   : > { %v1381_v24 = vadd.f32 %v3425_v21, %v4417_v32 }
 0x240   : > { %v3427_v25 = vpop.f32.mrf.mxu1 }
 0x241   : > { %v1433_v28 = vmax.f32 %v1381_v24, 0.0  ;;  %v3428_v46 = vadd.f32 %v3427_v25, %v3426_v22 }
 0x242   : > { %v3429_v30 = vpop.f32.mrf.mxu1 }
 0x243   : > { %v1452_v31 = vpack.c.bf16 %v1433_v28, %v1432_v3  ;;  %v1386_v34 = vadd.f32 %v3428_v46, %v4417_v32 }
 0x244   : > { %v3430_v33 = vpop.f32.mrf.mxu1 }
 0x245   : > { %v3431_v35 = vadd.f32 %v3430_v33, %v3429_v30  ;;  %3516 = vmatprep.mubr.msk.bf16.mxu0 %vm1488_vm13, %v1452_v31  ;;  %v1434_v37 = vmax.f32 %v1386_v34, 0.0 }
 0x246   : > { %v3432_v6 = vpop.f32.mrf.mxu1 }
 0x247   : > { %v1389_v36 = vadd.f32 %v3431_v35, %v4417_v32 }
 0x248   : > { %v3433_v57 = vpop.f32.mrf.mxu1 }
 0x249   : > { %v1435_v39 = vmax.f32 %v1389_v36, 0.0  ;;  %v3434_v40 = vadd.f32 %v3433_v57, %v3432_v6 }
 0x24a   : > { %v3435_v41 = vpop.f32.mrf.mxu1 }
 0x24b   : > { %v1453_v43 = vpack.c.bf16 %v1435_v39, %v1434_v37  ;;  %v1394_v48 = vadd.f32 %v3434_v40, %v4417_v32 }
 0x24c   : > { %v3436_v45 = vpop.f32.mrf.mxu1 }
 0x24d   : > { %v3437_v9 = vadd.f32 %v3436_v45, %v3435_v41  ;;  %3517 = vmatmul.mubr.msk.bf16.gmra.mxu0 %vm1488_vm13, %v1453_v43  ;;  %v1436_v52 = vmax.f32 %v1394_v48, 0.0 }
 0x24e   : > { %v3438_v49 = vpop.f32.mrf.mxu1 }
 0x24f   : > { %v1397_v50 = vadd.f32 %v3437_v9, %v4417_v32 }
 0x250   : > { %v3439_v51 = vpop.f32.mrf.mxu1 }
 0x251   : > { %v1437_v53 = vmax.f32 %v1397_v50, 0.0  ;;  %v3440_v54 = vadd.f32 %v3439_v51, %v3438_v49 }
 0x252   : > { %v3441_v55 = vpop.f32.mrf.mxu1 }
 0x253   : > { %v1454_v56 = vpack.c.bf16 %v1437_v53, %v1436_v52  ;;  %v1402_v58 = vadd.f32 %v3440_v54, %v4417_v32 }
 0x254   : > { %v3442_v13 = vpop.f32.mrf.mxu1 }
 0x255   : > { %v3443_v59 = vadd.f32 %v3442_v13, %v3441_v55  ;;  %3520 = vmatprep.mubr.msk.bf16.mxu0 %vm1488_vm13, %v1454_v56  ;;  %v1438_v61 = vmax.f32 %v1402_v58, 0.0 }
 0x256   : > { %v3538_v15 = vpop.f32.mrf.mxu1 }
 0x257   : > { %v1405_v60 = vadd.f32 %v3443_v59, %v4417_v32 }
 0x258   : > { %v2242_v19 = vpop.f32.mrf.mxu1 }
 0x259   : > { %v1439_v62 = vmax.f32 %v1405_v60, 0.0 }
 0x25a   : > { %v3539_v28 = vpop.f32.mrf.mxu1 }
 0x25b   : > { %v1455_v47 = vpack.c.bf16 %v1439_v62, %v1438_v61 }
 0x25c   : > { %v2245_v6 = vpop.f32.mrf.mxu1 }
 0x25d   : > { %3521 = vmatmul.mubr.msk.bf16.gmra.mxu0 %vm1488_vm13, %v1455_v47 }
 0x25e   : > { %3532 = vmatprep.mubr.msk.bf16.mxu0 %vm1488_vm13, %v2096_v29  ;;  %v3542_v48 = vpop.f32.mrf.mxu1 }
 0x260   : > { %v2258_v52 = vpop.f32.mrf.mxu1 }
 0x262   : > { %v3543_v59 = vpop.f32.mrf.mxu1 }
 0x265   : > { %3533 = vmatmul.mubr.msk.bf16.vlgmr.msra.gmra.mxu0 %vm1488_vm13, %v2097_v44  ;;  %vm2657_vm13 = vcmask 261120  }
 0x2ad   : > { %v3494_v23 = vpop.f32.mrf.mxu0 }
 0x2ae   : > { %v1707_v32 = vmul.f32 %v3494_v23, %v4558_v63 }
 0x2af   : > { %v1571_v1 = vpop.f32.mrf.mxu0 }
 0x2b0   : > { %v1705_v2 = vmul.f32 %v4558_v63, %v1571_v1  ;;  %v4565_v26 = vadd.f32 %v4561_v0, %v1707_v32  ;;  %v2261_v1 = vpop.f32.mrf.mxu1 }
 0x2b1   : > { %v3495_v4 = vpop.f32.mrf.mxu0 }
 0x2b2   : > { %v1708_v27 = vmul.f32 %v3495_v4, %v4558_v63  ;;  %v4569_v38 = vadd.f32 %v4561_v0, %v1705_v2  ;;  %v1778_v5 = vmax.f32 %v4565_v26, 0.0  ;;  %v3703_v26 = vld [vmem:[%s4959_s1 + $0x78] sm:$0xff]  }
 0x2b3   : > { %v1574_v29 = vpop.f32.mrf.mxu0 }
 0x2b4   : > { %v4572_v42 = vadd.f32 %v4561_v0, %v1708_v27  ;;  %v1706_v44 = vmul.f32 %v4558_v63, %v1574_v29  ;;  %v4970_v10 = vmax.f32 %v4569_v38, 0.0 }
 0x2b6   : > { %v4971_v7 = vmax.f32 %v4572_v42, 0.0  ;;  %v4578_v8 = vadd.f32 %v4561_v0, %v1706_v44 }
 0x2b8   : > { %v4969_v11 = vmax.f32 %v4578_v8, 0.0  ;;  %v2402_v12 = vpack.c.bf16 %v4971_v7, %v1778_v5 }
 0x2ba   : > { %2467 = vrot.lane.b32.xlu1 %v2402_v12, %s3855_s28  ;;  %v2401_v14 = vpack.c.bf16 %v4969_v11, %v4970_v10 }
 0x2bc   : > { %2465 = vrot.lane.b32.xlu0 %v2401_v14, %s3855_s28 }
 0x2bd   : > { %v3498_v16 = vpop.f32.mrf.mxu0 }
 0x2be   : > { %v1711_v17 = vmul.f32 %v3498_v16, %v4558_v63  ;;  %v3546_v16 = vpop.f32.mrf.mxu1 }
 0x2bf   : > { %v1587_v18 = vpop.f32.mrf.mxu0 }
 0x2c0   : > { %v1750_v20 = vadd.f32 %v4561_v0, %v1711_v17  ;;  %v1709_v21 = vmul.f32 %v4558_v63, %v1587_v18 }
 0x2c1   : > { %v3499_v22 = vpop.f32.mrf.mxu0 }
 0x2c2   : > { %v1748_v24 = vadd.f32 %v4561_v0, %v1709_v21  ;;  %v1712_v25 = vmul.f32 %v3499_v22, %v4558_v63  ;;  %v1782_v31 = vmax.f32 %v1750_v20, 0.0  ;;  %v2274_v21 = vpop.f32.mrf.mxu1 }
 0x2c3   : > { %v1590_v3 = vpop.f32.mrf.mxu0 }
 0x2c4   : > { %v1751_v46 = vadd.f32 %v4561_v0, %v1712_v25  ;;  %v1710_v30 = vmul.f32 %v4558_v63, %v1590_v3  ;;  %v1780_v34 = vmax.f32 %v1748_v24, 0.0  ;;  %v4600_v36 = vmul.f32 %v3538_v15, %v1782_v31 }
 0x2c6   : > { %v1749_v33 = vadd.f32 %v4561_v0, %v1710_v30  ;;  %v1783_v35 = vmax.f32 %v1751_v46, 0.0  ;;  %v4604_v40 = vmul.f32 %v2242_v19, %v1780_v34  ;;  %v3547_v30 = vpop.f32.mrf.mxu1 }
 0x2c8   : > { %v4602_v57 = vmul.f32 %v3539_v28, %v1783_v35  ;;  %v1781_v37 = vmax.f32 %v1749_v33, 0.0  ;;  %v2404_v39 = vpack.c.bf16 %v1783_v35, %v1782_v31 }
 0x2ca   : > { %v4608_v43 = vmul.f32 %v2245_v6, %v1781_v37  ;;  %2471 = vrot.lane.b32.xlu1 %v2404_v39, %s3855_s28  ;;  %v2403_v45 = vpack.c.bf16 %v1781_v37, %v1780_v34  ;;  %v2277_v39 = vpop.f32.mrf.mxu1 }
 0x2cc   : > { %2469 = vrot.lane.b32.xlu0 %v2403_v45, %s3855_s28 }
 0x2cd   : > { %v3502_v49 = vpop.f32.mrf.mxu0 }
 0x2ce   : > { %v1715_v50 = vmul.f32 %v3502_v49, %v4558_v63 }
 0x2cf   : > { %v1603_v51 = vpop.f32.mrf.mxu0 }
 0x2d0   : > { %v1754_v53 = vadd.f32 %v4561_v0, %v1715_v50  ;;  %v1713_v54 = vmul.f32 %v4558_v63, %v1603_v51 }
 0x2d1   : > { %v3503_v55 = vpop.f32.mrf.mxu0 }
 0x2d2   : > { %v1752_v56 = vadd.f32 %v4561_v0, %v1713_v54  ;;  %v1716_v13 = vmul.f32 %v3503_v55, %v4558_v63  ;;  %v1786_v62 = vmax.f32 %v1754_v53, 0.0  ;;  %v3550_v55 = vpop.f32.mrf.mxu1 }
 0x2d3   : > { %v1606_v58 = vpop.f32.mrf.mxu0 }
 0x2d4   : > { %v1755_v60 = vadd.f32 %v4561_v0, %v1716_v13  ;;  %v1714_v61 = vmul.f32 %v4558_v63, %v1606_v58  ;;  %v1784_v23 = vmax.f32 %v1752_v56, 0.0  ;;  %v4622_v2 = vmul.f32 %v3542_v48, %v1786_v62 }
 0x2d6   : > { %v1753_v47 = vadd.f32 %v4561_v0, %v1714_v61  ;;  %v1787_v32 = vmax.f32 %v1755_v60, 0.0  ;;  %v4626_v44 = vmul.f32 %v2258_v52, %v1784_v23  ;;  %v2290_v60 = vpop.f32.mrf.mxu1 }
 0x2d8   : > { %v4624_v4 = vmul.f32 %v3543_v59, %v1787_v32  ;;  %v1785_v27 = vmax.f32 %v1753_v47, 0.0  ;;  %v2406_v29 = vpack.c.bf16 %v1787_v32, %v1786_v62 }
 0x2da   : > { %v4630_v14 = vmul.f32 %v2261_v1, %v1785_v27  ;;  %2475 = vrot.lane.b32.xlu1 %v2406_v29, %s3855_s28  ;;  %v2405_v15 = vpack.c.bf16 %v1785_v27, %v1784_v23  ;;  %v3551_v27 = vpop.f32.mrf.mxu1 }
 0x2dc   : > { %2473 = vrot.lane.b32.xlu0 %v2405_v15, %s3855_s28 }
 0x2dd   : > { %v3506_v18 = vpop.f32.mrf.mxu0 }
 0x2de   : > { %v1719_v19 = vmul.f32 %v3506_v18, %v4558_v63 }
 0x2df   : > { %v1619_v20 = vpop.f32.mrf.mxu0 }
 0x2e0   : > { %v1758_v22 = vadd.f32 %v4561_v0, %v1719_v19  ;;  %v1717_v24 = vmul.f32 %v4558_v63, %v1619_v20 }
 0x2e1   : > { %v3507_v25 = vpop.f32.mrf.mxu0 }
 0x2e2   : > { %v1756_v3 = vadd.f32 %v4561_v0, %v1717_v24  ;;  %v1720_v28 = vmul.f32 %v3507_v25, %v4558_v63  ;;  %v1790_v34 = vmax.f32 %v1758_v22, 0.0 }
 0x2e3   : > { %v1622_v46 = vpop.f32.mrf.mxu0 }
 0x2e4   : > { %v1759_v31 = vadd.f32 %v4561_v0, %v1720_v28  ;;  %v1718_v33 = vmul.f32 %v4558_v63, %v1622_v46  ;;  %v1788_v6 = vmax.f32 %v1756_v3, 0.0  ;;  %v4644_v45 = vmul.f32 %v3546_v16, %v1790_v34 }
 0x2e6   : > { %v1757_v35 = vadd.f32 %v4561_v0, %v1718_v33  ;;  %v1791_v37 = vmax.f32 %v1759_v31, 0.0  ;;  %v4648_v51 = vmul.f32 %v2274_v21, %v1788_v6  ;;  %v2293_v21 = vpop.f32.mrf.mxu1 }
 0x2e8   : > { %v4646_v48 = vmul.f32 %v3547_v30, %v1791_v37  ;;  %v1789_v49 = vmax.f32 %v1757_v35, 0.0  ;;  %v2408_v50 = vpack.c.bf16 %v1791_v37, %v1790_v34  ;;  %v3554_v33 = vpop.f32.mrf.mxu1 }
 0x2ea   : > { %v4652_v53 = vmul.f32 %v2277_v39, %v1789_v49  ;;  %2479 = vrot.lane.b32.xlu1 %v2408_v50, %s3855_s28  ;;  %v2407_v54 = vpack.c.bf16 %v1789_v49, %v1788_v6  ;;  %v2306_v39 = vpop.f32.mrf.mxu1 }
 0x2ec   : > { %2477 = vrot.lane.b32.xlu0 %v2407_v54, %s3855_s28 }
 0x2ed   : > { %v3510_v13 = vpop.f32.mrf.mxu0 }
 0x2ee   : > { %v1723_v58 = vmul.f32 %v3510_v13, %v4558_v63 }
 0x2ef   : > { %v1635_v59 = vpop.f32.mrf.mxu0 }
 0x2f0   : > { %v1762_v61 = vadd.f32 %v4561_v0, %v1723_v58  ;;  %v1721_v62 = vmul.f32 %v4558_v63, %v1635_v59  ;;  %v4685_v58 = vpop.permute.xlu1 %2579 }
 0x2f1   : > { %v3511_v47 = vpop.f32.mrf.mxu0 }
 0x2f2   : > { %v1760_v23 = vadd.f32 %v4561_v0, %v1721_v62  ;;  %v1724_v32 = vmul.f32 %v3511_v47, %v4558_v63  ;;  %v1794_v16 = vmax.f32 %v1762_v61, 0.0 }
 0x2f3   : > { %v1638_v1 = vpop.f32.mrf.mxu0 }
 0x2f4   : > { %v1763_v29 = vadd.f32 %v4561_v0, %v1724_v32  ;;  %v1722_v15 = vmul.f32 %v4558_v63, %v1638_v1  ;;  %v1792_v19 = vmax.f32 %v1760_v23, 0.0  ;;  %v4666_v22 = vmul.f32 %v3550_v55, %v1794_v16  ;;  %v4689_v23 = vpop.permute.xlu0 %2577 }
 0x2f6   : > { %v1761_v18 = vadd.f32 %v4561_v0, %v1722_v15  ;;  %v1795_v20 = vmax.f32 %v1763_v29, 0.0  ;;  %v4670_v28 = vmul.f32 %v2290_v60, %v1792_v19  ;;  %v3555_v60 = vpop.f32.mrf.mxu1 }
 0x2f8   : > { %v4668_v24 = vmul.f32 %v3551_v27, %v1795_v20  ;;  %v1793_v25 = vmax.f32 %v1761_v18, 0.0  ;;  %v2410_v3 = vpack.c.bf16 %v1795_v20, %v1794_v16  ;;  %v2309_v29 = vpop.f32.mrf.mxu1  ;;  %v4696_v20 = vpop.permute.xlu1 %2583 }
 0x2fa   : > { %v4674_v30 = vmul.f32 %v2293_v21, %v1793_v25  ;;  %2483 = vrot.lane.b32.xlu1 %v2410_v3, %s3855_s28  ;;  %v2409_v31 = vpack.c.bf16 %v1793_v25, %v1792_v19 }
 0x2fc   : > { %2481 = vrot.lane.b32.xlu0 %v2409_v31, %s3855_s28 }
 0x2fd   : > { %v3514_v35 = vpop.f32.mrf.mxu0 }
 0x2fe   : > { %v1727_v6 = vmul.f32 %v3514_v35, %v4558_v63  ;;  %v4705_v35 = vpop.permute.xlu0 %2581 }
 0x2ff   : > { %v1651_v37 = vpop.f32.mrf.mxu0 }
 0x300   : > { %v1766_v49 = vadd.f32 %v4561_v0, %v1727_v6  ;;  %v1725_v50 = vmul.f32 %v4558_v63, %v1651_v37 }
 0x301   : > { %v3515_v54 = vpop.f32.mrf.mxu0 }
 0x302   : > { %v1764_v55 = vadd.f32 %v4561_v0, %v1725_v50  ;;  %v1728_v13 = vmul.f32 %v3515_v54, %v4558_v63  ;;  %v1798_v47 = vmax.f32 %v1766_v49, 0.0  ;;  %v4711_v49 = vpop.permute.xlu1 %2587 }
 0x303   : > { %v1654_v59 = vpop.f32.mrf.mxu0 }
 0x304   : > { %v1767_v61 = vadd.f32 %v4561_v0, %v1728_v13  ;;  %v1726_v62 = vmul.f32 %v4558_v63, %v1654_v59  ;;  %v1796_v1 = vmax.f32 %v1764_v55, 0.0  ;;  %v4692_v15 = vmul.f32 %v3554_v33, %v1798_v47  ;;  %v3558_v33 = vpop.f32.mrf.mxu1  ;;  %v4715_v59 = vpop.permute.xlu0 %2585 }
 0x306   : > { %v1765_v32 = vadd.f32 %v4561_v0, %v1726_v62  ;;  %v1799_v27 = vmax.f32 %v1767_v61, 0.0  ;;  %v4698_v21 = vmul.f32 %v2306_v39, %v1796_v1  ;;  %v2322_v54 = vpop.f32.mrf.mxu1 }
 0x308   : > { %v4694_v16 = vmul.f32 %v3555_v60, %v1799_v27  ;;  %v1797_v18 = vmax.f32 %v1765_v32, 0.0  ;;  %v2412_v19 = vpack.c.bf16 %v1799_v27, %v1798_v47  ;;  %v3559_v32 = vpop.f32.mrf.mxu1 }
 0x30a   : > { %v4702_v3 = vmul.f32 %v2309_v29, %v1797_v18  ;;  %2487 = vrot.lane.b32.xlu1 %v2412_v19, %s3855_s28  ;;  %v2411_v31 = vpack.c.bf16 %v1797_v18, %v1796_v1  ;;  %v4721_v18 = vpop.permute.xlu1 %2591 }
 0x30c   : > { %2485 = vrot.lane.b32.xlu0 %v2411_v31, %s3855_s28 }
 0x30d   : > { %v3518_v37 = vpop.f32.mrf.mxu0 }
 0x30e   : > { %v1731_v39 = vmul.f32 %v3518_v37, %v4558_v63 }
 0x30f   : > { %v1667_v50 = vpop.f32.mrf.mxu0 }
 0x310   : > { %v1770_v55 = vadd.f32 %v4561_v0, %v1731_v39  ;;  %v1729_v13 = vmul.f32 %v4558_v63, %v1667_v50  ;;  %v4724_v39 = vpop.permute.xlu0 %2589  ;;  %v2325_v50 = vpop.f32.mrf.mxu1 }
 0x311   : > { %v3519_v60 = vpop.f32.mrf.mxu0 }
 0x312   : > { %v1768_v61 = vadd.f32 %v4561_v0, %v1729_v13  ;;  %v1732_v62 = vmul.f32 %v3519_v60, %v4558_v63  ;;  %v1802_v29 = vmax.f32 %v1770_v55, 0.0 }
 0x313   : > { %v1670_v47 = vpop.f32.mrf.mxu0 }
 0x314   : > { %v1771_v1 = vadd.f32 %v4561_v0, %v1732_v62  ;;  %v1730_v27 = vmul.f32 %v4558_v63, %v1670_v47  ;;  %v1800_v31 = vmax.f32 %v1768_v61, 0.0  ;;  %v4726_v6 = vmul.f32 %v3558_v33, %v1802_v29  ;;  %v4737_v47 = vpop.permute.xlu1 %2595 }
 0x316   : > { %v1769_v19 = vadd.f32 %v4561_v0, %v1730_v27  ;;  %v1803_v37 = vmax.f32 %v1771_v1, 0.0  ;;  %v4730_v34 = vmul.f32 %v2322_v54, %v1800_v31  ;;  %v3562_v1 = vpop.f32.mrf.mxu1 }
 0x318   : > { %v4728_v13 = vmul.f32 %v3559_v32, %v1803_v37  ;;  %v1801_v60 = vmax.f32 %v1769_v19, 0.0  ;;  %v2414_v25 = vpack.c.bf16 %v1803_v37, %v1802_v29  ;;  %v4742_v32 = vpop.permute.xlu0 %2593  ;;  %v2338_v19 = vpop.f32.mrf.mxu1 }
 0x31a   : > { %v4734_v62 = vmul.f32 %v2325_v50, %v1801_v60  ;;  %2491 = vrot.lane.b32.xlu1 %v2414_v25, %s3855_s28  ;;  %v2413_v61 = vpack.c.bf16 %v1801_v60, %v1800_v31  ;;  %v4747_v31 = vpop.permute.xlu1 %2599  ;;  %v3563_v46 = vpop.f32.mrf.mxu1 }
 0x31c   : > { %2489 = vrot.lane.b32.xlu0 %v2413_v61, %s3855_s28  ;;  %v4751_v55 = vpop.permute.xlu0 %2597 }
 0x31d   : > { %v3522_v54 = vpop.f32.mrf.mxu0 }
 0x31e   : > { %v1735_v27 = vmul.f32 %v3522_v54, %v4558_v63  ;;  %v4756_v9 = vpop.permute.xlu1 %2603 }
 0x31f   : > { %v1683_v29 = vpop.f32.mrf.mxu0 }
 0x320   : > { %v1774_v37 = vadd.f32 %v4561_v0, %v1735_v27  ;;  %v1733_v25 = vmul.f32 %v4558_v63, %v1683_v29  ;;  %v4762_v7 = vpop.permute.xlu0 %2601 }
 0x321   : > { %v3523_v50 = vpop.f32.mrf.mxu0 }
 0x322   : > { %v1772_v60 = vadd.f32 %v4561_v0, %v1733_v25  ;;  %v1736_v33 = vmul.f32 %v3523_v50, %v4558_v63  ;;  %v1806_v52 = vmax.f32 %v1774_v37, 0.0  ;;  %v2341_v25 = vpop.f32.mrf.mxu1 }
 0x323   : > { %v1686_v61 = vpop.f32.mrf.mxu0 }
 0x324   : > { %v1775_v56 = vadd.f32 %v4561_v0, %v1736_v33  ;;  %v1734_v54 = vmul.f32 %v4558_v63, %v1686_v61  ;;  %v1804_v27 = vmax.f32 %v1772_v60, 0.0  ;;  %v4758_v11 = vmul.f32 %v3562_v1, %v1806_v52 }
 0x325   : > { %v3534_v17 = vpop.f32.mrf.mxu0 }
 0x326   : > { %v1773_v29 = vadd.f32 %v4561_v0, %v1734_v54  ;;  %v1807_v12 = vmax.f32 %v1775_v56, 0.0  ;;  %v2355_v63 = vmul.f32 %v3534_v17, %v1778_v5  ;;  %v4766_v37 = vmul.f32 %v2338_v19, %v1804_v27 }
 0x327   : > { %v2226_v41 = vpop.f32.mrf.mxu0  ;;  %v4976_v56 = vmax.f32 %v4572_v42, 0.0  ;;  %v4978_v19 = vmax.f32 %v4578_v8, 0.0 }
 0x328   : > { %v4760_v50 = vmul.f32 %v3563_v46, %v1807_v12  ;;  %v1805_v10 = vmax.f32 %v1773_v29, 0.0  ;;  %v2416_v33 = vpack.c.bf16 %v1807_v12, %v1806_v52  ;;  %v4977_v12 = vmax.f32 %v4569_v38, 0.0 }
 0x329   : > { %v3535_v60 = vpop.f32.mrf.mxu0 }
 0x32a   : > { %v2400_v0 = vpack.c.bf16 %v4760_v50, %v4758_v11  ;;  %v2356_v61 = vmul.f32 %v3535_v60, %v4976_v56  ;;  %v4772_v1 = vmul.f32 %v2341_v25, %v1805_v10  ;;  %2495 = vrot.lane.b32.xlu1 %v2416_v33, %s3855_s28  ;;  %v2415_v46 = vpack.c.bf16 %v1805_v10, %v1804_v27  ;;  %v3704_v10 = vld [vmem:[%s4959_s1 + $0x70] sm:$0xff]  }
 0x32b   : > { %v2229_v5 = vpop.f32.mrf.mxu0  ;;  %v2353_v17 = vmul.f32 %v2226_v41, %v4977_v12 }
 0x32c   : > { %v2386_v52 = vpack.c.bf16 %v2356_v61, %v2355_v63  ;;  %v2399_v42 = vpack.c.bf16 %v4772_v1, %v4766_v37  ;;  %v2354_v54 = vmul.f32 %v2229_v5, %v4978_v19  ;;  %v2468_v29 = vpop.permute.xlu1 %2467  ;;  %2493 = vrot.lane.b32.xlu0 %v2415_v46, %s3855_s28  ;;  %v4979_v46 = vpack.c.bf16 %v4602_v57, %v4600_v36 }
 0x32e   : > { %v2385_v27 = vpack.c.bf16 %v2354_v54, %v2353_v17  ;;  %v2614_v25 = vsel %vm641_vm0, %v2386_v52, %v2468_v29  ;;  %v2466_v33 = vpop.permute.xlu0 %2465  ;;  %2607 = vrot.lane.b32.xlu1 %v3703_v26, %s3854_s11  ;;  %v4980_v52 = vpack.c.bf16 %v4608_v43, %v4604_v40  ;;  %v4981_v43 = vpack.c.bf16 %v4624_v4, %v4622_v2 }
 0x32f   : > { %v2661_v38 = vsel %vm2657_vm13, %v2614_v25, %v4685_v58  ;;  %v4982_v25 = vpack.c.bf16 %v4630_v14, %v4626_v44  ;;  %v4983_v14 = vpack.c.bf16 %v4646_v48, %v4644_v45 }
 0x330   : > { %v3297_v8 = vcombine.low %v2661_v38, %v2661_v38  ;;  %v3298_v41 = vcombine.high %v2661_v38, %v2661_v38  ;;  %v2611_v63 = vsel %vm641_vm0, %v2385_v27, %v2466_v33  ;;  %2605 = vrot.lane.b32.xlu0 %v3704_v10, %s3854_s11 }
 0x331   : > { %v2659_v60 = vsel %vm2657_vm13, %v2611_v63, %v4689_v23 }
 0x332   : > { %2805 = vst.msk [vmem:[%s4795_s22 + $0x8] sm:$0xf] %vm2802_vm11, %v3297_v8  ;;  %2806 = vst.msk [vmem:[%s4795_s22 + $0xc] sm:$0xf] %vm2802_vm11, %v3298_v41  ;;  %v3295_v56 = vcombine.low %v2659_v60, %v2659_v60  ;;  %v3296_v61 = vcombine.high %v2659_v60, %v2659_v60  ;;  %v4984_v60 = vpack.c.bf16 %v4652_v53, %v4648_v51 }
 0x333   : > { %v4985_v53 = vpack.c.bf16 %v4668_v24, %v4666_v22 }
 0x334   : > { %2803 = vst.msk [vmem:[%s4795_s22] sm:$0xf] %vm2802_vm11, %v3295_v56  ;;  %2804 = vst.msk [vmem:[%s4795_s22 + $0x4] sm:$0xf] %vm2802_vm11, %v3296_v61 }
 0x33c   : > { %v2472_v58 = vpop.permute.xlu1 %2471 }
 0x33d   : > { %v2620_v26 = vsel %vm641_vm0, %v4979_v46, %v2472_v58 }
 0x33e   : > { %v2665_v23 = vsel %vm2657_vm13, %v2620_v26, %v4696_v20  ;;  %v2470_v5 = vpop.permute.xlu0 %2469 }
 0x33f   : > { %v3301_v12 = vcombine.low %v2665_v23, %v2665_v23  ;;  %v3302_v17 = vcombine.high %v2665_v23, %v2665_v23  ;;  %v2617_v19 = vsel %vm641_vm0, %v4980_v52, %v2470_v5  ;;  %v4986_v23 = vpack.c.bf16 %v4674_v30, %v4670_v28 }
 0x340   : > { %v2663_v54 = vsel %vm2657_vm13, %v2617_v19, %v4705_v35  ;;  %v4987_v30 = vpack.c.bf16 %v4694_v16, %v4692_v15 }
 0x341   : > { %2809 = vst.msk [vmem:[%s4795_s22 + $0x18] sm:$0xf] %vm2802_vm11, %v3301_v12  ;;  %2810 = vst.msk [vmem:[%s4795_s22 + $0x1c] sm:$0xf] %vm2802_vm11, %v3302_v17  ;;  %v3299_v36 = vcombine.low %v2663_v54, %v2663_v54  ;;  %v3300_v57 = vcombine.high %v2663_v54, %v2663_v54  ;;  %v4988_v54 = vpack.c.bf16 %v4702_v3, %v4698_v21 }
 0x342   : > { %v4989_v3 = vpack.c.bf16 %v4728_v13, %v4726_v6 }
 0x343   : > { %2807 = vst.msk [vmem:[%s4795_s22 + $0x10] sm:$0xf] %vm2802_vm11, %v3299_v36  ;;  %2808 = vst.msk [vmem:[%s4795_s22 + $0x14] sm:$0xf] %vm2802_vm11, %v3300_v57 }
 0x34c   : > { %v2476_v40 = vpop.permute.xlu1 %2475 }
 0x34d   : > { %v2626_v20 = vsel %vm641_vm0, %v4981_v43, %v2476_v40 }
 0x34e   : > { %v2669_v35 = vsel %vm2657_vm13, %v2626_v20, %v4711_v49  ;;  %v2474_v29 = vpop.permute.xlu0 %2473 }
 0x34f   : > { %v3305_v10 = vcombine.low %v2669_v35, %v2669_v35  ;;  %v3306_v27 = vcombine.high %v2669_v35, %v2669_v35  ;;  %v2623_v33 = vsel %vm641_vm0, %v4982_v25, %v2474_v29  ;;  %v4990_v35 = vpack.c.bf16 %v4734_v62, %v4730_v34 }
 0x350   : > { %v2667_v38 = vsel %vm2657_vm13, %v2623_v33, %v4715_v59 }
 0x351   : > { %2813 = vst.msk [vmem:[%s4795_s22 + $0x28] sm:$0xf] %vm2802_vm11, %v3305_v10  ;;  %2814 = vst.msk [vmem:[%s4795_s22 + $0x2c] sm:$0xf] %vm2802_vm11, %v3306_v27  ;;  %v3303_v2 = vcombine.low %v2667_v38, %v2667_v38  ;;  %v3304_v4 = vcombine.high %v2667_v38, %v2667_v38 }
 0x353   : > { %2811 = vst.msk [vmem:[%s4795_s22 + $0x20] sm:$0xf] %vm2802_vm11, %v3303_v2  ;;  %2812 = vst.msk [vmem:[%s4795_s22 + $0x24] sm:$0xf] %vm2802_vm11, %v3304_v4 }
 0x35c   : > { %v2480_v44 = vpop.permute.xlu1 %2479 }
 0x35d   : > { %v2632_v49 = vsel %vm641_vm0, %v4983_v14, %v2480_v44 }
 0x35e   : > { %v2673_v59 = vsel %vm2657_vm13, %v2632_v49, %v4721_v18  ;;  %v2478_v8 = vpop.permute.xlu0 %2477 }
 0x35f   : > { %v3309_v41 = vcombine.low %v2673_v59, %v2673_v59  ;;  %v3310_v63 = vcombine.high %v2673_v59, %v2673_v59  ;;  %v2629_v56 = vsel %vm641_vm0, %v4984_v60, %v2478_v8 }
 0x360   : > { %v2671_v61 = vsel %vm2657_vm13, %v2629_v56, %v4724_v39 }
 0x361   : > { %2817 = vst.msk [vmem:[%s4795_s22 + $0x38] sm:$0xf] %vm2802_vm11, %v3309_v41  ;;  %2818 = vst.msk [vmem:[%s4795_s22 + $0x3c] sm:$0xf] %vm2802_vm11, %v3310_v63  ;;  %v3307_v45 = vcombine.low %v2671_v61, %v2671_v61  ;;  %v3308_v48 = vcombine.high %v2671_v61, %v2671_v61 }
 0x363   : > { %2815 = vst.msk [vmem:[%s4795_s22 + $0x30] sm:$0xf] %vm2802_vm11, %v3307_v45  ;;  %2816 = vst.msk [vmem:[%s4795_s22 + $0x34] sm:$0xf] %vm2802_vm11, %v3308_v48 }
 0x36c   : > { %v2484_v51 = vpop.permute.xlu1 %2483 }
 0x36d   : > { %v2638_v18 = vsel %vm641_vm0, %v4985_v53, %v2484_v51 }
 0x36e   : > { %v2677_v39 = vsel %vm2657_vm13, %v2638_v18, %v4737_v47  ;;  %v2482_v58 = vpop.permute.xlu0 %2481 }
 0x36f   : > { %v3313_v46 = vcombine.low %v2677_v39, %v2677_v39  ;;  %v3314_v26 = vcombine.high %v2677_v39, %v2677_v39  ;;  %v2635_v5 = vsel %vm641_vm0, %v4986_v23, %v2482_v58 }
 0x370   : > { %v2675_v12 = vsel %vm2657_vm13, %v2635_v5, %v4742_v32 }
 0x371   : > { %2821 = vst.msk [vmem:[%s4795_s22 + $0x48] sm:$0xf] %vm2802_vm11, %v3313_v46  ;;  %2822 = vst.msk [vmem:[%s4795_s22 + $0x4c] sm:$0xf] %vm2802_vm11, %v3314_v26  ;;  %v3311_v22 = vcombine.low %v2675_v12, %v2675_v12  ;;  %v3312_v24 = vcombine.high %v2675_v12, %v2675_v12 }
 0x373   : > { %2819 = vst.msk [vmem:[%s4795_s22 + $0x40] sm:$0xf] %vm2802_vm11, %v3311_v22  ;;  %2820 = vst.msk [vmem:[%s4795_s22 + $0x44] sm:$0xf] %vm2802_vm11, %v3312_v24 }
 0x37c   : > { %v2488_v28 = vpop.permute.xlu1 %2487 }
 0x37d   : > { %v2644_v47 = vsel %vm641_vm0, %v4987_v30, %v2488_v28 }
 0x37e   : > { %v2681_v32 = vsel %vm2657_vm13, %v2644_v47, %v4747_v31  ;;  %v2486_v17 = vpop.permute.xlu0 %2485 }
 0x37f   : > { %v3317_v52 = vcombine.low %v2681_v32, %v2681_v32  ;;  %v3318_v19 = vcombine.high %v2681_v32, %v2681_v32  ;;  %v2641_v36 = vsel %vm641_vm0, %v4988_v54, %v2486_v17 }
 0x380   : > { %v2679_v57 = vsel %vm2657_vm13, %v2641_v36, %v4751_v55 }
 0x381   : > { %2825 = vst.msk [vmem:[%s4795_s22 + $0x58] sm:$0xf] %vm2802_vm11, %v3317_v52  ;;  %2826 = vst.msk [vmem:[%s4795_s22 + $0x5c] sm:$0xf] %vm2802_vm11, %v3318_v19  ;;  %v3315_v15 = vcombine.low %v2679_v57, %v2679_v57  ;;  %v3316_v16 = vcombine.high %v2679_v57, %v2679_v57 }
 0x383   : > { %2823 = vst.msk [vmem:[%s4795_s22 + $0x50] sm:$0xf] %vm2802_vm11, %v3315_v15  ;;  %2824 = vst.msk [vmem:[%s4795_s22 + $0x54] sm:$0xf] %vm2802_vm11, %v3316_v16 }
 0x38c   : > { %v2492_v21 = vpop.permute.xlu1 %2491 }
 0x38d   : > { %v2650_v31 = vsel %vm641_vm0, %v4989_v3, %v2492_v21 }
 0x38e   : > { %v2685_v55 = vsel %vm2657_vm13, %v2650_v31, %v4756_v9  ;;  %v2490_v40 = vpop.permute.xlu0 %2489 }
 0x38f   : > { %v3321_v43 = vcombine.low %v2685_v55, %v2685_v55  ;;  %v3322_v20 = vcombine.high %v2685_v55, %v2685_v55  ;;  %v2647_v29 = vsel %vm641_vm0, %v4990_v35, %v2490_v40 }
 0x390   : > { %v2683_v10 = vsel %vm2657_vm13, %v2647_v29, %v4762_v7 }
 0x391   : > { %2829 = vst.msk [vmem:[%s4795_s22 + $0x68] sm:$0xf] %vm2802_vm11, %v3321_v43  ;;  %2830 = vst.msk [vmem:[%s4795_s22 + $0x6c] sm:$0xf] %vm2802_vm11, %v3322_v20  ;;  %v3319_v6 = vcombine.low %v2683_v10, %v2683_v10  ;;  %v3320_v13 = vcombine.high %v2683_v10, %v2683_v10 }
 0x393   : > { %2827 = vst.msk [vmem:[%s4795_s22 + $0x60] sm:$0xf] %vm2802_vm11, %v3319_v6  ;;  %2828 = vst.msk [vmem:[%s4795_s22 + $0x64] sm:$0xf] %vm2802_vm11, %v3320_v13 }
 0x39c   : > { %v2496_v9 = vpop.permute.xlu1 %2495 }
 0x39d   : > { %v2656_v7 = vsel %vm641_vm0, %v2400_v0, %v2496_v9 }
 0x39e   : > { %v2494_v34 = vpop.permute.xlu0 %2493 }
 0x39f   : > { %v2653_v25 = vsel %vm641_vm0, %v2399_v42, %v2494_v34 }
 0x3a0   : > { %v2608_v62 = vpop.permute.xlu1 %2607 }
 0x3a1   : > { %v2689_v27 = vsel %vm2657_vm13, %v2656_v7, %v2608_v62 }
 0x3a2   : > { %v3325_v33 = vcombine.low %v2689_v27, %v2689_v27  ;;  %v3326_v38 = vcombine.high %v2689_v27, %v2689_v27  ;;  %v2606_v2 = vpop.permute.xlu0 %2605 }
 0x3a3   : > { %v2687_v4 = vsel %vm2657_vm13, %v2653_v25, %v2606_v2 }
 0x3a4   : > { %2833 = vst.msk [vmem:[%s4795_s22 + $0x78] sm:$0xf] %vm2802_vm11, %v3325_v33  ;;  %2834 = vst.msk [vmem:[%s4795_s22 + $0x7c] sm:$0xf] %vm2802_vm11, %v3326_v38  ;;  %v3323_v11 = vcombine.low %v2687_v4, %v2687_v4  ;;  %v3324_v50 = vcombine.high %v2687_v4, %v2687_v4 }
 0x3a6   : > { %2831 = vst.msk [vmem:[%s4795_s22 + $0x70] sm:$0xf] %vm2802_vm11, %v3323_v11  ;;  %2832 = vst.msk [vmem:[%s4795_s22 + $0x74] sm:$0xf] %vm2802_vm11, %v3324_v50 }
 0x3a7 PF: > { %s23_s15 = sadd.s32 1, %s3843_s15   ;;  %s4991_s13 = smov %s3839_s14 }
 0x3a8   : > { %p20_p2 = scmp.ge.s32.totalorder %s23_s15, 4   ;;  %s4992_s14 = smov %s4994_s21 }
 0x3aa   :  { %22 = sbr.rel (!%p20_p2) target bundleno = 4 (0x4), region = 116 }
 0x3af   :  { %2865 = vsyncpa [#allocation3], 1 }
 0x3b0   :  { %2867 = vsyncpa [#allocation3 + $0x1], 1 }
 0x3b1   :  { %2868 = vsyncpa [#allocation5], 1 }
 0x3b2   :  { %2869 = vsyncpa [#allocation8], 1 }

// kernel: fph_forward.15
= control target key start
LH: loop header
LB: loop body
LE: loop exit
PB: predicated region body
PF: predicated region fallthrough
CT: control target
= control target key end

     0   :  { %s4018_s1 = inlined_call_operand.vmem [shape: bf16[2304,256], index: 1, kind: input, shape index: {}]   ;;  %s4019_s0 = inlined_call_operand.vmem [shape: bf16[16,2304], index: 0, kind: input, shape index: {}]   ;;  %s4020_s2 = inlined_call_operand.vmem [shape: f32[1,256], index: 2, kind: input, shape index: {}]   ;;  %s4021_s3 = inlined_call_operand.vmem [shape: f32[1,256], index: 3, kind: input, shape index: {}]   ;;  %s4022_s4 = inlined_call_operand.vmem [shape: bf16[16,256], index: 4, kind: output, shape index: {}]  }
   0x1   :  { %v2604_v0 = vld [vmem:[%s4018_s1 + $0x74] ss:$8 sps:$4 sm:$0xff]   ;;  %v2608_v2 = vld [vmem:[%s4018_s1 + $0x70] ss:$8 sps:$4 sm:$0xff]   ;;  %v2610_v4 = vld [vmem:[%s4018_s1 + $0x64] ss:$8 sps:$4 sm:$0xff]  }
   0x2   :  { %v2606_v1 = vld [vmem:[%s4018_s1 + $0x174] ss:$8 sps:$4 sm:$0xff]   ;;  %1853 = vmatprep.subr.bf16.mxu0 %v2604_v0  ;;  %v2609_v3 = vld [vmem:[%s4018_s1 + $0x170] ss:$8 sps:$4 sm:$0xff]   ;;  %v2612_v5 = vld [vmem:[%s4018_s1 + $0x164] ss:$8 sps:$4 sm:$0xff]  }
   0x3   :  { %1896 = vmatprep.subr.bf16.mxu1 %v2606_v1  ;;  %1854 = vmatpush1.bf16.msra.mxu0 %v2608_v2  ;;  %v2614_v6 = vld [vmem:[%s4018_s1 + $0x60] ss:$8 sps:$4 sm:$0xff]   ;;  %v2616_v8 = vld [vmem:[%s4018_s1 + $0x54] ss:$8 sps:$4 sm:$0xff]   ;;  %v2620_v10 = vld [vmem:[%s4018_s1 + $0x50] ss:$8 sps:$4 sm:$0xff]  }
   0x4   :  { %1897 = vmatpush1.bf16.msra.mxu1 %v2609_v3  ;;  %1855 = vmatprep.subr.bf16.mxu0 %v2610_v4  ;;  %v2615_v7 = vld [vmem:[%s4018_s1 + $0x160] ss:$8 sps:$4 sm:$0xff]   ;;  %v2618_v9 = vld [vmem:[%s4018_s1 + $0x154] ss:$8 sps:$4 sm:$0xff]   ;;  %v2621_v11 = vld [vmem:[%s4018_s1 + $0x150] ss:$8 sps:$4 sm:$0xff]  }
   0x5   :  { %1898 = vmatprep.subr.bf16.mxu1 %v2612_v5  ;;  %v2622_v12 = vld [vmem:[%s4018_s1 + $0x44] ss:$8 sps:$4 sm:$0xff]   ;;  %v2626_v14 = vld [vmem:[%s4018_s1 + $0x40] ss:$8 sps:$4 sm:$0xff]   ;;  %v2628_v16 = vld [vmem:[%s4018_s1 + $0x34] ss:$8 sps:$4 sm:$0xff]  }
   0x6   :  { %v2624_v13 = vld [vmem:[%s4018_s1 + $0x144] ss:$8 sps:$4 sm:$0xff]   ;;  %v2627_v15 = vld [vmem:[%s4018_s1 + $0x140] ss:$8 sps:$4 sm:$0xff]   ;;  %v2630_v17 = vld [vmem:[%s4018_s1 + $0x134] ss:$8 sps:$4 sm:$0xff]  }
   0x7   :  { %1856 = vmatpush1.bf16.msra.mxu0 %v2614_v6  ;;  %v2632_v18 = vld [vmem:[%s4018_s1 + $0x30] ss:$8 sps:$4 sm:$0xff]   ;;  %v2634_v20 = vld [vmem:[%s4018_s1 + $0x24] ss:$8 sps:$4 sm:$0xff]   ;;  %v2638_v22 = vld [vmem:[%s4018_s1 + $0x20] ss:$8 sps:$4 sm:$0xff]  }
   0x8   :  { %1899 = vmatpush1.bf16.msra.mxu1 %v2615_v7  ;;  %1857 = vmatprep.subr.bf16.mxu0 %v2616_v8  ;;  %v2633_v19 = vld [vmem:[%s4018_s1 + $0x130] ss:$8 sps:$4 sm:$0xff]   ;;  %v2636_v21 = vld [vmem:[%s4018_s1 + $0x124] ss:$8 sps:$4 sm:$0xff]   ;;  %v2639_v23 = vld [vmem:[%s4018_s1 + $0x120] ss:$8 sps:$4 sm:$0xff]  }
   0x9   :  { %1900 = vmatprep.subr.bf16.mxu1 %v2618_v9  ;;  %v2640_v24 = vld [vmem:[%s4018_s1 + $0x14] ss:$8 sps:$4 sm:$0xff]   ;;  %v2644_v26 = vld [vmem:[%s4018_s1 + $0x10] ss:$8 sps:$4 sm:$0xff]   ;;  %v2646_v28 = vld [vmem:[%s4018_s1 + $0x4] ss:$8 sps:$4 sm:$0xff]  }
   0xa   :  { %v2642_v25 = vld [vmem:[%s4018_s1 + $0x114] ss:$8 sps:$4 sm:$0xff]   ;;  %v2645_v27 = vld [vmem:[%s4018_s1 + $0x110] ss:$8 sps:$4 sm:$0xff]   ;;  %v2648_v29 = vld [vmem:[%s4018_s1 + $0x104] ss:$8 sps:$4 sm:$0xff]  }
   0xb   :  { %1858 = vmatpush1.bf16.msra.mxu0 %v2620_v10  ;;  %v2650_v30 = vld [vmem:[%s4018_s1] ss:$8 sps:$4 sm:$0xff]   ;;  %v2652_v32 = vld [vmem:[%s4018_s1 + $0xf4] ss:$8 sps:$4 sm:$0xff]   ;;  %v2656_v34 = vld [vmem:[%s4018_s1 + $0xf0] ss:$8 sps:$4 sm:$0xff]  }
   0xc   :  { %1901 = vmatpush1.bf16.msra.mxu1 %v2621_v11  ;;  %1859 = vmatprep.subr.bf16.mxu0 %v2622_v12  ;;  %v2651_v31 = vld [vmem:[%s4018_s1 + $0x100] ss:$8 sps:$4 sm:$0xff]   ;;  %v2654_v33 = vld [vmem:[%s4018_s1 + $0x1f4] ss:$8 sps:$4 sm:$0xff]   ;;  %v2657_v35 = vld [vmem:[%s4018_s1 + $0x1f0] ss:$8 sps:$4 sm:$0xff]  }
   0xd   :  { %1902 = vmatprep.subr.bf16.mxu1 %v2624_v13  ;;  %v2658_v36 = vld [vmem:[%s4018_s1 + $0xe4] ss:$8 sps:$4 sm:$0xff]   ;;  %v2662_v38 = vld [vmem:[%s4018_s1 + $0xe0] ss:$8 sps:$4 sm:$0xff]   ;;  %v2664_v40 = vld [vmem:[%s4018_s1 + $0xd4] ss:$8 sps:$4 sm:$0xff]  }
   0xe   :  { %v2660_v37 = vld [vmem:[%s4018_s1 + $0x1e4] ss:$8 sps:$4 sm:$0xff]   ;;  %v2663_v39 = vld [vmem:[%s4018_s1 + $0x1e0] ss:$8 sps:$4 sm:$0xff]   ;;  %v2666_v41 = vld [vmem:[%s4018_s1 + $0x1d4] ss:$8 sps:$4 sm:$0xff]  }
   0xf   :  { %1860 = vmatpush1.bf16.msra.mxu0 %v2626_v14  ;;  %v2668_v42 = vld [vmem:[%s4018_s1 + $0xd0] ss:$8 sps:$4 sm:$0xff]   ;;  %v2670_v44 = vld [vmem:[%s4018_s1 + $0xc4] ss:$8 sps:$4 sm:$0xff]   ;;  %v2674_v46 = vld [vmem:[%s4018_s1 + $0xc0] ss:$8 sps:$4 sm:$0xff]  }
  0x10   :  { %1903 = vmatpush1.bf16.msra.mxu1 %v2627_v15  ;;  %1861 = vmatprep.subr.bf16.mxu0 %v2628_v16  ;;  %v2669_v43 = vld [vmem:[%s4018_s1 + $0x1d0] ss:$8 sps:$4 sm:$0xff]   ;;  %v2672_v45 = vld [vmem:[%s4018_s1 + $0x1c4] ss:$8 sps:$4 sm:$0xff]   ;;  %v2675_v47 = vld [vmem:[%s4018_s1 + $0x1c0] ss:$8 sps:$4 sm:$0xff]  }
  0x11   :  { %1904 = vmatprep.subr.bf16.mxu1 %v2630_v17  ;;  %v2676_v48 = vld [vmem:[%s4018_s1 + $0xb4] ss:$8 sps:$4 sm:$0xff]   ;;  %v2702_v49 = vld [vmem:[%s4019_s0 + $0x4] ss:$72 sps:$4 sm:$0xff]   ;;  %v2680_v52 = vld [vmem:[%s4018_s1 + $0xb0] ss:$8 sps:$4 sm:$0xff]  }
  0x12   :  { %v2678_v50 = vld [vmem:[%s4018_s1 + $0x1b4] ss:$8 sps:$4 sm:$0xff]   ;;  %1885 = vmatprep.mubr.bf16.mxu0 %v2702_v49  ;;  %v2681_v53 = vld [vmem:[%s4018_s1 + $0x1b0] ss:$8 sps:$4 sm:$0xff]   ;;  %v2682_v54 = vld [vmem:[%s4018_s1 + $0xa4] ss:$8 sps:$4 sm:$0xff]  }
  0x13   :  { %1862 = vmatpush1.bf16.msra.mxu0 %v2632_v18  ;;  %v2705_v51 = vld [vmem:[%s4019_s0 + $0xc] ss:$72 sps:$4 sm:$0xff]   ;;  %v2686_v56 = vld [vmem:[%s4018_s1 + $0xa0] ss:$8 sps:$4 sm:$0xff]   ;;  %v2692_v60 = vld [vmem:[%s4018_s1 + $0x90] ss:$8 sps:$4 sm:$0xff]  }
  0x14   :  { %1905 = vmatpush1.bf16.msra.mxu1 %v2633_v19  ;;  %1863 = vmatprep.subr.bf16.mxu0 %v2634_v20  ;;  %v2684_v55 = vld [vmem:[%s4018_s1 + $0x1a4] ss:$8 sps:$4 sm:$0xff]   ;;  %v2687_v57 = vld [vmem:[%s4018_s1 + $0x1a0] ss:$8 sps:$4 sm:$0xff]   ;;  %v2688_v58 = vld [vmem:[%s4018_s1 + $0x94] ss:$8 sps:$4 sm:$0xff]  }
  0x15   :  { %1906 = vmatprep.subr.bf16.mxu1 %v2636_v21  ;;  %1928 = vmatprep.mubr.bf16.mxu1 %v2705_v51  ;;  %v2690_v59 = vld [vmem:[%s4018_s1 + $0x194] ss:$8 sps:$4 sm:$0xff]   ;;  %v2693_v61 = vld [vmem:[%s4018_s1 + $0x190] ss:$8 sps:$4 sm:$0xff]   ;;  %v2694_v62 = vld [vmem:[%s4018_s1 + $0x84] ss:$8 sps:$4 sm:$0xff]  }
  0x16   :  { %v2696_v63 = vld [vmem:[%s4018_s1 + $0x184] ss:$8 sps:$4 sm:$0xff]   ;;  %v2698_v0 = vld [vmem:[%s4018_s1 + $0x80] ss:$8 sps:$4 sm:$0xff]   ;;  %v2708_v2 = vld [vmem:[%s4018_s1 + $0x274] ss:$8 sps:$4 sm:$0xff]  }
  0x17   :  { %1864 = vmatpush1.bf16.msra.mxu0 %v2638_v22  ;;  %v2699_v1 = vld [vmem:[%s4018_s1 + $0x180] ss:$8 sps:$4 sm:$0xff]   ;;  %v2711_v3 = vld [vmem:[%s4018_s1 + $0x374] ss:$8 sps:$4 sm:$0xff]   ;;  %v2706_v6 = vld [vmem:[%s4018_s1 + $0x270] ss:$8 sps:$4 sm:$0xff]  }
  0x18   :  { %1907 = vmatpush1.bf16.msra.mxu1 %v2639_v23  ;;  %1865 = vmatprep.subr.bf16.mxu0 %v2640_v24  ;;  %v2700_v4 = vld [vmem:[%s4019_s0] ss:$72 sps:$4 sm:$0xff]   ;;  %v2709_v7 = vld [vmem:[%s4018_s1 + $0x370] ss:$8 sps:$4 sm:$0xff]   ;;  %v2714_v8 = vld [vmem:[%s4018_s1 + $0x264] ss:$8 sps:$4 sm:$0xff]  }
  0x19   :  { %1908 = vmatprep.subr.bf16.mxu1 %v2642_v25  ;;  %v2703_v5 = vld [vmem:[%s4019_s0 + $0x8] ss:$72 sps:$4 sm:$0xff]   ;;  %v2717_v9 = vld [vmem:[%s4018_s1 + $0x364] ss:$8 sps:$4 sm:$0xff]   ;;  %v2720_v12 = vld [vmem:[%s4018_s1 + $0x254] ss:$8 sps:$4 sm:$0xff]  }
  0x1a   :  { %v2712_v10 = vld [vmem:[%s4018_s1 + $0x260] ss:$8 sps:$4 sm:$0xff]   ;;  %v2723_v13 = vld [vmem:[%s4018_s1 + $0x354] ss:$8 sps:$4 sm:$0xff]   ;;  %v2718_v14 = vld [vmem:[%s4018_s1 + $0x250] ss:$8 sps:$4 sm:$0xff]  }
  0x1b   :  { %1866 = vmatpush1.bf16.msra.mxu0 %v2644_v26  ;;  %v2715_v11 = vld [vmem:[%s4018_s1 + $0x360] ss:$8 sps:$4 sm:$0xff]   ;;  %v2721_v15 = vld [vmem:[%s4018_s1 + $0x350] ss:$8 sps:$4 sm:$0xff]   ;;  %v2726_v16 = vld [vmem:[%s4018_s1 + $0x244] ss:$8 sps:$4 sm:$0xff]  }
  0x1c   :  { %1909 = vmatpush1.bf16.msra.mxu1 %v2645_v27  ;;  %1867 = vmatprep.subr.bf16.mxu0 %v2646_v28  ;;  %v2729_v17 = vld [vmem:[%s4018_s1 + $0x344] ss:$8 sps:$4 sm:$0xff]   ;;  %v2724_v18 = vld [vmem:[%s4018_s1 + $0x240] ss:$8 sps:$4 sm:$0xff]   ;;  %v2732_v20 = vld [vmem:[%s4018_s1 + $0x234] ss:$8 sps:$4 sm:$0xff]  }
  0x1d   :  { %1910 = vmatprep.subr.bf16.mxu1 %v2648_v29  ;;  %v2727_v19 = vld [vmem:[%s4018_s1 + $0x340] ss:$8 sps:$4 sm:$0xff]   ;;  %v2735_v21 = vld [vmem:[%s4018_s1 + $0x334] ss:$8 sps:$4 sm:$0xff]   ;;  %v2730_v22 = vld [vmem:[%s4018_s1 + $0x230] ss:$8 sps:$4 sm:$0xff]  }
  0x1e   :  { %v2733_v23 = vld [vmem:[%s4018_s1 + $0x330] ss:$8 sps:$4 sm:$0xff]   ;;  %v2738_v24 = vld [vmem:[%s4018_s1 + $0x224] ss:$8 sps:$4 sm:$0xff]   ;;  %v2736_v26 = vld [vmem:[%s4018_s1 + $0x220] ss:$8 sps:$4 sm:$0xff]  }
  0x1f   :  { %1868 = vmatpush1.bf16.msra.mxu0 %v2650_v30  ;;  %v2741_v25 = vld [vmem:[%s4018_s1 + $0x324] ss:$8 sps:$4 sm:$0xff]   ;;  %v2739_v27 = vld [vmem:[%s4018_s1 + $0x320] ss:$8 sps:$4 sm:$0xff]   ;;  %v2744_v28 = vld [vmem:[%s4018_s1 + $0x214] ss:$8 sps:$4 sm:$0xff]  }
  0x20   :  { %1911 = vmatpush1.bf16.msra.mxu1 %v2651_v31  ;;  %1869 = vmatprep.subr.bf16.mxu0 %v2652_v32  ;;  %v2747_v29 = vld [vmem:[%s4018_s1 + $0x314] ss:$8 sps:$4 sm:$0xff]   ;;  %v2742_v30 = vld [vmem:[%s4018_s1 + $0x210] ss:$8 sps:$4 sm:$0xff]   ;;  %v2750_v32 = vld [vmem:[%s4018_s1 + $0x204] ss:$8 sps:$4 sm:$0xff]  }
  0x21   :  { %1912 = vmatprep.subr.bf16.mxu1 %v2654_v33  ;;  %v2745_v31 = vld [vmem:[%s4018_s1 + $0x310] ss:$8 sps:$4 sm:$0xff]   ;;  %v2753_v33 = vld [vmem:[%s4018_s1 + $0x304] ss:$8 sps:$4 sm:$0xff]  }
  0x22   :  { %v2769_v49 = vld [vmem:[%s4018_s1 + $0x3d0] ss:$8 sps:$4 sm:$0xff]   ;;  %v2777_v51 = vld [vmem:[%s4018_s1 + $0x3c4] ss:$8 sps:$4 sm:$0xff]  }
  0x23   :  { %1870 = vmatpush2.bf16.msra.mxu0 %v2656_v34  ;;  %v2804_v34 = vld [vmem:[%s4019_s0 + $0x14] ss:$72 sps:$4 sm:$0xff]  }
  0x24   :  { %1913 = vmatpush2.bf16.msra.mxu1 %v2657_v35  ;;  %1871 = vmatprep.subr.bf16.mxu0 %v2658_v36  ;;  %v2748_v35 = vld [vmem:[%s4018_s1 + $0x200] ss:$8 sps:$4 sm:$0xff]  }
  0x25   :  { %1914 = vmatprep.subr.bf16.mxu1 %v2660_v37  ;;  %v2751_v36 = vld [vmem:[%s4018_s1 + $0x300] ss:$8 sps:$4 sm:$0xff]   ;;  %v2810_v37 = vld [vmem:[%s4019_s0 + $0x1c] ss:$72 sps:$4 sm:$0xff]  }
  0x27   :  { %1872 = vmatpush2.bf16.msra.mxu0 %v2662_v38  ;;  %v2756_v38 = vld [vmem:[%s4018_s1 + $0x2f4] ss:$8 sps:$4 sm:$0xff]  }
  0x28   :  { %1915 = vmatpush2.bf16.msra.mxu1 %v2663_v39  ;;  %1873 = vmatprep.subr.bf16.mxu0 %v2664_v40  ;;  %v2759_v39 = vld [vmem:[%s4018_s1 + $0x3f4] ss:$8 sps:$4 sm:$0xff]   ;;  %v2754_v40 = vld [vmem:[%s4018_s1 + $0x2f0] ss:$8 sps:$4 sm:$0xff]  }
  0x29   :  { %1916 = vmatprep.subr.bf16.mxu1 %v2666_v41  ;;  %v2757_v41 = vld [vmem:[%s4018_s1 + $0x3f0] ss:$8 sps:$4 sm:$0xff]  }
  0x2b   :  { %1874 = vmatpush2.bf16.msra.mxu0 %v2668_v42  ;;  %v2762_v42 = vld [vmem:[%s4018_s1 + $0x2e4] ss:$8 sps:$4 sm:$0xff]  }
  0x2c   :  { %1917 = vmatpush2.bf16.msra.mxu1 %v2669_v43  ;;  %1875 = vmatprep.subr.bf16.mxu0 %v2670_v44  ;;  %v2765_v43 = vld [vmem:[%s4018_s1 + $0x3e4] ss:$8 sps:$4 sm:$0xff]   ;;  %v2760_v44 = vld [vmem:[%s4018_s1 + $0x2e0] ss:$8 sps:$4 sm:$0xff]  }
  0x2d   :  { %1918 = vmatprep.subr.bf16.mxu1 %v2672_v45  ;;  %v2763_v45 = vld [vmem:[%s4018_s1 + $0x3e0] ss:$8 sps:$4 sm:$0xff]  }
  0x2f   :  { %1876 = vmatpush2.bf16.msra.mxu0 %v2674_v46  ;;  %v2768_v46 = vld [vmem:[%s4018_s1 + $0x2d4] ss:$8 sps:$4 sm:$0xff]  }
  0x30   :  { %1919 = vmatpush2.bf16.msra.mxu1 %v2675_v47  ;;  %1877 = vmatprep.subr.bf16.mxu0 %v2676_v48  ;;  %v2771_v47 = vld [vmem:[%s4018_s1 + $0x3d4] ss:$8 sps:$4 sm:$0xff]   ;;  %v2766_v48 = vld [vmem:[%s4018_s1 + $0x2d0] ss:$8 sps:$4 sm:$0xff]  }
  0x31   :  { %1920 = vmatprep.subr.bf16.mxu1 %v2678_v50  ;;  %v2774_v50 = vld [vmem:[%s4018_s1 + $0x2c4] ss:$8 sps:$4 sm:$0xff]  }
  0x33   :  { %1878 = vmatpush2.bf16.msra.mxu0 %v2680_v52  ;;  %v2772_v52 = vld [vmem:[%s4018_s1 + $0x2c0] ss:$8 sps:$4 sm:$0xff]  }
  0x34   :  { %1921 = vmatpush2.bf16.msra.mxu1 %v2681_v53  ;;  %1879 = vmatprep.subr.bf16.mxu0 %v2682_v54  ;;  %v2775_v53 = vld [vmem:[%s4018_s1 + $0x3c0] ss:$8 sps:$4 sm:$0xff]   ;;  %v2780_v54 = vld [vmem:[%s4018_s1 + $0x2b4] ss:$8 sps:$4 sm:$0xff]  }
  0x35   :  { %1922 = vmatprep.subr.bf16.mxu1 %v2684_v55  ;;  %v2783_v55 = vld [vmem:[%s4018_s1 + $0x3b4] ss:$8 sps:$4 sm:$0xff]  }
  0x37   :  { %1880 = vmatpush2.bf16.msra.mxu0 %v2686_v56  ;;  %v2778_v56 = vld [vmem:[%s4018_s1 + $0x2b0] ss:$8 sps:$4 sm:$0xff]  }
  0x38   :  { %1923 = vmatpush2.bf16.msra.mxu1 %v2687_v57  ;;  %1881 = vmatprep.subr.bf16.mxu0 %v2688_v58  ;;  %v2781_v57 = vld [vmem:[%s4018_s1 + $0x3b0] ss:$8 sps:$4 sm:$0xff]   ;;  %v2786_v58 = vld [vmem:[%s4018_s1 + $0x2a4] ss:$8 sps:$4 sm:$0xff]  }
  0x39   :  { %1924 = vmatprep.subr.bf16.mxu1 %v2690_v59  ;;  %v2789_v59 = vld [vmem:[%s4018_s1 + $0x3a4] ss:$8 sps:$4 sm:$0xff]  }
  0x3b   :  { %1882 = vmatpush2.bf16.msra.mxu0 %v2692_v60  ;;  %v2784_v60 = vld [vmem:[%s4018_s1 + $0x2a0] ss:$8 sps:$4 sm:$0xff]  }
  0x3c   :  { %1925 = vmatpush2.bf16.msra.mxu1 %v2693_v61  ;;  %1883 = vmatprep.subr.bf16.mxu0 %v2694_v62  ;;  %v2787_v61 = vld [vmem:[%s4018_s1 + $0x3a0] ss:$8 sps:$4 sm:$0xff]   ;;  %v2792_v62 = vld [vmem:[%s4018_s1 + $0x294] ss:$8 sps:$4 sm:$0xff]  }
  0x3d   :  { %1926 = vmatprep.subr.bf16.mxu1 %v2696_v63  ;;  %v2795_v63 = vld [vmem:[%s4018_s1 + $0x394] ss:$8 sps:$4 sm:$0xff]  }
  0x3f   :  { %1884 = vmatpush2.bf16.msra.mxu0 %v2698_v0  ;;  %v2790_v0 = vld [vmem:[%s4018_s1 + $0x290] ss:$8 sps:$4 sm:$0xff]  }
  0x40   :  { %1927 = vmatpush2.bf16.msra.mxu1 %v2699_v1  ;;  %1939 = vmatprep.subr.bf16.mxu0 %v2708_v2  ;;  %v2793_v1 = vld [vmem:[%s4018_s1 + $0x390] ss:$8 sps:$4 sm:$0xff]   ;;  %v2798_v2 = vld [vmem:[%s4018_s1 + $0x284] ss:$8 sps:$4 sm:$0xff]  }
  0x41   :  { %1982 = vmatprep.subr.bf16.mxu1 %v2711_v3  ;;  %v2801_v3 = vld [vmem:[%s4018_s1 + $0x384] ss:$8 sps:$4 sm:$0xff]  }
  0x42   :  { %1886 = vmatmul.mubr.bf16.vlgmr.msra.gmra.mxu0 %v2700_v4  ;;  %v2796_v4 = vld [vmem:[%s4018_s1 + $0x280] ss:$8 sps:$4 sm:$0xff]  }
  0x43   :  { %1929 = vmatmul.mubr.bf16.vlgmr.msra.gmra.mxu1 %v2703_v5  ;;  %1940 = vmatpush1.bf16.msra.mxu0 %v2706_v6  ;;  %v2799_v5 = vld [vmem:[%s4018_s1 + $0x380] ss:$8 sps:$4 sm:$0xff]   ;;  %v2807_v6 = vld [vmem:[%s4018_s1 + $0x474] ss:$8 sps:$4 sm:$0xff]  }
  0x44   :  { %1983 = vmatpush1.bf16.msra.mxu1 %v2709_v7  ;;  %1941 = vmatprep.subr.bf16.mxu0 %v2714_v8  ;;  %v2813_v7 = vld [vmem:[%s4018_s1 + $0x574] ss:$8 sps:$4 sm:$0xff]   ;;  %v2802_v8 = vld [vmem:[%s4019_s0 + $0x10] ss:$72 sps:$4 sm:$0xff]  }
  0x45   :  { %1984 = vmatprep.subr.bf16.mxu1 %v2717_v9  ;;  %1971 = vmatprep.mubr.bf16.mxu0 %v2804_v34  ;;  %v2805_v9 = vld [vmem:[%s4018_s1 + $0x470] ss:$8 sps:$4 sm:$0xff]   ;;  %v2846_v34 = vld [vmem:[%s4018_s1 + $0x414] ss:$8 sps:$4 sm:$0xff]  }
  0x46   :  { %2014 = vmatprep.mubr.bf16.mxu1 %v2810_v37  ;;  %v2847_v37 = vld [vmem:[%s4018_s1 + $0x510] ss:$8 sps:$4 sm:$0xff]  }
  0x47   :  { %1942 = vmatpush1.bf16.msra.mxu0 %v2712_v10  ;;  %v2808_v10 = vld [vmem:[%s4019_s0 + $0x18] ss:$72 sps:$4 sm:$0xff]  }
  0x48   :  { %1985 = vmatpush1.bf16.msra.mxu1 %v2715_v11  ;;  %1943 = vmatprep.subr.bf16.mxu0 %v2720_v12  ;;  %v2811_v11 = vld [vmem:[%s4018_s1 + $0x570] ss:$8 sps:$4 sm:$0xff]   ;;  %v2816_v12 = vld [vmem:[%s4018_s1 + $0x464] ss:$8 sps:$4 sm:$0xff]  }
  0x49   :  { %1986 = vmatprep.subr.bf16.mxu1 %v2723_v13  ;;  %v2819_v13 = vld [vmem:[%s4018_s1 + $0x564] ss:$8 sps:$4 sm:$0xff]  }
  0x4b   :  { %1944 = vmatpush1.bf16.msra.mxu0 %v2718_v14  ;;  %v2814_v14 = vld [vmem:[%s4018_s1 + $0x460] ss:$8 sps:$4 sm:$0xff]  }
  0x4c   :  { %1987 = vmatpush1.bf16.msra.mxu1 %v2721_v15  ;;  %1945 = vmatprep.subr.bf16.mxu0 %v2726_v16  ;;  %v2817_v15 = vld [vmem:[%s4018_s1 + $0x560] ss:$8 sps:$4 sm:$0xff]   ;;  %v2822_v16 = vld [vmem:[%s4018_s1 + $0x454] ss:$8 sps:$4 sm:$0xff]  }
  0x4d   :  { %1988 = vmatprep.subr.bf16.mxu1 %v2729_v17  ;;  %v2825_v17 = vld [vmem:[%s4018_s1 + $0x554] ss:$8 sps:$4 sm:$0xff]  }
  0x4f   :  { %1946 = vmatpush1.bf16.msra.mxu0 %v2724_v18  ;;  %v2820_v18 = vld [vmem:[%s4018_s1 + $0x450] ss:$8 sps:$4 sm:$0xff]  }
  0x50   :  { %1989 = vmatpush1.bf16.msra.mxu1 %v2727_v19  ;;  %1947 = vmatprep.subr.bf16.mxu0 %v2732_v20  ;;  %v2906_v19 = vld [vmem:[%s4019_s0 + $0x24] ss:$72 sps:$4 sm:$0xff]   ;;  %v2823_v20 = vld [vmem:[%s4018_s1 + $0x550] ss:$8 sps:$4 sm:$0xff]  }
  0x51   :  { %1990 = vmatprep.subr.bf16.mxu1 %v2735_v21  ;;  %v2828_v21 = vld [vmem:[%s4018_s1 + $0x444] ss:$8 sps:$4 sm:$0xff]  }
  0x53   :  { %1948 = vmatpush1.bf16.msra.mxu0 %v2730_v22  ;;  %v2831_v22 = vld [vmem:[%s4018_s1 + $0x544] ss:$8 sps:$4 sm:$0xff]  }
  0x54   :  { %1991 = vmatpush1.bf16.msra.mxu1 %v2733_v23  ;;  %1949 = vmatprep.subr.bf16.mxu0 %v2738_v24  ;;  %v2912_v23 = vld [vmem:[%s4019_s0 + $0x2c] ss:$72 sps:$4 sm:$0xff]   ;;  %v2826_v24 = vld [vmem:[%s4018_s1 + $0x440] ss:$8 sps:$4 sm:$0xff]  }
  0x55   :  { %1992 = vmatprep.subr.bf16.mxu1 %v2741_v25  ;;  %v2829_v25 = vld [vmem:[%s4018_s1 + $0x540] ss:$8 sps:$4 sm:$0xff]  }
  0x57   :  { %1950 = vmatpush1.bf16.msra.mxu0 %v2736_v26  ;;  %v2834_v26 = vld [vmem:[%s4018_s1 + $0x434] ss:$8 sps:$4 sm:$0xff]  }
  0x58   :  { %1993 = vmatpush1.bf16.msra.mxu1 %v2739_v27  ;;  %1951 = vmatprep.subr.bf16.mxu0 %v2744_v28  ;;  %v2837_v27 = vld [vmem:[%s4018_s1 + $0x534] ss:$8 sps:$4 sm:$0xff]   ;;  %v2832_v28 = vld [vmem:[%s4018_s1 + $0x430] ss:$8 sps:$4 sm:$0xff]  }
  0x59   :  { %1994 = vmatprep.subr.bf16.mxu1 %v2747_v29  ;;  %v2835_v29 = vld [vmem:[%s4018_s1 + $0x530] ss:$8 sps:$4 sm:$0xff]  }
  0x5b   :  { %1952 = vmatpush1.bf16.msra.mxu0 %v2742_v30  ;;  %v2840_v30 = vld [vmem:[%s4018_s1 + $0x424] ss:$8 sps:$4 sm:$0xff]  }
  0x5c   :  { %1995 = vmatpush1.bf16.msra.mxu1 %v2745_v31  ;;  %1953 = vmatprep.subr.bf16.mxu0 %v2750_v32  ;;  %v2843_v31 = vld [vmem:[%s4018_s1 + $0x524] ss:$8 sps:$4 sm:$0xff]   ;;  %v2838_v32 = vld [vmem:[%s4018_s1 + $0x420] ss:$8 sps:$4 sm:$0xff]  }
  0x5d   :  { %1996 = vmatprep.subr.bf16.mxu1 %v2753_v33  ;;  %v2841_v33 = vld [vmem:[%s4018_s1 + $0x520] ss:$8 sps:$4 sm:$0xff]  }
  0x5f   :  { %1954 = vmatpush1.bf16.msra.mxu0 %v2748_v35  ;;  %v2849_v35 = vld [vmem:[%s4018_s1 + $0x514] ss:$8 sps:$4 sm:$0xff]  }
  0x60   :  { %1997 = vmatpush1.bf16.msra.mxu1 %v2751_v36  ;;  %1955 = vmatprep.subr.bf16.mxu0 %v2756_v38  ;;  %v2844_v36 = vld [vmem:[%s4018_s1 + $0x410] ss:$8 sps:$4 sm:$0xff]   ;;  %v2852_v38 = vld [vmem:[%s4018_s1 + $0x404] ss:$8 sps:$4 sm:$0xff]  }
  0x61   :  { %1998 = vmatprep.subr.bf16.mxu1 %v2759_v39  ;;  %v2855_v39 = vld [vmem:[%s4018_s1 + $0x504] ss:$8 sps:$4 sm:$0xff]  }
  0x63   :  { %1956 = vmatpush2.bf16.msra.mxu0 %v2754_v40  ;;  %v2850_v40 = vld [vmem:[%s4018_s1 + $0x400] ss:$8 sps:$4 sm:$0xff]  }
  0x64   :  { %1999 = vmatpush2.bf16.msra.mxu1 %v2757_v41  ;;  %1957 = vmatprep.subr.bf16.mxu0 %v2762_v42  ;;  %v2853_v41 = vld [vmem:[%s4018_s1 + $0x500] ss:$8 sps:$4 sm:$0xff]   ;;  %v2858_v42 = vld [vmem:[%s4018_s1 + $0x4f4] ss:$8 sps:$4 sm:$0xff]  }
  0x65   :  { %2000 = vmatprep.subr.bf16.mxu1 %v2765_v43  ;;  %v2861_v43 = vld [vmem:[%s4018_s1 + $0x5f4] ss:$8 sps:$4 sm:$0xff]  }
  0x67   :  { %1958 = vmatpush2.bf16.msra.mxu0 %v2760_v44  ;;  %v2856_v44 = vld [vmem:[%s4018_s1 + $0x4f0] ss:$8 sps:$4 sm:$0xff]  }
  0x68   :  { %2001 = vmatpush2.bf16.msra.mxu1 %v2763_v45  ;;  %1959 = vmatprep.subr.bf16.mxu0 %v2768_v46  ;;  %v2859_v45 = vld [vmem:[%s4018_s1 + $0x5f0] ss:$8 sps:$4 sm:$0xff]   ;;  %v2864_v46 = vld [vmem:[%s4018_s1 + $0x4e4] ss:$8 sps:$4 sm:$0xff]  }
  0x69   :  { %2002 = vmatprep.subr.bf16.mxu1 %v2771_v47  ;;  %v2867_v47 = vld [vmem:[%s4018_s1 + $0x5e4] ss:$8 sps:$4 sm:$0xff]  }
  0x6b   :  { %1960 = vmatpush2.bf16.msra.mxu0 %v2766_v48  ;;  %v2862_v48 = vld [vmem:[%s4018_s1 + $0x4e0] ss:$8 sps:$4 sm:$0xff]  }
  0x6c   :  { %2003 = vmatpush2.bf16.msra.mxu1 %v2769_v49  ;;  %1961 = vmatprep.subr.bf16.mxu0 %v2774_v50  ;;  %v2865_v49 = vld [vmem:[%s4018_s1 + $0x5e0] ss:$8 sps:$4 sm:$0xff]   ;;  %v2870_v50 = vld [vmem:[%s4018_s1 + $0x4d4] ss:$8 sps:$4 sm:$0xff]  }
  0x6d   :  { %2004 = vmatprep.subr.bf16.mxu1 %v2777_v51  ;;  %v2873_v51 = vld [vmem:[%s4018_s1 + $0x5d4] ss:$8 sps:$4 sm:$0xff]  }
  0x6f   :  { %1962 = vmatpush2.bf16.msra.mxu0 %v2772_v52  ;;  %v2868_v52 = vld [vmem:[%s4018_s1 + $0x4d0] ss:$8 sps:$4 sm:$0xff]  }
  0x70   :  { %2005 = vmatpush2.bf16.msra.mxu1 %v2775_v53  ;;  %1963 = vmatprep.subr.bf16.mxu0 %v2780_v54  ;;  %v2871_v53 = vld [vmem:[%s4018_s1 + $0x5d0] ss:$8 sps:$4 sm:$0xff]   ;;  %v2876_v54 = vld [vmem:[%s4018_s1 + $0x4c4] ss:$8 sps:$4 sm:$0xff]  }
  0x71   :  { %2006 = vmatprep.subr.bf16.mxu1 %v2783_v55  ;;  %v2879_v55 = vld [vmem:[%s4018_s1 + $0x5c4] ss:$8 sps:$4 sm:$0xff]  }
  0x73   :  { %1964 = vmatpush2.bf16.msra.mxu0 %v2778_v56  ;;  %v2874_v56 = vld [vmem:[%s4018_s1 + $0x4c0] ss:$8 sps:$4 sm:$0xff]  }
  0x74   :  { %2007 = vmatpush2.bf16.msra.mxu1 %v2781_v57  ;;  %1965 = vmatprep.subr.bf16.mxu0 %v2786_v58  ;;  %v2877_v57 = vld [vmem:[%s4018_s1 + $0x5c0] ss:$8 sps:$4 sm:$0xff]   ;;  %v2882_v58 = vld [vmem:[%s4018_s1 + $0x4b4] ss:$8 sps:$4 sm:$0xff]  }
  0x75   :  { %2008 = vmatprep.subr.bf16.mxu1 %v2789_v59  ;;  %v2885_v59 = vld [vmem:[%s4018_s1 + $0x5b4] ss:$8 sps:$4 sm:$0xff]  }
  0x77   :  { %1966 = vmatpush2.bf16.msra.mxu0 %v2784_v60  ;;  %v2880_v60 = vld [vmem:[%s4018_s1 + $0x4b0] ss:$8 sps:$4 sm:$0xff]  }
  0x78   :  { %2009 = vmatpush2.bf16.msra.mxu1 %v2787_v61  ;;  %1967 = vmatprep.subr.bf16.mxu0 %v2792_v62  ;;  %v2883_v61 = vld [vmem:[%s4018_s1 + $0x5b0] ss:$8 sps:$4 sm:$0xff]   ;;  %v2888_v62 = vld [vmem:[%s4018_s1 + $0x4a4] ss:$8 sps:$4 sm:$0xff]  }
  0x79   :  { %2010 = vmatprep.subr.bf16.mxu1 %v2795_v63  ;;  %v2891_v63 = vld [vmem:[%s4018_s1 + $0x5a4] ss:$8 sps:$4 sm:$0xff]  }
  0x7b   :  { %1968 = vmatpush2.bf16.msra.mxu0 %v2790_v0  ;;  %v2886_v0 = vld [vmem:[%s4018_s1 + $0x4a0] ss:$8 sps:$4 sm:$0xff]  }
  0x7c   :  { %2011 = vmatpush2.bf16.msra.mxu1 %v2793_v1  ;;  %1969 = vmatprep.subr.bf16.mxu0 %v2798_v2  ;;  %v2889_v1 = vld [vmem:[%s4018_s1 + $0x5a0] ss:$8 sps:$4 sm:$0xff]   ;;  %v2894_v2 = vld [vmem:[%s4018_s1 + $0x494] ss:$8 sps:$4 sm:$0xff]  }
  0x7d   :  { %2012 = vmatprep.subr.bf16.mxu1 %v2801_v3  ;;  %v2897_v3 = vld [vmem:[%s4018_s1 + $0x594] ss:$8 sps:$4 sm:$0xff]  }
  0x7f   :  { %1970 = vmatpush2.bf16.msra.mxu0 %v2796_v4  ;;  %v2892_v4 = vld [vmem:[%s4018_s1 + $0x490] ss:$8 sps:$4 sm:$0xff]  }
  0x80   :  { %2013 = vmatpush2.bf16.msra.mxu1 %v2799_v5  ;;  %2025 = vmatprep.subr.bf16.mxu0 %v2807_v6  ;;  %v2895_v5 = vld [vmem:[%s4018_s1 + $0x590] ss:$8 sps:$4 sm:$0xff]   ;;  %v2900_v6 = vld [vmem:[%s4018_s1 + $0x484] ss:$8 sps:$4 sm:$0xff]  }
  0x81   :  { %2068 = vmatprep.subr.bf16.mxu1 %v2813_v7  ;;  %v2903_v7 = vld [vmem:[%s4018_s1 + $0x584] ss:$8 sps:$4 sm:$0xff]  }
  0x82   :  { %1972 = vmatmul.mubr.bf16.vlgmr.msra.gmra.mxu0 %v2802_v8  ;;  %v2898_v8 = vld [vmem:[%s4018_s1 + $0x480] ss:$8 sps:$4 sm:$0xff]  }
  0x83   :  { %2015 = vmatmul.mubr.bf16.vlgmr.msra.gmra.mxu1 %v2808_v10  ;;  %2026 = vmatpush1.bf16.msra.mxu0 %v2805_v9  ;;  %v2901_v9 = vld [vmem:[%s4018_s1 + $0x580] ss:$8 sps:$4 sm:$0xff]   ;;  %v2909_v10 = vld [vmem:[%s4018_s1 + $0x674] ss:$8 sps:$4 sm:$0xff]  }
  0x84   :  { %2069 = vmatpush1.bf16.msra.mxu1 %v2811_v11  ;;  %2027 = vmatprep.subr.bf16.mxu0 %v2816_v12  ;;  %v2915_v11 = vld [vmem:[%s4018_s1 + $0x774] ss:$8 sps:$4 sm:$0xff]   ;;  %v2904_v12 = vld [vmem:[%s4019_s0 + $0x20] ss:$72 sps:$4 sm:$0xff]  }
  0x85   :  { %2070 = vmatprep.subr.bf16.mxu1 %v2819_v13  ;;  %2057 = vmatprep.mubr.bf16.mxu0 %v2906_v19  ;;  %v2907_v13 = vld [vmem:[%s4018_s1 + $0x670] ss:$8 sps:$4 sm:$0xff]   ;;  %v3014_v19 = vld [vmem:[%s4019_s0 + $0x3c] ss:$72 sps:$4 sm:$0xff]  }
  0x86   :  { %2100 = vmatprep.mubr.bf16.mxu1 %v2912_v23  ;;  %v2927_v23 = vld [vmem:[%s4018_s1 + $0x754] ss:$8 sps:$4 sm:$0xff]  }
  0x87   :  { %2028 = vmatpush1.bf16.msra.mxu0 %v2814_v14  ;;  %v2910_v14 = vld [vmem:[%s4019_s0 + $0x28] ss:$72 sps:$4 sm:$0xff]  }
  0x88   :  { %2071 = vmatpush1.bf16.msra.mxu1 %v2817_v15  ;;  %2029 = vmatprep.subr.bf16.mxu0 %v2822_v16  ;;  %v2913_v15 = vld [vmem:[%s4018_s1 + $0x770] ss:$8 sps:$4 sm:$0xff]   ;;  %v2918_v16 = vld [vmem:[%s4018_s1 + $0x664] ss:$8 sps:$4 sm:$0xff]  }
  0x89   :  { %2072 = vmatprep.subr.bf16.mxu1 %v2825_v17  ;;  %v2921_v17 = vld [vmem:[%s4018_s1 + $0x764] ss:$8 sps:$4 sm:$0xff]  }
  0x8b   :  { %2030 = vmatpush1.bf16.msra.mxu0 %v2820_v18  ;;  %v3008_v18 = vld [vmem:[%s4019_s0 + $0x34] ss:$72 sps:$4 sm:$0xff]  }
  0x8c   :  { %2073 = vmatpush1.bf16.msra.mxu1 %v2823_v20  ;;  %2031 = vmatprep.subr.bf16.mxu0 %v2828_v21  ;;  %v2916_v20 = vld [vmem:[%s4018_s1 + $0x660] ss:$8 sps:$4 sm:$0xff]  }
  0x8d   :  { %2074 = vmatprep.subr.bf16.mxu1 %v2831_v22  ;;  %v2919_v21 = vld [vmem:[%s4018_s1 + $0x760] ss:$8 sps:$4 sm:$0xff]   ;;  %v2924_v22 = vld [vmem:[%s4018_s1 + $0x654] ss:$8 sps:$4 sm:$0xff]  }
  0x8f   :  { %2032 = vmatpush1.bf16.msra.mxu0 %v2826_v24  ;;  %v2922_v24 = vld [vmem:[%s4018_s1 + $0x650] ss:$8 sps:$4 sm:$0xff]  }
  0x90   :  { %2075 = vmatpush1.bf16.msra.mxu1 %v2829_v25  ;;  %2033 = vmatprep.subr.bf16.mxu0 %v2834_v26  ;;  %v2925_v25 = vld [vmem:[%s4018_s1 + $0x750] ss:$8 sps:$4 sm:$0xff]   ;;  %v2930_v26 = vld [vmem:[%s4018_s1 + $0x644] ss:$8 sps:$4 sm:$0xff]  }
  0x91   :  { %2076 = vmatprep.subr.bf16.mxu1 %v2837_v27  ;;  %v2933_v27 = vld [vmem:[%s4018_s1 + $0x744] ss:$8 sps:$4 sm:$0xff]  }
  0x93   :  { %2034 = vmatpush1.bf16.msra.mxu0 %v2832_v28  ;;  %v2928_v28 = vld [vmem:[%s4018_s1 + $0x640] ss:$8 sps:$4 sm:$0xff]  }
  0x94   :  { %2077 = vmatpush1.bf16.msra.mxu1 %v2835_v29  ;;  %2035 = vmatprep.subr.bf16.mxu0 %v2840_v30  ;;  %v2931_v29 = vld [vmem:[%s4018_s1 + $0x740] ss:$8 sps:$4 sm:$0xff]   ;;  %v2936_v30 = vld [vmem:[%s4018_s1 + $0x634] ss:$8 sps:$4 sm:$0xff]  }
  0x95   :  { %2078 = vmatprep.subr.bf16.mxu1 %v2843_v31  ;;  %v2939_v31 = vld [vmem:[%s4018_s1 + $0x734] ss:$8 sps:$4 sm:$0xff]  }
  0x97   :  { %2036 = vmatpush1.bf16.msra.mxu0 %v2838_v32  ;;  %v2934_v32 = vld [vmem:[%s4018_s1 + $0x630] ss:$8 sps:$4 sm:$0xff]  }
  0x98   :  { %2079 = vmatpush1.bf16.msra.mxu1 %v2841_v33  ;;  %2037 = vmatprep.subr.bf16.mxu0 %v2846_v34  ;;  %v2937_v33 = vld [vmem:[%s4018_s1 + $0x730] ss:$8 sps:$4 sm:$0xff]   ;;  %v2942_v34 = vld [vmem:[%s4018_s1 + $0x624] ss:$8 sps:$4 sm:$0xff]  }
  0x99   :  { %2080 = vmatprep.subr.bf16.mxu1 %v2849_v35  ;;  %v2945_v35 = vld [vmem:[%s4018_s1 + $0x724] ss:$8 sps:$4 sm:$0xff]  }
  0x9b   :  { %2038 = vmatpush1.bf16.msra.mxu0 %v2844_v36  ;;  %v2940_v36 = vld [vmem:[%s4018_s1 + $0x620] ss:$8 sps:$4 sm:$0xff]  }
  0x9c   :  { %2081 = vmatpush1.bf16.msra.mxu1 %v2847_v37  ;;  %2039 = vmatprep.subr.bf16.mxu0 %v2852_v38  ;;  %v2943_v37 = vld [vmem:[%s4018_s1 + $0x720] ss:$8 sps:$4 sm:$0xff]   ;;  %v2948_v38 = vld [vmem:[%s4018_s1 + $0x614] ss:$8 sps:$4 sm:$0xff]  }
  0x9d   :  { %2082 = vmatprep.subr.bf16.mxu1 %v2855_v39  ;;  %v2951_v39 = vld [vmem:[%s4018_s1 + $0x714] ss:$8 sps:$4 sm:$0xff]  }
  0x9f   :  { %2040 = vmatpush1.bf16.msra.mxu0 %v2850_v40  ;;  %v2946_v40 = vld [vmem:[%s4018_s1 + $0x610] ss:$8 sps:$4 sm:$0xff]  }
  0xa0   :  { %2083 = vmatpush1.bf16.msra.mxu1 %v2853_v41  ;;  %2041 = vmatprep.subr.bf16.mxu0 %v2858_v42  ;;  %v2949_v41 = vld [vmem:[%s4018_s1 + $0x710] ss:$8 sps:$4 sm:$0xff]   ;;  %v2954_v42 = vld [vmem:[%s4018_s1 + $0x604] ss:$8 sps:$4 sm:$0xff]  }
  0xa1   :  { %2084 = vmatprep.subr.bf16.mxu1 %v2861_v43  ;;  %v2957_v43 = vld [vmem:[%s4018_s1 + $0x704] ss:$8 sps:$4 sm:$0xff]  }
  0xa3   :  { %2042 = vmatpush2.bf16.msra.mxu0 %v2856_v44  ;;  %v2952_v44 = vld [vmem:[%s4018_s1 + $0x600] ss:$8 sps:$4 sm:$0xff]  }
  0xa4   :  { %2085 = vmatpush2.bf16.msra.mxu1 %v2859_v45  ;;  %2043 = vmatprep.subr.bf16.mxu0 %v2864_v46  ;;  %v2955_v45 = vld [vmem:[%s4018_s1 + $0x700] ss:$8 sps:$4 sm:$0xff]   ;;  %v2960_v46 = vld [vmem:[%s4018_s1 + $0x6f4] ss:$8 sps:$4 sm:$0xff]  }
  0xa5   :  { %2086 = vmatprep.subr.bf16.mxu1 %v2867_v47  ;;  %v2963_v47 = vld [vmem:[%s4018_s1 + $0x7f4] ss:$8 sps:$4 sm:$0xff]  }
  0xa7   :  { %2044 = vmatpush2.bf16.msra.mxu0 %v2862_v48  ;;  %v2958_v48 = vld [vmem:[%s4018_s1 + $0x6f0] ss:$8 sps:$4 sm:$0xff]  }
  0xa8   :  { %2087 = vmatpush2.bf16.msra.mxu1 %v2865_v49  ;;  %2045 = vmatprep.subr.bf16.mxu0 %v2870_v50  ;;  %v2961_v49 = vld [vmem:[%s4018_s1 + $0x7f0] ss:$8 sps:$4 sm:$0xff]   ;;  %v2966_v50 = vld [vmem:[%s4018_s1 + $0x6e4] ss:$8 sps:$4 sm:$0xff]  }
  0xa9   :  { %2088 = vmatprep.subr.bf16.mxu1 %v2873_v51  ;;  %v2969_v51 = vld [vmem:[%s4018_s1 + $0x7e4] ss:$8 sps:$4 sm:$0xff]  }
  0xab   :  { %2046 = vmatpush2.bf16.msra.mxu0 %v2868_v52  ;;  %v2964_v52 = vld [vmem:[%s4018_s1 + $0x6e0] ss:$8 sps:$4 sm:$0xff]  }
  0xac   :  { %2089 = vmatpush2.bf16.msra.mxu1 %v2871_v53  ;;  %2047 = vmatprep.subr.bf16.mxu0 %v2876_v54  ;;  %v2967_v53 = vld [vmem:[%s4018_s1 + $0x7e0] ss:$8 sps:$4 sm:$0xff]   ;;  %v2972_v54 = vld [vmem:[%s4018_s1 + $0x6d4] ss:$8 sps:$4 sm:$0xff]  }
  0xad   :  { %2090 = vmatprep.subr.bf16.mxu1 %v2879_v55  ;;  %v2975_v55 = vld [vmem:[%s4018_s1 + $0x7d4] ss:$8 sps:$4 sm:$0xff]  }
  0xaf   :  { %2048 = vmatpush2.bf16.msra.mxu0 %v2874_v56  ;;  %v2970_v56 = vld [vmem:[%s4018_s1 + $0x6d0] ss:$8 sps:$4 sm:$0xff]  }
  0xb0   :  { %2091 = vmatpush2.bf16.msra.mxu1 %v2877_v57  ;;  %2049 = vmatprep.subr.bf16.mxu0 %v2882_v58  ;;  %v2973_v57 = vld [vmem:[%s4018_s1 + $0x7d0] ss:$8 sps:$4 sm:$0xff]   ;;  %v2978_v58 = vld [vmem:[%s4018_s1 + $0x6c4] ss:$8 sps:$4 sm:$0xff]  }
  0xb1   :  { %2092 = vmatprep.subr.bf16.mxu1 %v2885_v59  ;;  %v2981_v59 = vld [vmem:[%s4018_s1 + $0x7c4] ss:$8 sps:$4 sm:$0xff]  }
  0xb3   :  { %2050 = vmatpush2.bf16.msra.mxu0 %v2880_v60  ;;  %v2976_v60 = vld [vmem:[%s4018_s1 + $0x6c0] ss:$8 sps:$4 sm:$0xff]  }
  0xb4   :  { %2093 = vmatpush2.bf16.msra.mxu1 %v2883_v61  ;;  %2051 = vmatprep.subr.bf16.mxu0 %v2888_v62  ;;  %v2979_v61 = vld [vmem:[%s4018_s1 + $0x7c0] ss:$8 sps:$4 sm:$0xff]   ;;  %v2984_v62 = vld [vmem:[%s4018_s1 + $0x6b4] ss:$8 sps:$4 sm:$0xff]  }
  0xb5   :  { %2094 = vmatprep.subr.bf16.mxu1 %v2891_v63  ;;  %v2987_v63 = vld [vmem:[%s4018_s1 + $0x7b4] ss:$8 sps:$4 sm:$0xff]  }
  0xb7   :  { %2052 = vmatpush2.bf16.msra.mxu0 %v2886_v0  ;;  %v2982_v0 = vld [vmem:[%s4018_s1 + $0x6b0] ss:$8 sps:$4 sm:$0xff]  }
  0xb8   :  { %2095 = vmatpush2.bf16.msra.mxu1 %v2889_v1  ;;  %2053 = vmatprep.subr.bf16.mxu0 %v2894_v2  ;;  %v2985_v1 = vld [vmem:[%s4018_s1 + $0x7b0] ss:$8 sps:$4 sm:$0xff]   ;;  %v2990_v2 = vld [vmem:[%s4018_s1 + $0x6a4] ss:$8 sps:$4 sm:$0xff]  }
  0xb9   :  { %2096 = vmatprep.subr.bf16.mxu1 %v2897_v3  ;;  %v2993_v3 = vld [vmem:[%s4018_s1 + $0x7a4] ss:$8 sps:$4 sm:$0xff]  }
  0xbb   :  { %2054 = vmatpush2.bf16.msra.mxu0 %v2892_v4  ;;  %v2988_v4 = vld [vmem:[%s4018_s1 + $0x6a0] ss:$8 sps:$4 sm:$0xff]  }
  0xbc   :  { %2097 = vmatpush2.bf16.msra.mxu1 %v2895_v5  ;;  %2055 = vmatprep.subr.bf16.mxu0 %v2900_v6  ;;  %v2991_v5 = vld [vmem:[%s4018_s1 + $0x7a0] ss:$8 sps:$4 sm:$0xff]   ;;  %v2996_v6 = vld [vmem:[%s4018_s1 + $0x694] ss:$8 sps:$4 sm:$0xff]  }
  0xbd   :  { %2098 = vmatprep.subr.bf16.mxu1 %v2903_v7  ;;  %v2999_v7 = vld [vmem:[%s4018_s1 + $0x794] ss:$8 sps:$4 sm:$0xff]  }
  0xbf   :  { %2056 = vmatpush2.bf16.msra.mxu0 %v2898_v8  ;;  %v2994_v8 = vld [vmem:[%s4018_s1 + $0x690] ss:$8 sps:$4 sm:$0xff]  }
  0xc0   :  { %2099 = vmatpush2.bf16.msra.mxu1 %v2901_v9  ;;  %2111 = vmatprep.subr.bf16.mxu0 %v2909_v10  ;;  %v2997_v9 = vld [vmem:[%s4018_s1 + $0x790] ss:$8 sps:$4 sm:$0xff]   ;;  %v3002_v10 = vld [vmem:[%s4018_s1 + $0x684] ss:$8 sps:$4 sm:$0xff]  }
  0xc1   :  { %2154 = vmatprep.subr.bf16.mxu1 %v2915_v11  ;;  %v3005_v11 = vld [vmem:[%s4018_s1 + $0x784] ss:$8 sps:$4 sm:$0xff]  }
  0xc2   :  { %2058 = vmatmul.mubr.bf16.vlgmr.msra.gmra.mxu0 %v2904_v12  ;;  %v3000_v12 = vld [vmem:[%s4018_s1 + $0x680] ss:$8 sps:$4 sm:$0xff]  }
  0xc3   :  { %2101 = vmatmul.mubr.bf16.vlgmr.msra.gmra.mxu1 %v2910_v14  ;;  %2112 = vmatpush1.bf16.msra.mxu0 %v2907_v13  ;;  %v3003_v13 = vld [vmem:[%s4018_s1 + $0x780] ss:$8 sps:$4 sm:$0xff]   ;;  %v3011_v14 = vld [vmem:[%s4018_s1 + $0x874] ss:$8 sps:$4 sm:$0xff]  }
  0xc4   :  { %2155 = vmatpush1.bf16.msra.mxu1 %v2913_v15  ;;  %2113 = vmatprep.subr.bf16.mxu0 %v2918_v16  ;;  %v3006_v15 = vld [vmem:[%s4019_s0 + $0x30] ss:$72 sps:$4 sm:$0xff]  }
  0xc5   :  { %2156 = vmatprep.subr.bf16.mxu1 %v2921_v17  ;;  %2143 = vmatprep.mubr.bf16.mxu0 %v3008_v18  ;;  %v3012_v16 = vld [vmem:[%s4019_s0 + $0x38] ss:$72 sps:$4 sm:$0xff]   ;;  %v3062_v18 = vld [vmem:[%s4019_s0 + $0x44] ss:$72 sps:$4 sm:$0xff]  }
  0xc6   :  { %2186 = vmatprep.mubr.bf16.mxu1 %v3014_v19  ;;  %v3009_v17 = vld [vmem:[%s4018_s1 + $0x870] ss:$8 sps:$4 sm:$0xff]   ;;  %v3017_v19 = vld [vmem:[%s4018_s1 + $0x864] ss:$8 sps:$4 sm:$0xff]  }
  0xc7   :  { %2114 = vmatpush1.bf16.msra.mxu0 %v2916_v20  ;;  %v3015_v20 = vld [vmem:[%s4018_s1 + $0x860] ss:$8 sps:$4 sm:$0xff]  }
  0xc8   :  { %2157 = vmatpush1.bf16.msra.mxu1 %v2919_v21  ;;  %2115 = vmatprep.subr.bf16.mxu0 %v2924_v22  ;;  %v3020_v21 = vld [vmem:[%s4018_s1 + $0x854] ss:$8 sps:$4 sm:$0xff]   ;;  %v3018_v22 = vld [vmem:[%s4018_s1 + $0x850] ss:$8 sps:$4 sm:$0xff]  }
  0xc9   :  { %2158 = vmatprep.subr.bf16.mxu1 %v2927_v23  ;;  %v3023_v23 = vld [vmem:[%s4018_s1 + $0x844] ss:$8 sps:$4 sm:$0xff]  }
  0xcb   :  { %2116 = vmatpush1.bf16.msra.mxu0 %v2922_v24  ;;  %v3021_v24 = vld [vmem:[%s4018_s1 + $0x840] ss:$8 sps:$4 sm:$0xff]  }
  0xcc   :  { %2159 = vmatpush1.bf16.msra.mxu1 %v2925_v25  ;;  %2117 = vmatprep.subr.bf16.mxu0 %v2930_v26  ;;  %v3026_v25 = vld [vmem:[%s4018_s1 + $0x834] ss:$8 sps:$4 sm:$0xff]   ;;  %v3024_v26 = vld [vmem:[%s4018_s1 + $0x830] ss:$8 sps:$4 sm:$0xff]  }
  0xcd   :  { %2160 = vmatprep.subr.bf16.mxu1 %v2933_v27  ;;  %v3029_v27 = vld [vmem:[%s4018_s1 + $0x824] ss:$8 sps:$4 sm:$0xff]  }
  0xcf   :  { %2118 = vmatpush1.bf16.msra.mxu0 %v2928_v28  ;;  %v3027_v28 = vld [vmem:[%s4018_s1 + $0x820] ss:$8 sps:$4 sm:$0xff]  }
  0xd0   :  { %2161 = vmatpush1.bf16.msra.mxu1 %v2931_v29  ;;  %2119 = vmatprep.subr.bf16.mxu0 %v2936_v30  ;;  %v3032_v29 = vld [vmem:[%s4018_s1 + $0x814] ss:$8 sps:$4 sm:$0xff]   ;;  %v3030_v30 = vld [vmem:[%s4018_s1 + $0x810] ss:$8 sps:$4 sm:$0xff]  }
  0xd1   :  { %2162 = vmatprep.subr.bf16.mxu1 %v2939_v31  ;;  %v3035_v31 = vld [vmem:[%s4018_s1 + $0x804] ss:$8 sps:$4 sm:$0xff]  }
  0xd3   :  { %2120 = vmatpush1.bf16.msra.mxu0 %v2934_v32  ;;  %v3033_v32 = vld [vmem:[%s4018_s1 + $0x800] ss:$8 sps:$4 sm:$0xff]  }
  0xd4   :  { %2163 = vmatpush1.bf16.msra.mxu1 %v2937_v33  ;;  %2121 = vmatprep.subr.bf16.mxu0 %v2942_v34  ;;  %v3038_v33 = vld [vmem:[%s4018_s1 + $0x8f4] ss:$8 sps:$4 sm:$0xff]   ;;  %v3036_v34 = vld [vmem:[%s4018_s1 + $0x8f0] ss:$8 sps:$4 sm:$0xff]  }
  0xd5   :  { %2164 = vmatprep.subr.bf16.mxu1 %v2945_v35  ;;  %v3041_v35 = vld [vmem:[%s4018_s1 + $0x8e4] ss:$8 sps:$4 sm:$0xff]  }
  0xd7   :  { %2122 = vmatpush1.bf16.msra.mxu0 %v2940_v36  ;;  %v3039_v36 = vld [vmem:[%s4018_s1 + $0x8e0] ss:$8 sps:$4 sm:$0xff]  }
  0xd8   :  { %2165 = vmatpush1.bf16.msra.mxu1 %v2943_v37  ;;  %2123 = vmatprep.subr.bf16.mxu0 %v2948_v38  ;;  %v3044_v37 = vld [vmem:[%s4018_s1 + $0x8d4] ss:$8 sps:$4 sm:$0xff]   ;;  %v3042_v38 = vld [vmem:[%s4018_s1 + $0x8d0] ss:$8 sps:$4 sm:$0xff]  }
  0xd9   :  { %2166 = vmatprep.subr.bf16.mxu1 %v2951_v39  ;;  %v3047_v39 = vld [vmem:[%s4018_s1 + $0x8c4] ss:$8 sps:$4 sm:$0xff]  }
  0xdb   :  { %2124 = vmatpush1.bf16.msra.mxu0 %v2946_v40  ;;  %v3045_v40 = vld [vmem:[%s4018_s1 + $0x8c0] ss:$8 sps:$4 sm:$0xff]  }
  0xdc   :  { %2167 = vmatpush1.bf16.msra.mxu1 %v2949_v41  ;;  %2125 = vmatprep.subr.bf16.mxu0 %v2954_v42  ;;  %v3050_v41 = vld [vmem:[%s4018_s1 + $0x8b4] ss:$8 sps:$4 sm:$0xff]   ;;  %v3048_v42 = vld [vmem:[%s4018_s1 + $0x8b0] ss:$8 sps:$4 sm:$0xff]  }
  0xdd   :  { %2168 = vmatprep.subr.bf16.mxu1 %v2957_v43  ;;  %v3053_v43 = vld [vmem:[%s4018_s1 + $0x8a4] ss:$8 sps:$4 sm:$0xff]  }
  0xdf   :  { %2126 = vmatpush1.bf16.msra.mxu0 %v2952_v44  ;;  %v3051_v44 = vld [vmem:[%s4018_s1 + $0x8a0] ss:$8 sps:$4 sm:$0xff]  }
  0xe0   :  { %2169 = vmatpush1.bf16.msra.mxu1 %v2955_v45  ;;  %2127 = vmatprep.subr.bf16.mxu0 %v2960_v46  ;;  %v3056_v45 = vld [vmem:[%s4018_s1 + $0x894] ss:$8 sps:$4 sm:$0xff]   ;;  %v3054_v46 = vld [vmem:[%s4018_s1 + $0x890] ss:$8 sps:$4 sm:$0xff]  }
  0xe1   :  { %2170 = vmatprep.subr.bf16.mxu1 %v2963_v47  ;;  %v3059_v47 = vld [vmem:[%s4018_s1 + $0x884] ss:$8 sps:$4 sm:$0xff]  }
  0xe3   :  { %2128 = vmatpush2.bf16.msra.mxu0 %v2958_v48  ;;  %v3057_v48 = vld [vmem:[%s4018_s1 + $0x880] ss:$8 sps:$4 sm:$0xff]  }
  0xe4   :  { %2171 = vmatpush2.bf16.msra.mxu1 %v2961_v49  ;;  %2129 = vmatprep.subr.bf16.mxu0 %v2966_v50  ;;  %v3060_v49 = vld [vmem:[%s4019_s0 + $0x40] ss:$72 sps:$4 sm:$0xff]  }
  0xe5   :  { %2172 = vmatprep.subr.bf16.mxu1 %v2969_v51 }
  0xe7   :  { %2130 = vmatpush2.bf16.msra.mxu0 %v2964_v52 }
  0xe8   :  { %2173 = vmatpush2.bf16.msra.mxu1 %v2967_v53  ;;  %2131 = vmatprep.subr.bf16.mxu0 %v2972_v54 }
  0xe9   :  { %2174 = vmatprep.subr.bf16.mxu1 %v2975_v55 }
  0xeb   :  { %2132 = vmatpush2.bf16.msra.mxu0 %v2970_v56 }
  0xec   :  { %2175 = vmatpush2.bf16.msra.mxu1 %v2973_v57  ;;  %2133 = vmatprep.subr.bf16.mxu0 %v2978_v58 }
  0xed   :  { %2176 = vmatprep.subr.bf16.mxu1 %v2981_v59 }
  0xef   :  { %2134 = vmatpush2.bf16.msra.mxu0 %v2976_v60 }
  0xf0   :  { %2177 = vmatpush2.bf16.msra.mxu1 %v2979_v61  ;;  %2135 = vmatprep.subr.bf16.mxu0 %v2984_v62 }
  0xf1   :  { %2178 = vmatprep.subr.bf16.mxu1 %v2987_v63 }
  0xf3   :  { %2136 = vmatpush2.bf16.msra.mxu0 %v2982_v0 }
  0xf4   :  { %2179 = vmatpush2.bf16.msra.mxu1 %v2985_v1  ;;  %2137 = vmatprep.subr.bf16.mxu0 %v2990_v2 }
  0xf5   :  { %2180 = vmatprep.subr.bf16.mxu1 %v2993_v3 }
  0xf7   :  { %2138 = vmatpush2.bf16.msra.mxu0 %v2988_v4 }
  0xf8   :  { %2181 = vmatpush2.bf16.msra.mxu1 %v2991_v5  ;;  %2139 = vmatprep.subr.bf16.mxu0 %v2996_v6 }
  0xf9   :  { %2182 = vmatprep.subr.bf16.mxu1 %v2999_v7 }
  0xfb   :  { %2140 = vmatpush2.bf16.msra.mxu0 %v2994_v8 }
  0xfc   :  { %2183 = vmatpush2.bf16.msra.mxu1 %v2997_v9  ;;  %2141 = vmatprep.subr.bf16.mxu0 %v3002_v10 }
  0xfd   :  { %2184 = vmatprep.subr.bf16.mxu1 %v3005_v11 }
  0xff   :  { %2142 = vmatpush2.bf16.msra.mxu0 %v3000_v12 }
 0x100   :  { %2185 = vmatpush2.bf16.msra.mxu1 %v3003_v13  ;;  %2197 = vmatprep.subr.bf16.mxu0 %v3011_v14 }
 0x102   :  { %2144 = vmatmul.mubr.bf16.vlgmr.msra.gmra.mxu0 %v3006_v15  ;;  %v1887_v50 = vpop.f32.mrf.mxu0 }
 0x103   :  { %2187 = vmatmul.mubr.bf16.vlgmr.msra.gmra.mxu1 %v3012_v16  ;;  %2198 = vmatpush1.bf16.msra.mxu0 %v3009_v17  ;;  %v1930_v51 = vpop.f32.mrf.mxu1 }
 0x104   :  { %2229 = vmatprep.mubr.bf16.mxu0 %v3062_v18  ;;  %2199 = vmatprep.subr.bf16.mxu0 %v3017_v19  ;;  %v1889_v52 = vpop.f32.mrf.mxu0  ;;  %v1931_v7 = vadd.f32 %v1930_v51, %v1887_v50  ;;  %v2242_v18 = vlaneseq }
 0x105   :  { %v1932_v53 = vpop.f32.mrf.mxu1 }
 0x106   :  { %v1891_v54 = vpop.f32.mrf.mxu0  ;;  %v1933_v8 = vadd.f32 %v1932_v53, %v1889_v52 }
 0x107   :  { %2200 = vmatpush1.bf16.msra.mxu0 %v3015_v20  ;;  %v1934_v55 = vpop.f32.mrf.mxu1 }
 0x108   :  { %2201 = vmatprep.subr.bf16.mxu0 %v3020_v21  ;;  %v1893_v56 = vpop.f32.mrf.mxu0  ;;  %v1935_v12 = vadd.f32 %v1934_v55, %v1891_v54 }
 0x109   :  { %v1936_v58 = vpop.f32.mrf.mxu1 }
 0x10a   :  { %v1937_v15 = vadd.f32 %v1936_v58, %v1893_v56 }
 0x10b   :  { %2202 = vmatpush1.bf16.msra.mxu0 %v3018_v22 }
 0x10c   :  { %2203 = vmatprep.subr.bf16.mxu0 %v3023_v23 }
 0x10f   :  { %2204 = vmatpush1.bf16.msra.mxu0 %v3021_v24 }
 0x110   :  { %2205 = vmatprep.subr.bf16.mxu0 %v3026_v25 }
 0x113   :  { %2206 = vmatpush1.bf16.msra.mxu0 %v3024_v26 }
 0x114   :  { %2207 = vmatprep.subr.bf16.mxu0 %v3029_v27  ;;  %v2243_v27 = vshrl.u32 %v2242_v18, 7 }
 0x117   :  { %2208 = vmatpush1.bf16.msra.mxu0 %v3027_v28 }
 0x118   :  { %2209 = vmatprep.subr.bf16.mxu0 %v3032_v29 }
 0x11b   :  { %2210 = vmatpush1.bf16.msra.mxu0 %v3030_v30 }
 0x11c   :  { %2211 = vmatprep.subr.bf16.mxu0 %v3035_v31 }
 0x11f   :  { %2212 = vmatpush1.bf16.msra.mxu0 %v3033_v32 }
 0x120   :  { %2213 = vmatprep.subr.bf16.mxu0 %v3038_v33 }
 0x123   :  { %2214 = vmatpush2.bf16.msra.mxu0 %v3036_v34 }
 0x124   :  { %2215 = vmatprep.subr.bf16.mxu0 %v3041_v35 }
 0x127   :  { %2216 = vmatpush2.bf16.msra.mxu0 %v3039_v36  ;;  %v2244_v36 = vsub.s32 0, %v2243_v27 }
 0x128   :  { %2217 = vmatprep.subr.bf16.mxu0 %v3044_v37  ;;  %v2240_v37 = vld [vmem:[%s4020_s2] sm:$0x3] }
 0x12b   :  { %2218 = vmatpush2.bf16.msra.mxu0 %v3042_v38 }
 0x12c   :  { %2219 = vmatprep.subr.bf16.mxu0 %v3047_v39 }
 0x12f   :  { %2220 = vmatpush2.bf16.msra.mxu0 %v3045_v40  ;;  %v2256_v40 = vld [vmem:[%s4021_s3] sm:$0x3] }
 0x130   :  { %2221 = vmatprep.subr.bf16.mxu0 %v3050_v41  ;;  %v2248_v41 = vsub.s32 1, %v2243_v27 }
 0x132   :  { %v2249_v53 = vrot.slane %v2240_v37, %v2248_v41 }
 0x133   :  { %2222 = vmatpush2.bf16.msra.mxu0 %v3048_v42 }
 0x134   :  { %2223 = vmatprep.subr.bf16.mxu0 %v3053_v43 }
 0x137   :  { %2224 = vmatpush2.bf16.msra.mxu0 %v3051_v44 }
 0x138   :  { %2225 = vmatprep.subr.bf16.mxu0 %v3056_v45 }
 0x13b   :  { %2226 = vmatpush2.bf16.msra.mxu0 %v3054_v46 }
 0x13c   :  { %2227 = vmatprep.subr.bf16.mxu0 %v3059_v47  ;;  %v2245_v47 = vrot.slane %v2240_v37, %v2244_v36 }
 0x13f   :  { %2228 = vmatpush2.bf16.msra.mxu0 %v3057_v48 }
 0x142   :  { %2230 = vmatmul.mubr.bf16.vlgmr.msra.gmra.mxu0 %v3060_v49  ;;  %v1973_v57 = vpop.f32.mrf.mxu0  ;;  %v2261_v49 = vrot.slane %v2256_v40, %v2244_v36 }
 0x143   :  { %v2016_v60 = vpop.f32.mrf.mxu1  ;;  %v1974_v9 = vadd.f32 %v1973_v57, %v1931_v7 }
 0x144   :  { %v1975_v59 = vpop.f32.mrf.mxu0 }
 0x145   :  { %v2018_v62 = vpop.f32.mrf.mxu1  ;;  %v1976_v13 = vadd.f32 %v1975_v59, %v1933_v8  ;;  %v2017_v16 = vadd.f32 %v2016_v60, %v1974_v9  ;;  %v2265_v59 = vrot.slane %v2256_v40, %v2248_v41 }
 0x146   :  { %v1977_v61 = vpop.f32.mrf.mxu0 }
 0x147   :  { %v2020_v0 = vpop.f32.mrf.mxu1  ;;  %v1978_v17 = vadd.f32 %v1977_v61, %v1935_v12  ;;  %v2019_v20 = vadd.f32 %v2018_v62, %v1976_v13 }
 0x148   :  { %v1979_v63 = vpop.f32.mrf.mxu0 }
 0x149   :  { %v2022_v2 = vpop.f32.mrf.mxu1  ;;  %v1980_v21 = vadd.f32 %v1979_v63, %v1937_v15  ;;  %v2021_v25 = vadd.f32 %v2020_v0, %v1978_v17 }
 0x14b   :  { %v2023_v28 = vadd.f32 %v2022_v2, %v1980_v21 }
 0x182   :  { %v2059_v1 = vpop.f32.mrf.mxu0 }
 0x183   :  { %v2102_v4 = vpop.f32.mrf.mxu1  ;;  %v2060_v22 = vadd.f32 %v2059_v1, %v2017_v16 }
 0x184   :  { %v2061_v3 = vpop.f32.mrf.mxu0 }
 0x185   :  { %v2104_v6 = vpop.f32.mrf.mxu1  ;;  %v2062_v26 = vadd.f32 %v2061_v3, %v2019_v20  ;;  %v2103_v29 = vadd.f32 %v2102_v4, %v2060_v22 }
 0x186   :  { %v2063_v5 = vpop.f32.mrf.mxu0 }
 0x187   :  { %v2106_v11 = vpop.f32.mrf.mxu1  ;;  %v2064_v30 = vadd.f32 %v2063_v5, %v2021_v25  ;;  %v2105_v33 = vadd.f32 %v2104_v6, %v2062_v26 }
 0x188   :  { %v2065_v10 = vpop.f32.mrf.mxu0 }
 0x189   :  { %v2108_v19 = vpop.f32.mrf.mxu1  ;;  %v2066_v34 = vadd.f32 %v2065_v10, %v2023_v28  ;;  %v2107_v38 = vadd.f32 %v2106_v11, %v2064_v30 }
 0x18b   :  { %v2109_v44 = vadd.f32 %v2108_v19, %v2066_v34 }
 0x1c2   :  { %v2145_v14 = vpop.f32.mrf.mxu0 }
 0x1c3   :  { %v2188_v24 = vpop.f32.mrf.mxu1  ;;  %v2146_v35 = vadd.f32 %v2145_v14, %v2103_v29 }
 0x1c4   :  { %v2147_v23 = vpop.f32.mrf.mxu0 }
 0x1c5   :  { %v2190_v32 = vpop.f32.mrf.mxu1  ;;  %v2148_v39 = vadd.f32 %v2147_v23, %v2105_v33  ;;  %v2189_v45 = vadd.f32 %v2188_v24, %v2146_v35 }
 0x1c6   :  { %v2149_v31 = vpop.f32.mrf.mxu0 }
 0x1c7   :  { %v2192_v43 = vpop.f32.mrf.mxu1  ;;  %v2150_v46 = vadd.f32 %v2149_v31, %v2107_v38  ;;  %v2191_v50 = vadd.f32 %v2190_v32, %v2148_v39 }
 0x1c8   :  { %v2151_v42 = vpop.f32.mrf.mxu0 }
 0x1c9   :  { %v2152_v51 = vadd.f32 %v2151_v42, %v2109_v44  ;;  %v2194_v54 = vpop.f32.mrf.mxu1  ;;  %v2193_v56 = vadd.f32 %v2192_v43, %v2150_v46 }
 0x1cb   :  { %v2195_v61 = vadd.f32 %v2194_v54, %v2152_v51 }
 0x202   :  { %v2231_v48 = vpop.f32.mrf.mxu0 }
 0x203   :  { %v2232_v52 = vadd.f32 %v2231_v48, %v2189_v45 }
 0x204   :  { %v2233_v55 = vpop.f32.mrf.mxu0 }
 0x205   :  { %v2252_v57 = vmul.f32 %v2245_v47, %v2232_v52  ;;  %v2234_v58 = vadd.f32 %v2233_v55, %v2191_v50 }
 0x206   :  { %v2235_v60 = vpop.f32.mrf.mxu0 }
 0x207   :  { %v2268_v62 = vadd.f32 %v2261_v49, %v2252_v57  ;;  %v2253_v63 = vmul.f32 %v2249_v53, %v2234_v58  ;;  %v2236_v0 = vadd.f32 %v2235_v60, %v2193_v56 }
 0x208   :  { %v2237_v1 = vpop.f32.mrf.mxu0 }
 0x209   :  { %v2269_v2 = vadd.f32 %v2265_v59, %v2253_v63  ;;  %v2254_v3 = vmul.f32 %v2245_v47, %v2236_v0  ;;  %v2238_v4 = vadd.f32 %v2237_v1, %v2195_v61  ;;  %v2272_v5 = vmax.f32 %v2268_v62, 0.0 }
 0x20b   :  { %v2273_v6 = vmax.f32 %v2269_v2, 0.0  ;;  %v2270_v7 = vadd.f32 %v2261_v49, %v2254_v3  ;;  %v2255_v8 = vmul.f32 %v2249_v53, %v2238_v4 }
 0x20d   :  { %v2602_v9 = vpack.c.bf16 %v2273_v6, %v2272_v5  ;;  %v2271_v10 = vadd.f32 %v2265_v59, %v2255_v8  ;;  %v2274_v11 = vmax.f32 %v2270_v7, 0.0 }
 0x20f   :  { %2288 = vst [vmem:[%s4022_s4] sm:$0xff] %v2602_v9  ;;  %v2275_v12 = vmax.f32 %v2271_v10, 0.0 }
 0x211   :  { %v2603_v13 = vpack.c.bf16 %v2275_v12, %v2274_v11 }
 0x213   :  { %2289 = vst [vmem:[%s4022_s4 + $0x8] sm:$0xff] %v2603_v13 }

// kernel: fph_forward.17
= control target key start
LH: loop header
LB: loop body
LE: loop exit
PB: predicated region body
PF: predicated region fallthrough
CT: control target
= control target key end

     0   :  { %s1509_s18 = smov 0   ;;  %s1511_s19 = smov 0   ;;  %s1875_s0 = inlined_call_operand.vmem [shape: bf16[2,4,4,1536], index: 0, kind: input, shape index: {}]   ;;  %s1876_s1 = inlined_call_operand.vmem [shape: f32[9,1536], index: 1, kind: input, shape index: {}]   ;;  %s1877_s2 = inlined_call_operand.vmem [shape: f32[1,1536], index: 2, kind: input, shape index: {}]   ;;  %s1878_s3 = inlined_call_operand.vmem [shape: f32[1,1536], index: 3, kind: input, shape index: {}]   ;;  %s1879_s4 = inlined_call_operand.vmem [shape: bf16[2,2,2,1536], index: 4, kind: output, shape index: {0}]   ;;  %s1880_s5 = inlined_call_operand.vmem [shape: f32[2,1,1536], index: 5, kind: output, shape index: {1}]  }
   0x1   :  { %s1513_s20 = smov 0   ;;  %s1515_s21 = smov 0  }
   0x2   :  { %s1517_s22 = smov 0   ;;  %s1519_s23 = smov 0  }
   0x3   :  { %s1521_s24 = smov 0   ;;  %s1523_s25 = smov 0  }
   0x4   :  { %s1525_s26 = smov 0  }
   0x5 LB: > { %s1258_s27 = sadd.s32 4294967295, %s1476_s26   ;;  %s25_s28 = sadd.s32 1, %s1468_s24  ;;  %s1476_s26 = sphi %s1525_s26, %s16_s26   ;;  %s1472_s25 = sphi %s1523_s25, %s1894_s25   ;;  %s1468_s24 = sphi %s1521_s24, %s1893_s24   ;;  %s1464_s23 = sphi %s1519_s23, %s1892_s23   ;;  %s1460_s22 = sphi %s1517_s22, %s1891_s22   ;;  %s1456_s21 = sphi %s1515_s21, %s1890_s21   ;;  %s1452_s20 = sphi %s1513_s20, %s1889_s20   ;;  %s1448_s19 = sphi %s1511_s19, %s1888_s19   ;;  %s1444_s18 = sphi %s1509_s18, %s1887_s18  }
   0x6   : > { %p26_p0 = scmp.ge.s32.totalorder %s25_s28, 3  ;;  %s28_s29 = sadd.s32 1, %s1472_s25 }
   0x7   : > { %s37_s30 = sadd.s32 1, %s1456_s21  ;;  %p44_p1 = scmp.ne.s32.totalorder %s1456_s21, %s1452_s20 }
   0x8   : > { %s1896_s28 = smov (%p26_p0, %s25_s28), 0  ;;  %s1898_s29 = smov (!%p26_p0, %s28_s29), %s1472_s25 }
   0x9   : > { %s33_s6 = ssub.s32 %s1468_s24, %s1896_s28  ;;  %p45_p2 = scmp.eq.s32.totalorder %s1476_s26, 0 }
   0xa   : > { %p30_p3 = scmp.ge.s32.totalorder %s1898_s29, 2  ;;  %p61_p4 = scmp.eq.s32.totalorder %s33_s6, 0 }
   0xb   : > { %p1569_p5 = por %p45_p2, %p44_p1  ;;  %s63_s8 = sadd.s32 1, %s1448_s19 }
   0xc   : > { %s1900_s29 = smov (%p30_p3, %s1898_s29), 0  ;;  %p70_p6 = scmp.ne.s32.totalorder %s1448_s19, %s1444_s18 }
   0xd   : > { %1883 = sst [smem:[#allocation5_spill]] %s1900_s29  ;;  %s32_s10 = ssub.s32 %s1472_s25, %s1900_s29 }
   0xe   : > { %s1577_s9 = scalar_select %p61_p4, %s1448_s19, %s63_s8  }
   0xf   : > { %s34_s11 = sor.u32 %s33_s6, %s32_s10  ;;  %p154_p7 = scmp.eq.s32.totalorder %s1258_s27, 5 }
  0x10   : > { %p35_p8 = scmp.eq.s32.totalorder %s34_s11, 0  ;;  %p1583_p9 = por %p70_p6, %p45_p2 }
  0x11   : > { %p1590_p10 = por %p154_p7, %p44_p1  ;;  %p1261_p11 = scmp.ge.s32.totalorder %s1476_s26, 6 }
  0x12   : > { %s1595_s14 = scalar_select %p35_p8, %s1456_s21, %s37_s30  }
  0x13   : > { %204 = sbr.rel (%p1261_p11) target bundleno = 42 (0x2a), region = 16 }
  0x18   : > { %207 = sbr.rel (!%p1569_p5) target bundleno = 34 (0x22), region = 20  ;;  %s209_s15 = sand.u32 (%p1569_p5), 1, %s1456_s21  }
  0x19   : > { %s1263_s16 = sshll.u32 (%p1569_p5), %s1468_s24, 2  ;;  %s1262_s17 = sshll.u32 (%p1569_p5), %s209_s15, 5 }
  0x1a   : > { %s1314_s27 = smul.u32 (%p1569_p5), 48, %s1472_s25  ;;  %s211_s29 = scalar_lea.vmem (%p1569_p5), [#allocation2], %s1262_s17 }
  0x1c   : > { %s214_s6 = sadd.s32 (%p1569_p5), %s1314_s27, %s1263_s16 }
  0x1d   : > { %s1264_s8 = sshll.u32 %s214_s6, 1 }
  0x1e   : > { %s216_s30 = scalar_lea.vmem %s1875_s0, %s1264_s8 }
  0x1f   : > { %v251_v0 = vld [vmem:[%s216_s30] sm:$0xff]  ;;  %v253_v1 = vld [vmem:[%s216_s30 + $0x18] sm:$0xff]  ;;  %v255_v2 = vld [vmem:[%s216_s30 + $0x30] sm:$0xff] }
  0x20   : > { %252 = vst [vmem:[%s211_s29] sm:$0xff] %v251_v0  ;;  %254 = vst [vmem:[%s211_s29 + $0x8] sm:$0xff] %v253_v1  ;;  %v257_v3 = vld [vmem:[%s216_s30 + $0x48] sm:$0xff] }
  0x21   : > { %256 = vst [vmem:[%s211_s29 + $0x10] sm:$0xff] %v255_v2  ;;  %258 = vst [vmem:[%s211_s29 + $0x18] sm:$0xff] %v257_v3 }
  0x22 PF: > { %264 = sbr.rel (!%p1583_p9) target bundleno = 42 (0x2a), region = 58  ;;  %s266_s7 = sand.u32 (%p1583_p9), 1, %s1448_s19  }
  0x23   : > { %s1313_s15 = sshll.u32 (%p1583_p9), %s1468_s24, 5  ;;  %s1265_s16 = sshll.u32 (%p1583_p9), %s266_s7, 6 }
  0x24   : > { %s271_s8 = scalar_lea.vmem (%p1583_p9), %s1876_s1, %s1313_s15  ;;  %s268_s17 = scalar_lea.vmem (%p1583_p9), [#allocation3], %s1265_s16 }
  0x25   : > { %v284_v4 = vld [vmem:[%s271_s8] sm:$0xff] (%p1583_p9)  ;;  %v286_v5 = vld [vmem:[%s271_s8 + $0x8] sm:$0xff] (%p1583_p9)  ;;  %v288_v6 = vld [vmem:[%s271_s8 + $0x10] sm:$0xff] (%p1583_p9) }
  0x26   : > { %285 = vst [vmem:[%s268_s17] sm:$0xff] (%p1583_p9), %v284_v4  ;;  %287 = vst [vmem:[%s268_s17 + $0x8] sm:$0xff] (%p1583_p9), %v286_v5  ;;  %v290_v7 = vld [vmem:[%s271_s8 + $0x18] sm:$0xff] (%p1583_p9)  ;;  %v292_v8 = vld [vmem:[%s271_s8 + $0x60] sm:$0xff] (%p1583_p9) }
  0x27   : > { %289 = vst [vmem:[%s268_s17 + $0x10] sm:$0xff] %v288_v6  ;;  %v294_v9 = vld [vmem:[%s271_s8 + $0x68] sm:$0xff]  ;;  %291 = vst [vmem:[%s268_s17 + $0x18] sm:$0xff] %v290_v7  ;;  %v296_v10 = vld [vmem:[%s271_s8 + $0x70] sm:$0xff] }
  0x28   : > { %293 = vst [vmem:[%s268_s17 + $0x20] sm:$0xff] %v292_v8  ;;  %295 = vst [vmem:[%s268_s17 + $0x28] sm:$0xff] %v294_v9  ;;  %v298_v11 = vld [vmem:[%s271_s8 + $0x78] sm:$0xff] }
  0x29   : > { %297 = vst [vmem:[%s268_s17 + $0x30] sm:$0xff] %v296_v10  ;;  %299 = vst [vmem:[%s268_s17 + $0x38] sm:$0xff] %v298_v11 }
  0x2a PF: > { %p1268_p12 = scmp.ge.s32.totalorder %s1476_s26, 1  ;;  %p320_p13 = scmp.lt.s32.totalorder %s1476_s26, 7 }
  0x2c   : > { %p321_p0 = pnand %p1268_p12, %p320_p13 }
  0x2d   : > { %s327_s29 = sand.u32 (!%p321_p0), 1, %s1452_s20   ;;  %s334_s12 = sand.u32 (!%p321_p0), 1, %s1444_s18  }
  0x2e   : > { %324 = sbr.rel (%p321_p0) target bundleno = 173 (0xad), region = 89  ;;  %s1269_s10 = sshll.u32 (!%p321_p0), %s327_s29, 5 }
  0x2f   : > { %s1270_s11 = sshll.u32 (!%p321_p0), %s334_s12, 6  ;;  %s329_s7 = scalar_lea.vmem (!%p321_p0), [#allocation2], %s1269_s10 }
  0x30   : > { %s1619_s30 = scalar_lea.vmem (!%p321_p0), [#allocation3], %s1270_s11  ;;  %s1734_s18 = sshll.u32 (!%p321_p0), %s1460_s22, 2 }
  0x31   : > { %p383_p1 = scmp.lt.s32.totalorder (!%p321_p0), %s1734_s18, 11  ;;  %s1271_s12 = sshll.u32 (!%p321_p0), %s327_s29, 3 }
  0x32   : > { %s1825_s20 = scalar_lea.vmem (!%p321_p0), [#allocation4], %s1271_s12  ;;  %p394_p2 = scmp.lt.s32.totalorder (!%p321_p0), %s1464_s23, 1 }
  0x33   : > { %v422_v12 = vlaneseq  ;;  %v1622_v13 = vld [vmem:[%s1619_s30 + $0x20] ss:$0 sm:$0xff]  ;;  %v1628_v16 = vld [vmem:[%s1619_s30 + $0x28] ss:$0 sm:$0xff]  ;;  %v412_v21 = vld [vmem:[%s329_s7 + $0x10] sm:$0xff]  ;;  %s1765_s22 = scalar_select %p383_p1, %s1734_s18, 11 }
  0x34   : > { %v410_v14 = vld [vmem:[%s329_s7] sm:$0xff]  ;;  %v411_v17 = vld [vmem:[%s329_s7 + $0x8] sm:$0xff]  ;;  %v413_v22 = vld [vmem:[%s329_s7 + $0x18] sm:$0xff]  ;;  %v788_v26 = vcombine.low %v1622_v13, %v1628_v16  ;;  %v1655_v30 = vunpack.c.l.bf16 %v412_v21  ;;  %v1657_v31 = vunpack.c.h.bf16 %v412_v21  ;;  %vm974_vm0 = vcmask 1041408   ;;  %s395_s29 = scalar_select %p394_p2, %s1464_s23, 1 }
  0x35   : > { %v1625_v15 = vshrl.u32 %v422_v12, 7  ;;  %v1630_v18 = vunpack.c.l.bf16 %v410_v14  ;;  %v1632_v19 = vunpack.c.h.bf16 %v410_v14  ;;  %v1635_v20 = vld [vmem:[%s1619_s30] sm:$0xff]  ;;  %v1637_v23 = vunpack.c.l.bf16 %v411_v17  ;;  %v1647_v27 = vld [vmem:[%s1619_s30 + $0x8] sm:$0xff]  ;;  %v1650_v28 = vld [vmem:[%s1619_s30 + $0x10] sm:$0xff]  ;;  %s385_s27 = scalar_lea.vmem %s1877_s2, %s1765_s22  ;;  %s390_s17 = scalar_lea.vmem %s1878_s3, %s1765_s22 }
  0x36   : > { %v1639_v24 = vunpack.c.h.bf16 %v411_v17  ;;  %v1653_v29 = vld [vmem:[%s1619_s30 + $0x18] sm:$0xff]  ;;  %v1659_v32 = vunpack.c.l.bf16 %v413_v22  ;;  %v1661_v33 = vunpack.c.h.bf16 %v413_v22  ;;  %s1315_s10 = smul.u32 12, %s395_s29  ;;  %vm1046_vm1 = vcmp.lt.s32.totalorder %v422_v12, 512 }
  0x37   : > { %v1642_v25 = vsub.s32 0, %v1625_v15  ;;  %v1672_v38 = vsub.s32 1, %v1625_v15  ;;  %v1675_v39 = vsub.s32 2, %v1625_v15  ;;  %v1678_v40 = vsub.s32 3, %v1625_v15 }
  0x38   : > { %v1681_v41 = vsub.s32 4, %v1625_v15  ;;  %v1684_v44 = vsub.s32 5, %v1625_v15  ;;  %v1687_v45 = vsub.s32 6, %v1625_v15  ;;  %s399_s11 = sadd.s32 %s1315_s10, %s1765_s22  ;;  %s1316_s22 = smul.u32 (%p1590_p10), 24, %s1464_s23 }
  0x39   : > { %v425_v34 = vrot.slane %v1635_v20, %v1642_v25  ;;  %v429_v35 = vrot.slane %v1647_v27, %v1642_v25  ;;  %v433_v36 = vrot.slane %v1650_v28, %v1642_v25  ;;  %v437_v37 = vrot.slane %v1653_v29, %v1642_v25  ;;  %s400_s15 = scalar_lea.vmem %s1880_s5, %s399_s11 }
  0x3a   : > { %v457_v46 = vrot.slane %v1635_v20, %v1672_v38  ;;  %v461_v47 = vrot.slane %v1647_v27, %v1672_v38  ;;  %v465_v48 = vrot.slane %v1650_v28, %v1672_v38  ;;  %v469_v49 = vrot.slane %v1653_v29, %v1672_v38  ;;  %s1066_s16 = sadd.s32 (%p1590_p10), %s1316_s22, %s1734_s18 }
  0x3b   : > { %v442_v42 = vcombine.low %v425_v34, %v429_v35  ;;  %v443_v43 = vcombine.low %v433_v36, %v437_v37  ;;  %v507_v56 = vrot.slane %v1635_v20, %v1675_v39  ;;  %v511_v57 = vrot.slane %v1647_v27, %v1675_v39  ;;  %s1067_s8 = scalar_lea.vmem (%p1590_p10), %s1879_s4, %s1066_s16 }
  0x3c   : > { %v474_v54 = vcombine.low %v457_v46, %v461_v47  ;;  %v475_v55 = vcombine.low %v465_v48, %v469_v49  ;;  %v515_v58 = vrot.slane %v1650_v28, %v1675_v39  ;;  %v519_v59 = vrot.slane %v1653_v29, %v1675_v39 }
  0x3d   : > { %v446_v50 = vmul.f32 %v442_v42, %v1630_v18  ;;  %v447_v51 = vmul.f32 %v443_v43, %v1632_v19  ;;  %v448_v52 = vmul.f32 %v442_v42, %v1637_v23  ;;  %v449_v53 = vmul.f32 %v443_v43, %v1639_v24 }
  0x3e   : > { %v557_v60 = vrot.slane %v1635_v20, %v1678_v40  ;;  %v561_v61 = vrot.slane %v1647_v27, %v1678_v40  ;;  %v476_v62 = vrot.slane %v474_v54, 7  ;;  %v477_v63 = vrot.slane %v475_v55, 7 }
  0x3f   : > { %v524_v0 = vcombine.low %v507_v56, %v511_v57  ;;  %v565_v1 = vrot.slane %v1650_v28, %v1678_v40  ;;  %v525_v2 = vcombine.low %v515_v58, %v519_v59  ;;  %v569_v3 = vrot.slane %v1653_v29, %v1678_v40 }
  0x40   : > { %v574_v4 = vcombine.low %v557_v60, %v561_v61  ;;  %v589_v5 = vrot.slane %v1635_v20, %v1681_v41  ;;  %v480_v6 = vmul.f32 %v476_v62, %v1630_v18  ;;  %v481_v7 = vmul.f32 %v477_v63, %v1632_v19 }
  0x41   : > { %v482_v8 = vmul.f32 %v476_v62, %v1637_v23  ;;  %v483_v9 = vmul.f32 %v477_v63, %v1639_v24  ;;  %v526_v10 = vrot.slane %v524_v0, 6  ;;  %v527_v11 = vrot.slane %v525_v2, 6 }
  0x42   : > { %v575_v14 = vcombine.low %v565_v1, %v569_v3  ;;  %v578_v17 = vmul.f32 %v574_v4, %v1637_v23  ;;  %v1275_v21 = vrot.slane %v480_v6, 9  ;;  %v1276_v22 = vrot.slane %v481_v7, 9 }
  0x43   : > { %v1277_v34 = vrot.slane %v482_v8, 9  ;;  %v1278_v35 = vrot.slane %v483_v9, 9  ;;  %v530_v36 = vmul.f32 %v526_v10, %v1630_v18  ;;  %v531_v37 = vmul.f32 %v527_v11, %v1632_v19 }
  0x44   : > { %v532_v42 = vmul.f32 %v526_v10, %v1637_v23  ;;  %v533_v43 = vmul.f32 %v527_v11, %v1639_v24  ;;  %v500_v46 = vadd.f32 %v1275_v21, %v446_v50  ;;  %v501_v47 = vadd.f32 %v1276_v22, %v447_v51 }
  0x45   : > { %v502_v48 = vadd.f32 %v1277_v34, %v448_v52  ;;  %v503_v49 = vadd.f32 %v1278_v35, %v449_v53  ;;  %v1279_v54 = vrot.slane %v530_v36, 10  ;;  %v1280_v55 = vrot.slane %v531_v37, 10 }
  0x46   : > { %v1281_v56 = vrot.slane %v532_v42, 10  ;;  %v1282_v57 = vrot.slane %v533_v43, 10  ;;  %v579_v58 = vmul.f32 %v575_v14, %v1639_v24  ;;  %v580_v59 = vmul.f32 %v574_v4, %v1655_v30 }
  0x47   : > { %v581_v18 = vmul.f32 %v575_v14, %v1657_v31  ;;  %v593_v19 = vrot.slane %v1647_v27, %v1681_v41  ;;  %v550_v60 = vadd.f32 %v1279_v54, %v500_v46  ;;  %v551_v61 = vadd.f32 %v1280_v55, %v501_v47 }
  0x48   : > { %v552_v50 = vadd.f32 %v1281_v56, %v502_v48  ;;  %v553_v62 = vadd.f32 %v1282_v57, %v503_v49  ;;  %v597_v51 = vrot.slane %v1650_v28, %v1681_v41  ;;  %v601_v52 = vrot.slane %v1653_v29, %v1681_v41 }
  0x49   : > { %v606_v53 = vcombine.low %v589_v5, %v593_v19  ;;  %v639_v63 = vrot.slane %v1635_v20, %v1684_v44  ;;  %v582_v0 = vadd.f32 %v578_v17, %v550_v60  ;;  %v583_v1 = vadd.f32 %v579_v58, %v551_v61  ;;  %v1297_v19 = vld [vmem:[%s1619_s30 + $0x30] ss:$0 sm:$0xff] }
  0x4a   : > { %v584_v2 = vadd.f32 %v580_v59, %v552_v50  ;;  %v585_v3 = vadd.f32 %v581_v18, %v553_v62  ;;  %v607_v4 = vcombine.low %v597_v51, %v601_v52  ;;  %v643_v7 = vrot.slane %v1647_v27, %v1684_v44  ;;  %v1298_v51 = vld [vmem:[%s1619_s30 + $0x38] ss:$0 sm:$0xff] }
  0x4b   : > { %v608_v6 = vrot.slane %v606_v53, 7  ;;  %v647_v8 = vrot.slane %v1650_v28, %v1684_v44  ;;  %v651_v41 = vrot.slane %v1653_v29, %v1684_v44  ;;  %v689_v5 = vrot.slane %v1635_v20, %v1687_v45 }
  0x4c   : > { %v693_v9 = vrot.slane %v1647_v27, %v1687_v45  ;;  %v697_v10 = vrot.slane %v1650_v28, %v1687_v45  ;;  %v609_v11 = vrot.slane %v607_v4, 7  ;;  %v656_v21 = vcombine.low %v639_v63, %v643_v7 }
  0x4d   : > { %v612_v14 = vmul.f32 %v608_v6, %v1637_v23  ;;  %v614_v17 = vmul.f32 %v608_v6, %v1655_v30  ;;  %v657_v22 = vcombine.low %v647_v8, %v651_v41  ;;  %v701_v44 = vrot.slane %v1653_v29, %v1687_v45 }
  0x4e   : > { %v706_v34 = vcombine.low %v689_v5, %v693_v9  ;;  %v720_v35 = vsub.s32 7, %v1625_v15  ;;  %v613_v36 = vmul.f32 %v609_v11, %v1639_v24  ;;  %v615_v37 = vmul.f32 %v609_v11, %v1657_v31 }
  0x4f   : > { %v1283_v42 = vrot.slane %v612_v14, 9  ;;  %v1285_v43 = vrot.slane %v614_v17, 9  ;;  %v658_v46 = vrot.slane %v656_v21, 6  ;;  %v659_v47 = vrot.slane %v657_v22, 6 }
  0x50   : > { %v707_v48 = vcombine.low %v697_v10, %v701_v44  ;;  %v710_v45 = vmul.f32 %v706_v34, %v1655_v30  ;;  %v1284_v49 = vrot.slane %v613_v36, 9  ;;  %v1286_v54 = vrot.slane %v615_v37, 9  ;;  %v818_v10 = vld [vmem:[%s385_s27] sm:$0xf] }
  0x51   : > { %v632_v55 = vadd.f32 %v1283_v42, %v582_v0  ;;  %v634_v56 = vadd.f32 %v1285_v43, %v584_v2  ;;  %v662_v57 = vmul.f32 %v658_v46, %v1637_v23  ;;  %v663_v58 = vmul.f32 %v659_v47, %v1639_v24 }
  0x52   : > { %v664_v59 = vmul.f32 %v658_v46, %v1655_v30  ;;  %v665_v18 = vmul.f32 %v659_v47, %v1657_v31  ;;  %v633_v60 = vadd.f32 %v1284_v49, %v583_v1  ;;  %v635_v61 = vadd.f32 %v1286_v54, %v585_v3  ;;  %v844_v54 = vld [vmem:[%s390_s17] sm:$0xf] }
  0x53   : > { %v711_v50 = vmul.f32 %v707_v48, %v1657_v31  ;;  %v712_v62 = vmul.f32 %v706_v34, %v1659_v32  ;;  %v1287_v52 = vrot.slane %v662_v57, 10  ;;  %v1288_v23 = vrot.slane %v663_v58, 10 }
  0x54   : > { %v1289_v53 = vrot.slane %v664_v59, 10  ;;  %v1290_v24 = vrot.slane %v665_v18, 10  ;;  %v713_v63 = vmul.f32 %v707_v48, %v1661_v33  ;;  %v721_v0 = vrot.slane %v1635_v20, %v720_v35 }
  0x55   : > { %v725_v1 = vrot.slane %v1647_v27, %v720_v35  ;;  %v729_v2 = vrot.slane %v1650_v28, %v720_v35  ;;  %v682_v3 = vadd.f32 %v1287_v52, %v632_v55  ;;  %v683_v4 = vadd.f32 %v1288_v23, %v633_v60 }
  0x56   : > { %v684_v6 = vadd.f32 %v1289_v53, %v634_v56  ;;  %v685_v7 = vadd.f32 %v1290_v24, %v635_v61  ;;  %v733_v8 = vrot.slane %v1653_v29, %v720_v35  ;;  %v789_v5 = vcombine.low %v1297_v19, %v1298_v51 }
  0x57   : > { %v738_v41 = vcombine.low %v721_v0, %v725_v1  ;;  %v790_v9 = vrot.slane %v788_v26, 6  ;;  %v714_v11 = vadd.f32 %v710_v45, %v682_v3  ;;  %v715_v20 = vadd.f32 %v711_v50, %v683_v4 }
  0x58   : > { %v716_v14 = vadd.f32 %v712_v62, %v684_v6  ;;  %v717_v27 = vadd.f32 %v713_v63, %v685_v7  ;;  %v739_v17 = vcombine.low %v729_v2, %v733_v8  ;;  %v791_v21 = vrot.slane %v789_v5, 6 }
  0x59   : > { %v740_v28 = vrot.slane %v738_v41, 7  ;;  %v794_v22 = vmul.f32 %v790_v9, %v1655_v30  ;;  %v796_v29 = vmul.f32 %v790_v9, %v1659_v32  ;;  %v823_v44 = vrot.slane %v818_v10, %v1642_v25 }
  0x5a   : > { %v827_v13 = vrot.slane %v818_v10, %v1672_v38  ;;  %v831_v16 = vrot.slane %v818_v10, %v1675_v39  ;;  %v741_v26 = vrot.slane %v739_v17, 7  ;;  %v795_v36 = vmul.f32 %v791_v21, %v1657_v31 }
  0x5b   : > { %v744_v34 = vmul.f32 %v740_v28, %v1655_v30  ;;  %v746_v35 = vmul.f32 %v740_v28, %v1659_v32  ;;  %v797_v37 = vmul.f32 %v791_v21, %v1661_v33  ;;  %v1299_v42 = vrot.slane %v794_v22, 10 }
  0x5c   : > { %v1301_v43 = vrot.slane %v796_v29, 10  ;;  %v835_v46 = vrot.slane %v818_v10, %v1678_v40  ;;  %v745_v47 = vmul.f32 %v741_v26, %v1657_v31  ;;  %v747_v48 = vmul.f32 %v741_v26, %v1661_v33 }
  0x5d   : > { %v1291_v45 = vrot.slane %v744_v34, 9  ;;  %v1293_v49 = vrot.slane %v746_v35, 9  ;;  %v1300_v55 = vrot.slane %v795_v36, 10  ;;  %v1302_v56 = vrot.slane %v797_v37, 10 }
  0x5e   : > { %v836_v30 = vcombine.low %v823_v44, %v827_v13  ;;  %v837_v57 = vcombine.low %v831_v16, %v835_v46  ;;  %v1292_v32 = vrot.slane %v745_v47, 9  ;;  %v1294_v58 = vrot.slane %v747_v48, 9 }
  0x5f   : > { %v764_v59 = vadd.f32 %v1291_v45, %v714_v11  ;;  %v766_v18 = vadd.f32 %v1293_v49, %v716_v14  ;;  %v849_v19 = vrot.slane %v844_v54, %v1642_v25  ;;  %v853_v60 = vrot.slane %v844_v54, %v1672_v38 }
  0x60   : > { %v857_v61 = vrot.slane %v844_v54, %v1675_v39  ;;  %v861_v31 = vrot.slane %v844_v54, %v1678_v40  ;;  %v765_v33 = vadd.f32 %v1292_v32, %v715_v20  ;;  %v767_v50 = vadd.f32 %v1294_v58, %v717_v27 }
  0x61   : > { %v814_v62 = vadd.f32 %v1299_v42, %v764_v59  ;;  %v816_v51 = vadd.f32 %v1301_v43, %v766_v18  ;;  %v862_v52 = vcombine.low %v849_v19, %v853_v60  ;;  %v1478_v22 = vmov 1966171168  }
  0x62   : > { %v863_v23 = vcombine.low %v857_v61, %v861_v31  ;;  %v815_v53 = vadd.f32 %v1300_v55, %v765_v33  ;;  %v817_v24 = vadd.f32 %v1302_v56, %v767_v50  ;;  %v925_v29 = vunpack.c.l.s4 %v1478_v22 }
  0x63   : > { %v840_v63 = vmul.f32 %v836_v30, %v814_v62  ;;  %v842_v0 = vmul.f32 %v836_v30, %v816_v51 }
  0x64   : > { %v841_v1 = vmul.f32 %v837_v57, %v815_v53  ;;  %v843_v2 = vmul.f32 %v837_v57, %v817_v24  ;;  %v926_v13 = vunpack.c.0.s8 %v925_v29 }
  0x65   : > { %v866_v3 = vadd.f32 %v862_v52, %v840_v63  ;;  %v868_v25 = vadd.f32 %v862_v52, %v842_v0 }
  0x66   : > { %v867_v4 = vadd.f32 %v863_v23, %v841_v1  ;;  %v869_v38 = vadd.f32 %v863_v23, %v843_v2  ;;  %v1810_v48 = vsub.s32 %v926_v13, %v1625_v15 }
  0x67   : > { %v870_v6 = vsub.f32 0.0, %v866_v3  ;;  %v872_v39 = vsub.f32 0.0, %v868_v25 }
  0x68   : > { %v871_v7 = vsub.f32 0.0, %v867_v4  ;;  %v873_v40 = vsub.f32 0.0, %v869_v38 }
  0x69   : > { %v874_v8 = vmul.f32 1.442695, %v870_v6  ;;  %v878_v41 = vmul.f32 1.442695, %v872_v39 }
  0x6a   : > { %v876_v5 = vmul.f32 1.442695, %v871_v7  ;;  %v880_v9 = vmul.f32 1.442695, %v873_v40 }
  0x6b   : > { %1390 = vpow2.f32 %v874_v8 }
  0x6c   : > { %1392 = vpow2.f32 %v878_v41 }
  0x6d   : > { %1394 = vpow2.f32 %v876_v5 }
  0x6e   : > { %1396 = vpow2.f32 %v880_v9 }
  0x78   : > { %v1391_v10 = vpop.eup %1390 }
  0x79   : > { %v1393_v11 = vpop.eup %1392  ;;  %v882_v20 = vadd.f32 1.0, %v1391_v10 }
  0x7a   : > { %v1395_v14 = vpop.eup %1394  ;;  %v884_v27 = vadd.f32 1.0, %v1393_v11 }
  0x7b   : > { %v1397_v17 = vpop.eup %1396  ;;  %v883_v28 = vadd.f32 1.0, %v1395_v14  ;;  %1398 = vrcp.f32 %v882_v20 }
  0x7c   : > { %v885_v21 = vadd.f32 1.0, %v1397_v17  ;;  %1400 = vrcp.f32 %v884_v27 }
  0x7d   : > { %1402 = vrcp.f32 %v883_v28 }
  0x7e   : > { %1404 = vrcp.f32 %v885_v21 }
  0x88   : > { %v1399_v44 = vpop.eup %1398 }
  0x89   : > { %v1401_v16 = vpop.eup %1400  ;;  %v890_v26 = vmul.f32 %v1399_v44, %v866_v3 }
  0x8a   : > { %v1403_v34 = vpop.eup %1402  ;;  %v892_v35 = vmul.f32 %v1401_v16, %v868_v25 }
  0x8b   : > { %v1405_v36 = vpop.eup %1404  ;;  %v891_v37 = vmul.f32 %v1403_v34, %v867_v4  ;;  %v898_v42 = vcombine.high %v890_v26, %v890_v26  ;;  %v975_v43 = vsel %vm974_vm0, %v890_v26, 0.0 }
  0x8c   : > { %v893_v46 = vmul.f32 %v1405_v36, %v869_v38  ;;  %v900_v47 = vcombine.high %v892_v35, %v892_v35  ;;  %v976_v45 = vsel %vm974_vm0, %v892_v35, 0.0 }
  0x8d   : > { %v899_v49 = vcombine.high %v891_v37, %v891_v37  ;;  %v1303_v54 = vpack.c.bf16 %v898_v42, %v890_v26  ;;  %v977_v55 = vadd.f32 %v976_v45, %v975_v43  ;;  %v984_v56 = vsel %vm974_vm0, %v898_v42, 0.0 }
  0x8e   : > { %v901_v30 = vcombine.high %v893_v46, %v893_v46  ;;  %v1305_v57 = vpack.c.bf16 %v900_v47, %v892_v35  ;;  %v985_v32 = vsel %vm974_vm0, %v900_v47, 0.0  ;;  %v993_v58 = vsel %vm974_vm0, %v891_v37, 0.0 }
  0x8f   : > { %v1304_v59 = vpack.c.bf16 %v899_v49, %v891_v37  ;;  %v930_v18 = vrot.slane %v1303_v54, %v1810_v48  ;;  %v978_v15 = vrot.slane %v977_v55, 4  ;;  %v986_v19 = vadd.f32 %v985_v32, %v984_v56 }
  0x90   : > { %v1306_v60 = vpack.c.bf16 %v901_v30, %v893_v46  ;;  %v954_v61 = vrot.slane %v1305_v57, %v1810_v48  ;;  %v994_v31 = vsel %vm974_vm0, %v893_v46, 0.0  ;;  %v1002_v33 = vsel %vm974_vm0, %v899_v49, 0.0 }
  0x91   : > { %v937_v50 = vrot.slane %v1304_v59, %v1810_v48  ;;  %v979_v62 = vadd.f32 %v978_v15, %v977_v55  ;;  %v987_v51 = vrot.slane %v986_v19, 4  ;;  %v995_v52 = vadd.f32 %v994_v31, %v993_v58 }
  0x92   : > { %v961_v23 = vrot.slane %v1306_v60, %v1810_v48  ;;  %v1003_v53 = vsel %vm974_vm0, %v901_v30, 0.0 }
  0x93   : > { %v938_v24 = vcombine.low %v930_v18, %v937_v50  ;;  %v980_v63 = vrot.slane %v979_v62, 2  ;;  %v988_v0 = vadd.f32 %v987_v51, %v986_v19  ;;  %v996_v1 = vrot.slane %v995_v52, 4 }
  0x94   : > { %v962_v2 = vcombine.low %v954_v61, %v961_v23  ;;  %v1004_v3 = vadd.f32 %v1003_v53, %v1002_v33 }
  0x95   : > { %1307 = vst.sshfl [vmem:[%s1825_s20] sm:$0x55 pattern:$0x73625140] %v938_v24  ;;  %v981_v25 = vadd.f32 %v980_v63, %v979_v62  ;;  %v989_v4 = vrot.slane %v988_v0, 2  ;;  %v997_v38 = vadd.f32 %v996_v1, %v995_v52 }
  0x96   : > { %1308 = vst.sshfl [vmem:[%s1825_s20 + $0x4] sm:$0x55 pattern:$0x73625140] %v962_v2  ;;  %v1005_v6 = vrot.slane %v1004_v3, 4 }
  0x97   : > { %v982_v39 = vrot.slane %v981_v25, 1  ;;  %v990_v7 = vadd.f32 %v989_v4, %v988_v0  ;;  %v998_v40 = vrot.slane %v997_v38, 2 }
  0x98   : > { %v1006_v8 = vadd.f32 %v1005_v6, %v1004_v3 }
  0x99   : > { %v983_v41 = vadd.f32 %v982_v39, %v981_v25  ;;  %v991_v5 = vrot.slane %v990_v7, 1  ;;  %v999_v9 = vadd.f32 %v998_v40, %v997_v38 }
  0x9a   : > { %v1007_v10 = vrot.slane %v1006_v8, 2 }
  0x9b   : > { %v992_v11 = vadd.f32 %v991_v5, %v990_v7  ;;  %v1000_v20 = vrot.slane %v999_v9, 1  ;;  %v1011_v27 = vmul.f32 0.25, %v983_v41 }
  0x9c   : > { %v1008_v14 = vadd.f32 %v1007_v10, %v1006_v8  ;;  %v1084_v37 = vld [vmem:[%s1825_s20] sm:$0xf] (%p1590_p10) }
  0x9d   : > { %v1001_v17 = vadd.f32 %v1000_v20, %v999_v9  ;;  %v1012_v28 = vmul.f32 0.25, %v992_v11  ;;  %v1086_v42 = vld [vmem:[%s1825_s20 + $0x4] sm:$0xf] (%p1590_p10)  ;;  %1085 = vst [vmem:[%s1067_s8] sm:$0xf] (%p1590_p10), %v1084_v37 }
  0x9e   : > { %v1009_v21 = vrot.slane %v1008_v14, 1  ;;  %1087 = vst [vmem:[%s1067_s8 + $0xc] sm:$0xf] (%p1590_p10), %v1086_v42 }
  0x9f   : > { %v1013_v29 = vmul.f32 0.25, %v1001_v17  ;;  %v1019_v44 = vcombine.low %v1011_v27, %v1012_v28 }
  0xa0   : > { %v1010_v22 = vadd.f32 %v1009_v21, %v1008_v14 }
  0xa1   : > { %v1027_v26 = vrot.slane %v1019_v44, %v1810_v48 }
  0xa2   : > { %v1014_v13 = vmul.f32 0.25, %v1010_v22 }
  0xa4   : > { %v1020_v16 = vcombine.low %v1013_v29, %v1014_v13 }
  0xa6   : > { %v1034_v34 = vrot.slane %v1020_v16, %v1810_v48 }
  0xa8   : > { %v1035_v35 = vcombine.low %v1027_v26, %v1034_v34  ;;  %1063 = sbr.rel (!%p1590_p10) target bundleno = 173 (0xad), region = 101 }
  0xaa   : > { %v1042_v36 = vrot.slane %v1035_v35, %v1810_v48 }
  0xac   : > { %1048 = vst.msk [vmem:[%s400_s15] sm:$0xf] %vm1046_vm1, %v1042_v36 }
  0xad PF: > { %s16_s26 = sadd.s32 1, %s1476_s26   ;;  %s1886_s13 = sld [smem:[#allocation5_spill]] }
  0xae   : > { %p13_p3 = scmp.ge.s32.totalorder %s16_s26, 8   ;;  %s1887_s18 = smov %s1448_s19 }
  0xaf   : > { %s1888_s19 = smov %s1577_s9  ;;  %s1889_s20 = smov %s1456_s21 }
  0xb0   : > { %s1890_s21 = smov %s1595_s14  ;;  %s1891_s22 = smov %s1468_s24 }
  0xb1   : > { %s1892_s23 = smov %s1472_s25  ;;  %s1893_s24 = smov %s1896_s28 }
  0xb2   :  { %15 = sbr.rel (!%p13_p3) target bundleno = 5 (0x5), region = 199 }
  0xb3   : > { %s1894_s25 = smov %s1886_s13 }

// kernel: fph_forward.18
= control target key start
LH: loop header
LB: loop body
LE: loop exit
PB: predicated region body
PF: predicated region fallthrough
CT: control target
= control target key end

     0   :  { %v2367_v22 = vmov 1983009808   ;;  %v31_v24 = vlaneseq  ;;  %vm1476_vm0 = vcmask 523264   ;;  %s2919_s1 = inlined_call_operand.vmem [shape: bf16[1536,64], index: 1, kind: input, shape index: {}]   ;;  %s2920_s0 = inlined_call_operand.vmem [shape: f32[2,1536], index: 0, kind: input, shape index: {}]   ;;  %s2921_s3 = inlined_call_operand.vmem [shape: bf16[64,1536], index: 3, kind: input, shape index: {}]   ;;  %s2922_s2 = inlined_call_operand.vmem [shape: f32[1,64], index: 2, kind: input, shape index: {}]   ;;  %s2923_s4 = inlined_call_operand.vmem [shape: f32[1,1536], index: 4, kind: input, shape index: {}]   ;;  %s2924_s5 = inlined_call_operand.vmem [shape: f32[2,1536], index: 5, kind: output, shape index: {}]  }
   0x1   :  { %v2144_v0 = vld [vmem:[%s2919_s1 + $0x78] sm:$0xff]   ;;  %v2148_v4 = vld [vmem:[%s2919_s1 + $0x70] sm:$0xff]   ;;  %v2152_v8 = vld [vmem:[%s2919_s1 + $0x68] sm:$0xff]   ;;  %v29_v23 = vunpack.c.l.s4 %v2367_v22 }
   0x2   :  { %v2145_v1 = vld [vmem:[%s2919_s1 + $0xf8] sm:$0xff]   ;;  %2010 = vmatprep.subr.bf16.mxu0 %v2144_v0  ;;  %v2149_v5 = vld [vmem:[%s2919_s1 + $0xf0] sm:$0xff]   ;;  %v2153_v9 = vld [vmem:[%s2919_s1 + $0xe8] sm:$0xff]   ;;  %v2477_v30 = vshrl.u32 %v31_v24, 7 }
   0x3   :  { %v2146_v2 = vld [vmem:[%s2919_s1 + $0x38] sm:$0xff]   ;;  %2032 = vmatprep.subr.bf16.mxu1 %v2145_v1  ;;  %v2150_v6 = vld [vmem:[%s2919_s1 + $0x30] sm:$0xff]   ;;  %v2154_v10 = vld [vmem:[%s2919_s1 + $0x28] sm:$0xff]   ;;  %v30_v29 = vunpack.c.0.s8 %v29_v23 }
   0x4   :  { %v2147_v3 = vld [vmem:[%s2919_s1 + $0xb8] sm:$0xff]   ;;  %2011 = vmatpush3.bf16.msra.mxu0 %v2146_v2  ;;  %v2151_v7 = vld [vmem:[%s2919_s1 + $0xb0] sm:$0xff]   ;;  %v2155_v11 = vld [vmem:[%s2919_s1 + $0xa8] sm:$0xff]  }
   0x5   :  { %2033 = vmatpush3.bf16.msra.mxu1 %v2147_v3  ;;  %2012 = vmatprep.subr.bf16.mxu0 %v2148_v4  ;;  %v2156_v12 = vld [vmem:[%s2919_s1 + $0x60] sm:$0xff]   ;;  %v2160_v16 = vld [vmem:[%s2919_s1 + $0x58] sm:$0xff]   ;;  %v2164_v20 = vld [vmem:[%s2919_s1 + $0x50] sm:$0xff]   ;;  %v2492_v35 = vsub.s32 %v30_v29, %v2477_v30 }
   0x6   :  { %2034 = vmatprep.subr.bf16.mxu1 %v2149_v5  ;;  %v2157_v13 = vld [vmem:[%s2919_s1 + $0xe0] sm:$0xff]   ;;  %v2161_v17 = vld [vmem:[%s2919_s1 + $0xd8] sm:$0xff]   ;;  %v2165_v21 = vld [vmem:[%s2919_s1 + $0xd0] sm:$0xff]  }
   0x7   :  { %v2158_v14 = vld [vmem:[%s2919_s1 + $0x20] sm:$0xff]   ;;  %v2162_v18 = vld [vmem:[%s2919_s1 + $0x18] sm:$0xff]   ;;  %v2166_v25 = vld [vmem:[%s2919_s1 + $0x10] sm:$0xff]  }
   0x8   :  { %2013 = vmatpush3.bf16.msra.mxu0 %v2150_v6  ;;  %v2159_v15 = vld [vmem:[%s2919_s1 + $0xa0] sm:$0xff]   ;;  %v2163_v19 = vld [vmem:[%s2919_s1 + $0x98] sm:$0xff]   ;;  %v2167_v26 = vld [vmem:[%s2919_s1 + $0x90] sm:$0xff]  }
   0x9   :  { %2035 = vmatpush3.bf16.msra.mxu1 %v2151_v7  ;;  %2014 = vmatprep.subr.bf16.mxu0 %v2152_v8  ;;  %v2168_v27 = vld [vmem:[%s2919_s1 + $0x48] sm:$0xff]   ;;  %v2172_v33 = vld [vmem:[%s2919_s1 + $0x40] sm:$0xff]   ;;  %v2177_v41 = vld [vmem:[%s2919_s1 + $0x178] sm:$0xff]  }
   0xa   :  { %2036 = vmatprep.subr.bf16.mxu1 %v2153_v9  ;;  %v2169_v28 = vld [vmem:[%s2919_s1 + $0xc8] sm:$0xff]   ;;  %v2173_v34 = vld [vmem:[%s2919_s1 + $0xc0] sm:$0xff]   ;;  %v2178_v42 = vld [vmem:[%s2919_s1 + $0x1f8] sm:$0xff]  }
   0xb   :  { %v2170_v31 = vld [vmem:[%s2919_s1 + $0x8] sm:$0xff]   ;;  %v2174_v36 = vld [vmem:[%s2919_s1] sm:$0xff]   ;;  %v2179_v48 = vld [vmem:[%s2919_s1 + $0x138] sm:$0xff]  }
   0xc   :  { %2015 = vmatpush3.bf16.msra.mxu0 %v2154_v10  ;;  %v2171_v32 = vld [vmem:[%s2919_s1 + $0x88] sm:$0xff]   ;;  %v2175_v37 = vld [vmem:[%s2919_s1 + $0x80] sm:$0xff]   ;;  %v2181_v50 = vld [vmem:[%s2919_s1 + $0x170] sm:$0xff]  }
   0xd   :  { %2037 = vmatpush3.bf16.msra.mxu1 %v2155_v11  ;;  %2016 = vmatprep.subr.bf16.mxu0 %v2156_v12  ;;  %v21_v38 = vld [vmem:[%s2920_s0] sm:$0xff]  ;;  %v2180_v52 = vld [vmem:[%s2919_s1 + $0x1b8] sm:$0xff]   ;;  %v2182_v53 = vld [vmem:[%s2919_s1 + $0x1f0] sm:$0xff]  }
   0xe   :  { %2038 = vmatprep.subr.bf16.mxu1 %v2157_v13  ;;  %v34_v39 = vrot.slane %v21_v38, %v2492_v35  ;;  %v27_v40 = vcombine.high %v21_v38, %v21_v38  ;;  %v2183_v54 = vld [vmem:[%s2919_s1 + $0x130] sm:$0xff]   ;;  %v2185_v55 = vld [vmem:[%s2919_s1 + $0x168] sm:$0xff]   ;;  %v2189_v59 = vld [vmem:[%s2919_s1 + $0x160] sm:$0xff]  }
   0xf   :  { %v2184_v56 = vld [vmem:[%s2919_s1 + $0x1b0] sm:$0xff]   ;;  %v2186_v57 = vld [vmem:[%s2919_s1 + $0x1e8] sm:$0xff]   ;;  %v2190_v61 = vld [vmem:[%s2919_s1 + $0x1e0] sm:$0xff]  }
  0x10   :  { %2017 = vmatpush3.bf16.msra.mxu0 %v2158_v14  ;;  %v42_v43 = vcombine.high %v34_v39, %v34_v39  ;;  %v41_v44 = vrot.slane %v27_v40, %v2492_v35  ;;  %v90_v45 = vpack.c.bf16 %v34_v39, %v34_v39  ;;  %v2187_v58 = vld [vmem:[%s2919_s1 + $0x128] sm:$0xff]   ;;  %v2191_v62 = vld [vmem:[%s2919_s1 + $0x120] sm:$0xff]   ;;  %v2193_v63 = vld [vmem:[%s2919_s1 + $0x158] sm:$0xff]  }
  0x11   :  { %2039 = vmatpush3.bf16.msra.mxu1 %v2159_v15  ;;  %2018 = vmatprep.subr.bf16.mxu0 %v2160_v16  ;;  %v2188_v60 = vld [vmem:[%s2919_s1 + $0x1a8] sm:$0xff]   ;;  %v2192_v0 = vld [vmem:[%s2919_s1 + $0x1a0] sm:$0xff]   ;;  %v2194_v1 = vld [vmem:[%s2919_s1 + $0x1d8] sm:$0xff]  }
  0x12   :  { %2040 = vmatprep.subr.bf16.mxu1 %v2161_v17  ;;  %v91_v46 = vpack.c.bf16 %v42_v43, %v42_v43  ;;  %v43_v47 = vcombine.high %v41_v44, %v41_v44  ;;  %v92_v49 = vpack.c.bf16 %v41_v44, %v41_v44  ;;  %v2195_v2 = vld [vmem:[%s2919_s1 + $0x118] sm:$0xff]   ;;  %v2197_v3 = vld [vmem:[%s2919_s1 + $0x150] sm:$0xff]   ;;  %v2201_v7 = vld [vmem:[%s2919_s1 + $0x148] sm:$0xff]  }
  0x13   :  { %v2196_v4 = vld [vmem:[%s2919_s1 + $0x198] sm:$0xff]   ;;  %v2198_v5 = vld [vmem:[%s2919_s1 + $0x1d0] sm:$0xff]   ;;  %v2202_v9 = vld [vmem:[%s2919_s1 + $0x1c8] sm:$0xff]  }
  0x14   :  { %2019 = vmatpush3.bf16.msra.mxu0 %v2162_v18  ;;  %909 = vmatprep.mubr.bf16.mxu0 %v91_v46  ;;  %v93_v51 = vpack.c.bf16 %v43_v47, %v43_v47  ;;  %v2199_v6 = vld [vmem:[%s2919_s1 + $0x110] sm:$0xff]   ;;  %v2203_v10 = vld [vmem:[%s2919_s1 + $0x108] sm:$0xff]   ;;  %v2205_v11 = vld [vmem:[%s2919_s1 + $0x140] sm:$0xff]  }
  0x15   :  { %2041 = vmatpush3.bf16.msra.mxu1 %v2163_v19  ;;  %2020 = vmatprep.subr.bf16.mxu0 %v2164_v20  ;;  %v2200_v8 = vld [vmem:[%s2919_s1 + $0x190] sm:$0xff]   ;;  %v2204_v12 = vld [vmem:[%s2919_s1 + $0x188] sm:$0xff]   ;;  %v2206_v13 = vld [vmem:[%s2919_s1 + $0x1c0] sm:$0xff]  }
  0x16   :  { %2042 = vmatprep.subr.bf16.mxu1 %v2165_v21  ;;  %949 = vmatprep.mubr.bf16.mxu1 %v93_v51  ;;  %v22_v14 = vld [vmem:[%s2920_s0 + $0x8] sm:$0xff]  ;;  %v2207_v15 = vld [vmem:[%s2919_s1 + $0x100] sm:$0xff]   ;;  %v2210_v18 = vld [vmem:[%s2919_s1 + $0x278] sm:$0xff]  }
  0x17   :  { %v51_v16 = vrot.slane %v22_v14, %v2492_v35  ;;  %v44_v17 = vcombine.high %v22_v14, %v22_v14  ;;  %v2208_v19 = vld [vmem:[%s2919_s1 + $0x180] sm:$0xff]   ;;  %v2211_v23 = vld [vmem:[%s2919_s1 + $0x2f8] sm:$0xff]   ;;  %v2220_v38 = vld [vmem:[%s2919_s1 + $0x228] sm:$0xff]  }
  0x18   :  { %2021 = vmatpush3.bf16.msra.mxu0 %v2166_v25  ;;  %v2222_v39 = vld [vmem:[%s2919_s1 + $0x260] sm:$0xff]   ;;  %v2221_v40 = vld [vmem:[%s2919_s1 + $0x2a8] sm:$0xff]   ;;  %v2226_v43 = vld [vmem:[%s2919_s1 + $0x258] sm:$0xff]  }
  0x19   :  { %2043 = vmatpush3.bf16.msra.mxu1 %v2167_v26  ;;  %2022 = vmatprep.subr.bf16.mxu0 %v2168_v27  ;;  %v59_v20 = vcombine.high %v51_v16, %v51_v16  ;;  %v58_v21 = vrot.slane %v44_v17, %v2492_v35  ;;  %v94_v22 = vpack.c.bf16 %v51_v16, %v51_v16  ;;  %v2212_v26 = vld [vmem:[%s2919_s1 + $0x238] sm:$0xff]   ;;  %v2225_v44 = vld [vmem:[%s2919_s1 + $0x2a0] sm:$0xff]   ;;  %v2230_v47 = vld [vmem:[%s2919_s1 + $0x250] sm:$0xff]  }
  0x1a   :  { %2044 = vmatprep.subr.bf16.mxu1 %v2169_v28  ;;  %v2214_v28 = vld [vmem:[%s2919_s1 + $0x270] sm:$0xff]   ;;  %v2228_v46 = vld [vmem:[%s2919_s1 + $0x218] sm:$0xff]   ;;  %v2234_v51 = vld [vmem:[%s2919_s1 + $0x248] sm:$0xff]  }
  0x1b   :  { %v95_v24 = vpack.c.bf16 %v59_v20, %v59_v20  ;;  %v60_v25 = vcombine.high %v58_v21, %v58_v21  ;;  %v96_v27 = vpack.c.bf16 %v58_v21, %v58_v21  ;;  %v2257_v14 = vld [vmem:[%s2921_s3 + $0x64] ss:$48 sps:$4 sm:$0xff]   ;;  %v2255_v16 = vld [vmem:[%s2921_s3 + $0x60] ss:$48 sps:$4 sm:$0xff]   ;;  %v2258_v17 = vld [vmem:[%s2921_s3 + $0x68] ss:$48 sps:$4 sm:$0xff]  }
  0x1c   :  { %2023 = vmatpush3.bf16.msra.mxu0 %v2170_v31  ;;  %v2213_v31 = vld [vmem:[%s2919_s1 + $0x2b8] sm:$0xff]   ;;  %v2261_v20 = vld [vmem:[%s2921_s3] ss:$48 sps:$4 sm:$0xff]  }
  0x1d   :  { %2045 = vmatpush3.bf16.msra.mxu1 %v2171_v32  ;;  %2024 = vmatprep.subr.bf16.mxu0 %v2172_v33  ;;  %v97_v29 = vpack.c.bf16 %v60_v25, %v60_v25  ;;  %v2215_v32 = vld [vmem:[%s2919_s1 + $0x2f0] sm:$0xff]   ;;  %v2264_v21 = vld [vmem:[%s2921_s3 + $0x8] ss:$48 sps:$4 sm:$0xff]  }
  0x1e   :  { %2046 = vmatprep.subr.bf16.mxu1 %v2173_v34  ;;  %v2216_v33 = vld [vmem:[%s2919_s1 + $0x230] sm:$0xff]   ;;  %v2218_v34 = vld [vmem:[%s2919_s1 + $0x268] sm:$0xff]  }
  0x20   :  { %2025 = vmatpush3.bf16.msra.mxu0 %v2174_v36  ;;  %v2217_v36 = vld [vmem:[%s2919_s1 + $0x2b0] sm:$0xff]  }
  0x21   :  { %2047 = vmatpush3.bf16.msra.mxu1 %v2175_v37  ;;  %2054 = vmatprep.subr.bf16.mxu0 %v2177_v41  ;;  %v2219_v37 = vld [vmem:[%s2919_s1 + $0x2e8] sm:$0xff]   ;;  %v2223_v41 = vld [vmem:[%s2919_s1 + $0x2e0] sm:$0xff]  }
  0x22   :  { %2076 = vmatprep.subr.bf16.mxu1 %v2178_v42  ;;  %v2224_v42 = vld [vmem:[%s2919_s1 + $0x220] sm:$0xff]  }
  0x23   :  { %910 = vmatmul.mubr.bf16.vlgmr.msra.gmra.mxu0 %v90_v45  ;;  %v2227_v45 = vld [vmem:[%s2919_s1 + $0x2d8] sm:$0xff]  }
  0x24   :  { %2055 = vmatpush3.bf16.msra.mxu0 %v2179_v48  ;;  %950 = vmatmul.mubr.bf16.vlgmr.msra.gmra.mxu1 %v92_v49  ;;  %v2229_v48 = vld [vmem:[%s2919_s1 + $0x298] sm:$0xff]   ;;  %v2231_v49 = vld [vmem:[%s2919_s1 + $0x2d0] sm:$0xff]  }
  0x25   :  { %2056 = vmatprep.subr.bf16.mxu0 %v2181_v50  ;;  %2077 = vmatpush3.bf16.msra.mxu1 %v2180_v52  ;;  %v2232_v50 = vld [vmem:[%s2919_s1 + $0x210] sm:$0xff]  }
  0x26   :  { %2078 = vmatprep.subr.bf16.mxu1 %v2182_v53  ;;  %989 = vmatprep.mubr.bf16.mxu0 %v95_v24  ;;  %v2233_v52 = vld [vmem:[%s2919_s1 + $0x290] sm:$0xff]   ;;  %v2235_v53 = vld [vmem:[%s2919_s1 + $0x2c8] sm:$0xff]  }
  0x27   :  { %1029 = vmatprep.mubr.bf16.mxu1 %v97_v29  ;;  %v2272_v24 = vld [vmem:[%s2921_s3 + $0x13c] ss:$48 sps:$4 sm:$0xff]  }
  0x28   :  { %2057 = vmatpush3.bf16.msra.mxu0 %v2183_v54  ;;  %v2236_v54 = vld [vmem:[%s2919_s1 + $0x208] sm:$0xff]  }
  0x29   :  { %2058 = vmatprep.subr.bf16.mxu0 %v2185_v55  ;;  %2079 = vmatpush3.bf16.msra.mxu1 %v2184_v56  ;;  %v2238_v55 = vld [vmem:[%s2919_s1 + $0x240] sm:$0xff]   ;;  %v2237_v56 = vld [vmem:[%s2919_s1 + $0x288] sm:$0xff]  }
  0x2a   :  { %2080 = vmatprep.subr.bf16.mxu1 %v2186_v57  ;;  %v2239_v57 = vld [vmem:[%s2919_s1 + $0x2c0] sm:$0xff]  }
  0x2c   :  { %2059 = vmatpush3.bf16.msra.mxu0 %v2187_v58  ;;  %v23_v58 = vld [vmem:[%s2920_s0 + $0x10] sm:$0xff] }
  0x2d   :  { %2060 = vmatprep.subr.bf16.mxu0 %v2189_v59  ;;  %2081 = vmatpush3.bf16.msra.mxu1 %v2188_v60  ;;  %v2240_v59 = vld [vmem:[%s2919_s1 + $0x200] sm:$0xff]   ;;  %v68_v60 = vrot.slane %v23_v58, %v2492_v35 }
  0x2e   :  { %2082 = vmatprep.subr.bf16.mxu1 %v2190_v61  ;;  %v61_v61 = vcombine.high %v23_v58, %v23_v58 }
  0x30   :  { %2061 = vmatpush3.bf16.msra.mxu0 %v2191_v62  ;;  %v2241_v62 = vld [vmem:[%s2919_s1 + $0x280] sm:$0xff]  }
  0x31   :  { %2062 = vmatprep.subr.bf16.mxu0 %v2193_v63  ;;  %2083 = vmatpush3.bf16.msra.mxu1 %v2192_v0  ;;  %v76_v63 = vcombine.high %v68_v60, %v68_v60  ;;  %v75_v0 = vrot.slane %v61_v61, %v2492_v35 }
  0x32   :  { %2084 = vmatprep.subr.bf16.mxu1 %v2194_v1  ;;  %v98_v1 = vpack.c.bf16 %v68_v60, %v68_v60 }
  0x34   :  { %2063 = vmatpush3.bf16.msra.mxu0 %v2195_v2  ;;  %v99_v2 = vpack.c.bf16 %v76_v63, %v76_v63 }
  0x35   :  { %2064 = vmatprep.subr.bf16.mxu0 %v2197_v3  ;;  %2085 = vmatpush3.bf16.msra.mxu1 %v2196_v4  ;;  %v77_v3 = vcombine.high %v75_v0, %v75_v0  ;;  %v100_v4 = vpack.c.bf16 %v75_v0, %v75_v0 }
  0x36   :  { %2086 = vmatprep.subr.bf16.mxu1 %v2198_v5 }
  0x37   :  { %v101_v5 = vpack.c.bf16 %v77_v3, %v77_v3 }
  0x38   :  { %2065 = vmatpush3.bf16.msra.mxu0 %v2199_v6  ;;  %v2245_v6 = vld [vmem:[%s2921_s3 + $0x124] ss:$48 sps:$4 sm:$0xff]  }
  0x39   :  { %2066 = vmatprep.subr.bf16.mxu0 %v2201_v7  ;;  %2087 = vmatpush3.bf16.msra.mxu1 %v2200_v8  ;;  %v2243_v7 = vld [vmem:[%s2921_s3 + $0x120] ss:$48 sps:$4 sm:$0xff]   ;;  %v2246_v8 = vld [vmem:[%s2921_s3 + $0x128] ss:$48 sps:$4 sm:$0xff]  }
  0x3a   :  { %2088 = vmatprep.subr.bf16.mxu1 %v2202_v9  ;;  %v2248_v9 = vld [vmem:[%s2921_s3 + $0x12c] ss:$48 sps:$4 sm:$0xff]  }
  0x3c   :  { %2067 = vmatpush3.bf16.msra.mxu0 %v2203_v10  ;;  %v2251_v10 = vld [vmem:[%s2921_s3 + $0xc4] ss:$48 sps:$4 sm:$0xff]  }
  0x3d   :  { %2068 = vmatprep.subr.bf16.mxu0 %v2205_v11  ;;  %2089 = vmatpush3.bf16.msra.mxu1 %v2204_v12  ;;  %v2254_v11 = vld [vmem:[%s2921_s3 + $0xcc] ss:$48 sps:$4 sm:$0xff]   ;;  %v2249_v12 = vld [vmem:[%s2921_s3 + $0xc0] ss:$48 sps:$4 sm:$0xff]  }
  0x3e   :  { %2090 = vmatprep.subr.bf16.mxu1 %v2206_v13  ;;  %v2252_v13 = vld [vmem:[%s2921_s3 + $0xc8] ss:$48 sps:$4 sm:$0xff]  }
  0x40   :  { %2069 = vmatpush3.bf16.msra.mxu0 %v2207_v15  ;;  %v2260_v15 = vld [vmem:[%s2921_s3 + $0x6c] ss:$48 sps:$4 sm:$0xff]  }
  0x41   :  { %2098 = vmatprep.subr.bf16.mxu0 %v2210_v18  ;;  %2091 = vmatpush3.bf16.msra.mxu1 %v2208_v19  ;;  %v2263_v18 = vld [vmem:[%s2921_s3 + $0x4] ss:$48 sps:$4 sm:$0xff]   ;;  %v2266_v19 = vld [vmem:[%s2921_s3 + $0xc] ss:$48 sps:$4 sm:$0xff]  }
  0x42   :  { %2120 = vmatprep.subr.bf16.mxu1 %v2211_v23  ;;  %v2368_v23 = vmov 0  }
  0x43   :  { %990 = vmatmul.mubr.bf16.vlgmr.msra.gmra.mxu0 %v94_v22  ;;  %v2269_v22 = vld [vmem:[%s2921_s3 + $0x134] ss:$48 sps:$4 sm:$0xff]  }
  0x44   :  { %2099 = vmatpush3.bf16.msra.mxu0 %v2212_v26  ;;  %1030 = vmatmul.mubr.bf16.vlgmr.msra.gmra.mxu1 %v96_v27 }
  0x45   :  { %2100 = vmatprep.subr.bf16.mxu0 %v2214_v28  ;;  %2121 = vmatpush3.bf16.msra.mxu1 %v2213_v31 }
  0x46   :  { %2122 = vmatprep.subr.bf16.mxu1 %v2215_v32  ;;  %1069 = vmatprep.mubr.bf16.mxu0 %v99_v2 }
  0x47   :  { %1109 = vmatprep.mubr.bf16.mxu1 %v101_v5 }
  0x48   :  { %2101 = vmatpush3.bf16.msra.mxu0 %v2216_v33 }
  0x49   :  { %2102 = vmatprep.subr.bf16.mxu0 %v2218_v34  ;;  %2123 = vmatpush3.bf16.msra.mxu1 %v2217_v36 }
  0x4a   :  { %2124 = vmatprep.subr.bf16.mxu1 %v2219_v37 }
  0x4c   :  { %2103 = vmatpush3.bf16.msra.mxu0 %v2220_v38 }
  0x4d   :  { %2104 = vmatprep.subr.bf16.mxu0 %v2222_v39  ;;  %2125 = vmatpush3.bf16.msra.mxu1 %v2221_v40 }
  0x4e   :  { %2126 = vmatprep.subr.bf16.mxu1 %v2223_v41 }
  0x50   :  { %2105 = vmatpush3.bf16.msra.mxu0 %v2224_v42 }
  0x51   :  { %2106 = vmatprep.subr.bf16.mxu0 %v2226_v43  ;;  %2127 = vmatpush3.bf16.msra.mxu1 %v2225_v44  ;;  %v1859_v44 = vld [vmem:[%s2922_s2] ss:$0 sm:$0xff] }
  0x52   :  { %2128 = vmatprep.subr.bf16.mxu1 %v2227_v45 }
  0x54   :  { %2107 = vmatpush3.bf16.msra.mxu0 %v2228_v46 }
  0x55   :  { %2108 = vmatprep.subr.bf16.mxu0 %v2230_v47  ;;  %2129 = vmatpush3.bf16.msra.mxu1 %v2229_v48 }
  0x56   :  { %2130 = vmatprep.subr.bf16.mxu1 %v2231_v49 }
  0x58   :  { %2109 = vmatpush3.bf16.msra.mxu0 %v2232_v50 }
  0x59   :  { %2110 = vmatprep.subr.bf16.mxu0 %v2234_v51  ;;  %2131 = vmatpush3.bf16.msra.mxu1 %v2233_v52 }
  0x5a   :  { %2132 = vmatprep.subr.bf16.mxu1 %v2235_v53 }
  0x5c   :  { %2111 = vmatpush3.bf16.msra.mxu0 %v2236_v54 }
  0x5d   :  { %2112 = vmatprep.subr.bf16.mxu0 %v2238_v55  ;;  %2133 = vmatpush3.bf16.msra.mxu1 %v2237_v56 }
  0x5e   :  { %2134 = vmatprep.subr.bf16.mxu1 %v2239_v57 }
  0x60   :  { %2113 = vmatpush3.bf16.msra.mxu0 %v2240_v59 }
  0x61   :  { %2135 = vmatpush3.bf16.msra.mxu1 %v2241_v62  ;;  %1488 = vmatprep.subr.bf16.mxu0 %v2245_v6  ;;  %v2267_v6 = vld [vmem:[%s2921_s3 + $0x130] ss:$48 sps:$4 sm:$0xff]  }
  0x62   :  { %1529 = vmatprep.subr.bf16.mxu1 %v2248_v9  ;;  %v2275_v9 = vld [vmem:[%s2921_s3 + $0xd4] ss:$48 sps:$4 sm:$0xff]  }
  0x63   :  { %1070 = vmatmul.mubr.bf16.vlgmr.msra.gmra.mxu0 %v98_v1 }
  0x64   :  { %1110 = vmatmul.mubr.bf16.vlgmr.msra.gmra.mxu1 %v100_v4  ;;  %1489 = vmatpush1.bf16.msra.mxu0 %v2243_v7  ;;  %v2270_v7 = vld [vmem:[%s2921_s3 + $0x138] ss:$48 sps:$4 sm:$0xff]  }
  0x65   :  { %1530 = vmatpush1.bf16.msra.mxu1 %v2246_v8  ;;  %1490 = vmatprep.subr.bf16.mxu0 %v2251_v10  ;;  %v2278_v10 = vld [vmem:[%s2921_s3 + $0xdc] ss:$48 sps:$4 sm:$0xff]  }
  0x66   :  { %1531 = vmatprep.subr.bf16.mxu1 %v2254_v11  ;;  %1512 = vmatprep.mubr.bf16.mxu0 %v2368_v23  ;;  %v2273_v11 = vld [vmem:[%s2921_s3 + $0xd0] ss:$48 sps:$4 sm:$0xff]  }
  0x67   :  { %1553 = vmatprep.mubr.bf16.mxu1 %v2368_v23 }
  0x68   :  { %1491 = vmatpush1.bf16.msra.mxu0 %v2249_v12  ;;  %v2276_v12 = vld [vmem:[%s2921_s3 + $0xd8] ss:$48 sps:$4 sm:$0xff]  }
  0x69   :  { %1532 = vmatpush1.bf16.msra.mxu1 %v2252_v13  ;;  %1492 = vmatprep.subr.bf16.mxu0 %v2257_v14  ;;  %v2281_v13 = vld [vmem:[%s2921_s3 + $0x74] ss:$48 sps:$4 sm:$0xff]   ;;  %v2284_v14 = vld [vmem:[%s2921_s3 + $0x7c] ss:$48 sps:$4 sm:$0xff]  }
  0x6a   :  { %1533 = vmatprep.subr.bf16.mxu1 %v2260_v15  ;;  %v2279_v15 = vld [vmem:[%s2921_s3 + $0x70] ss:$48 sps:$4 sm:$0xff]  }
  0x6c   :  { %1493 = vmatpush1.bf16.msra.mxu0 %v2255_v16  ;;  %v2282_v16 = vld [vmem:[%s2921_s3 + $0x78] ss:$48 sps:$4 sm:$0xff]  }
  0x6d   :  { %1534 = vmatpush1.bf16.msra.mxu1 %v2258_v17  ;;  %1494 = vmatprep.subr.bf16.mxu0 %v2263_v18  ;;  %v2287_v17 = vld [vmem:[%s2921_s3 + $0x14] ss:$48 sps:$4 sm:$0xff]   ;;  %v2290_v18 = vld [vmem:[%s2921_s3 + $0x1c] ss:$48 sps:$4 sm:$0xff]  }
  0x6e   :  { %1535 = vmatprep.subr.bf16.mxu1 %v2266_v19  ;;  %v2285_v19 = vld [vmem:[%s2921_s3 + $0x10] ss:$48 sps:$4 sm:$0xff]  }
  0x70   :  { %1495 = vmatpush1.bf16.msra.mxu0 %v2261_v20  ;;  %v2288_v20 = vld [vmem:[%s2921_s3 + $0x18] ss:$48 sps:$4 sm:$0xff]  }
  0x71   :  { %1536 = vmatpush1.bf16.msra.mxu1 %v2264_v21  ;;  %1570 = vmatprep.subr.bf16.mxu0 %v2269_v22  ;;  %v2293_v21 = vld [vmem:[%s2921_s3 + $0x144] ss:$48 sps:$4 sm:$0xff]   ;;  %v2296_v22 = vld [vmem:[%s2921_s3 + $0x14c] ss:$48 sps:$4 sm:$0xff]  }
  0x72   :  { %1611 = vmatprep.subr.bf16.mxu1 %v2272_v24  ;;  %v2291_v24 = vld [vmem:[%s2921_s3 + $0x140] ss:$48 sps:$4 sm:$0xff]  }
  0xe3   :  { %v2026_v25 = vpop.f32.mrf.mxu0 }
  0xe4   :  { %v2048_v26 = vpop.f32.mrf.mxu1 }
  0xe5   :  { %v2027_v27 = vpop.f32.mrf.mxu0 }
  0xe6   :  { %v2049_v28 = vpop.f32.mrf.mxu1  ;;  %v2028_v43 = vadd.f32 %v2027_v27, %v2026_v25  ;;  %v2294_v25 = vld [vmem:[%s2921_s3 + $0x148] ss:$48 sps:$4 sm:$0xff]   ;;  %v2302_v27 = vld [vmem:[%s2921_s3 + $0xec] ss:$48 sps:$4 sm:$0xff]  }
  0xe7   :  { %v2029_v29 = vpop.f32.mrf.mxu0  ;;  %v2050_v46 = vadd.f32 %v2049_v28, %v2048_v26  ;;  %v2299_v26 = vld [vmem:[%s2921_s3 + $0xe4] ss:$48 sps:$4 sm:$0xff]   ;;  %v2297_v28 = vld [vmem:[%s2921_s3 + $0xe0] ss:$48 sps:$4 sm:$0xff]  }
  0xe8   :  { %v2051_v31 = vpop.f32.mrf.mxu1  ;;  %v912_v45 = vadd.f32 %v2028_v43, %v1859_v44  ;;  %v2300_v29 = vld [vmem:[%s2921_s3 + $0xe8] ss:$48 sps:$4 sm:$0xff]   ;;  %v1190_v43 = vsub.s32 3, %v2477_v30 }
  0xe9   :  { %v2030_v32 = vpop.f32.mrf.mxu0  ;;  %v2305_v31 = vld [vmem:[%s2921_s3 + $0x84] ss:$48 sps:$4 sm:$0xff]  }
  0xea   :  { %v2052_v33 = vpop.f32.mrf.mxu1  ;;  %v952_v48 = vadd.f32 %v2050_v46, %v912_v45  ;;  %v2308_v32 = vld [vmem:[%s2921_s3 + $0x8c] ss:$48 sps:$4 sm:$0xff]  }
  0xeb   :  { %v2303_v33 = vld [vmem:[%s2921_s3 + $0x80] ss:$48 sps:$4 sm:$0xff]  }
 0x103   :  { %v2070_v34 = vpop.f32.mrf.mxu0 }
 0x104   :  { %v2092_v36 = vpop.f32.mrf.mxu1 }
 0x105   :  { %v2071_v37 = vpop.f32.mrf.mxu0 }
 0x106   :  { %v2093_v38 = vpop.f32.mrf.mxu1  ;;  %v2072_v47 = vadd.f32 %v2071_v37, %v2070_v34  ;;  %v2306_v34 = vld [vmem:[%s2921_s3 + $0x88] ss:$48 sps:$4 sm:$0xff]   ;;  %v2309_v37 = vld [vmem:[%s2921_s3 + $0x20] ss:$48 sps:$4 sm:$0xff]  }
 0x107   :  { %v2073_v39 = vpop.f32.mrf.mxu0  ;;  %v2094_v50 = vadd.f32 %v2093_v38, %v2092_v36  ;;  %v2311_v36 = vld [vmem:[%s2921_s3 + $0x24] ss:$48 sps:$4 sm:$0xff]   ;;  %v2312_v38 = vld [vmem:[%s2921_s3 + $0x28] ss:$48 sps:$4 sm:$0xff]  }
 0x108   :  { %v2095_v40 = vpop.f32.mrf.mxu1  ;;  %v992_v49 = vadd.f32 %v2072_v47, %v952_v48  ;;  %v1178_v39 = vsub.s32 0, %v2477_v30 }
 0x109   :  { %v2074_v41 = vpop.f32.mrf.mxu0  ;;  %v1186_v40 = vsub.s32 2, %v2477_v30 }
 0x10a   :  { %v2096_v42 = vpop.f32.mrf.mxu1  ;;  %v1032_v54 = vadd.f32 %v2094_v50, %v992_v49  ;;  %v1172_v41 = vld [vmem:[%s2923_s4] sm:$0xff] }
 0x10b   :  { %v1182_v42 = vsub.s32 1, %v2477_v30  ;;  %v1179_v44 = vrot.slane %v1172_v41, %v1178_v39  ;;  %v1187_v45 = vrot.slane %v1172_v41, %v1186_v40  ;;  %v1191_v47 = vrot.slane %v1172_v41, %v1190_v43 }
 0x10d   :  { %v1183_v46 = vrot.slane %v1172_v41, %v1182_v42 }
 0x123   :  { %v2114_v51 = vpop.f32.mrf.mxu0 }
 0x124   :  { %v2136_v52 = vpop.f32.mrf.mxu1 }
 0x125   :  { %v2115_v53 = vpop.f32.mrf.mxu0 }
 0x126   :  { %v2116_v55 = vadd.f32 %v2115_v53, %v2114_v51  ;;  %v2137_v56 = vpop.f32.mrf.mxu1 }
 0x127   :  { %v2117_v57 = vpop.f32.mrf.mxu0  ;;  %v2138_v59 = vadd.f32 %v2137_v56, %v2136_v52 }
 0x128   :  { %v1072_v58 = vadd.f32 %v2116_v55, %v1032_v54  ;;  %v2139_v60 = vpop.f32.mrf.mxu1 }
 0x129   :  { %v2118_v61 = vpop.f32.mrf.mxu0 }
 0x12a   :  { %v1112_v62 = vadd.f32 %v2138_v59, %v1072_v58  ;;  %v2140_v63 = vpop.f32.mrf.mxu1 }
 0x12c   :  { %v1117_v0 = vsub.f32 0.0, %v1112_v62 }
 0x12e   :  { %v1118_v1 = vmul.f32 1.442695, %v1117_v0 }
 0x130   :  { %2315 = vpow2.f32 %v1118_v1 }
 0x13d   :  { %v2316_v2 = vpop.eup %2315 }
 0x13e   :  { %v1120_v3 = vadd.f32 1.0, %v2316_v2 }
 0x140   :  { %2317 = vrcp.f32 %v1120_v3 }
 0x14d   :  { %v2318_v4 = vpop.eup %2317 }
 0x14e   :  { %v1122_v5 = vmul.f32 %v2318_v4, %v1112_v62  ;;  %v1194_v4 = vsub.s32 4, %v2477_v30 }
 0x150   :  { %v2772_v8 = vpack.c.bf16 %v1122_v5, %v1122_v5  ;;  %v1202_v5 = vsub.s32 6, %v2477_v30 }
 0x152   :  { %2004 = vmatmul.mubr.msk.bf16.vlgmr.msra.gmra.mxu0 %vm1476_vm0, %v2772_v8  ;;  %2005 = vmatmul.mubr.msk.bf16.vlgmr.msra.gmra.mxu1 %vm1476_vm0, %v2772_v8 }
 0x153   :  { %1571 = vmatpush1.bf16.msra.mxu0 %v2267_v6  ;;  %1612 = vmatpush1.bf16.msra.mxu1 %v2270_v7  ;;  %v1198_v6 = vsub.s32 5, %v2477_v30  ;;  %v1206_v7 = vsub.s32 7, %v2477_v30 }
 0x154   :  { %1572 = vmatprep.subr.bf16.mxu0 %v2275_v9  ;;  %1613 = vmatprep.subr.bf16.mxu1 %v2278_v10  ;;  %v1203_v9 = vrot.slane %v1172_v41, %v1202_v5 }
 0x155   :  { %1594 = vmatprep.mubr.bf16.mxu0 %v2368_v23  ;;  %1635 = vmatprep.mubr.bf16.mxu1 %v2368_v23  ;;  %v1199_v10 = vrot.slane %v1172_v41, %v1198_v6 }
 0x157   :  { %1573 = vmatpush1.bf16.msra.mxu0 %v2273_v11  ;;  %1614 = vmatpush1.bf16.msra.mxu1 %v2276_v12  ;;  %v1207_v11 = vrot.slane %v1172_v41, %v1206_v7 }
 0x158   :  { %1574 = vmatprep.subr.bf16.mxu0 %v2281_v13  ;;  %1615 = vmatprep.subr.bf16.mxu1 %v2284_v14 }
 0x15b   :  { %1575 = vmatpush1.bf16.msra.mxu0 %v2279_v15  ;;  %1616 = vmatpush1.bf16.msra.mxu1 %v2282_v16 }
 0x15c   :  { %1576 = vmatprep.subr.bf16.mxu0 %v2287_v17  ;;  %1617 = vmatprep.subr.bf16.mxu1 %v2290_v18 }
 0x15f   :  { %1577 = vmatpush1.bf16.msra.mxu0 %v2285_v19  ;;  %1618 = vmatpush1.bf16.msra.mxu1 %v2288_v20 }
 0x160   :  { %1652 = vmatprep.subr.bf16.mxu0 %v2293_v21  ;;  %1693 = vmatprep.subr.bf16.mxu1 %v2296_v22 }
 0x162   :  { %2006 = vmatmul.mubr.msk.bf16.vlgmr.msra.gmra.mxu0 %vm1476_vm0, %v2772_v8  ;;  %2007 = vmatmul.mubr.msk.bf16.vlgmr.msra.gmra.mxu1 %vm1476_vm0, %v2772_v8 }
 0x163   :  { %1653 = vmatpush1.bf16.msra.mxu0 %v2291_v24  ;;  %1694 = vmatpush1.bf16.msra.mxu1 %v2294_v25 }
 0x164   :  { %1654 = vmatprep.subr.bf16.mxu0 %v2299_v26  ;;  %1695 = vmatprep.subr.bf16.mxu1 %v2302_v27 }
 0x165   :  { %1676 = vmatprep.mubr.bf16.mxu0 %v2368_v23  ;;  %1717 = vmatprep.mubr.bf16.mxu1 %v2368_v23  ;;  %v2314_v23 = vld [vmem:[%s2921_s3 + $0x2c] ss:$48 sps:$4 sm:$0xff]  }
 0x167   :  { %1655 = vmatpush1.bf16.msra.mxu0 %v2297_v28  ;;  %1696 = vmatpush1.bf16.msra.mxu1 %v2300_v29 }
 0x168   :  { %1656 = vmatprep.subr.bf16.mxu0 %v2305_v31  ;;  %1697 = vmatprep.subr.bf16.mxu1 %v2308_v32 }
 0x16b   :  { %1657 = vmatpush1.bf16.msra.mxu0 %v2303_v33  ;;  %1698 = vmatpush1.bf16.msra.mxu1 %v2306_v34 }
 0x16c   :  { %1658 = vmatprep.subr.bf16.mxu0 %v2311_v36  ;;  %1699 = vmatprep.subr.bf16.mxu1 %v2314_v23 }
 0x16f   :  { %1659 = vmatpush1.bf16.msra.mxu0 %v2309_v37  ;;  %1700 = vmatpush1.bf16.msra.mxu1 %v2312_v38 }
 0x172   :  { %2008 = vmatmul.mubr.msk.bf16.vlgmr.msra.gmra.mxu0 %vm1476_vm0, %v2772_v8  ;;  %2009 = vmatmul.mubr.msk.bf16.vlgmr.msra.gmra.mxu1 %vm1476_vm0, %v2772_v8  ;;  %v1195_v8 = vrot.slane %v1172_v41, %v1194_v4 }
 0x212   :  { %v1514_v48 = vpop.f32.mrf.mxu0  ;;  %v1555_v49 = vpop.f32.mrf.mxu1 }
 0x213   :  { %v1515_v50 = vadd.f32 %v1514_v48, %v1179_v44  ;;  %v1556_v51 = vadd.f32 %v1555_v49, %v1187_v45 }
 0x214   :  { %v1516_v52 = vpop.f32.mrf.mxu0  ;;  %v1557_v53 = vpop.f32.mrf.mxu1 }
 0x215   :  { %v1726_v54 = vsub.f32 0.0, %v1515_v50  ;;  %v1728_v55 = vsub.f32 0.0, %v1556_v51  ;;  %v1517_v56 = vadd.f32 %v1516_v52, %v1183_v46  ;;  %v1558_v57 = vadd.f32 %v1557_v53, %v1191_v47  ;;  %v1173_v46 = vld [vmem:[%s2923_s4 + $0x8] sm:$0xf] }
 0x216   :  { %v1518_v58 = vpop.f32.mrf.mxu0  ;;  %v1559_v59 = vpop.f32.mrf.mxu1  ;;  %v1211_v47 = vrot.slane %v1173_v46, %v1178_v39  ;;  %v1219_v48 = vrot.slane %v1173_v46, %v1186_v40  ;;  %v1215_v49 = vrot.slane %v1173_v46, %v1182_v42  ;;  %v1223_v50 = vrot.slane %v1173_v46, %v1190_v43 }
 0x217   :  { %v1738_v60 = vmul.f32 1.442695, %v1726_v54  ;;  %v1742_v61 = vmul.f32 1.442695, %v1728_v55  ;;  %v1727_v62 = vsub.f32 0.0, %v1517_v56  ;;  %v1729_v63 = vsub.f32 0.0, %v1558_v57 }
 0x218   :  { %v1519_v0 = vpop.f32.mrf.mxu0  ;;  %v1560_v1 = vpop.f32.mrf.mxu1 }
 0x219   :  { %2319 = vpow2.f32 %v1738_v60  ;;  %v1740_v2 = vmul.f32 1.442695, %v1727_v62  ;;  %v1744_v3 = vmul.f32 1.442695, %v1729_v63 }
 0x21a   :  { %2321 = vpow2.f32 %v1742_v61 }
 0x21b   :  { %2323 = vpow2.f32 %v1740_v2 }
 0x21c   :  { %2325 = vpow2.f32 %v1744_v3 }
 0x222   :  { %v1596_v12 = vpop.f32.mrf.mxu0  ;;  %v1637_v13 = vpop.f32.mrf.mxu1 }
 0x223   :  { %v1597_v14 = vadd.f32 %v1596_v12, %v1195_v8  ;;  %v1638_v15 = vadd.f32 %v1637_v13, %v1203_v9 }
 0x224   :  { %v1598_v16 = vpop.f32.mrf.mxu0  ;;  %v1639_v17 = vpop.f32.mrf.mxu1 }
 0x225   :  { %v1730_v18 = vsub.f32 0.0, %v1597_v14  ;;  %v1599_v19 = vadd.f32 %v1598_v16, %v1199_v10  ;;  %v1640_v20 = vadd.f32 %v1639_v17, %v1207_v11  ;;  %v1732_v22 = vsub.f32 0.0, %v1638_v15 }
 0x226   :  { %v2320_v21 = vpop.eup %2319  ;;  %v1600_v24 = vpop.f32.mrf.mxu0 }
 0x227   :  { %v1641_v25 = vpop.f32.mrf.mxu1  ;;  %v2322_v26 = vpop.eup %2321  ;;  %v1762_v27 = vadd.f32 1.0, %v2320_v21  ;;  %v1731_v28 = vsub.f32 0.0, %v1599_v19  ;;  %v1733_v32 = vsub.f32 0.0, %v1640_v20  ;;  %v1746_v37 = vmul.f32 1.442695, %v1730_v18 }
 0x228   :  { %v2324_v29 = vpop.eup %2323  ;;  %v1764_v31 = vadd.f32 1.0, %v2322_v26  ;;  %v1601_v33 = vpop.f32.mrf.mxu0  ;;  %v1750_v41 = vmul.f32 1.442695, %v1732_v22 }
 0x229   :  { %v1642_v34 = vpop.f32.mrf.mxu1  ;;  %v2326_v36 = vpop.eup %2325  ;;  %2327 = vrcp.f32 %v1762_v27  ;;  %v1763_v23 = vadd.f32 1.0, %v2324_v29  ;;  %v1748_v44 = vmul.f32 1.442695, %v1731_v28  ;;  %v1752_v45 = vmul.f32 1.442695, %v1733_v32 }
 0x22a   :  { %2329 = vrcp.f32 %v1764_v31  ;;  %v1765_v38 = vadd.f32 1.0, %v2326_v36 }
 0x22b   :  { %2331 = vrcp.f32 %v1763_v23 }
 0x22c   :  { %2333 = vrcp.f32 %v1765_v38 }
 0x22d   :  { %2335 = vpow2.f32 %v1746_v37 }
 0x22e   :  { %2337 = vpow2.f32 %v1750_v41 }
 0x22f   :  { %2339 = vpow2.f32 %v1748_v44 }
 0x230   :  { %2341 = vpow2.f32 %v1752_v45 }
 0x232   :  { %v1678_v51 = vpop.f32.mrf.mxu0  ;;  %v1719_v52 = vpop.f32.mrf.mxu1 }
 0x233   :  { %v1679_v53 = vadd.f32 %v1678_v51, %v1211_v47  ;;  %v1720_v54 = vadd.f32 %v1719_v52, %v1219_v48 }
 0x234   :  { %v1680_v55 = vpop.f32.mrf.mxu0  ;;  %v1721_v56 = vpop.f32.mrf.mxu1 }
 0x235   :  { %v1734_v57 = vsub.f32 0.0, %v1679_v53  ;;  %v1736_v58 = vsub.f32 0.0, %v1720_v54  ;;  %v1681_v59 = vadd.f32 %v1680_v55, %v1215_v49  ;;  %v1722_v39 = vadd.f32 %v1721_v56, %v1223_v50 }
 0x236   :  { %v2328_v60 = vpop.eup %2327  ;;  %v1682_v61 = vpop.f32.mrf.mxu0 }
 0x237   :  { %v1723_v40 = vpop.f32.mrf.mxu1  ;;  %v2330_v62 = vpop.eup %2329  ;;  %v1754_v63 = vmul.f32 1.442695, %v1734_v57  ;;  %v1758_v0 = vmul.f32 1.442695, %v1736_v58  ;;  %v1735_v42 = vsub.f32 0.0, %v1681_v59  ;;  %v1737_v1 = vsub.f32 0.0, %v1722_v39 }
 0x238   :  { %v2332_v30 = vpop.eup %2331  ;;  %v1683_v43 = vpop.f32.mrf.mxu0 }
 0x239   :  { %v1724_v2 = vpop.f32.mrf.mxu1  ;;  %v2334_v3 = vpop.eup %2333  ;;  %v1798_v4 = vcombine.low %v2328_v60, %v2332_v30  ;;  %2343 = vpow2.f32 %v1754_v63  ;;  %v1756_v5 = vmul.f32 1.442695, %v1735_v42  ;;  %v1760_v6 = vmul.f32 1.442695, %v1737_v1 }
 0x23a   :  { %v2336_v7 = vpop.eup %2335  ;;  %v1799_v8 = vcombine.low %v2330_v62, %v2334_v3  ;;  %2345 = vpow2.f32 %v1758_v0 }
 0x23b   :  { %v2338_v9 = vpop.eup %2337  ;;  %v1806_v10 = vrot.slane %v1798_v4, %v2492_v35  ;;  %v1766_v11 = vadd.f32 1.0, %v2336_v7  ;;  %2347 = vpow2.f32 %v1756_v5 }
 0x23c   :  { %v2340_v12 = vpop.eup %2339  ;;  %v1813_v13 = vrot.slane %v1799_v8, %v2492_v35  ;;  %v1768_v14 = vadd.f32 1.0, %v2338_v9  ;;  %2349 = vpow2.f32 %v1760_v6 }
 0x23d   :  { %v2342_v15 = vpop.eup %2341  ;;  %2351 = vrcp.f32 %v1766_v11  ;;  %v1767_v16 = vadd.f32 1.0, %v2340_v12 }
 0x23e   :  { %v1814_v17 = vcombine.low %v1806_v10, %v1813_v13  ;;  %2353 = vrcp.f32 %v1768_v14  ;;  %v1769_v18 = vadd.f32 1.0, %v2342_v15 }
 0x23f   :  { %2355 = vrcp.f32 %v1767_v16 }
 0x240   :  { %1852 = vst [vmem:[%s2924_s5] sm:$0xff] %v1814_v17  ;;  %2357 = vrcp.f32 %v1769_v18 }
 0x246   :  { %v2344_v19 = vpop.eup %2343 }
 0x247   :  { %v2346_v20 = vpop.eup %2345  ;;  %v1770_v21 = vadd.f32 1.0, %v2344_v19 }
 0x248   :  { %v2348_v22 = vpop.eup %2347  ;;  %v1772_v24 = vadd.f32 1.0, %v2346_v20 }
 0x249   :  { %v2350_v25 = vpop.eup %2349  ;;  %2359 = vrcp.f32 %v1770_v21  ;;  %v1771_v26 = vadd.f32 1.0, %v2348_v22 }
 0x24a   :  { %v2352_v27 = vpop.eup %2351  ;;  %2361 = vrcp.f32 %v1772_v24  ;;  %v1773_v28 = vadd.f32 1.0, %v2350_v25 }
 0x24b   :  { %v2354_v29 = vpop.eup %2353  ;;  %2363 = vrcp.f32 %v1771_v26 }
 0x24c   :  { %v2356_v31 = vpop.eup %2355  ;;  %2365 = vrcp.f32 %v1773_v28 }
 0x24d   :  { %v2358_v32 = vpop.eup %2357  ;;  %v1815_v33 = vcombine.low %v2352_v27, %v2356_v31 }
 0x24e   :  { %v1816_v34 = vcombine.low %v2354_v29, %v2358_v32 }
 0x24f   :  { %v1823_v36 = vrot.slane %v1815_v33, %v2492_v35 }
 0x250   :  { %v1830_v23 = vrot.slane %v1816_v34, %v2492_v35 }
 0x252   :  { %v1831_v37 = vcombine.low %v1823_v36, %v1830_v23 }
 0x254   :  { %1853 = vst [vmem:[%s2924_s5 + $0x8] sm:$0xff] %v1831_v37 }
 0x256   :  { %v2360_v38 = vpop.eup %2359 }
 0x257   :  { %v2362_v41 = vpop.eup %2361 }
 0x258   :  { %v2364_v44 = vpop.eup %2363 }
 0x259   :  { %v2366_v45 = vpop.eup %2365  ;;  %v1832_v46 = vcombine.low %v2360_v38, %v2364_v44 }
 0x25a   :  { %v1833_v47 = vcombine.low %v2362_v41, %v2366_v45 }
 0x25b   :  { %v1840_v48 = vrot.slane %v1832_v46, %v2492_v35 }
 0x25c   :  { %v1847_v49 = vrot.slane %v1833_v47, %v2492_v35 }
 0x25e   :  { %v1848_v50 = vcombine.low %v1840_v48, %v1847_v49 }
 0x260   :  { %1854 = vst [vmem:[%s2924_s5 + $0x10] sm:$0xff] %v1848_v50 }

// kernel: fph_forward.19
= control target key start
LH: loop header
LB: loop body
LE: loop exit
PB: predicated region body
PF: predicated region fallthrough
CT: control target
= control target key end

     0   :  { %s2499_s15 = smov 0   ;;  %s2501_s16 = smov 0   ;;  %s2754_s0 = inlined_call_operand.vmem [shape: bf16[2,16,1536], index: 0, kind: input, shape index: {}]   ;;  %s2755_s1 = inlined_call_operand.vmem [shape: bf16[2,1536,256], index: 1, kind: input, shape index: {}]   ;;  %s2756_s2 = inlined_call_operand.vmem [shape: f32[1,256], index: 2, kind: input, shape index: {}]   ;;  %s2757_s3 = inlined_call_operand.vmem [shape: f32[1,256], index: 3, kind: input, shape index: {}]   ;;  %s2758_s4 = inlined_call_operand.vmem [shape: bf16[2,16,256], index: 4, kind: output, shape index: {}]  }
   0x1   :  { %s2503_s17 = smov 0  }
   0x2 LB: > { %s26_s18 = sadd.s32 1, %s2468_s16  ;;  %p1902_p0 = scmp.ge.s32.totalorder %s2472_s17, 1  ;;  %s2472_s17 = sphi %s2503_s17, %s14_s17   ;;  %s2468_s16 = sphi %s2501_s16, %s2760_s16   ;;  %s2464_s15 = sphi %s2499_s15, %s2759_s15  }
   0x3   : > { %p28_p1 = scmp.ge.s32.totalorder %s26_s18, 2  ;;  %p194_p2 = scmp.lt.s32.totalorder %s2472_s17, 3 }
   0x5   : > { %s2762_s18 = smov (%p28_p1, %s26_s18), 0  ;;  %p195_p3 = pnand %p1902_p0, %p194_p2 }
   0x6   : > { %p236_p4 = scmp.lt.s32.totalorder (!%p195_p3), %s2464_s15, 1 }
   0x7   : > { %198 = sbr.rel (%p195_p3) target bundleno = 419 (0x1a3), region = 36 }
   0xc   : > { %s2764_s15 = smov (!%p236_p4, %s2464_s15), 1 }
   0xd   : > { %s2119_s19 = smul.u32 1536, %s2764_s15  ;;  %s2115_s5 = sshll.u32 %s2764_s15, 4 }
   0xe   : > { %s2118_s23 = smul.u32 96, %s2764_s15  ;;  %s260_s8 = scalar_lea.vmem %s2758_s4, %s2115_s5 }
   0xf   : > { %s2523_s22 = scalar_lea.vmem %s2755_s1, %s2119_s19 }
  0x10   : > { %v2144_v0 = vld [vmem:[%s2523_s22 + $0x74] ss:$8 sps:$4 sm:$0xff]   ;;  %v2148_v2 = vld [vmem:[%s2523_s22 + $0x70] ss:$8 sps:$4 sm:$0xff]   ;;  %v2150_v4 = vld [vmem:[%s2523_s22 + $0x64] ss:$8 sps:$4 sm:$0xff]   ;;  %s2574_s26 = scalar_lea.vmem %s2754_s0, %s2118_s23 }
  0x11   : > { %v2146_v1 = vld [vmem:[%s2523_s22 + $0x174] ss:$8 sps:$4 sm:$0xff]   ;;  %1486 = vmatprep.subr.bf16.mxu0 %v2144_v0  ;;  %v2149_v3 = vld [vmem:[%s2523_s22 + $0x170] ss:$8 sps:$4 sm:$0xff]   ;;  %v2152_v5 = vld [vmem:[%s2523_s22 + $0x164] ss:$8 sps:$4 sm:$0xff]  }
  0x12   : > { %1529 = vmatprep.subr.bf16.mxu1 %v2146_v1  ;;  %1487 = vmatpush1.bf16.msra.mxu0 %v2148_v2  ;;  %v2154_v6 = vld [vmem:[%s2523_s22 + $0x60] ss:$8 sps:$4 sm:$0xff]   ;;  %v2156_v8 = vld [vmem:[%s2523_s22 + $0x54] ss:$8 sps:$4 sm:$0xff]   ;;  %v2160_v10 = vld [vmem:[%s2523_s22 + $0x50] ss:$8 sps:$4 sm:$0xff]  }
  0x13   : > { %1530 = vmatpush1.bf16.msra.mxu1 %v2149_v3  ;;  %1488 = vmatprep.subr.bf16.mxu0 %v2150_v4  ;;  %v2155_v7 = vld [vmem:[%s2523_s22 + $0x160] ss:$8 sps:$4 sm:$0xff]   ;;  %v2158_v9 = vld [vmem:[%s2523_s22 + $0x154] ss:$8 sps:$4 sm:$0xff]   ;;  %v2161_v11 = vld [vmem:[%s2523_s22 + $0x150] ss:$8 sps:$4 sm:$0xff]  }
  0x14   : > { %1531 = vmatprep.subr.bf16.mxu1 %v2152_v5  ;;  %v2162_v12 = vld [vmem:[%s2523_s22 + $0x44] ss:$8 sps:$4 sm:$0xff]   ;;  %v2166_v14 = vld [vmem:[%s2523_s22 + $0x40] ss:$8 sps:$4 sm:$0xff]   ;;  %v2168_v16 = vld [vmem:[%s2523_s22 + $0x34] ss:$8 sps:$4 sm:$0xff]  }
  0x15   : > { %v2164_v13 = vld [vmem:[%s2523_s22 + $0x144] ss:$8 sps:$4 sm:$0xff]   ;;  %v2167_v15 = vld [vmem:[%s2523_s22 + $0x140] ss:$8 sps:$4 sm:$0xff]   ;;  %v2170_v17 = vld [vmem:[%s2523_s22 + $0x134] ss:$8 sps:$4 sm:$0xff]  }
  0x16   : > { %1489 = vmatpush1.bf16.msra.mxu0 %v2154_v6  ;;  %v2172_v18 = vld [vmem:[%s2523_s22 + $0x30] ss:$8 sps:$4 sm:$0xff]   ;;  %v2174_v20 = vld [vmem:[%s2523_s22 + $0x24] ss:$8 sps:$4 sm:$0xff]   ;;  %v2178_v22 = vld [vmem:[%s2523_s22 + $0x20] ss:$8 sps:$4 sm:$0xff]  }
  0x17   : > { %1532 = vmatpush1.bf16.msra.mxu1 %v2155_v7  ;;  %1490 = vmatprep.subr.bf16.mxu0 %v2156_v8  ;;  %v2173_v19 = vld [vmem:[%s2523_s22 + $0x130] ss:$8 sps:$4 sm:$0xff]   ;;  %v2176_v21 = vld [vmem:[%s2523_s22 + $0x124] ss:$8 sps:$4 sm:$0xff]   ;;  %v2179_v23 = vld [vmem:[%s2523_s22 + $0x120] ss:$8 sps:$4 sm:$0xff]  }
  0x18   : > { %1533 = vmatprep.subr.bf16.mxu1 %v2158_v9  ;;  %v2180_v24 = vld [vmem:[%s2523_s22 + $0x14] ss:$8 sps:$4 sm:$0xff]   ;;  %v2184_v26 = vld [vmem:[%s2523_s22 + $0x10] ss:$8 sps:$4 sm:$0xff]   ;;  %v2186_v28 = vld [vmem:[%s2523_s22 + $0x4] ss:$8 sps:$4 sm:$0xff]  }
  0x19   : > { %v2182_v25 = vld [vmem:[%s2523_s22 + $0x114] ss:$8 sps:$4 sm:$0xff]   ;;  %v2185_v27 = vld [vmem:[%s2523_s22 + $0x110] ss:$8 sps:$4 sm:$0xff]   ;;  %v2188_v29 = vld [vmem:[%s2523_s22 + $0x104] ss:$8 sps:$4 sm:$0xff]  }
  0x1a   : > { %1491 = vmatpush1.bf16.msra.mxu0 %v2160_v10  ;;  %v2190_v30 = vld [vmem:[%s2523_s22] ss:$8 sps:$4 sm:$0xff]   ;;  %v2192_v32 = vld [vmem:[%s2523_s22 + $0xf4] ss:$8 sps:$4 sm:$0xff]   ;;  %v2196_v34 = vld [vmem:[%s2523_s22 + $0xf0] ss:$8 sps:$4 sm:$0xff]  }
  0x1b   : > { %1534 = vmatpush1.bf16.msra.mxu1 %v2161_v11  ;;  %1492 = vmatprep.subr.bf16.mxu0 %v2162_v12  ;;  %v2191_v31 = vld [vmem:[%s2523_s22 + $0x100] ss:$8 sps:$4 sm:$0xff]   ;;  %v2194_v33 = vld [vmem:[%s2523_s22 + $0x1f4] ss:$8 sps:$4 sm:$0xff]   ;;  %v2197_v35 = vld [vmem:[%s2523_s22 + $0x1f0] ss:$8 sps:$4 sm:$0xff]  }
  0x1c   : > { %1535 = vmatprep.subr.bf16.mxu1 %v2164_v13  ;;  %v2198_v36 = vld [vmem:[%s2523_s22 + $0xe4] ss:$8 sps:$4 sm:$0xff]   ;;  %v2202_v38 = vld [vmem:[%s2523_s22 + $0xe0] ss:$8 sps:$4 sm:$0xff]   ;;  %v2204_v40 = vld [vmem:[%s2523_s22 + $0xd4] ss:$8 sps:$4 sm:$0xff]  }
  0x1d   : > { %v2200_v37 = vld [vmem:[%s2523_s22 + $0x1e4] ss:$8 sps:$4 sm:$0xff]   ;;  %v2203_v39 = vld [vmem:[%s2523_s22 + $0x1e0] ss:$8 sps:$4 sm:$0xff]   ;;  %v2206_v41 = vld [vmem:[%s2523_s22 + $0x1d4] ss:$8 sps:$4 sm:$0xff]  }
  0x1e   : > { %1493 = vmatpush1.bf16.msra.mxu0 %v2166_v14  ;;  %v2208_v42 = vld [vmem:[%s2523_s22 + $0xd0] ss:$8 sps:$4 sm:$0xff]   ;;  %v2210_v44 = vld [vmem:[%s2523_s22 + $0xc4] ss:$8 sps:$4 sm:$0xff]   ;;  %v2214_v46 = vld [vmem:[%s2523_s22 + $0xc0] ss:$8 sps:$4 sm:$0xff]  }
  0x1f   : > { %1536 = vmatpush1.bf16.msra.mxu1 %v2167_v15  ;;  %1494 = vmatprep.subr.bf16.mxu0 %v2168_v16  ;;  %v2209_v43 = vld [vmem:[%s2523_s22 + $0x1d0] ss:$8 sps:$4 sm:$0xff]   ;;  %v2212_v45 = vld [vmem:[%s2523_s22 + $0x1c4] ss:$8 sps:$4 sm:$0xff]   ;;  %v2215_v47 = vld [vmem:[%s2523_s22 + $0x1c0] ss:$8 sps:$4 sm:$0xff]  }
  0x20   : > { %1537 = vmatprep.subr.bf16.mxu1 %v2170_v17  ;;  %v2216_v48 = vld [vmem:[%s2523_s22 + $0xb4] ss:$8 sps:$4 sm:$0xff]   ;;  %v2220_v52 = vld [vmem:[%s2523_s22 + $0xb0] ss:$8 sps:$4 sm:$0xff]   ;;  %v2222_v54 = vld [vmem:[%s2523_s22 + $0xa4] ss:$8 sps:$4 sm:$0xff]  }
  0x21   : > { %v2242_v49 = vld [vmem:[%s2574_s26 + $0x4] ss:$48 sps:$4 sm:$0xff]   ;;  %v2245_v51 = vld [vmem:[%s2574_s26 + $0xc] ss:$48 sps:$4 sm:$0xff]   ;;  %v2221_v53 = vld [vmem:[%s2523_s22 + $0x1b0] ss:$8 sps:$4 sm:$0xff]  }
  0x22   : > { %1495 = vmatpush1.bf16.msra.mxu0 %v2172_v18  ;;  %v2218_v50 = vld [vmem:[%s2523_s22 + $0x1b4] ss:$8 sps:$4 sm:$0xff]   ;;  %1518 = vmatprep.mubr.bf16.mxu0 %v2242_v49  ;;  %v2224_v55 = vld [vmem:[%s2523_s22 + $0x1a4] ss:$8 sps:$4 sm:$0xff]   ;;  %v2226_v56 = vld [vmem:[%s2523_s22 + $0xa0] ss:$8 sps:$4 sm:$0xff]  }
  0x23   : > { %1538 = vmatpush1.bf16.msra.mxu1 %v2173_v19  ;;  %1496 = vmatprep.subr.bf16.mxu0 %v2174_v20  ;;  %v2227_v57 = vld [vmem:[%s2523_s22 + $0x1a0] ss:$8 sps:$4 sm:$0xff]   ;;  %v2228_v58 = vld [vmem:[%s2523_s22 + $0x94] ss:$8 sps:$4 sm:$0xff]   ;;  %v2232_v60 = vld [vmem:[%s2523_s22 + $0x90] ss:$8 sps:$4 sm:$0xff]  }
  0x24   : > { %1539 = vmatprep.subr.bf16.mxu1 %v2176_v21  ;;  %1561 = vmatprep.mubr.bf16.mxu1 %v2245_v51  ;;  %v2230_v59 = vld [vmem:[%s2523_s22 + $0x194] ss:$8 sps:$4 sm:$0xff]   ;;  %v2233_v61 = vld [vmem:[%s2523_s22 + $0x190] ss:$8 sps:$4 sm:$0xff]   ;;  %v2234_v62 = vld [vmem:[%s2523_s22 + $0x84] ss:$8 sps:$4 sm:$0xff]  }
  0x25   : > { %v2236_v63 = vld [vmem:[%s2523_s22 + $0x184] ss:$8 sps:$4 sm:$0xff]   ;;  %v2238_v0 = vld [vmem:[%s2523_s22 + $0x80] ss:$8 sps:$4 sm:$0xff]   ;;  %v2248_v2 = vld [vmem:[%s2523_s22 + $0x274] ss:$8 sps:$4 sm:$0xff]  }
  0x26   : > { %1497 = vmatpush1.bf16.msra.mxu0 %v2178_v22  ;;  %v2239_v1 = vld [vmem:[%s2523_s22 + $0x180] ss:$8 sps:$4 sm:$0xff]   ;;  %v2251_v3 = vld [vmem:[%s2523_s22 + $0x374] ss:$8 sps:$4 sm:$0xff]   ;;  %v2246_v6 = vld [vmem:[%s2523_s22 + $0x270] ss:$8 sps:$4 sm:$0xff]  }
  0x27   : > { %1540 = vmatpush1.bf16.msra.mxu1 %v2179_v23  ;;  %1498 = vmatprep.subr.bf16.mxu0 %v2180_v24  ;;  %v2240_v4 = vld [vmem:[%s2574_s26] ss:$48 sps:$4 sm:$0xff]   ;;  %v2243_v5 = vld [vmem:[%s2574_s26 + $0x8] ss:$48 sps:$4 sm:$0xff]   ;;  %v2254_v8 = vld [vmem:[%s2523_s22 + $0x264] ss:$8 sps:$4 sm:$0xff]  }
  0x28   : > { %1541 = vmatprep.subr.bf16.mxu1 %v2182_v25  ;;  %v2249_v7 = vld [vmem:[%s2523_s22 + $0x370] ss:$8 sps:$4 sm:$0xff]   ;;  %v2257_v9 = vld [vmem:[%s2523_s22 + $0x364] ss:$8 sps:$4 sm:$0xff]   ;;  %v2252_v10 = vld [vmem:[%s2523_s22 + $0x260] ss:$8 sps:$4 sm:$0xff]  }
  0x29   : > { %v2255_v11 = vld [vmem:[%s2523_s22 + $0x360] ss:$8 sps:$4 sm:$0xff]   ;;  %v2260_v12 = vld [vmem:[%s2523_s22 + $0x254] ss:$8 sps:$4 sm:$0xff]   ;;  %v2258_v14 = vld [vmem:[%s2523_s22 + $0x250] ss:$8 sps:$4 sm:$0xff]  }
  0x2a   : > { %1499 = vmatpush1.bf16.msra.mxu0 %v2184_v26  ;;  %v2263_v13 = vld [vmem:[%s2523_s22 + $0x354] ss:$8 sps:$4 sm:$0xff]   ;;  %v2261_v15 = vld [vmem:[%s2523_s22 + $0x350] ss:$8 sps:$4 sm:$0xff]   ;;  %v2266_v16 = vld [vmem:[%s2523_s22 + $0x244] ss:$8 sps:$4 sm:$0xff]  }
  0x2b   : > { %1542 = vmatpush1.bf16.msra.mxu1 %v2185_v27  ;;  %1500 = vmatprep.subr.bf16.mxu0 %v2186_v28  ;;  %v2269_v17 = vld [vmem:[%s2523_s22 + $0x344] ss:$8 sps:$4 sm:$0xff]   ;;  %v2264_v18 = vld [vmem:[%s2523_s22 + $0x240] ss:$8 sps:$4 sm:$0xff]   ;;  %v2272_v20 = vld [vmem:[%s2523_s22 + $0x234] ss:$8 sps:$4 sm:$0xff]  }
  0x2c   : > { %1543 = vmatprep.subr.bf16.mxu1 %v2188_v29  ;;  %v2267_v19 = vld [vmem:[%s2523_s22 + $0x340] ss:$8 sps:$4 sm:$0xff]   ;;  %v2275_v21 = vld [vmem:[%s2523_s22 + $0x334] ss:$8 sps:$4 sm:$0xff]   ;;  %v2270_v22 = vld [vmem:[%s2523_s22 + $0x230] ss:$8 sps:$4 sm:$0xff]  }
  0x2d   : > { %v2273_v23 = vld [vmem:[%s2523_s22 + $0x330] ss:$8 sps:$4 sm:$0xff]   ;;  %v2278_v24 = vld [vmem:[%s2523_s22 + $0x224] ss:$8 sps:$4 sm:$0xff]   ;;  %v2276_v26 = vld [vmem:[%s2523_s22 + $0x220] ss:$8 sps:$4 sm:$0xff]  }
  0x2e   : > { %1501 = vmatpush1.bf16.msra.mxu0 %v2190_v30  ;;  %v2281_v25 = vld [vmem:[%s2523_s22 + $0x324] ss:$8 sps:$4 sm:$0xff]   ;;  %v2279_v27 = vld [vmem:[%s2523_s22 + $0x320] ss:$8 sps:$4 sm:$0xff]   ;;  %v2284_v28 = vld [vmem:[%s2523_s22 + $0x214] ss:$8 sps:$4 sm:$0xff]  }
  0x2f   : > { %1544 = vmatpush1.bf16.msra.mxu1 %v2191_v31  ;;  %1502 = vmatprep.subr.bf16.mxu0 %v2192_v32  ;;  %v2287_v29 = vld [vmem:[%s2523_s22 + $0x314] ss:$8 sps:$4 sm:$0xff]   ;;  %v2282_v30 = vld [vmem:[%s2523_s22 + $0x210] ss:$8 sps:$4 sm:$0xff]   ;;  %v2290_v32 = vld [vmem:[%s2523_s22 + $0x204] ss:$8 sps:$4 sm:$0xff]  }
  0x30   : > { %1545 = vmatprep.subr.bf16.mxu1 %v2194_v33  ;;  %v2285_v31 = vld [vmem:[%s2523_s22 + $0x310] ss:$8 sps:$4 sm:$0xff]   ;;  %v2293_v33 = vld [vmem:[%s2523_s22 + $0x304] ss:$8 sps:$4 sm:$0xff]  }
  0x31   : > { %v2309_v49 = vld [vmem:[%s2523_s22 + $0x3d0] ss:$8 sps:$4 sm:$0xff]   ;;  %v2317_v51 = vld [vmem:[%s2523_s22 + $0x3c4] ss:$8 sps:$4 sm:$0xff]  }
  0x32   : > { %1503 = vmatpush2.bf16.msra.mxu0 %v2196_v34  ;;  %v2344_v34 = vld [vmem:[%s2574_s26 + $0x14] ss:$48 sps:$4 sm:$0xff]  }
  0x33   : > { %1546 = vmatpush2.bf16.msra.mxu1 %v2197_v35  ;;  %1504 = vmatprep.subr.bf16.mxu0 %v2198_v36  ;;  %v2347_v35 = vld [vmem:[%s2574_s26 + $0x1c] ss:$48 sps:$4 sm:$0xff]   ;;  %v2288_v36 = vld [vmem:[%s2523_s22 + $0x200] ss:$8 sps:$4 sm:$0xff]  }
  0x34   : > { %1547 = vmatprep.subr.bf16.mxu1 %v2200_v37  ;;  %v2291_v37 = vld [vmem:[%s2523_s22 + $0x300] ss:$8 sps:$4 sm:$0xff]  }
  0x36   : > { %1505 = vmatpush2.bf16.msra.mxu0 %v2202_v38  ;;  %v2296_v38 = vld [vmem:[%s2523_s22 + $0x2f4] ss:$8 sps:$4 sm:$0xff]  }
  0x37   : > { %1548 = vmatpush2.bf16.msra.mxu1 %v2203_v39  ;;  %1506 = vmatprep.subr.bf16.mxu0 %v2204_v40  ;;  %v2299_v39 = vld [vmem:[%s2523_s22 + $0x3f4] ss:$8 sps:$4 sm:$0xff]   ;;  %v2294_v40 = vld [vmem:[%s2523_s22 + $0x2f0] ss:$8 sps:$4 sm:$0xff]  }
  0x38   : > { %1549 = vmatprep.subr.bf16.mxu1 %v2206_v41  ;;  %v2297_v41 = vld [vmem:[%s2523_s22 + $0x3f0] ss:$8 sps:$4 sm:$0xff]  }
  0x3a   : > { %1507 = vmatpush2.bf16.msra.mxu0 %v2208_v42  ;;  %v2302_v42 = vld [vmem:[%s2523_s22 + $0x2e4] ss:$8 sps:$4 sm:$0xff]  }
  0x3b   : > { %1550 = vmatpush2.bf16.msra.mxu1 %v2209_v43  ;;  %1508 = vmatprep.subr.bf16.mxu0 %v2210_v44  ;;  %v2305_v43 = vld [vmem:[%s2523_s22 + $0x3e4] ss:$8 sps:$4 sm:$0xff]   ;;  %v2300_v44 = vld [vmem:[%s2523_s22 + $0x2e0] ss:$8 sps:$4 sm:$0xff]  }
  0x3c   : > { %1551 = vmatprep.subr.bf16.mxu1 %v2212_v45  ;;  %v2303_v45 = vld [vmem:[%s2523_s22 + $0x3e0] ss:$8 sps:$4 sm:$0xff]  }
  0x3e   : > { %1509 = vmatpush2.bf16.msra.mxu0 %v2214_v46  ;;  %v2308_v46 = vld [vmem:[%s2523_s22 + $0x2d4] ss:$8 sps:$4 sm:$0xff]  }
  0x3f   : > { %1552 = vmatpush2.bf16.msra.mxu1 %v2215_v47  ;;  %1510 = vmatprep.subr.bf16.mxu0 %v2216_v48  ;;  %v2311_v47 = vld [vmem:[%s2523_s22 + $0x3d4] ss:$8 sps:$4 sm:$0xff]   ;;  %v2306_v48 = vld [vmem:[%s2523_s22 + $0x2d0] ss:$8 sps:$4 sm:$0xff]  }
  0x40   : > { %1553 = vmatprep.subr.bf16.mxu1 %v2218_v50  ;;  %v2314_v50 = vld [vmem:[%s2523_s22 + $0x2c4] ss:$8 sps:$4 sm:$0xff]  }
  0x42   : > { %1511 = vmatpush2.bf16.msra.mxu0 %v2220_v52  ;;  %v2312_v52 = vld [vmem:[%s2523_s22 + $0x2c0] ss:$8 sps:$4 sm:$0xff]  }
  0x43   : > { %1554 = vmatpush2.bf16.msra.mxu1 %v2221_v53  ;;  %1512 = vmatprep.subr.bf16.mxu0 %v2222_v54  ;;  %v2315_v53 = vld [vmem:[%s2523_s22 + $0x3c0] ss:$8 sps:$4 sm:$0xff]   ;;  %v2320_v54 = vld [vmem:[%s2523_s22 + $0x2b4] ss:$8 sps:$4 sm:$0xff]  }
  0x44   : > { %1555 = vmatprep.subr.bf16.mxu1 %v2224_v55  ;;  %v2323_v55 = vld [vmem:[%s2523_s22 + $0x3b4] ss:$8 sps:$4 sm:$0xff]  }
  0x46   : > { %1513 = vmatpush2.bf16.msra.mxu0 %v2226_v56  ;;  %v2318_v56 = vld [vmem:[%s2523_s22 + $0x2b0] ss:$8 sps:$4 sm:$0xff]  }
  0x47   : > { %1556 = vmatpush2.bf16.msra.mxu1 %v2227_v57  ;;  %1514 = vmatprep.subr.bf16.mxu0 %v2228_v58  ;;  %v2321_v57 = vld [vmem:[%s2523_s22 + $0x3b0] ss:$8 sps:$4 sm:$0xff]   ;;  %v2326_v58 = vld [vmem:[%s2523_s22 + $0x2a4] ss:$8 sps:$4 sm:$0xff]  }
  0x48   : > { %1557 = vmatprep.subr.bf16.mxu1 %v2230_v59  ;;  %v2329_v59 = vld [vmem:[%s2523_s22 + $0x3a4] ss:$8 sps:$4 sm:$0xff]  }
  0x4a   : > { %1515 = vmatpush2.bf16.msra.mxu0 %v2232_v60  ;;  %v2324_v60 = vld [vmem:[%s2523_s22 + $0x2a0] ss:$8 sps:$4 sm:$0xff]  }
  0x4b   : > { %1558 = vmatpush2.bf16.msra.mxu1 %v2233_v61  ;;  %1516 = vmatprep.subr.bf16.mxu0 %v2234_v62  ;;  %v2327_v61 = vld [vmem:[%s2523_s22 + $0x3a0] ss:$8 sps:$4 sm:$0xff]   ;;  %v2332_v62 = vld [vmem:[%s2523_s22 + $0x294] ss:$8 sps:$4 sm:$0xff]  }
  0x4c   : > { %1559 = vmatprep.subr.bf16.mxu1 %v2236_v63  ;;  %v2335_v63 = vld [vmem:[%s2523_s22 + $0x394] ss:$8 sps:$4 sm:$0xff]  }
  0x4e   : > { %1517 = vmatpush2.bf16.msra.mxu0 %v2238_v0  ;;  %v2330_v0 = vld [vmem:[%s2523_s22 + $0x290] ss:$8 sps:$4 sm:$0xff]  }
  0x4f   : > { %1560 = vmatpush2.bf16.msra.mxu1 %v2239_v1  ;;  %1572 = vmatprep.subr.bf16.mxu0 %v2248_v2  ;;  %v2333_v1 = vld [vmem:[%s2523_s22 + $0x390] ss:$8 sps:$4 sm:$0xff]   ;;  %v2338_v2 = vld [vmem:[%s2523_s22 + $0x284] ss:$8 sps:$4 sm:$0xff]  }
  0x50   : > { %1615 = vmatprep.subr.bf16.mxu1 %v2251_v3  ;;  %v2341_v3 = vld [vmem:[%s2523_s22 + $0x384] ss:$8 sps:$4 sm:$0xff]  }
  0x51   : > { %1519 = vmatmul.mubr.bf16.vlgmr.msra.gmra.mxu0 %v2240_v4  ;;  %v2336_v4 = vld [vmem:[%s2523_s22 + $0x280] ss:$8 sps:$4 sm:$0xff]  }
  0x52   : > { %1562 = vmatmul.mubr.bf16.vlgmr.msra.gmra.mxu1 %v2243_v5  ;;  %1573 = vmatpush1.bf16.msra.mxu0 %v2246_v6  ;;  %v2339_v5 = vld [vmem:[%s2523_s22 + $0x380] ss:$8 sps:$4 sm:$0xff]   ;;  %v2350_v6 = vld [vmem:[%s2523_s22 + $0x474] ss:$8 sps:$4 sm:$0xff]  }
  0x53   : > { %1616 = vmatpush1.bf16.msra.mxu1 %v2249_v7  ;;  %1574 = vmatprep.subr.bf16.mxu0 %v2254_v8  ;;  %v2353_v7 = vld [vmem:[%s2523_s22 + $0x574] ss:$8 sps:$4 sm:$0xff]   ;;  %v2342_v8 = vld [vmem:[%s2574_s26 + $0x10] ss:$48 sps:$4 sm:$0xff]  }
  0x54   : > { %1617 = vmatprep.subr.bf16.mxu1 %v2257_v9  ;;  %1604 = vmatprep.mubr.bf16.mxu0 %v2344_v34  ;;  %v2345_v9 = vld [vmem:[%s2574_s26 + $0x18] ss:$48 sps:$4 sm:$0xff]   ;;  %v2386_v34 = vld [vmem:[%s2523_s22 + $0x414] ss:$8 sps:$4 sm:$0xff]  }
  0x55   : > { %1647 = vmatprep.mubr.bf16.mxu1 %v2347_v35  ;;  %v2389_v35 = vld [vmem:[%s2523_s22 + $0x514] ss:$8 sps:$4 sm:$0xff]  }
  0x56   : > { %1575 = vmatpush1.bf16.msra.mxu0 %v2252_v10  ;;  %v2348_v10 = vld [vmem:[%s2523_s22 + $0x470] ss:$8 sps:$4 sm:$0xff]  }
  0x57   : > { %1618 = vmatpush1.bf16.msra.mxu1 %v2255_v11  ;;  %1576 = vmatprep.subr.bf16.mxu0 %v2260_v12  ;;  %v2351_v11 = vld [vmem:[%s2523_s22 + $0x570] ss:$8 sps:$4 sm:$0xff]   ;;  %v2356_v12 = vld [vmem:[%s2523_s22 + $0x464] ss:$8 sps:$4 sm:$0xff]  }
  0x58   : > { %1619 = vmatprep.subr.bf16.mxu1 %v2263_v13  ;;  %v2359_v13 = vld [vmem:[%s2523_s22 + $0x564] ss:$8 sps:$4 sm:$0xff]  }
  0x5a   : > { %1577 = vmatpush1.bf16.msra.mxu0 %v2258_v14  ;;  %v2354_v14 = vld [vmem:[%s2523_s22 + $0x460] ss:$8 sps:$4 sm:$0xff]  }
  0x5b   : > { %1620 = vmatpush1.bf16.msra.mxu1 %v2261_v15  ;;  %1578 = vmatprep.subr.bf16.mxu0 %v2266_v16  ;;  %v2357_v15 = vld [vmem:[%s2523_s22 + $0x560] ss:$8 sps:$4 sm:$0xff]   ;;  %v2362_v16 = vld [vmem:[%s2523_s22 + $0x454] ss:$8 sps:$4 sm:$0xff]  }
  0x5c   : > { %1621 = vmatprep.subr.bf16.mxu1 %v2269_v17  ;;  %v2365_v17 = vld [vmem:[%s2523_s22 + $0x554] ss:$8 sps:$4 sm:$0xff]  }
  0x5e   : > { %1579 = vmatpush1.bf16.msra.mxu0 %v2264_v18  ;;  %v2446_v18 = vld [vmem:[%s2574_s26 + $0x24] ss:$48 sps:$4 sm:$0xff]  }
  0x5f   : > { %1622 = vmatpush1.bf16.msra.mxu1 %v2267_v19  ;;  %1580 = vmatprep.subr.bf16.mxu0 %v2272_v20  ;;  %v2449_v19 = vld [vmem:[%s2574_s26 + $0x2c] ss:$48 sps:$4 sm:$0xff]   ;;  %v2360_v20 = vld [vmem:[%s2523_s22 + $0x450] ss:$8 sps:$4 sm:$0xff]  }
  0x60   : > { %1623 = vmatprep.subr.bf16.mxu1 %v2275_v21  ;;  %v2363_v21 = vld [vmem:[%s2523_s22 + $0x550] ss:$8 sps:$4 sm:$0xff]  }
  0x62   : > { %1581 = vmatpush1.bf16.msra.mxu0 %v2270_v22  ;;  %v2368_v22 = vld [vmem:[%s2523_s22 + $0x444] ss:$8 sps:$4 sm:$0xff]  }
  0x63   : > { %1624 = vmatpush1.bf16.msra.mxu1 %v2273_v23  ;;  %1582 = vmatprep.subr.bf16.mxu0 %v2278_v24  ;;  %v2371_v23 = vld [vmem:[%s2523_s22 + $0x544] ss:$8 sps:$4 sm:$0xff]   ;;  %v2366_v24 = vld [vmem:[%s2523_s22 + $0x440] ss:$8 sps:$4 sm:$0xff]  }
  0x64   : > { %1625 = vmatprep.subr.bf16.mxu1 %v2281_v25  ;;  %v2369_v25 = vld [vmem:[%s2523_s22 + $0x540] ss:$8 sps:$4 sm:$0xff]  }
  0x66   : > { %1583 = vmatpush1.bf16.msra.mxu0 %v2276_v26  ;;  %v2374_v26 = vld [vmem:[%s2523_s22 + $0x434] ss:$8 sps:$4 sm:$0xff]  }
  0x67   : > { %1626 = vmatpush1.bf16.msra.mxu1 %v2279_v27  ;;  %1584 = vmatprep.subr.bf16.mxu0 %v2284_v28  ;;  %v2377_v27 = vld [vmem:[%s2523_s22 + $0x534] ss:$8 sps:$4 sm:$0xff]   ;;  %v2372_v28 = vld [vmem:[%s2523_s22 + $0x430] ss:$8 sps:$4 sm:$0xff]  }
  0x68   : > { %1627 = vmatprep.subr.bf16.mxu1 %v2287_v29  ;;  %v2375_v29 = vld [vmem:[%s2523_s22 + $0x530] ss:$8 sps:$4 sm:$0xff]  }
  0x6a   : > { %1585 = vmatpush1.bf16.msra.mxu0 %v2282_v30  ;;  %v2380_v30 = vld [vmem:[%s2523_s22 + $0x424] ss:$8 sps:$4 sm:$0xff]  }
  0x6b   : > { %1628 = vmatpush1.bf16.msra.mxu1 %v2285_v31  ;;  %1586 = vmatprep.subr.bf16.mxu0 %v2290_v32  ;;  %v2383_v31 = vld [vmem:[%s2523_s22 + $0x524] ss:$8 sps:$4 sm:$0xff]   ;;  %v2378_v32 = vld [vmem:[%s2523_s22 + $0x420] ss:$8 sps:$4 sm:$0xff]  }
  0x6c   : > { %1629 = vmatprep.subr.bf16.mxu1 %v2293_v33  ;;  %v2381_v33 = vld [vmem:[%s2523_s22 + $0x520] ss:$8 sps:$4 sm:$0xff]  }
  0x6e   : > { %1587 = vmatpush1.bf16.msra.mxu0 %v2288_v36  ;;  %v2384_v36 = vld [vmem:[%s2523_s22 + $0x410] ss:$8 sps:$4 sm:$0xff]  }
  0x6f   : > { %1630 = vmatpush1.bf16.msra.mxu1 %v2291_v37  ;;  %1588 = vmatprep.subr.bf16.mxu0 %v2296_v38  ;;  %v2387_v37 = vld [vmem:[%s2523_s22 + $0x510] ss:$8 sps:$4 sm:$0xff]   ;;  %v2392_v38 = vld [vmem:[%s2523_s22 + $0x404] ss:$8 sps:$4 sm:$0xff]  }
  0x70   : > { %1631 = vmatprep.subr.bf16.mxu1 %v2299_v39  ;;  %v2395_v39 = vld [vmem:[%s2523_s22 + $0x504] ss:$8 sps:$4 sm:$0xff]  }
  0x72   : > { %1589 = vmatpush2.bf16.msra.mxu0 %v2294_v40  ;;  %v2390_v40 = vld [vmem:[%s2523_s22 + $0x400] ss:$8 sps:$4 sm:$0xff]  }
  0x73   : > { %1632 = vmatpush2.bf16.msra.mxu1 %v2297_v41  ;;  %1590 = vmatprep.subr.bf16.mxu0 %v2302_v42  ;;  %v2393_v41 = vld [vmem:[%s2523_s22 + $0x500] ss:$8 sps:$4 sm:$0xff]   ;;  %v2398_v42 = vld [vmem:[%s2523_s22 + $0x4f4] ss:$8 sps:$4 sm:$0xff]  }
  0x74   : > { %1633 = vmatprep.subr.bf16.mxu1 %v2305_v43  ;;  %v2401_v43 = vld [vmem:[%s2523_s22 + $0x5f4] ss:$8 sps:$4 sm:$0xff]  }
  0x76   : > { %1591 = vmatpush2.bf16.msra.mxu0 %v2300_v44  ;;  %v2396_v44 = vld [vmem:[%s2523_s22 + $0x4f0] ss:$8 sps:$4 sm:$0xff]  }
  0x77   : > { %1634 = vmatpush2.bf16.msra.mxu1 %v2303_v45  ;;  %1592 = vmatprep.subr.bf16.mxu0 %v2308_v46  ;;  %v2399_v45 = vld [vmem:[%s2523_s22 + $0x5f0] ss:$8 sps:$4 sm:$0xff]   ;;  %v2404_v46 = vld [vmem:[%s2523_s22 + $0x4e4] ss:$8 sps:$4 sm:$0xff]  }
  0x78   : > { %1635 = vmatprep.subr.bf16.mxu1 %v2311_v47  ;;  %v2407_v47 = vld [vmem:[%s2523_s22 + $0x5e4] ss:$8 sps:$4 sm:$0xff]  }
  0x7a   : > { %1593 = vmatpush2.bf16.msra.mxu0 %v2306_v48  ;;  %v2402_v48 = vld [vmem:[%s2523_s22 + $0x4e0] ss:$8 sps:$4 sm:$0xff]  }
  0x7b   : > { %1636 = vmatpush2.bf16.msra.mxu1 %v2309_v49  ;;  %1594 = vmatprep.subr.bf16.mxu0 %v2314_v50  ;;  %v2405_v49 = vld [vmem:[%s2523_s22 + $0x5e0] ss:$8 sps:$4 sm:$0xff]   ;;  %v2410_v50 = vld [vmem:[%s2523_s22 + $0x4d4] ss:$8 sps:$4 sm:$0xff]  }
  0x7c   : > { %1637 = vmatprep.subr.bf16.mxu1 %v2317_v51  ;;  %v2413_v51 = vld [vmem:[%s2523_s22 + $0x5d4] ss:$8 sps:$4 sm:$0xff]  }
  0x7e   : > { %1595 = vmatpush2.bf16.msra.mxu0 %v2312_v52  ;;  %v2408_v52 = vld [vmem:[%s2523_s22 + $0x4d0] ss:$8 sps:$4 sm:$0xff]  }
  0x7f   : > { %1638 = vmatpush2.bf16.msra.mxu1 %v2315_v53  ;;  %1596 = vmatprep.subr.bf16.mxu0 %v2320_v54  ;;  %v2411_v53 = vld [vmem:[%s2523_s22 + $0x5d0] ss:$8 sps:$4 sm:$0xff]   ;;  %v2416_v54 = vld [vmem:[%s2523_s22 + $0x4c4] ss:$8 sps:$4 sm:$0xff]  }
  0x80   : > { %1639 = vmatprep.subr.bf16.mxu1 %v2323_v55  ;;  %v2419_v55 = vld [vmem:[%s2523_s22 + $0x5c4] ss:$8 sps:$4 sm:$0xff]  }
  0x82   : > { %1597 = vmatpush2.bf16.msra.mxu0 %v2318_v56  ;;  %v2414_v56 = vld [vmem:[%s2523_s22 + $0x4c0] ss:$8 sps:$4 sm:$0xff]  }
  0x83   : > { %1640 = vmatpush2.bf16.msra.mxu1 %v2321_v57  ;;  %1598 = vmatprep.subr.bf16.mxu0 %v2326_v58  ;;  %v2417_v57 = vld [vmem:[%s2523_s22 + $0x5c0] ss:$8 sps:$4 sm:$0xff]   ;;  %v2422_v58 = vld [vmem:[%s2523_s22 + $0x4b4] ss:$8 sps:$4 sm:$0xff]  }
  0x84   : > { %1641 = vmatprep.subr.bf16.mxu1 %v2329_v59  ;;  %v2425_v59 = vld [vmem:[%s2523_s22 + $0x5b4] ss:$8 sps:$4 sm:$0xff]  }
  0x86   : > { %1599 = vmatpush2.bf16.msra.mxu0 %v2324_v60  ;;  %v2420_v60 = vld [vmem:[%s2523_s22 + $0x4b0] ss:$8 sps:$4 sm:$0xff]  }
  0x87   : > { %1642 = vmatpush2.bf16.msra.mxu1 %v2327_v61  ;;  %1600 = vmatprep.subr.bf16.mxu0 %v2332_v62  ;;  %v2423_v61 = vld [vmem:[%s2523_s22 + $0x5b0] ss:$8 sps:$4 sm:$0xff]   ;;  %v2428_v62 = vld [vmem:[%s2523_s22 + $0x4a4] ss:$8 sps:$4 sm:$0xff]  }
  0x88   : > { %1643 = vmatprep.subr.bf16.mxu1 %v2335_v63  ;;  %v2431_v63 = vld [vmem:[%s2523_s22 + $0x5a4] ss:$8 sps:$4 sm:$0xff]  }
  0x8a   : > { %1601 = vmatpush2.bf16.msra.mxu0 %v2330_v0  ;;  %v2426_v0 = vld [vmem:[%s2523_s22 + $0x4a0] ss:$8 sps:$4 sm:$0xff]  }
  0x8b   : > { %1644 = vmatpush2.bf16.msra.mxu1 %v2333_v1  ;;  %1602 = vmatprep.subr.bf16.mxu0 %v2338_v2  ;;  %v2429_v1 = vld [vmem:[%s2523_s22 + $0x5a0] ss:$8 sps:$4 sm:$0xff]   ;;  %v2434_v2 = vld [vmem:[%s2523_s22 + $0x494] ss:$8 sps:$4 sm:$0xff]  }
  0x8c   : > { %1645 = vmatprep.subr.bf16.mxu1 %v2341_v3  ;;  %v2437_v3 = vld [vmem:[%s2523_s22 + $0x594] ss:$8 sps:$4 sm:$0xff]  }
  0x8e   : > { %1603 = vmatpush2.bf16.msra.mxu0 %v2336_v4  ;;  %v2432_v4 = vld [vmem:[%s2523_s22 + $0x490] ss:$8 sps:$4 sm:$0xff]  }
  0x8f   : > { %1646 = vmatpush2.bf16.msra.mxu1 %v2339_v5  ;;  %1658 = vmatprep.subr.bf16.mxu0 %v2350_v6  ;;  %v2435_v5 = vld [vmem:[%s2523_s22 + $0x590] ss:$8 sps:$4 sm:$0xff]   ;;  %v2440_v6 = vld [vmem:[%s2523_s22 + $0x484] ss:$8 sps:$4 sm:$0xff]  }
  0x90   : > { %1701 = vmatprep.subr.bf16.mxu1 %v2353_v7  ;;  %v2443_v7 = vld [vmem:[%s2523_s22 + $0x584] ss:$8 sps:$4 sm:$0xff]  }
  0x91   : > { %1605 = vmatmul.mubr.bf16.vlgmr.msra.gmra.mxu0 %v2342_v8  ;;  %v2438_v8 = vld [vmem:[%s2523_s22 + $0x480] ss:$8 sps:$4 sm:$0xff]  }
  0x92   : > { %1648 = vmatmul.mubr.bf16.vlgmr.msra.gmra.mxu1 %v2345_v9  ;;  %1659 = vmatpush1.bf16.msra.mxu0 %v2348_v10  ;;  %v2441_v9 = vld [vmem:[%s2523_s22 + $0x580] ss:$8 sps:$4 sm:$0xff]  }
  0x93   : > { %1702 = vmatpush1.bf16.msra.mxu1 %v2351_v11  ;;  %1660 = vmatprep.subr.bf16.mxu0 %v2356_v12  ;;  %v2444_v10 = vld [vmem:[%s2574_s26 + $0x20] ss:$48 sps:$4 sm:$0xff]   ;;  %v2447_v11 = vld [vmem:[%s2574_s26 + $0x28] ss:$48 sps:$4 sm:$0xff]  }
  0x94   : > { %1703 = vmatprep.subr.bf16.mxu1 %v2359_v13  ;;  %1690 = vmatprep.mubr.bf16.mxu0 %v2446_v18 }
  0x95   : > { %1733 = vmatprep.mubr.bf16.mxu1 %v2449_v19 }
  0x96   : > { %1661 = vmatpush1.bf16.msra.mxu0 %v2354_v14 }
  0x97   : > { %1704 = vmatpush1.bf16.msra.mxu1 %v2357_v15  ;;  %1662 = vmatprep.subr.bf16.mxu0 %v2362_v16 }
  0x98   : > { %1705 = vmatprep.subr.bf16.mxu1 %v2365_v17 }
  0x9a   : > { %1663 = vmatpush1.bf16.msra.mxu0 %v2360_v20 }
  0x9b   : > { %1706 = vmatpush1.bf16.msra.mxu1 %v2363_v21  ;;  %1664 = vmatprep.subr.bf16.mxu0 %v2368_v22  ;;  %v1746_v22 = vlaneseq }
  0x9c   : > { %1707 = vmatprep.subr.bf16.mxu1 %v2371_v23 }
  0x9e   : > { %1665 = vmatpush1.bf16.msra.mxu0 %v2366_v24 }
  0x9f   : > { %1708 = vmatpush1.bf16.msra.mxu1 %v2369_v25  ;;  %1666 = vmatprep.subr.bf16.mxu0 %v2374_v26  ;;  %v1747_v26 = vshrl.u32 %v1746_v22, 7 }
  0xa0   : > { %1709 = vmatprep.subr.bf16.mxu1 %v2377_v27 }
  0xa2   : > { %1667 = vmatpush1.bf16.msra.mxu0 %v2372_v28 }
  0xa3   : > { %1710 = vmatpush1.bf16.msra.mxu1 %v2375_v29  ;;  %1668 = vmatprep.subr.bf16.mxu0 %v2380_v30 }
  0xa4   : > { %1711 = vmatprep.subr.bf16.mxu1 %v2383_v31 }
  0xa6   : > { %1669 = vmatpush1.bf16.msra.mxu0 %v2378_v32 }
  0xa7   : > { %1712 = vmatpush1.bf16.msra.mxu1 %v2381_v33  ;;  %1670 = vmatprep.subr.bf16.mxu0 %v2386_v34  ;;  %v1748_v33 = vsub.s32 0, %v1747_v26 }
  0xa8   : > { %1713 = vmatprep.subr.bf16.mxu1 %v2389_v35 }
  0xaa   : > { %1671 = vmatpush1.bf16.msra.mxu0 %v2384_v36  ;;  %v1744_v36 = vld [vmem:[%s2756_s2] sm:$0x3] }
  0xab   : > { %1714 = vmatpush1.bf16.msra.mxu1 %v2387_v37  ;;  %1672 = vmatprep.subr.bf16.mxu0 %v2392_v38 }
  0xac   : > { %1715 = vmatprep.subr.bf16.mxu1 %v2395_v39 }
  0xae   : > { %1673 = vmatpush1.bf16.msra.mxu0 %v2390_v40  ;;  %v1752_v40 = vsub.s32 1, %v1747_v26 }
  0xaf   : > { %1716 = vmatpush1.bf16.msra.mxu1 %v2393_v41  ;;  %1674 = vmatprep.subr.bf16.mxu0 %v2398_v42 }
  0xb0   : > { %1717 = vmatprep.subr.bf16.mxu1 %v2401_v43 }
  0xb2   : > { %1675 = vmatpush2.bf16.msra.mxu0 %v2396_v44 }
  0xb3   : > { %1718 = vmatpush2.bf16.msra.mxu1 %v2399_v45  ;;  %1676 = vmatprep.subr.bf16.mxu0 %v2404_v46  ;;  %v1749_v46 = vrot.slane %v1744_v36, %v1748_v33 }
  0xb4   : > { %1719 = vmatprep.subr.bf16.mxu1 %v2407_v47  ;;  %v1760_v47 = vld [vmem:[%s2757_s3] sm:$0x3] }
  0xb6   : > { %1677 = vmatpush2.bf16.msra.mxu0 %v2402_v48 }
  0xb7   : > { %1720 = vmatpush2.bf16.msra.mxu1 %v2405_v49  ;;  %1678 = vmatprep.subr.bf16.mxu0 %v2410_v50 }
  0xb8   : > { %1721 = vmatprep.subr.bf16.mxu1 %v2413_v51 }
  0xba   : > { %1679 = vmatpush2.bf16.msra.mxu0 %v2408_v52 }
  0xbb   : > { %1722 = vmatpush2.bf16.msra.mxu1 %v2411_v53  ;;  %1680 = vmatprep.subr.bf16.mxu0 %v2416_v54  ;;  %v1753_v53 = vrot.slane %v1744_v36, %v1752_v40  ;;  %v1765_v54 = vrot.slane %v1760_v47, %v1748_v33 }
  0xbc   : > { %1723 = vmatprep.subr.bf16.mxu1 %v2419_v55  ;;  %v1769_v55 = vrot.slane %v1760_v47, %v1752_v40 }
  0xbe   : > { %1681 = vmatpush2.bf16.msra.mxu0 %v2414_v56 }
  0xbf   : > { %1724 = vmatpush2.bf16.msra.mxu1 %v2417_v57  ;;  %1682 = vmatprep.subr.bf16.mxu0 %v2422_v58 }
  0xc0   : > { %1725 = vmatprep.subr.bf16.mxu1 %v2425_v59 }
  0xc2   : > { %1683 = vmatpush2.bf16.msra.mxu0 %v2420_v60 }
  0xc3   : > { %1726 = vmatpush2.bf16.msra.mxu1 %v2423_v61  ;;  %1684 = vmatprep.subr.bf16.mxu0 %v2428_v62 }
  0xc4   : > { %1727 = vmatprep.subr.bf16.mxu1 %v2431_v63 }
  0xc6   : > { %1685 = vmatpush2.bf16.msra.mxu0 %v2426_v0 }
  0xc7   : > { %1728 = vmatpush2.bf16.msra.mxu1 %v2429_v1  ;;  %1686 = vmatprep.subr.bf16.mxu0 %v2434_v2 }
  0xc8   : > { %1729 = vmatprep.subr.bf16.mxu1 %v2437_v3 }
  0xca   : > { %1687 = vmatpush2.bf16.msra.mxu0 %v2432_v4 }
  0xcb   : > { %1730 = vmatpush2.bf16.msra.mxu1 %v2435_v5  ;;  %1688 = vmatprep.subr.bf16.mxu0 %v2440_v6 }
  0xcc   : > { %1731 = vmatprep.subr.bf16.mxu1 %v2443_v7 }
  0xce   : > { %1689 = vmatpush2.bf16.msra.mxu0 %v2438_v8 }
  0xcf   : > { %1732 = vmatpush2.bf16.msra.mxu1 %v2441_v9 }
  0xd1   : > { %1691 = vmatmul.mubr.bf16.vlgmr.msra.gmra.mxu0 %v2444_v10 }
  0xd2   : > { %1734 = vmatmul.mubr.bf16.vlgmr.msra.gmra.mxu1 %v2447_v11 }
 0x111   : > { %v1520_v12 = vpop.f32.mrf.mxu0 }
 0x112   : > { %v1563_v13 = vpop.f32.mrf.mxu1 }
 0x113   : > { %v1522_v14 = vpop.f32.mrf.mxu0  ;;  %v1564_v25 = vadd.f32 %v1563_v13, %v1520_v12 }
 0x114   : > { %v1565_v15 = vpop.f32.mrf.mxu1 }
 0x115   : > { %v1524_v16 = vpop.f32.mrf.mxu0  ;;  %v1566_v29 = vadd.f32 %v1565_v15, %v1522_v14 }
 0x116   : > { %v1567_v17 = vpop.f32.mrf.mxu1 }
 0x117   : > { %v1526_v18 = vpop.f32.mrf.mxu0  ;;  %v1568_v31 = vadd.f32 %v1567_v17, %v1524_v16 }
 0x118   : > { %v1569_v19 = vpop.f32.mrf.mxu1 }
 0x119   : > { %v1570_v37 = vadd.f32 %v1569_v19, %v1526_v18 }
 0x151   : > { %v1606_v20 = vpop.f32.mrf.mxu0 }
 0x152   : > { %v1649_v21 = vpop.f32.mrf.mxu1  ;;  %v1607_v30 = vadd.f32 %v1606_v20, %v1564_v25 }
 0x153   : > { %v1608_v23 = vpop.f32.mrf.mxu0 }
 0x154   : > { %v1651_v24 = vpop.f32.mrf.mxu1  ;;  %v1609_v32 = vadd.f32 %v1608_v23, %v1566_v29  ;;  %v1650_v38 = vadd.f32 %v1649_v21, %v1607_v30 }
 0x155   : > { %v1610_v27 = vpop.f32.mrf.mxu0 }
 0x156   : > { %v1653_v28 = vpop.f32.mrf.mxu1  ;;  %v1611_v39 = vadd.f32 %v1610_v27, %v1568_v31  ;;  %v1652_v43 = vadd.f32 %v1651_v24, %v1609_v32 }
 0x157   : > { %v1612_v34 = vpop.f32.mrf.mxu0 }
 0x158   : > { %v1655_v35 = vpop.f32.mrf.mxu1  ;;  %v1613_v44 = vadd.f32 %v1612_v34, %v1570_v37  ;;  %v1654_v50 = vadd.f32 %v1653_v28, %v1611_v39 }
 0x15a   : > { %v1656_v58 = vadd.f32 %v1655_v35, %v1613_v44 }
 0x191   : > { %v1692_v41 = vpop.f32.mrf.mxu0 }
 0x192   : > { %v1735_v42 = vpop.f32.mrf.mxu1  ;;  %v1693_v45 = vadd.f32 %v1692_v41, %v1650_v38 }
 0x193   : > { %v1694_v48 = vpop.f32.mrf.mxu0 }
 0x194   : > { %v1737_v49 = vpop.f32.mrf.mxu1  ;;  %v1736_v51 = vadd.f32 %v1735_v42, %v1693_v45  ;;  %v1695_v52 = vadd.f32 %v1694_v48, %v1652_v43 }
 0x195   : > { %v1696_v56 = vpop.f32.mrf.mxu0 }
 0x196   : > { %v1739_v57 = vpop.f32.mrf.mxu1  ;;  %v1756_v59 = vmul.f32 %v1749_v46, %v1736_v51  ;;  %v1738_v60 = vadd.f32 %v1737_v49, %v1695_v52  ;;  %v1697_v61 = vadd.f32 %v1696_v56, %v1654_v50 }
 0x197   : > { %v1698_v62 = vpop.f32.mrf.mxu0 }
 0x198   : > { %v1757_v63 = vmul.f32 %v1753_v53, %v1738_v60  ;;  %v1740_v0 = vadd.f32 %v1739_v57, %v1697_v61  ;;  %v1699_v1 = vadd.f32 %v1698_v62, %v1656_v58  ;;  %v1741_v2 = vpop.f32.mrf.mxu1  ;;  %v1772_v3 = vadd.f32 %v1765_v54, %v1756_v59 }
 0x19a   : > { %v1773_v4 = vadd.f32 %v1769_v55, %v1757_v63  ;;  %v1758_v5 = vmul.f32 %v1749_v46, %v1740_v0  ;;  %v1742_v6 = vadd.f32 %v1741_v2, %v1699_v1 }
 0x19c   : > { %v2116_v7 = vpack.c.bf16 %v1773_v4, %v1772_v3  ;;  %v1759_v8 = vmul.f32 %v1753_v53, %v1742_v6  ;;  %v1774_v9 = vadd.f32 %v1765_v54, %v1758_v5 }
 0x19e   : > { %1788 = vst [vmem:[%s260_s8] sm:$0xff] %v2116_v7  ;;  %v1775_v10 = vadd.f32 %v1769_v55, %v1759_v8 }
 0x1a0   : > { %v2117_v11 = vpack.c.bf16 %v1775_v10, %v1774_v9 }
 0x1a2   : > { %1789 = vst [vmem:[%s260_s8 + $0x8] sm:$0xff] %v2117_v11 }
 0x1a3 PF: > { %s14_s17 = sadd.s32 1, %s2472_s17   ;;  %s2759_s15 = smov %s2468_s16 }
 0x1a4   : > { %p11_p5 = scmp.ge.s32.totalorder %s14_s17, 4   ;;  %s2760_s16 = smov %s2762_s18 }
 0x1a6   :  { %13 = sbr.rel (!%p11_p5) target bundleno = 2 (0x2), region = 69 }

</bundles_post_ra>
